<compile_context>
chip_gen: v7x
topology: tpu7x:2x2x1
jax: 0.10.0
libtpu: 0.0.40
codegen_flags: <defaults>
</compile_context>

<pallas_src>
import functools

import jax
import jax.numpy as jnp
from jax.experimental import pallas as pl
from jax.experimental.pallas import tpu as pltpu

LANE = 128
_EPS = 1e-12


# ------------------------------ kernel helpers ------------------------------

def _conv_stage(xpad, slab, act, pw, w_ref, b_ref, Hs, Ws, Cin_s):
    """conv3x3(pad already applied in xpad) + bias + ReLU + 2x2 max-pool.

    xpad : (Hs+2, Ws+2, Cin_s) bf16 scratch (border is zero)
    slab : (Hs*Ws, 9*Cin_s)    bf16 scratch (im2col slab)
    act  : (Hs, Ws, Cout)      f32 scratch (conv output)
    pw   : (Hs, Ws//2, Cout)   f32 scratch (width-pooled)
    returns (Hs//2, Ws//2, Cout) f32 value.
    """
    Cout = w_ref.shape[-1]
    # Pack the 9 shifted views into ONE (Hs*Ws, 9*Cin_s) slab -> ONE MXU matmul
    # with K = 9*Cin (instead of 9 matmuls with K = Cin).
    for k in range(9):
        dh, dw = divmod(k, 3)
        v = xpad[dh:dh + Hs, dw:dw + Ws, :]                # (Hs, Ws, Cin_s)
        slab[:, k * Cin_s:(k + 1) * Cin_s] = v.reshape(Hs * Ws, Cin_s)

    acc = jnp.dot(slab[...], w_ref[...], preferred_element_type=jnp.float32)
    y = jnp.maximum(acc + b_ref[...], 0.0)                 # bias + ReLU in f32
    act[...] = y.reshape(Hs, Ws, Cout)

    # 2x2 max-pool: width pairs via sublane-strided ref reads, then height pairs
    # via major-dim strided ref reads (proven-lowering pattern; VMEM-only).
    pw[...] = jnp.maximum(act[:, pl.ds(0, Ws // 2, 2), :],
                          act[:, pl.ds(1, Ws // 2, 2), :])
    return jnp.maximum(pw[pl.ds(0, Hs // 2, 2), :, :],
                       pw[pl.ds(1, Hs // 2, 2), :, :])


def _reid_fused_kernel(x_ref, w1_ref, b1_ref, w2_ref, b2_ref,
                       cls_w_ref, cls_b_ref, fc_w_ref, fc_b_ref,
                       fc2_w_ref, fc2_b_ref, o_ref,
                       xpad1, slab1, act1, pw1,
                       xpad2, slab2, act2, pw2, feat,
                       *, H, W, Cin, C1, C2):
    """Whole forward pass for one image (grid iterates over the batch)."""
    # ---------------- stage 1: conv3x3 + relu + 2x2 pool ----------------
    xpad1[...] = jnp.zeros((H + 2, W + 2, Cin), jnp.bfloat16)   # zero border
    xpad1[1:H + 1, 1:W + 1, :] = x_ref[...]
    p1 = _conv_stage(xpad1, slab1, act1, pw1, w1_ref, b1_ref, H, W, Cin)

    # ---------------- stage 2: conv3x3 + relu + 2x2 pool ----------------
    H2, W2 = H // 2, W // 2
    xpad2[...] = jnp.zeros((H2 + 2, W2 + 2, C1), jnp.bfloat16)
    xpad2[1:H2 + 1, 1:W2 + 1, :] = p1.astype(jnp.bfloat16)
    p2 = _conv_stage(xpad2, slab2, act2, pw2, w2_ref, b2_ref, H2, W2, C1)

    # ---------------- flatten (HWC order) into a lane-dense row ----------------
    # Build the (1, FLAT) feature row with static lane-offset stores; avoids any
    # sublane<->lane reshapes (guaranteed lowering).
    S = (H // 4) * (W // 4)
    A = p2.reshape(S, C2)                                  # leading-dim merge only
    for s in range(S):
        feat[:, s * C2:(s + 1) * C2] = A[s:s + 1, :]

    # ---------------- head (all f32): cls FC + relu, l2norm, fc, relu, fc2, l2norm
    f = jnp.dot(feat[...], cls_w_ref[...], preferred_element_type=jnp.float32)
    f = jnp.maximum(f + cls_b_ref[...], 0.0)
    f = f * jax.lax.rsqrt(jnp.sum(f * f, axis=1, keepdims=True) + _EPS)

    h = jnp.dot(f, fc_w_ref[...], preferred_element_type=jnp.float32)
    h = jnp.maximum(h + fc_b_ref[...], 0.0)

    e = jnp.dot(h, fc2_w_ref[...], preferred_element_type=jnp.float32)
    e = e + fc2_b_ref[...]
    # final l2norm — the zero-padded columns contribute nothing to the norm
    o_ref[...] = e * jax.lax.rsqrt(jnp.sum(e * e, axis=1, keepdims=True) + _EPS)


# ------------------------------- wrapper (JAX) -------------------------------

def reid_forward(images_nchw, params, embed_size):
    """Equivalent of ReIdModel.forward(images); one fused pallas_call."""
    x = jnp.transpose(images_nchw, (0, 2, 3, 1)).astype(jnp.bfloat16)  # NCHW->NHWC
    N, H, W, Cin = x.shape
    C1 = params["conv1_w"].shape[-1]
    C2 = params["conv2_w"].shape[-1]
    FLAT = (H // 4) * (W // 4) * C2
    CLS_OUT = params["cls_w"].shape[-1]
    HID = params["fc_w"].shape[-1]

    full2d = lambda arr: pl.BlockSpec(arr.shape, lambda i: (0, 0))  # VMEM-resident

    out = pl.pallas_call(
        functools.partial(_reid_fused_kernel, H=H, W=W, Cin=Cin, C1=C1, C2=C2),
        out_shape=jax.ShapeDtypeStruct((N, 1, LANE), jnp.float32),
        grid_spec=pltpu.PrefetchScalarGridSpec(
            num_scalar_prefetch=0,
            grid=(N,),
            in_specs=[
                pl.BlockSpec((None, H, W, Cin), lambda i: (i, 0, 0, 0)),  # image
                full2d(params["conv1_w"]), full2d(params["conv1_b"]),
                full2d(params["conv2_w"]), full2d(params["conv2_b"]),
                full2d(params["cls_w"]),   full2d(params["cls_b"]),
                full2d(params["fc_w"]),    full2d(params["fc_b"]),
                full2d(params["fc2_w_pad"]), full2d(params["fc2_b_pad"]),
            ],
            out_specs=pl.BlockSpec((None, 1, LANE), lambda i: (i, 0, 0)),
            scratch_shapes=[
                pltpu.VMEM((H + 2, W + 2, Cin), jnp.bfloat16),        # xpad1
                pltpu.VMEM((H * W, 9 * Cin), jnp.bfloat16),           # slab1
                pltpu.VMEM((H, W, C1), jnp.float32),                  # act1
                pltpu.VMEM((H, W // 2, C1), jnp.float32),             # pw1
                pltpu.VMEM((H // 2 + 2, W // 2 + 2, C1), jnp.bfloat16),  # xpad2
                pltpu.VMEM(((H // 2) * (W // 2), 9 * C1), jnp.bfloat16),  # slab2
                pltpu.VMEM((H // 2, W // 2, C2), jnp.float32),        # act2
                pltpu.VMEM((H // 2, W // 4, C2), jnp.float32),        # pw2
                pltpu.VMEM((1, FLAT), jnp.float32),                   # feat
            ],
        ),
        compiler_params=pltpu.CompilerParams(
            dimension_semantics=("parallel",)),
    )(x, params["conv1_w"], params["conv1_b"],
      params["conv2_w"], params["conv2_b"],
      params["cls_w"], params["cls_b"],
      params["fc_w"], params["fc_b"],
      params["fc2_w_pad"], params["fc2_b_pad"])

    return out.reshape(N, LANE)[:, :embed_size]


def init_params(key):
    C_IN, C1, C2 = 4, 8, 16
    H = W = 16
    CLS_OUT = 64   # stands in for VGG's 4096-dim truncated-classifier feature
    HID = 32       # stands in for the 512-dim self.fc
    EMBED = 16     # opt.embed_size

    ks = jax.random.split(key, 6)

    def u(k, shape, r):
        return jax.random.uniform(k, shape, jnp.float32, -r, r)

    p = {}
    # conv weights: rows ordered (tap kh*3+kw)-major then input channel.
    p["conv1_w"] = u(ks[0], (9 * C_IN, C1), 0.1).astype(jnp.bfloat16)
    p["conv1_b"] = jnp.zeros((1, C1), jnp.float32)
    p["conv2_w"] = u(ks[1], (9 * C1, C2), 0.1).astype(jnp.bfloat16)
    p["conv2_b"] = jnp.zeros((1, C2), jnp.float32)

    flat = C2 * (H // 4) * (W // 4)
    # classifier FC weight rows in HWC flatten order (see kernel flatten).
    p["cls_w"] = u(ks[2], (flat, CLS_OUT), 0.05)
    p["cls_b"] = jnp.zeros((1, CLS_OUT), jnp.float32)

    # self.fc: Xavier init as in ReIdModel.init_weights (bias = 0)
    r = (6.0 ** 0.5) / ((CLS_OUT + HID) ** 0.5)
    p["fc_w"] = u(ks[3], (CLS_OUT, HID), r)
    p["fc_b"] = jnp.zeros((1, HID), jnp.float32)

    # self.fc2: PyTorch default uniform(-1/sqrt(in), 1/sqrt(in)); zero-padded to
    # a lane-dense 128-wide output slab (padded columns stay exactly zero).
    r2 = 1.0 / (HID ** 0.5)
    fc2_w = u(ks[4], (HID, EMBED), r2)
    fc2_b = u(ks[5], (EMBED,), r2)
    p["fc2_w_pad"] = jnp.zeros((HID, LANE), jnp.float32).at[:, :EMBED].set(fc2_w)
    p["fc2_b_pad"] = jnp.zeros((1, LANE), jnp.float32).at[0, :EMBED].set(fc2_b)
    return p, EMBED


if __name__ == "__main__":
    key = jax.random.PRNGKey(0)
    k_img, k_par = jax.random.split(key)

    params, embed_size = init_params(k_par)
    images = jax.random.normal(k_img, (2, 4, 16, 16), jnp.float32)  # NCHW, like PyTorch

    fwd = jax.jit(lambda im: reid_forward(im, params, embed_size))
    out = jax.block_until_ready(fwd(images))

    assert out.shape == (2, embed_size)
    # embeddings are l2-normalized (rows have unit norm)
    norms = jnp.sqrt(jnp.sum(out.astype(jnp.float32) ** 2, axis=1))
    assert bool(jnp.all(jnp.abs(norms - 1.0) < 1e-3)), norms
    print("KERNEL_OK")
</pallas_src>

<mosaic_0001>
module attributes {stable_mosaic.version = 11 : i64} {
  func.func @_reid_fused_kernel(%arg0: i32, %arg1: memref<1x16x16x4xbf16, #tpu.memory_space<vmem>>, %arg2: memref<36x8xbf16, #tpu.memory_space<vmem>>, %arg3: memref<1x8xf32, #tpu.memory_space<vmem>>, %arg4: memref<72x16xbf16, #tpu.memory_space<vmem>>, %arg5: memref<1x16xf32, #tpu.memory_space<vmem>>, %arg6: memref<256x64xf32, #tpu.memory_space<vmem>>, %arg7: memref<1x64xf32, #tpu.memory_space<vmem>>, %arg8: memref<64x32xf32, #tpu.memory_space<vmem>>, %arg9: memref<1x32xf32, #tpu.memory_space<vmem>>, %arg10: memref<32x128xf32, #tpu.memory_space<vmem>>, %arg11: memref<1x128xf32, #tpu.memory_space<vmem>>, %arg12: memref<1x1x128xf32, #tpu.memory_space<vmem>>, %arg13: memref<18x18x4xbf16, #tpu.memory_space<vmem>>, %arg14: memref<256x36xbf16, #tpu.memory_space<vmem>>, %arg15: memref<16x16x8xf32, #tpu.memory_space<vmem>>, %arg16: memref<16x8x8xf32, #tpu.memory_space<vmem>>, %arg17: memref<10x10x8xbf16, #tpu.memory_space<vmem>>, %arg18: memref<64x72xbf16, #tpu.memory_space<vmem>>, %arg19: memref<8x8x16xf32, #tpu.memory_space<vmem>>, %arg20: memref<8x4x16xf32, #tpu.memory_space<vmem>>, %arg21: memref<1x256xf32, #tpu.memory_space<vmem>>) attributes {dimension_semantics = [#tpu.dimension_semantics<parallel>], iteration_bounds = array<i64: 2>, scalar_prefetch = 0 : i64, scratch_operands = 9 : i64, tpu.core_type = #tpu.core_type<tc>, window_params = [{transform_indices = @transform_0, window_bounds = array<i64: 1, 16, 16, 4>}, {pipeline_mode = #tpu.pipeline_mode<synchronous>, transform_indices = @transform_1, window_bounds = array<i64: 36, 8>}, {pipeline_mode = #tpu.pipeline_mode<synchronous>, transform_indices = @transform_2, window_bounds = array<i64: 1, 8>}, {pipeline_mode = #tpu.pipeline_mode<synchronous>, transform_indices = @transform_3, window_bounds = array<i64: 72, 16>}, {pipeline_mode = #tpu.pipeline_mode<synchronous>, transform_indices = @transform_4, window_bounds = array<i64: 1, 16>}, {pipeline_mode = #tpu.pipeline_mode<synchronous>, transform_indices = @transform_5, window_bounds = array<i64: 256, 64>}, {pipeline_mode = #tpu.pipeline_mode<synchronous>, transform_indices = @transform_6, window_bounds = array<i64: 1, 64>}, {pipeline_mode = #tpu.pipeline_mode<synchronous>, transform_indices = @transform_7, window_bounds = array<i64: 64, 32>}, {pipeline_mode = #tpu.pipeline_mode<synchronous>, transform_indices = @transform_8, window_bounds = array<i64: 1, 32>}, {pipeline_mode = #tpu.pipeline_mode<synchronous>, transform_indices = @transform_9, window_bounds = array<i64: 32, 128>}, {pipeline_mode = #tpu.pipeline_mode<synchronous>, transform_indices = @transform_10, window_bounds = array<i64: 1, 128>}, {transform_indices = @transform_11, window_bounds = array<i64: 1, 1, 128>}]} {
    %cst = arith.constant 0.000000e+00 : bf16
    %0 = vector.broadcast %cst : bf16 to vector<18x18x4xbf16>
    %c0 = arith.constant 0 : index
    %c0_0 = arith.constant 0 : index
    %c0_1 = arith.constant 0 : index
    %1 = vector.load %arg13[%c0, %c0_0, %c0_1] : memref<18x18x4xbf16, #tpu.memory_space<vmem>>, vector<18x18x4xbf16>
    tpu.vector_store %arg13[%c0, %c0_0, %c0_1], %0 {strides = array<i32>} : memref<18x18x4xbf16, #tpu.memory_space<vmem>>, vector<18x18x4xbf16>,
    %c0_2 = arith.constant 0 : index
    %c0_3 = arith.constant 0 : index
    %c0_4 = arith.constant 0 : index
    %c0_5 = arith.constant 0 : index
    %2 = vector.load %arg1[%c0_2, %c0_3, %c0_4, %c0_5] : memref<1x16x16x4xbf16, #tpu.memory_space<vmem>>, vector<1x16x16x4xbf16>
    %3 = vector.shape_cast %2 : vector<1x16x16x4xbf16> to vector<16x16x4xbf16>
    %c1 = arith.constant 1 : index
    %c1_6 = arith.constant 1 : index
    %c0_7 = arith.constant 0 : index
    %4 = vector.load %arg13[%c1, %c1_6, %c0_7] : memref<18x18x4xbf16, #tpu.memory_space<vmem>>, vector<16x16x4xbf16>
    tpu.vector_store %arg13[%c1, %c1_6, %c0_7], %3 {strides = array<i32>} : memref<18x18x4xbf16, #tpu.memory_space<vmem>>, vector<16x16x4xbf16>,
    %c0_8 = arith.constant 0 : index
    %c0_9 = arith.constant 0 : index
    %c0_10 = arith.constant 0 : index
    %5 = vector.load %arg13[%c0_8, %c0_9, %c0_10] : memref<18x18x4xbf16, #tpu.memory_space<vmem>>, vector<16x16x4xbf16>
    %6 = vector.shape_cast %5 : vector<16x16x4xbf16> to vector<256x4xbf16>
    %c0_11 = arith.constant 0 : index
    %c0_12 = arith.constant 0 : index
    %7 = vector.load %arg14[%c0_11, %c0_12] : memref<256x36xbf16, #tpu.memory_space<vmem>>, vector<256x4xbf16>
    tpu.vector_store %arg14[%c0_11, %c0_12], %6 {strides = array<i32>} : memref<256x36xbf16, #tpu.memory_space<vmem>>, vector<256x4xbf16>,
    %c0_13 = arith.constant 0 : index
    %c1_14 = arith.constant 1 : index
    %c0_15 = arith.constant 0 : index
    %8 = vector.load %arg13[%c0_13, %c1_14, %c0_15] : memref<18x18x4xbf16, #tpu.memory_space<vmem>>, vector<16x16x4xbf16>
    %9 = vector.shape_cast %8 : vector<16x16x4xbf16> to vector<256x4xbf16>
    %c0_16 = arith.constant 0 : index
    %c4 = arith.constant 4 : index
    %10 = vector.load %arg14[%c0_16, %c4] : memref<256x36xbf16, #tpu.memory_space<vmem>>, vector<256x4xbf16>
    tpu.vector_store %arg14[%c0_16, %c4], %9 {strides = array<i32>} : memref<256x36xbf16, #tpu.memory_space<vmem>>, vector<256x4xbf16>,
    %c0_17 = arith.constant 0 : index
    %c2 = arith.constant 2 : index
    %c0_18 = arith.constant 0 : index
    %11 = vector.load %arg13[%c0_17, %c2, %c0_18] : memref<18x18x4xbf16, #tpu.memory_space<vmem>>, vector<16x16x4xbf16>
    %12 = vector.shape_cast %11 : vector<16x16x4xbf16> to vector<256x4xbf16>
    %c0_19 = arith.constant 0 : index
    %c8 = arith.constant 8 : index
    %13 = vector.load %arg14[%c0_19, %c8] : memref<256x36xbf16, #tpu.memory_space<vmem>>, vector<256x4xbf16>
    tpu.vector_store %arg14[%c0_19, %c8], %12 {strides = array<i32>} : memref<256x36xbf16, #tpu.memory_space<vmem>>, vector<256x4xbf16>,
    %c1_20 = arith.constant 1 : index
    %c0_21 = arith.constant 0 : index
    %c0_22 = arith.constant 0 : index
    %14 = vector.load %arg13[%c1_20, %c0_21, %c0_22] : memref<18x18x4xbf16, #tpu.memory_space<vmem>>, vector<16x16x4xbf16>
    %15 = vector.shape_cast %14 : vector<16x16x4xbf16> to vector<256x4xbf16>
    %c0_23 = arith.constant 0 : index
    %c12 = arith.constant 12 : index
    %16 = vector.load %arg14[%c0_23, %c12] : memref<256x36xbf16, #tpu.memory_space<vmem>>, vector<256x4xbf16>
    tpu.vector_store %arg14[%c0_23, %c12], %15 {strides = array<i32>} : memref<256x36xbf16, #tpu.memory_space<vmem>>, vector<256x4xbf16>,
    %c1_24 = arith.constant 1 : index
    %c1_25 = arith.constant 1 : index
    %c0_26 = arith.constant 0 : index
    %17 = vector.load %arg13[%c1_24, %c1_25, %c0_26] : memref<18x18x4xbf16, #tpu.memory_space<vmem>>, vector<16x16x4xbf16>
    %18 = vector.shape_cast %17 : vector<16x16x4xbf16> to vector<256x4xbf16>
    %c0_27 = arith.constant 0 : index
    %c16 = arith.constant 16 : index
    %19 = vector.load %arg14[%c0_27, %c16] : memref<256x36xbf16, #tpu.memory_space<vmem>>, vector<256x4xbf16>
    tpu.vector_store %arg14[%c0_27, %c16], %18 {strides = array<i32>} : memref<256x36xbf16, #tpu.memory_space<vmem>>, vector<256x4xbf16>,
    %c1_28 = arith.constant 1 : index
    %c2_29 = arith.constant 2 : index
    %c0_30 = arith.constant 0 : index
    %20 = vector.load %arg13[%c1_28, %c2_29, %c0_30] : memref<18x18x4xbf16, #tpu.memory_space<vmem>>, vector<16x16x4xbf16>
    %21 = vector.shape_cast %20 : vector<16x16x4xbf16> to vector<256x4xbf16>
    %c0_31 = arith.constant 0 : index
    %c20 = arith.constant 20 : index
    %22 = vector.load %arg14[%c0_31, %c20] : memref<256x36xbf16, #tpu.memory_space<vmem>>, vector<256x4xbf16>
    tpu.vector_store %arg14[%c0_31, %c20], %21 {strides = array<i32>} : memref<256x36xbf16, #tpu.memory_space<vmem>>, vector<256x4xbf16>,
    %c2_32 = arith.constant 2 : index
    %c0_33 = arith.constant 0 : index
    %c0_34 = arith.constant 0 : index
    %23 = vector.load %arg13[%c2_32, %c0_33, %c0_34] : memref<18x18x4xbf16, #tpu.memory_space<vmem>>, vector<16x16x4xbf16>
    %24 = vector.shape_cast %23 : vector<16x16x4xbf16> to vector<256x4xbf16>
    %c0_35 = arith.constant 0 : index
    %c24 = arith.constant 24 : index
    %25 = vector.load %arg14[%c0_35, %c24] : memref<256x36xbf16, #tpu.memory_space<vmem>>, vector<256x4xbf16>
    tpu.vector_store %arg14[%c0_35, %c24], %24 {strides = array<i32>} : memref<256x36xbf16, #tpu.memory_space<vmem>>, vector<256x4xbf16>,
    %c2_36 = arith.constant 2 : index
    %c1_37 = arith.constant 1 : index
    %c0_38 = arith.constant 0 : index
    %26 = vector.load %arg13[%c2_36, %c1_37, %c0_38] : memref<18x18x4xbf16, #tpu.memory_space<vmem>>, vector<16x16x4xbf16>
    %27 = vector.shape_cast %26 : vector<16x16x4xbf16> to vector<256x4xbf16>
    %c0_39 = arith.constant 0 : index
    %c28 = arith.constant 28 : index
    %28 = vector.load %arg14[%c0_39, %c28] : memref<256x36xbf16, #tpu.memory_space<vmem>>, vector<256x4xbf16>
    tpu.vector_store %arg14[%c0_39, %c28], %27 {strides = array<i32>} : memref<256x36xbf16, #tpu.memory_space<vmem>>, vector<256x4xbf16>,
    %c2_40 = arith.constant 2 : index
    %c2_41 = arith.constant 2 : index
    %c0_42 = arith.constant 0 : index
    %29 = vector.load %arg13[%c2_40, %c2_41, %c0_42] : memref<18x18x4xbf16, #tpu.memory_space<vmem>>, vector<16x16x4xbf16>
    %30 = vector.shape_cast %29 : vector<16x16x4xbf16> to vector<256x4xbf16>
    %c0_43 = arith.constant 0 : index
    %c32 = arith.constant 32 : index
    %31 = vector.load %arg14[%c0_43, %c32] : memref<256x36xbf16, #tpu.memory_space<vmem>>, vector<256x4xbf16>
    tpu.vector_store %arg14[%c0_43, %c32], %30 {strides = array<i32>} : memref<256x36xbf16, #tpu.memory_space<vmem>>, vector<256x4xbf16>,
    %c0_44 = arith.constant 0 : index
    %c0_45 = arith.constant 0 : index
    %32 = vector.load %arg14[%c0_44, %c0_45] : memref<256x36xbf16, #tpu.memory_space<vmem>>, vector<256x36xbf16>
    %c0_46 = arith.constant 0 : index
    %c0_47 = arith.constant 0 : index
    %33 = vector.load %arg2[%c0_46, %c0_47] : memref<36x8xbf16, #tpu.memory_space<vmem>>, vector<36x8xbf16>
    %cst_48 = arith.constant dense<0.000000e+00> : vector<256x8xf32>
    %34 = tpu.matmul %32, %33, %cst_48 {dimension_numbers = #tpu.dot_dimension_numbers<[1], [0], [0], [1], [0, 0, 1, 1], [], []>} : vector<256x36xbf16>, vector<36x8xbf16>, vector<256x8xf32> -> vector<256x8xf32>
    %c0_49 = arith.constant 0 : index
    %c0_50 = arith.constant 0 : index
    %35 = vector.load %arg3[%c0_49, %c0_50] : memref<1x8xf32, #tpu.memory_space<vmem>>, vector<1x8xf32>
    %36 = vector.broadcast %35 : vector<1x8xf32> to vector<256x8xf32>
    %37 = arith.addf %34, %36 : vector<256x8xf32>
    %cst_51 = arith.constant 0.000000e+00 : f32
    %38 = vector.broadcast %cst_51 : f32 to vector<256x8xf32>
    %39 = arith.maximumf %37, %38 : vector<256x8xf32>
    %40 = vector.shape_cast %39 : vector<256x8xf32> to vector<16x16x8xf32>
    %c0_52 = arith.constant 0 : index
    %c0_53 = arith.constant 0 : index
    %c0_54 = arith.constant 0 : index
    %41 = vector.load %arg15[%c0_52, %c0_53, %c0_54] : memref<16x16x8xf32, #tpu.memory_space<vmem>>, vector<16x16x8xf32>
    tpu.vector_store %arg15[%c0_52, %c0_53, %c0_54], %40 {strides = array<i32>} : memref<16x16x8xf32, #tpu.memory_space<vmem>>, vector<16x16x8xf32>,
    %c0_55 = arith.constant 0 : index
    %c0_56 = arith.constant 0 : index
    %c0_57 = arith.constant 0 : index
    %42 = tpu.strided_load %arg15[%c0_55, %c0_56, %c0_57] {strides = array<i32: 1, 2, 1>} : memref<16x16x8xf32, #tpu.memory_space<vmem>>, vector<16x8x8xf32>
    %c0_58 = arith.constant 0 : index
    %c1_59 = arith.constant 1 : index
    %c0_60 = arith.constant 0 : index
    %43 = tpu.strided_load %arg15[%c0_58, %c1_59, %c0_60] {strides = array<i32: 1, 2, 1>} : memref<16x16x8xf32, #tpu.memory_space<vmem>>, vector<16x8x8xf32>
    %44 = arith.maximumf %42, %43 : vector<16x8x8xf32>
    %c0_61 = arith.constant 0 : index
    %c0_62 = arith.constant 0 : index
    %c0_63 = arith.constant 0 : index
    %45 = vector.load %arg16[%c0_61, %c0_62, %c0_63] : memref<16x8x8xf32, #tpu.memory_space<vmem>>, vector<16x8x8xf32>
    tpu.vector_store %arg16[%c0_61, %c0_62, %c0_63], %44 {strides = array<i32>} : memref<16x8x8xf32, #tpu.memory_space<vmem>>, vector<16x8x8xf32>,
    %c0_64 = arith.constant 0 : index
    %c0_65 = arith.constant 0 : index
    %c0_66 = arith.constant 0 : index
    %46 = tpu.strided_load %arg16[%c0_64, %c0_65, %c0_66] {strides = array<i32: 2, 1, 1>} : memref<16x8x8xf32, #tpu.memory_space<vmem>>, vector<8x8x8xf32>
    %c1_67 = arith.constant 1 : index
    %c0_68 = arith.constant 0 : index
    %c0_69 = arith.constant 0 : index
    %47 = tpu.strided_load %arg16[%c1_67, %c0_68, %c0_69] {strides = array<i32: 2, 1, 1>} : memref<16x8x8xf32, #tpu.memory_space<vmem>>, vector<8x8x8xf32>
    %48 = arith.maximumf %46, %47 : vector<8x8x8xf32>
    %cst_70 = arith.constant 0.000000e+00 : bf16
    %49 = vector.broadcast %cst_70 : bf16 to vector<10x10x8xbf16>
    %c0_71 = arith.constant 0 : index
    %c0_72 = arith.constant 0 : index
    %c0_73 = arith.constant 0 : index
    %50 = vector.load %arg17[%c0_71, %c0_72, %c0_73] : memref<10x10x8xbf16, #tpu.memory_space<vmem>>, vector<10x10x8xbf16>
    tpu.vector_store %arg17[%c0_71, %c0_72, %c0_73], %49 {strides = array<i32>} : memref<10x10x8xbf16, #tpu.memory_space<vmem>>, vector<10x10x8xbf16>,
    %51 = arith.truncf %48 : vector<8x8x8xf32> to vector<8x8x8xbf16>
    %c1_74 = arith.constant 1 : index
    %c1_75 = arith.constant 1 : index
    %c0_76 = arith.constant 0 : index
    %52 = vector.load %arg17[%c1_74, %c1_75, %c0_76] : memref<10x10x8xbf16, #tpu.memory_space<vmem>>, vector<8x8x8xbf16>
    tpu.vector_store %arg17[%c1_74, %c1_75, %c0_76], %51 {strides = array<i32>} : memref<10x10x8xbf16, #tpu.memory_space<vmem>>, vector<8x8x8xbf16>,
    %c0_77 = arith.constant 0 : index
    %c0_78 = arith.constant 0 : index
    %c0_79 = arith.constant 0 : index
    %53 = vector.load %arg17[%c0_77, %c0_78, %c0_79] : memref<10x10x8xbf16, #tpu.memory_space<vmem>>, vector<8x8x8xbf16>
    %54 = vector.shape_cast %53 : vector<8x8x8xbf16> to vector<64x8xbf16>
    %c0_80 = arith.constant 0 : index
    %c0_81 = arith.constant 0 : index
    %55 = vector.load %arg18[%c0_80, %c0_81] : memref<64x72xbf16, #tpu.memory_space<vmem>>, vector<64x8xbf16>
    tpu.vector_store %arg18[%c0_80, %c0_81], %54 {strides = array<i32>} : memref<64x72xbf16, #tpu.memory_space<vmem>>, vector<64x8xbf16>,
    %c0_82 = arith.constant 0 : index
    %c1_83 = arith.constant 1 : index
    %c0_84 = arith.constant 0 : index
    %56 = vector.load %arg17[%c0_82, %c1_83, %c0_84] : memref<10x10x8xbf16, #tpu.memory_space<vmem>>, vector<8x8x8xbf16>
    %57 = vector.shape_cast %56 : vector<8x8x8xbf16> to vector<64x8xbf16>
    %c0_85 = arith.constant 0 : index
    %c8_86 = arith.constant 8 : index
    %58 = vector.load %arg18[%c0_85, %c8_86] : memref<64x72xbf16, #tpu.memory_space<vmem>>, vector<64x8xbf16>
    tpu.vector_store %arg18[%c0_85, %c8_86], %57 {strides = array<i32>} : memref<64x72xbf16, #tpu.memory_space<vmem>>, vector<64x8xbf16>,
    %c0_87 = arith.constant 0 : index
    %c2_88 = arith.constant 2 : index
    %c0_89 = arith.constant 0 : index
    %59 = vector.load %arg17[%c0_87, %c2_88, %c0_89] : memref<10x10x8xbf16, #tpu.memory_space<vmem>>, vector<8x8x8xbf16>
    %60 = vector.shape_cast %59 : vector<8x8x8xbf16> to vector<64x8xbf16>
    %c0_90 = arith.constant 0 : index
    %c16_91 = arith.constant 16 : index
    %61 = vector.load %arg18[%c0_90, %c16_91] : memref<64x72xbf16, #tpu.memory_space<vmem>>, vector<64x8xbf16>
    tpu.vector_store %arg18[%c0_90, %c16_91], %60 {strides = array<i32>} : memref<64x72xbf16, #tpu.memory_space<vmem>>, vector<64x8xbf16>,
    %c1_92 = arith.constant 1 : index
    %c0_93 = arith.constant 0 : index
    %c0_94 = arith.constant 0 : index
    %62 = vector.load %arg17[%c1_92, %c0_93, %c0_94] : memref<10x10x8xbf16, #tpu.memory_space<vmem>>, vector<8x8x8xbf16>
    %63 = vector.shape_cast %62 : vector<8x8x8xbf16> to vector<64x8xbf16>
    %c0_95 = arith.constant 0 : index
    %c24_96 = arith.constant 24 : index
    %64 = vector.load %arg18[%c0_95, %c24_96] : memref<64x72xbf16, #tpu.memory_space<vmem>>, vector<64x8xbf16>
    tpu.vector_store %arg18[%c0_95, %c24_96], %63 {strides = array<i32>} : memref<64x72xbf16, #tpu.memory_space<vmem>>, vector<64x8xbf16>,
    %c1_97 = arith.constant 1 : index
    %c1_98 = arith.constant 1 : index
    %c0_99 = arith.constant 0 : index
    %65 = vector.load %arg17[%c1_97, %c1_98, %c0_99] : memref<10x10x8xbf16, #tpu.memory_space<vmem>>, vector<8x8x8xbf16>
    %66 = vector.shape_cast %65 : vector<8x8x8xbf16> to vector<64x8xbf16>
    %c0_100 = arith.constant 0 : index
    %c32_101 = arith.constant 32 : index
    %67 = vector.load %arg18[%c0_100, %c32_101] : memref<64x72xbf16, #tpu.memory_space<vmem>>, vector<64x8xbf16>
    tpu.vector_store %arg18[%c0_100, %c32_101], %66 {strides = array<i32>} : memref<64x72xbf16, #tpu.memory_space<vmem>>, vector<64x8xbf16>,
    %c1_102 = arith.constant 1 : index
    %c2_103 = arith.constant 2 : index
    %c0_104 = arith.constant 0 : index
    %68 = vector.load %arg17[%c1_102, %c2_103, %c0_104] : memref<10x10x8xbf16, #tpu.memory_space<vmem>>, vector<8x8x8xbf16>
    %69 = vector.shape_cast %68 : vector<8x8x8xbf16> to vector<64x8xbf16>
    %c0_105 = arith.constant 0 : index
    %c40 = arith.constant 40 : index
    %70 = vector.load %arg18[%c0_105, %c40] : memref<64x72xbf16, #tpu.memory_space<vmem>>, vector<64x8xbf16>
    tpu.vector_store %arg18[%c0_105, %c40], %69 {strides = array<i32>} : memref<64x72xbf16, #tpu.memory_space<vmem>>, vector<64x8xbf16>,
    %c2_106 = arith.constant 2 : index
    %c0_107 = arith.constant 0 : index
    %c0_108 = arith.constant 0 : index
    %71 = vector.load %arg17[%c2_106, %c0_107, %c0_108] : memref<10x10x8xbf16, #tpu.memory_space<vmem>>, vector<8x8x8xbf16>
    %72 = vector.shape_cast %71 : vector<8x8x8xbf16> to vector<64x8xbf16>
    %c0_109 = arith.constant 0 : index
    %c48 = arith.constant 48 : index
    %73 = vector.load %arg18[%c0_109, %c48] : memref<64x72xbf16, #tpu.memory_space<vmem>>, vector<64x8xbf16>
    tpu.vector_store %arg18[%c0_109, %c48], %72 {strides = array<i32>} : memref<64x72xbf16, #tpu.memory_space<vmem>>, vector<64x8xbf16>,
    %c2_110 = arith.constant 2 : index
    %c1_111 = arith.constant 1 : index
    %c0_112 = arith.constant 0 : index
    %74 = vector.load %arg17[%c2_110, %c1_111, %c0_112] : memref<10x10x8xbf16, #tpu.memory_space<vmem>>, vector<8x8x8xbf16>
    %75 = vector.shape_cast %74 : vector<8x8x8xbf16> to vector<64x8xbf16>
    %c0_113 = arith.constant 0 : index
    %c56 = arith.constant 56 : index
    %76 = vector.load %arg18[%c0_113, %c56] : memref<64x72xbf16, #tpu.memory_space<vmem>>, vector<64x8xbf16>
    tpu.vector_store %arg18[%c0_113, %c56], %75 {strides = array<i32>} : memref<64x72xbf16, #tpu.memory_space<vmem>>, vector<64x8xbf16>,
    %c2_114 = arith.constant 2 : index
    %c2_115 = arith.constant 2 : index
    %c0_116 = arith.constant 0 : index
    %77 = vector.load %arg17[%c2_114, %c2_115, %c0_116] : memref<10x10x8xbf16, #tpu.memory_space<vmem>>, vector<8x8x8xbf16>
    %78 = vector.shape_cast %77 : vector<8x8x8xbf16> to vector<64x8xbf16>
    %c0_117 = arith.constant 0 : index
    %c64 = arith.constant 64 : index
    %79 = vector.load %arg18[%c0_117, %c64] : memref<64x72xbf16, #tpu.memory_space<vmem>>, vector<64x8xbf16>
    tpu.vector_store %arg18[%c0_117, %c64], %78 {strides = array<i32>} : memref<64x72xbf16, #tpu.memory_space<vmem>>, vector<64x8xbf16>,
    %c0_118 = arith.constant 0 : index
    %c0_119 = arith.constant 0 : index
    %80 = vector.load %arg18[%c0_118, %c0_119] : memref<64x72xbf16, #tpu.memory_space<vmem>>, vector<64x72xbf16>
    %c0_120 = arith.constant 0 : index
    %c0_121 = arith.constant 0 : index
    %81 = vector.load %arg4[%c0_120, %c0_121] : memref<72x16xbf16, #tpu.memory_space<vmem>>, vector<72x16xbf16>
    %cst_122 = arith.constant dense<0.000000e+00> : vector<64x16xf32>
    %82 = tpu.matmul %80, %81, %cst_122 {dimension_numbers = #tpu.dot_dimension_numbers<[1], [0], [0], [1], [0, 0, 1, 1], [], []>} : vector<64x72xbf16>, vector<72x16xbf16>, vector<64x16xf32> -> vector<64x16xf32>
    %c0_123 = arith.constant 0 : index
    %c0_124 = arith.constant 0 : index
    %83 = vector.load %arg5[%c0_123, %c0_124] : memref<1x16xf32, #tpu.memory_space<vmem>>, vector<1x16xf32>
    %84 = vector.broadcast %83 : vector<1x16xf32> to vector<64x16xf32>
    %85 = arith.addf %82, %84 : vector<64x16xf32>
    %cst_125 = arith.constant 0.000000e+00 : f32
    %86 = vector.broadcast %cst_125 : f32 to vector<64x16xf32>
    %87 = arith.maximumf %85, %86 : vector<64x16xf32>
    %88 = vector.shape_cast %87 : vector<64x16xf32> to vector<8x8x16xf32>
    %c0_126 = arith.constant 0 : index
    %c0_127 = arith.constant 0 : index
    %c0_128 = arith.constant 0 : index
    %89 = vector.load %arg19[%c0_126, %c0_127, %c0_128] : memref<8x8x16xf32, #tpu.memory_space<vmem>>, vector<8x8x16xf32>
    tpu.vector_store %arg19[%c0_126, %c0_127, %c0_128], %88 {strides = array<i32>} : memref<8x8x16xf32, #tpu.memory_space<vmem>>, vector<8x8x16xf32>,
    %c0_129 = arith.constant 0 : index
    %c0_130 = arith.constant 0 : index
    %c0_131 = arith.constant 0 : index
    %90 = tpu.strided_load %arg19[%c0_129, %c0_130, %c0_131] {strides = array<i32: 1, 2, 1>} : memref<8x8x16xf32, #tpu.memory_space<vmem>>, vector<8x4x16xf32>
    %c0_132 = arith.constant 0 : index
    %c1_133 = arith.constant 1 : index
    %c0_134 = arith.constant 0 : index
    %91 = tpu.strided_load %arg19[%c0_132, %c1_133, %c0_134] {strides = array<i32: 1, 2, 1>} : memref<8x8x16xf32, #tpu.memory_space<vmem>>, vector<8x4x16xf32>
    %92 = arith.maximumf %90, %91 : vector<8x4x16xf32>
    %c0_135 = arith.constant 0 : index
    %c0_136 = arith.constant 0 : index
    %c0_137 = arith.constant 0 : index
    %93 = vector.load %arg20[%c0_135, %c0_136, %c0_137] : memref<8x4x16xf32, #tpu.memory_space<vmem>>, vector<8x4x16xf32>
    tpu.vector_store %arg20[%c0_135, %c0_136, %c0_137], %92 {strides = array<i32>} : memref<8x4x16xf32, #tpu.memory_space<vmem>>, vector<8x4x16xf32>,
    %c0_138 = arith.constant 0 : index
    %c0_139 = arith.constant 0 : index
    %c0_140 = arith.constant 0 : index
    %94 = tpu.strided_load %arg20[%c0_138, %c0_139, %c0_140] {strides = array<i32: 2, 1, 1>} : memref<8x4x16xf32, #tpu.memory_space<vmem>>, vector<4x4x16xf32>
    %c1_141 = arith.constant 1 : index
    %c0_142 = arith.constant 0 : index
    %c0_143 = arith.constant 0 : index
    %95 = tpu.strided_load %arg20[%c1_141, %c0_142, %c0_143] {strides = array<i32: 2, 1, 1>} : memref<8x4x16xf32, #tpu.memory_space<vmem>>, vector<4x4x16xf32>
    %96 = arith.maximumf %94, %95 : vector<4x4x16xf32>
    %97 = vector.shape_cast %96 : vector<4x4x16xf32> to vector<16x16xf32>
    %98 = vector.extract_strided_slice %97 {offsets = [0, 0], sizes = [1, 16], strides = [1, 1]} : vector<16x16xf32> to vector<1x16xf32>
    %c0_144 = arith.constant 0 : index
    %c0_145 = arith.constant 0 : index
    %99 = vector.load %arg21[%c0_144, %c0_145] : memref<1x256xf32, #tpu.memory_space<vmem>>, vector<1x16xf32>
    tpu.vector_store %arg21[%c0_144, %c0_145], %98 {strides = array<i32>} : memref<1x256xf32, #tpu.memory_space<vmem>>, vector<1x16xf32>,
    %100 = vector.extract_strided_slice %97 {offsets = [1, 0], sizes = [1, 16], strides = [1, 1]} : vector<16x16xf32> to vector<1x16xf32>
    %c0_146 = arith.constant 0 : index
    %c16_147 = arith.constant 16 : index
    %101 = vector.load %arg21[%c0_146, %c16_147] : memref<1x256xf32, #tpu.memory_space<vmem>>, vector<1x16xf32>
    tpu.vector_store %arg21[%c0_146, %c16_147], %100 {strides = array<i32>} : memref<1x256xf32, #tpu.memory_space<vmem>>, vector<1x16xf32>,
    %102 = vector.extract_strided_slice %97 {offsets = [2, 0], sizes = [1, 16], strides = [1, 1]} : vector<16x16xf32> to vector<1x16xf32>
    %c0_148 = arith.constant 0 : index
    %c32_149 = arith.constant 32 : index
    %103 = vector.load %arg21[%c0_148, %c32_149] : memref<1x256xf32, #tpu.memory_space<vmem>>, vector<1x16xf32>
    tpu.vector_store %arg21[%c0_148, %c32_149], %102 {strides = array<i32>} : memref<1x256xf32, #tpu.memory_space<vmem>>, vector<1x16xf32>,
    %104 = vector.extract_strided_slice %97 {offsets = [3, 0], sizes = [1, 16], strides = [1, 1]} : vector<16x16xf32> to vector<1x16xf32>
    %c0_150 = arith.constant 0 : index
    %c48_151 = arith.constant 48 : index
    %105 = vector.load %arg21[%c0_150, %c48_151] : memref<1x256xf32, #tpu.memory_space<vmem>>, vector<1x16xf32>
    tpu.vector_store %arg21[%c0_150, %c48_151], %104 {strides = array<i32>} : memref<1x256xf32, #tpu.memory_space<vmem>>, vector<1x16xf32>,
    %106 = vector.extract_strided_slice %97 {offsets = [4, 0], sizes = [1, 16], strides = [1, 1]} : vector<16x16xf32> to vector<1x16xf32>
    %c0_152 = arith.constant 0 : index
    %c64_153 = arith.constant 64 : index
    %107 = vector.load %arg21[%c0_152, %c64_153] : memref<1x256xf32, #tpu.memory_space<vmem>>, vector<1x16xf32>
    tpu.vector_store %arg21[%c0_152, %c64_153], %106 {strides = array<i32>} : memref<1x256xf32, #tpu.memory_space<vmem>>, vector<1x16xf32>,
    %108 = vector.extract_strided_slice %97 {offsets = [5, 0], sizes = [1, 16], strides = [1, 1]} : vector<16x16xf32> to vector<1x16xf32>
    %c0_154 = arith.constant 0 : index
    %c80 = arith.constant 80 : index
    %109 = vector.load %arg21[%c0_154, %c80] : memref<1x256xf32, #tpu.memory_space<vmem>>, vector<1x16xf32>
    tpu.vector_store %arg21[%c0_154, %c80], %108 {strides = array<i32>} : memref<1x256xf32, #tpu.memory_space<vmem>>, vector<1x16xf32>,
    %110 = vector.extract_strided_slice %97 {offsets = [6, 0], sizes = [1, 16], strides = [1, 1]} : vector<16x16xf32> to vector<1x16xf32>
    %c0_155 = arith.constant 0 : index
    %c96 = arith.constant 96 : index
    %111 = vector.load %arg21[%c0_155, %c96] : memref<1x256xf32, #tpu.memory_space<vmem>>, vector<1x16xf32>
    tpu.vector_store %arg21[%c0_155, %c96], %110 {strides = array<i32>} : memref<1x256xf32, #tpu.memory_space<vmem>>, vector<1x16xf32>,
    %112 = vector.extract_strided_slice %97 {offsets = [7, 0], sizes = [1, 16], strides = [1, 1]} : vector<16x16xf32> to vector<1x16xf32>
    %c0_156 = arith.constant 0 : index
    %c112 = arith.constant 112 : index
    %113 = vector.load %arg21[%c0_156, %c112] : memref<1x256xf32, #tpu.memory_space<vmem>>, vector<1x16xf32>
    tpu.vector_store %arg21[%c0_156, %c112], %112 {strides = array<i32>} : memref<1x256xf32, #tpu.memory_space<vmem>>, vector<1x16xf32>,
    %114 = vector.extract_strided_slice %97 {offsets = [8, 0], sizes = [1, 16], strides = [1, 1]} : vector<16x16xf32> to vector<1x16xf32>
    %c0_157 = arith.constant 0 : index
    %c128 = arith.constant 128 : index
    %115 = vector.load %arg21[%c0_157, %c128] : memref<1x256xf32, #tpu.memory_space<vmem>>, vector<1x16xf32>
    tpu.vector_store %arg21[%c0_157, %c128], %114 {strides = array<i32>} : memref<1x256xf32, #tpu.memory_space<vmem>>, vector<1x16xf32>,
    %116 = vector.extract_strided_slice %97 {offsets = [9, 0], sizes = [1, 16], strides = [1, 1]} : vector<16x16xf32> to vector<1x16xf32>
    %c0_158 = arith.constant 0 : index
    %c144 = arith.constant 144 : index
    %117 = vector.load %arg21[%c0_158, %c144] : memref<1x256xf32, #tpu.memory_space<vmem>>, vector<1x16xf32>
    tpu.vector_store %arg21[%c0_158, %c144], %116 {strides = array<i32>} : memref<1x256xf32, #tpu.memory_space<vmem>>, vector<1x16xf32>,
    %118 = vector.extract_strided_slice %97 {offsets = [10, 0], sizes = [1, 16], strides = [1, 1]} : vector<16x16xf32> to vector<1x16xf32>
    %c0_159 = arith.constant 0 : index
    %c160 = arith.constant 160 : index
    %119 = vector.load %arg21[%c0_159, %c160] : memref<1x256xf32, #tpu.memory_space<vmem>>, vector<1x16xf32>
    tpu.vector_store %arg21[%c0_159, %c160], %118 {strides = array<i32>} : memref<1x256xf32, #tpu.memory_space<vmem>>, vector<1x16xf32>,
    %120 = vector.extract_strided_slice %97 {offsets = [11, 0], sizes = [1, 16], strides = [1, 1]} : vector<16x16xf32> to vector<1x16xf32>
    %c0_160 = arith.constant 0 : index
    %c176 = arith.constant 176 : index
    %121 = vector.load %arg21[%c0_160, %c176] : memref<1x256xf32, #tpu.memory_space<vmem>>, vector<1x16xf32>
    tpu.vector_store %arg21[%c0_160, %c176], %120 {strides = array<i32>} : memref<1x256xf32, #tpu.memory_space<vmem>>, vector<1x16xf32>,
    %122 = vector.extract_strided_slice %97 {offsets = [12, 0], sizes = [1, 16], strides = [1, 1]} : vector<16x16xf32> to vector<1x16xf32>
    %c0_161 = arith.constant 0 : index
    %c192 = arith.constant 192 : index
    %123 = vector.load %arg21[%c0_161, %c192] : memref<1x256xf32, #tpu.memory_space<vmem>>, vector<1x16xf32>
    tpu.vector_store %arg21[%c0_161, %c192], %122 {strides = array<i32>} : memref<1x256xf32, #tpu.memory_space<vmem>>, vector<1x16xf32>,
    %124 = vector.extract_strided_slice %97 {offsets = [13, 0], sizes = [1, 16], strides = [1, 1]} : vector<16x16xf32> to vector<1x16xf32>
    %c0_162 = arith.constant 0 : index
    %c208 = arith.constant 208 : index
    %125 = vector.load %arg21[%c0_162, %c208] : memref<1x256xf32, #tpu.memory_space<vmem>>, vector<1x16xf32>
    tpu.vector_store %arg21[%c0_162, %c208], %124 {strides = array<i32>} : memref<1x256xf32, #tpu.memory_space<vmem>>, vector<1x16xf32>,
    %126 = vector.extract_strided_slice %97 {offsets = [14, 0], sizes = [1, 16], strides = [1, 1]} : vector<16x16xf32> to vector<1x16xf32>
    %c0_163 = arith.constant 0 : index
    %c224 = arith.constant 224 : index
    %127 = vector.load %arg21[%c0_163, %c224] : memref<1x256xf32, #tpu.memory_space<vmem>>, vector<1x16xf32>
    tpu.vector_store %arg21[%c0_163, %c224], %126 {strides = array<i32>} : memref<1x256xf32, #tpu.memory_space<vmem>>, vector<1x16xf32>,
    %128 = vector.extract_strided_slice %97 {offsets = [15, 0], sizes = [1, 16], strides = [1, 1]} : vector<16x16xf32> to vector<1x16xf32>
    %c0_164 = arith.constant 0 : index
    %c240 = arith.constant 240 : index
    %129 = vector.load %arg21[%c0_164, %c240] : memref<1x256xf32, #tpu.memory_space<vmem>>, vector<1x16xf32>
    tpu.vector_store %arg21[%c0_164, %c240], %128 {strides = array<i32>} : memref<1x256xf32, #tpu.memory_space<vmem>>, vector<1x16xf32>,
    %c0_165 = arith.constant 0 : index
    %c0_166 = arith.constant 0 : index
    %130 = vector.load %arg21[%c0_165, %c0_166] : memref<1x256xf32, #tpu.memory_space<vmem>>, vector<1x256xf32>
    %c0_167 = arith.constant 0 : index
    %c0_168 = arith.constant 0 : index
    %131 = vector.load %arg6[%c0_167, %c0_168] : memref<256x64xf32, #tpu.memory_space<vmem>>, vector<256x64xf32>
    %cst_169 = arith.constant dense<0.000000e+00> : vector<1x64xf32>
    %132 = tpu.matmul %130, %131, %cst_169 {dimension_numbers = #tpu.dot_dimension_numbers<[1], [0], [0], [1], [0, 0, 1, 1], [], []>} : vector<1x256xf32>, vector<256x64xf32>, vector<1x64xf32> -> vector<1x64xf32>
    %c0_170 = arith.constant 0 : index
    %c0_171 = arith.constant 0 : index
    %133 = vector.load %arg7[%c0_170, %c0_171] : memref<1x64xf32, #tpu.memory_space<vmem>>, vector<1x64xf32>
    %134 = arith.addf %132, %133 : vector<1x64xf32>
    %cst_172 = arith.constant 0.000000e+00 : f32
    %135 = vector.broadcast %cst_172 : f32 to vector<1x64xf32>
    %136 = arith.maximumf %134, %135 : vector<1x64xf32>
    %137 = arith.mulf %136, %136 : vector<1x64xf32>
    %cst_173 = arith.constant dense<0.000000e+00> : vector<1xf32>
    %138 = vector.multi_reduction <add>, %137, %cst_173 [1] : vector<1x64xf32> to vector<1xf32>
    %139 = vector.shape_cast %138 : vector<1xf32> to vector<1x1xf32>
    %cst_174 = arith.constant 9.99999996E-13 : f32
    %140 = vector.broadcast %cst_174 : f32 to vector<1x1xf32>
    %141 = arith.addf %139, %140 : vector<1x1xf32>
    %142 = math.rsqrt %141 : vector<1x1xf32>
    %143 = vector.broadcast %142 : vector<1x1xf32> to vector<1x64xf32>
    %144 = arith.mulf %136, %143 : vector<1x64xf32>
    %c0_175 = arith.constant 0 : index
    %c0_176 = arith.constant 0 : index
    %145 = vector.load %arg8[%c0_175, %c0_176] : memref<64x32xf32, #tpu.memory_space<vmem>>, vector<64x32xf32>
    %cst_177 = arith.constant dense<0.000000e+00> : vector<1x32xf32>
    %146 = tpu.matmul %144, %145, %cst_177 {dimension_numbers = #tpu.dot_dimension_numbers<[1], [0], [0], [1], [0, 0, 1, 1], [], []>} : vector<1x64xf32>, vector<64x32xf32>, vector<1x32xf32> -> vector<1x32xf32>
    %c0_178 = arith.constant 0 : index
    %c0_179 = arith.constant 0 : index
    %147 = vector.load %arg9[%c0_178, %c0_179] : memref<1x32xf32, #tpu.memory_space<vmem>>, vector<1x32xf32>
    %148 = arith.addf %146, %147 : vector<1x32xf32>
    %cst_180 = arith.constant 0.000000e+00 : f32
    %149 = vector.broadcast %cst_180 : f32 to vector<1x32xf32>
    %150 = arith.maximumf %148, %149 : vector<1x32xf32>
    %c0_181 = arith.constant 0 : index
    %c0_182 = arith.constant 0 : index
    %151 = vector.load %arg10[%c0_181, %c0_182] : memref<32x128xf32, #tpu.memory_space<vmem>>, vector<32x128xf32>
    %cst_183 = arith.constant dense<0.000000e+00> : vector<1x128xf32>
    %152 = tpu.matmul %150, %151, %cst_183 {dimension_numbers = #tpu.dot_dimension_numbers<[1], [0], [0], [1], [0, 0, 1, 1], [], []>} : vector<1x32xf32>, vector<32x128xf32>, vector<1x128xf32> -> vector<1x128xf32>
    %c0_184 = arith.constant 0 : index
    %c0_185 = arith.constant 0 : index
    %153 = vector.load %arg11[%c0_184, %c0_185] : memref<1x128xf32, #tpu.memory_space<vmem>>, vector<1x128xf32>
    %154 = arith.addf %152, %153 : vector<1x128xf32>
    %155 = arith.mulf %154, %154 : vector<1x128xf32>
    %cst_186 = arith.constant dense<0.000000e+00> : vector<1xf32>
    %156 = vector.multi_reduction <add>, %155, %cst_186 [1] : vector<1x128xf32> to vector<1xf32>
    %157 = vector.shape_cast %156 : vector<1xf32> to vector<1x1xf32>
    %cst_187 = arith.constant 9.99999996E-13 : f32
    %158 = vector.broadcast %cst_187 : f32 to vector<1x1xf32>
    %159 = arith.addf %157, %158 : vector<1x1xf32>
    %160 = math.rsqrt %159 : vector<1x1xf32>
    %161 = vector.broadcast %160 : vector<1x1xf32> to vector<1x128xf32>
    %162 = arith.mulf %154, %161 : vector<1x128xf32>
    %c0_188 = arith.constant 0 : index
    %c0_189 = arith.constant 0 : index
    %c0_190 = arith.constant 0 : index
    %163 = vector.load %arg12[%c0_188, %c0_189, %c0_190] : memref<1x1x128xf32, #tpu.memory_space<vmem>>, vector<1x1x128xf32>
    %164 = vector.shape_cast %163 : vector<1x1x128xf32> to vector<1x128xf32>
    %165 = vector.shape_cast %162 : vector<1x128xf32> to vector<1x1x128xf32>
    tpu.vector_store %arg12[%c0_188, %c0_189, %c0_190], %165 {strides = array<i32>} : memref<1x1x128xf32, #tpu.memory_space<vmem>>, vector<1x1x128xf32>,
    return
  }
  func.func @transform_0(%arg0: i32) -> (i32, i32, i32, i32) {
    %c0_i32 = arith.constant 0 : i32
    %c0_i32_0 = arith.constant 0 : i32
    %c0_i32_1 = arith.constant 0 : i32
    %c0_i32_2 = arith.constant 0 : i32
    return %arg0, %c0_i32, %c0_i32_0, %c0_i32_1 : i32, i32, i32, i32
  }
  func.func @transform_1(%arg0: i32) -> (i32, i32) {
    %c0_i32 = arith.constant 0 : i32
    %c0_i32_0 = arith.constant 0 : i32
    %c0_i32_1 = arith.constant 0 : i32
    return %c0_i32, %c0_i32_0 : i32, i32
  }
  func.func @transform_2(%arg0: i32) -> (i32, i32) {
    %c0_i32 = arith.constant 0 : i32
    %c0_i32_0 = arith.constant 0 : i32
    %c0_i32_1 = arith.constant 0 : i32
    return %c0_i32, %c0_i32_0 : i32, i32
  }
  func.func @transform_3(%arg0: i32) -> (i32, i32) {
    %c0_i32 = arith.constant 0 : i32
    %c0_i32_0 = arith.constant 0 : i32
    %c0_i32_1 = arith.constant 0 : i32
    return %c0_i32, %c0_i32_0 : i32, i32
  }
  func.func @transform_4(%arg0: i32) -> (i32, i32) {
    %c0_i32 = arith.constant 0 : i32
    %c0_i32_0 = arith.constant 0 : i32
    %c0_i32_1 = arith.constant 0 : i32
    return %c0_i32, %c0_i32_0 : i32, i32
  }
  func.func @transform_5(%arg0: i32) -> (i32, i32) {
    %c0_i32 = arith.constant 0 : i32
    %c0_i32_0 = arith.constant 0 : i32
    %c0_i32_1 = arith.constant 0 : i32
    return %c0_i32, %c0_i32_0 : i32, i32
  }
  func.func @transform_6(%arg0: i32) -> (i32, i32) {
    %c0_i32 = arith.constant 0 : i32
    %c0_i32_0 = arith.constant 0 : i32
    %c0_i32_1 = arith.constant 0 : i32
    return %c0_i32, %c0_i32_0 : i32, i32
  }
  func.func @transform_7(%arg0: i32) -> (i32, i32) {
    %c0_i32 = arith.constant 0 : i32
    %c0_i32_0 = arith.constant 0 : i32
    %c0_i32_1 = arith.constant 0 : i32
    return %c0_i32, %c0_i32_0 : i32, i32
  }
  func.func @transform_8(%arg0: i32) -> (i32, i32) {
    %c0_i32 = arith.constant 0 : i32
    %c0_i32_0 = arith.constant 0 : i32
    %c0_i32_1 = arith.constant 0 : i32
    return %c0_i32, %c0_i32_0 : i32, i32
  }
  func.func @transform_9(%arg0: i32) -> (i32, i32) {
    %c0_i32 = arith.constant 0 : i32
    %c0_i32_0 = arith.constant 0 : i32
    %c0_i32_1 = arith.constant 0 : i32
    return %c0_i32, %c0_i32_0 : i32, i32
  }
  func.func @transform_10(%arg0: i32) -> (i32, i32) {
    %c0_i32 = arith.constant 0 : i32
    %c0_i32_0 = arith.constant 0 : i32
    %c0_i32_1 = arith.constant 0 : i32
    return %c0_i32, %c0_i32_0 : i32, i32
  }
  func.func @transform_11(%arg0: i32) -> (i32, i32, i32) {
    %c0_i32 = arith.constant 0 : i32
    %c0_i32_0 = arith.constant 0 : i32
    %c0_i32_1 = arith.constant 0 : i32
    return %arg0, %c0_i32, %c0_i32_0 : i32, i32, i32
  }
}

</mosaic_0001>

<bundles_post_ra>
// kernel: _lambda_.1
= control target key start
LH: loop header
LB: loop body
LE: loop exit
PB: predicated region body
PF: predicated region fallthrough
CT: control target
= control target key end

     0   :  { %s9085_s0 = inlined_call_operand.vmem [shape: bf16[2,16,16,4], index: 0, kind: input, shape index: {}]   ;;  %s9086_s1 = inlined_call_operand.vmem [shape: bf16[36,8], index: 1, kind: input, shape index: {}]   ;;  %s9087_s2 = inlined_call_operand.vmem [shape: f32[1,8], index: 2, kind: input, shape index: {}]   ;;  %s9088_s3 = inlined_call_operand.vmem [shape: bf16[72,16], index: 3, kind: input, shape index: {}]   ;;  %s9089_s4 = inlined_call_operand.vmem [shape: f32[1,16], index: 4, kind: input, shape index: {}]   ;;  %s9090_s5 = inlined_call_operand.vmem [shape: f32[256,64], index: 5, kind: input, shape index: {}]   ;;  %s9091_s6 = inlined_call_operand.vmem [shape: f32[1,64], index: 6, kind: input, shape index: {}]   ;;  %s9092_s7 = inlined_call_operand.vmem [shape: f32[64,32], index: 7, kind: input, shape index: {}]   ;;  %s9093_s8 = inlined_call_operand.vmem [shape: f32[1,32], index: 8, kind: input, shape index: {}]   ;;  %s9094_s9 = inlined_call_operand.vmem [shape: f32[32,128], index: 9, kind: input, shape index: {}]   ;;  %s9095_s10 = inlined_call_operand.vmem [shape: f32[1,128], index: 10, kind: input, shape index: {}]   ;;  %s9096_s11 = inlined_call_operand.hbm [shape: f32[2,1,128], index: 11, kind: output, shape index: {}]  }
   0x1   :  { %9121 = sst [smem:[#allocation14_spill]] %s9085_s0 }
   0x2   :  { %16 = vsyncpa [#allocation12], 0 }
   0x3   :  { %18 = vsyncpa [#allocation12 + $0x1], 0  ;;  %s7080_s17 = smov 0   ;;  %s7082_s18 = smov 0  }
   0x4   :  { %s7084_s19 = smov 0   ;;  %s7086_s20 = smov 0  }
   0x5 LB: > { %s7101_s21 = sadd.s32 4294967295, %s6997_s20   ;;  %s6278_s22 = sadd.s32 4294967294, %s6997_s20   ;;  %s6997_s20 = sphi %s7086_s20, %s9208_s20   ;;  %s6993_s19 = sphi %s7084_s19, %s9207_s19   ;;  %s6989_s18 = sphi %s7082_s18, %s9206_s18   ;;  %s6985_s17 = sphi %s7080_s17, %s9205_s17  }
   0x6   : > { %s7105_s23 = sadd.s32 1, %s6997_s20   ;;  %s267_s24 = sadd.s32 1, %s6993_s19 }
   0x7   : > { %s264_s25 = ssub.s32 %s6997_s20, %s7105_s23  ;;  %p277_p0 = scmp.ne.s32.totalorder %s6993_s19, %s6989_s18 }
   0x8   : > { %p265_p1 = scmp.eq.s32.totalorder %s264_s25, 0  ;;  %p278_p2 = scmp.eq.s32.totalorder %s7101_s21, 1 }
   0x9   : > { %p283_p3 = scmp.ne.s32.totalorder %s6989_s18, %s6985_s17  ;;  %p284_p4 = scmp.eq.s32.totalorder %s6278_s22, 1 }
   0xa   : > { %s7116_s26 = scalar_select %p265_p1, %s6993_s19, %s267_s24  }
   0xb   : > { %p7118_p5 = por %p278_p2, %p277_p0  ;;  %p7122_p6 = por %p284_p4, %p283_p3 }
   0xc   : > { %p6281_p7 = scmp.ge.s32.totalorder %s6997_s20, 1  ;;  %p340_p8 = scmp.lt.s32.totalorder %s6997_s20, 3 }
   0xe   : > { %p341_p9 = pnand %p6281_p7, %p340_p8 }
   0xf   : > { %vm385_vm0 = vcmask (!%p341_p9), 27648   ;;  %vm388_vm1 = vcmask (!%p341_p9), 24576   ;;  %v6999_v0 = vmov (!%p341_p9), 0   ;;  %p379_p10 = scmp.lt.s32.totalorder (!%p341_p9), %s7101_s21, 1  ;;  %vm1107_vm2 = vsmask.f32 (!%p341_p9), 3328 }
  0x10   : > { %344 = sbr.rel (%p341_p9) target bundleno = 2312 (0x908), region = 64  ;;  %386 = vst.msk [vmem:[#allocation2] sm:$0xf] (!%p341_p9), %vm385_vm0, %v6999_v0  ;;  %387 = vst.msk [vmem:[#allocation2 + $0x4] sm:$0xf] (!%p341_p9), %vm385_vm0, %v6999_v0  ;;  %vm1703_vm4 = vcmask (!%p341_p9), 1042432  }
  0x11   : > { %389 = vst.msk [vmem:[#allocation2 + $0x8] sm:$0x1] (!%p341_p9), %vm388_vm1, %v6999_v0  ;;  %392 = vst.msk [vmem:[#allocation2 + $0x14] sm:$0x1] (!%p341_p9), %vm388_vm1, %v6999_v0  ;;  %vm1108_vm3 = vsmask.f32 (!%p341_p9), 7440 }
  0x12   : > { %390 = vst.msk [vmem:[#allocation2 + $0xc] sm:$0xf] (!%p341_p9), %vm385_vm0, %v6999_v0  ;;  %391 = vst.msk [vmem:[#allocation2 + $0x10] sm:$0xf] (!%p341_p9), %vm385_vm0, %v6999_v0  ;;  %vm1704_vm5 = vcmask (!%p341_p9), 1046532   ;;  %s9124_s0 = sld [smem:[#allocation14_spill]] (!%p341_p9) }
  0x13   : > { %393 = vst.msk [vmem:[#allocation2 + $0x18] sm:$0xf] (!%p341_p9), %vm385_vm0, %v6999_v0  ;;  %394 = vst.msk [vmem:[#allocation2 + $0x1c] sm:$0xf] (!%p341_p9), %vm385_vm0, %v6999_v0  ;;  %vm9099_vm6 = vsmask.f32 (!%p341_p9), 256 }
  0x14   : > { %395 = vst.msk [vmem:[#allocation2 + $0x20] sm:$0x1] (!%p341_p9), %vm388_vm1, %v6999_v0  ;;  %398 = vst.msk [vmem:[#allocation2 + $0x2c] sm:$0x1] (!%p341_p9), %vm388_vm1, %v6999_v0  ;;  %vm474_vm7 = vsmask.f32 (!%p341_p9), 4368 }
  0x15   : > { %396 = vst.msk [vmem:[#allocation2 + $0x24] sm:$0xf] (!%p341_p9), %vm385_vm0, %v6999_v0  ;;  %397 = vst.msk [vmem:[#allocation2 + $0x28] sm:$0xf] (!%p341_p9), %vm385_vm0, %v6999_v0  ;;  %vm9102_vm8 = vsmask.f32 (!%p341_p9), 7938 }
  0x16   : > { %399 = vst.msk [vmem:[#allocation2 + $0x30] sm:$0xf] (!%p341_p9), %vm385_vm0, %v6999_v0  ;;  %400 = vst.msk [vmem:[#allocation2 + $0x34] sm:$0xf] (!%p341_p9), %vm385_vm0, %v6999_v0  ;;  %s9108_s15 = smov (!%p341_p9), 8   ;;  %s9100_s16 = smov (!%p341_p9), 4  }
  0x17   : > { %401 = vst.msk [vmem:[#allocation2 + $0x38] sm:$0x1] %vm388_vm1, %v6999_v0  ;;  %404 = vst.msk [vmem:[#allocation2 + $0x44] sm:$0x1] %vm388_vm1, %v6999_v0  ;;  %s380_s29 = scalar_select %p379_p10, %s7101_s21, 1  ;;  %vm1042_vm14 = vcmask 31744  }
  0x18   : > { %402 = vst.msk [vmem:[#allocation2 + $0x3c] sm:$0xf] %vm385_vm0, %v6999_v0  ;;  %403 = vst.msk [vmem:[#allocation2 + $0x40] sm:$0xf] %vm385_vm0, %v6999_v0  ;;  %v1059_v2 = vld [vmem:[#allocation2] sm:$0xf] }
  0x19   : > { %405 = vst.msk [vmem:[#allocation2 + $0x48] sm:$0xf] %vm385_vm0, %v6999_v0  ;;  %406 = vst.msk [vmem:[#allocation2 + $0x4c] sm:$0xf] %vm385_vm0, %v6999_v0  ;;  %s6579_s30 = sshll.u32 %s380_s29, 7  ;;  %v1111_v6 = vshrl.u32 %v1059_v2, 16 }
  0x1a   : > { %407 = vst.msk [vmem:[#allocation2 + $0x50] sm:$0x1] %vm388_vm1, %v6999_v0  ;;  %410 = vst.msk [vmem:[#allocation2 + $0x5c] sm:$0x1] %vm388_vm1, %v6999_v0  ;;  %s7241_s14 = scalar_lea.vmem %s9124_s0, %s6579_s30  ;;  %v1060_v3 = vld [vmem:[#allocation2 + $0x4] sm:$0xf] }
  0x1b   : > { %408 = vst.msk [vmem:[#allocation2 + $0x54] sm:$0xf] %vm385_vm0, %v6999_v0  ;;  %409 = vst.msk [vmem:[#allocation2 + $0x58] sm:$0xf] %vm385_vm0, %v6999_v0  ;;  %v441_v1 = vld [vmem:[%s7241_s14] sm:$0xf] }
  0x1c   : > { %411 = vst.msk [vmem:[#allocation2 + $0x60] sm:$0xf] %vm385_vm0, %v6999_v0  ;;  %412 = vst.msk [vmem:[#allocation2 + $0x64] sm:$0xf] %vm385_vm0, %v6999_v0  ;;  %v1061_v4 = vld [vmem:[#allocation2 + $0x8] sm:$0x1] }
  0x1d   : > { %413 = vst.msk [vmem:[#allocation2 + $0x68] sm:$0x1] %vm388_vm1, %v6999_v0  ;;  %416 = vst.msk [vmem:[#allocation2 + $0x74] sm:$0x1] %vm388_vm1, %v6999_v0  ;;  %v442_v5 = vld [vmem:[%s7241_s14 + $0x4] sm:$0xf] }
  0x1e   : > { %414 = vst.msk [vmem:[#allocation2 + $0x6c] sm:$0xf] %vm385_vm0, %v6999_v0  ;;  %415 = vst.msk [vmem:[#allocation2 + $0x70] sm:$0xf] %vm385_vm0, %v6999_v0  ;;  %v1114_v7 = vshll.u32 %v1059_v2, 16  ;;  %v1120_v8 = vshll.u32 %v1060_v3, 16 }
  0x1f   : > { %417 = vst.msk [vmem:[#allocation2 + $0x78] sm:$0xf] %vm385_vm0, %v6999_v0  ;;  %418 = vst.msk [vmem:[#allocation2 + $0x7c] sm:$0xf] %vm385_vm0, %v6999_v0  ;;  %v1124_v9 = vshrl.u32 %v1060_v3, 16  ;;  %v1130_v11 = vshll.u32 %v1061_v4, 16 }
  0x20   : > { %419 = vst.msk [vmem:[#allocation2 + $0x80] sm:$0x1] %vm388_vm1, %v6999_v0  ;;  %422 = vst.msk [vmem:[#allocation2 + $0x8c] sm:$0x1] %vm388_vm1, %v6999_v0  ;;  %v1607_v10 = vld [vmem:[#allocation2] sm:$0xe] }
  0x21   : > { %420 = vst.msk [vmem:[#allocation2 + $0x84] sm:$0xf] %vm385_vm0, %v6999_v0  ;;  %421 = vst.msk [vmem:[#allocation2 + $0x88] sm:$0xf] %vm385_vm0, %v6999_v0  ;;  %v1608_v12 = vld [vmem:[#allocation2 + $0x4] sm:$0xf] }
  0x22   : > { %423 = vst.msk [vmem:[#allocation2 + $0x90] sm:$0xf] %vm385_vm0, %v6999_v0  ;;  %424 = vst.msk [vmem:[#allocation2 + $0x94] sm:$0xf] %vm385_vm0, %v6999_v0  ;;  %v1609_v13 = vld [vmem:[#allocation2 + $0x8] sm:$0x1] }
  0x23   : > { %425 = vst.msk [vmem:[#allocation2 + $0x98] sm:$0x1] %vm388_vm1, %v6999_v0  ;;  %428 = vst.msk [vmem:[#allocation2 + $0xa4] sm:$0x1] %vm388_vm1, %v6999_v0  ;;  %v6316_v14 = vrot.slane %v1607_v10, 9  ;;  %v1113_v15 = vrot.slane %v1111_v6, 4 }
  0x24   : > { %426 = vst.msk [vmem:[#allocation2 + $0x9c] sm:$0xf] %vm385_vm0, %v6999_v0  ;;  %427 = vst.msk [vmem:[#allocation2 + $0xa0] sm:$0xf] %vm385_vm0, %v6999_v0  ;;  %v1116_v16 = vrot.slane %v1114_v7, 5  ;;  %v1122_v17 = vrot.slane %v1120_v8, 5 }
  0x25   : > { %429 = vst.msk [vmem:[#allocation2 + $0xa8] sm:$0xf] %vm385_vm0, %v6999_v0  ;;  %430 = vst.msk [vmem:[#allocation2 + $0xac] sm:$0xf] %vm385_vm0, %v6999_v0  ;;  %v1126_v18 = vrot.slane %v1124_v9, 4  ;;  %v1132_v20 = vrot.slane %v1130_v11, 5 }
  0x26   : > { %431 = vst.msk [vmem:[#allocation2 + $0xb0] sm:$0x1] %vm388_vm1, %v6999_v0  ;;  %434 = vst.msk [vmem:[#allocation2 + $0xbc] sm:$0x1] %vm388_vm1, %v6999_v0  ;;  %v1708_v21 = vrot.slane %v1608_v12, 5  ;;  %v1711_v22 = vrot.slane %v1609_v13, 5  ;;  %v1117_v25 = vor.u32 %v1116_v16, %v1113_v15 }
  0x27   : > { %432 = vst.msk [vmem:[#allocation2 + $0xb4] sm:$0xf] %vm385_vm0, %v6999_v0  ;;  %433 = vst.msk [vmem:[#allocation2 + $0xb8] sm:$0xf] %vm385_vm0, %v6999_v0  ;;  %v477_v23 = vshrl.u32 %v441_v1, 16  ;;  %v1127_v26 = vor.u32 %v1126_v18, %v1122_v17  ;;  %v480_v27 = vshll.u32 %v441_v1, 16 }
  0x28   : > { %435 = vst.msk [vmem:[#allocation2 + $0xc0] sm:$0xf] %vm385_vm0, %v6999_v0  ;;  %436 = vst.msk [vmem:[#allocation2 + $0xc4] sm:$0xf] %vm385_vm0, %v6999_v0  ;;  %v443_v24 = vld [vmem:[%s7241_s14 + $0x8] sm:$0xf] }
  0x29   : > { %437 = vst.msk [vmem:[#allocation2 + $0xc8] sm:$0x1] %vm388_vm1, %v6999_v0  ;;  %440 = vst.msk [vmem:[#allocation2 + $0xd4] sm:$0x1] %vm388_vm1, %v6999_v0  ;;  %v485_v28 = vshrl.u32 %v442_v5, 16  ;;  %v1710_v31 = vrot.slane %v1708_v21, 4 }
  0x2a   : > { %438 = vst.msk [vmem:[#allocation2 + $0xcc] sm:$0xf] %vm385_vm0, %v6999_v0  ;;  %439 = vst.msk [vmem:[#allocation2 + $0xd0] sm:$0xf] %vm385_vm0, %v6999_v0  ;;  %v479_v32 = vrot.slane %v477_v23, 7  ;;  %v488_v33 = vshll.u32 %v442_v5, 16 }
  0x2b   : > { %vm7247_vm9 = vmor %vm1703_vm4, %vm1704_vm5  ;;  %v1118_v34 = vrot.slane %v1117_v25, 4  ;;  %v1128_v35 = vrot.slane %v1127_v26, 4  ;;  %v487_v36 = vrot.slane %v485_v28, 7  ;;  %v800_v38 = vld [vmem:[#allocation2 + $0xc] sm:$0xf]  ;;  %v494_v39 = vshrl.u32 %v443_v24, 16 }
  0x2c   : > { %vm7254_vm10 = vmor %vm1107_vm2, %vm1108_vm3  ;;  %v1709_v30 = vsel %vm7247_vm9, %v6316_v14, %v1708_v21  ;;  %v1712_v40 = vsel %vm7247_vm9, %v1710_v31, %v1711_v22  ;;  %v482_v42 = vor.u32 %v480_v27, %v479_v32  ;;  %v483_v43 = vrot.slane %v479_v32, 4  ;;  %v444_v44 = vld [vmem:[%s7241_s14 + $0xc] sm:$0xf]  ;;  %v445_v46 = vld [vmem:[%s7241_s14 + $0x10] sm:$0xf]  ;;  %s7002_s22 = smov 12  }
  0x2d   : > { %vm7262_vm11 = vmand %vm385_vm0, %vm9102_vm8  ;;  %v497_v45 = vshll.u32 %v443_v24, 16  ;;  %v1123_v47 = vsel %vm7254_vm10, %v1118_v34, %v1122_v17  ;;  %v1133_v48 = vsel %vm7254_vm10, %v1128_v35, %v1132_v20  ;;  %v6332_v49 = vcombine.low %v1709_v30, %v1712_v40  ;;  %v446_v51 = vld [vmem:[%s7241_s14 + $0x14] sm:$0xf]  ;;  %v809_v57 = vld [vmem:[#allocation2 + $0x18] sm:$0xf]  ;;  %s9097_s24 = smov 24  }
  0x2e   : > { %vm7270_vm12 = vmor %vm9099_vm6, %vm474_vm7  ;;  %v490_v50 = vor.u32 %v488_v33, %v487_v36  ;;  %v6300_v52 = vcombine.low %v1123_v47, %v1133_v48  ;;  %v492_v53 = vrot.slane %v487_v36, 4  ;;  %v801_v54 = vsel %vm7262_vm11, %v482_v42, %v800_v38  ;;  %v806_v58 = vld [vmem:[#allocation2 + $0x14] sm:$0x1]  ;;  %v447_v63 = vld [vmem:[%s7241_s14 + $0x18] sm:$0xf]  ;;  %s7004_s25 = smov 20  }
  0x2f   : > { %vm7285_vm13 = vmand %vm388_vm1, %vm9099_vm6  ;;  %v496_v56 = vrot.slane %v494_v39, 7  ;;  %1866 = vrot.lane.b32.xlu1 %v6332_v49, %s9108_s15  ;;  %802 = vst [vmem:[#allocation2 + $0xc] sm:$0xf] %v801_v54  ;;  %v502_v60 = vshrl.u32 %v444_v44, 16  ;;  %v505_v61 = vshll.u32 %v444_v44, 16  ;;  %v511_v62 = vshrl.u32 %v445_v46, 16 }
  0x30   : > { %v491_v59 = vsel %vm7270_vm12, %v483_v43, %v490_v50  ;;  %1542 = vrot.lane.b32.xlu0 %v6300_v52, %s9100_s16  ;;  %v514_v3 = vshll.u32 %v445_v46, 16  ;;  %v519_v4 = vshrl.u32 %v446_v51, 16  ;;  %v522_v7 = vshll.u32 %v446_v51, 16  ;;  %v816_v8 = vld [vmem:[#allocation2 + $0x24] sm:$0xf]  ;;  %s9115_s29 = smov 32  }
  0x31   : > { %803 = vst.msk [vmem:[#allocation2 + $0x10] sm:$0xf] %vm385_vm0, %v491_v59  ;;  %v499_v1 = vor.u32 %v497_v45, %v496_v56  ;;  %v500_v2 = vrot.slane %v496_v56, 4  ;;  %v504_v5 = vrot.slane %v502_v60, 7  ;;  %v513_v6 = vrot.slane %v511_v62, 7  ;;  %s9109_s30 = smov 16  }
  0x32   : > { %v807_v9 = vsel %vm7285_vm13, %v492_v53, %v806_v58  ;;  %v521_v11 = vrot.slane %v519_v4, 7  ;;  %v813_v12 = vld [vmem:[#allocation2 + $0x20] sm:$0x1]  ;;  %v528_v13 = vshrl.u32 %v447_v63, 16  ;;  %v531_v14 = vshll.u32 %v447_v63, 16  ;;  %s7007_s12 = smov 28  }
  0x33   : > { %v810_v10 = vsel %vm7262_vm11, %v499_v1, %v809_v57  ;;  %808 = vst [vmem:[#allocation2 + $0x14] sm:$0x1] %v807_v9  ;;  %v507_v15 = vor.u32 %v505_v61, %v504_v5  ;;  %v509_v16 = vrot.slane %v504_v5, 4  ;;  %v516_v17 = vor.u32 %v514_v3, %v513_v6  ;;  %v820_v20 = vld [vmem:[#allocation2 + $0x2c] sm:$0x1]  ;;  %s9104_s13 = smov 64  }
  0x34   : > { %811 = vst [vmem:[#allocation2 + $0x18] sm:$0xf] %v810_v10  ;;  %v517_v18 = vrot.slane %v513_v6, 4  ;;  %v524_v21 = vor.u32 %v522_v7, %v521_v11  ;;  %v526_v22 = vrot.slane %v521_v11, 4  ;;  %v7300_v23 = vld [vmem:[%s7241_s14 + $0x1c] sm:$0xf] }
  0x35   : > { %v7302_v24 = vrot.slane %v528_v13, 7  ;;  %v508_v25 = vsel %vm7270_vm12, %v500_v2, %v507_v15  ;;  %v817_v26 = vsel %vm7262_vm11, %v516_v17, %v816_v8  ;;  %v814_v27 = vsel %vm7285_vm13, %v509_v16, %v813_v12  ;;  %v823_v28 = vld [vmem:[#allocation2 + $0x30] sm:$0xf] }
  0x36   : > { %812 = vst.msk [vmem:[#allocation2 + $0x1c] sm:$0xf] %vm385_vm0, %v508_v25  ;;  %v525_v30 = vsel %vm7270_vm12, %v517_v18, %v524_v21  ;;  %818 = vst [vmem:[#allocation2 + $0x24] sm:$0xf] %v817_v26  ;;  %v2653_v31 = vld [vmem:[#allocation2 + $0xc] sm:$0xe]  ;;  %v821_v33 = vsel %vm7285_vm13, %v526_v22, %v820_v20 }
  0x37   : > { %v1610_v32 = vld [vmem:[#allocation2 + $0xc] sm:$0xe]  ;;  %815 = vst [vmem:[#allocation2 + $0x20] sm:$0x1] %v814_v27  ;;  %v533_v34 = vor.u32 %v531_v14, %v7302_v24  ;;  %819 = vst.msk [vmem:[#allocation2 + $0x28] sm:$0xf] %vm385_vm0, %v525_v30 }
  0x38   : > { %v6862_v35 = vld [vmem:[#allocation2 + $0xc] sm:$0xff]   ;;  %822 = vst [vmem:[#allocation2 + $0x2c] sm:$0x1] %v821_v33  ;;  %v536_v38 = vshrl.u32 %v7300_v23, 16  ;;  %v539_v43 = vshll.u32 %v7300_v23, 16  ;;  %v6380_v46 = vrot.slane %v2653_v31, 9 }
  0x39   : > { %v2654_v36 = vld [vmem:[#allocation2 + $0x10] sm:$0xf]  ;;  %v7318_v42 = vld [vmem:[#allocation2 + $0xc] sm:$0xf]  ;;  %v824_v44 = vsel %vm7262_vm11, %v533_v34, %v823_v28  ;;  %2043 = vrot.lane.b32.xlu0 %v6862_v35, %s7002_s22  ;;  %v6317_v51 = vrot.slane %v1610_v32, 9  ;;  %vm1590_vm15 = vcmask 64544  }
  0x3a   : > { %v2751_v39 = vrot.slane %v2654_v36, 5  ;;  %v1611_v40 = vld [vmem:[#allocation2 + $0x10] sm:$0xf]  ;;  %v2655_v45 = vld [vmem:[#allocation2 + $0x14] sm:$0x1]  ;;  %v1135_v54 = vshrl.u32 %v7318_v42, 16 }
  0x3b   : > { %v1612_v47 = vld [vmem:[#allocation2 + $0x14] sm:$0x1]  ;;  %v1715_v48 = vrot.slane %v1611_v40, 5  ;;  %825 = vst [vmem:[#allocation2 + $0x30] sm:$0xf] %v824_v44  ;;  %v2754_v50 = vrot.slane %v2655_v45, 5 }
  0x3c   : > { %v2753_v49 = vrot.slane %v2751_v39, 4  ;;  %v3697_v52 = vld [vmem:[#allocation2 + $0x18] sm:$0xe]  ;;  %v1718_v57 = vrot.slane %v1612_v47, 5  ;;  %v2752_v62 = vsel %vm7247_vm9, %v6380_v46, %v2751_v39  ;;  %v1063_v47 = vld [vmem:[#allocation2 + $0x10] sm:$0xf] }
  0x3d   : > { %v2656_v53 = vld [vmem:[#allocation2 + $0x18] sm:$0xe]  ;;  %v1717_v56 = vrot.slane %v1715_v48, 4  ;;  %v6444_v58 = vrot.slane %v3697_v52, 9  ;;  %v1716_v5 = vsel %vm7247_vm9, %v6317_v51, %v1715_v48  ;;  %v3698_v6 = vld [vmem:[#allocation2 + $0x1c] sm:$0xf] }
  0x3e   : > { %v6381_v59 = vrot.slane %v2656_v53, 9  ;;  %v2111_v60 = vld [vmem:[#allocation2 + $0x18] sm:$0xf]  ;;  %v2755_v63 = vsel %vm7247_vm9, %v2753_v49, %v2754_v50  ;;  %v6865_v4 = vld [vmem:[#allocation2 + $0x24] sm:$0xff]   ;;  %v3699_v7 = vld [vmem:[#allocation2 + $0x20] sm:$0x1] }
  0x3f   : > { %v6863_v61 = vld [vmem:[#allocation2 + $0x18] sm:$0xff]   ;;  %v2181_v1 = vshrl.u32 %v2111_v60, 16  ;;  %v2184_v3 = vshll.u32 %v2111_v60, 16  ;;  %v6396_v9 = vcombine.low %v2752_v62, %v2755_v63  ;;  %v1719_v10 = vsel %vm7247_vm9, %v1717_v56, %v1718_v57  ;;  %v2658_v14 = vld [vmem:[#allocation2 + $0x20] sm:$0x1] }
  0x40   : > { %v6864_v2 = vld [vmem:[#allocation2 + $0x18] sm:$0xff]   ;;  %2045 = vrot.lane.b32.xlu1 %v6863_v61, %s7002_s22  ;;  %v3795_v11 = vrot.slane %v3698_v6, 5  ;;  %v3798_v12 = vrot.slane %v3699_v7, 5  ;;  %v2761_v16 = vrot.slane %v2658_v14, 5  ;;  %v3700_v17 = vld [vmem:[#allocation2 + $0x24] sm:$0xe]  ;;  %v6333_v27 = vcombine.low %v1716_v5, %v1719_v10 }
  0x41   : > { %v2183_v8 = vrot.slane %v2181_v1, 4  ;;  %3087 = vrot.lane.b32.xlu0 %v6864_v2, %s9097_s24  ;;  %v2657_v13 = vld [vmem:[#allocation2 + $0x1c] sm:$0xf]  ;;  %v3701_v18 = vld [vmem:[#allocation2 + $0x28] sm:$0xf]  ;;  %v6445_v25 = vrot.slane %v3700_v17, 9 }
  0x42   : > { %v2758_v15 = vrot.slane %v2657_v13, 5  ;;  %v3796_v20 = vsel %vm7247_vm9, %v6444_v58, %v3795_v11  ;;  %v3797_v21 = vrot.slane %v3795_v11, 4  ;;  %v3702_v22 = vld [vmem:[#allocation2 + $0x2c] sm:$0x1]  ;;  %v3802_v26 = vrot.slane %v3701_v18, 5 }
  0x43   : > { %v3805_v31 = vrot.slane %v3702_v22, 5  ;;  %v2112_v32 = vld [vmem:[#allocation2 + $0x1c] sm:$0xf]  ;;  %v2113_v33 = vld [vmem:[#allocation2 + $0x20] sm:$0x1]  ;;  %v2186_v39 = vrot.slane %v2184_v3, 5 }
  0x44   : > { %3089 = vrot.lane.b32.xlu1 %v6865_v4, %s9097_s24  ;;  %v2759_v28 = vsel %vm7247_vm9, %v6381_v59, %v2758_v15  ;;  %v2760_v30 = vrot.slane %v2758_v15, 4  ;;  %v3799_v34 = vsel %vm7247_vm9, %v3797_v21, %v3798_v12  ;;  %v3803_v35 = vsel %vm7247_vm9, %v6445_v25, %v3802_v26  ;;  %v1064_v52 = vld [vmem:[#allocation2 + $0x14] sm:$0x1]  ;;  %v3155_v53 = vld [vmem:[#allocation2 + $0x24] sm:$0xf] }
  0x45   : > { %2909 = vrot.lane.b32.xlu0 %v6396_v9, %s7004_s25  ;;  %v3804_v36 = vrot.slane %v3802_v26, 4  ;;  %v6460_v40 = vcombine.low %v3796_v20, %v3799_v34  ;;  %v2190_v45 = vshll.u32 %v2112_v32, 16  ;;  %v2194_v46 = vshrl.u32 %v2112_v32, 16  ;;  %v3156_v1 = vld [vmem:[#allocation2 + $0x28] sm:$0xf] }
  0x46   : > { %v2762_v44 = vsel %vm7247_vm9, %v2760_v30, %v2761_v16  ;;  %v2187_v50 = vor.u32 %v2186_v39, %v2183_v8  ;;  %v2200_v51 = vshll.u32 %v2113_v33, 16  ;;  %v1137_v59 = vrot.slane %v1135_v54, 4  ;;  %v3157_v5 = vld [vmem:[#allocation2 + $0x2c] sm:$0x1]  ;;  %v2109_v22 = vld [vmem:[#allocation2 + $0x10] sm:$0xf] }
  0x47   : > { %v6397_v48 = vcombine.low %v2759_v28, %v2762_v44  ;;  %v3806_v49 = vsel %vm7247_vm9, %v3804_v36, %v3805_v31  ;;  %v2192_v57 = vrot.slane %v2190_v45, 5  ;;  %v2196_v58 = vrot.slane %v2194_v46, 4  ;;  %v2108_v10 = vld [vmem:[#allocation2 + $0xc] sm:$0xf]  ;;  %v2110_v31 = vld [vmem:[#allocation2 + $0x14] sm:$0x1] }
  0x48   : > { %1868 = vrot.lane.b32.xlu1 %v6333_v27, %s9108_s15  ;;  %v6461_v56 = vcombine.low %v3803_v35, %v3806_v49  ;;  %v2188_v60 = vrot.slane %v2187_v50, 4  ;;  %v2202_v61 = vrot.slane %v2200_v51, 5  ;;  %v1138_v62 = vshll.u32 %v7318_v42, 16  ;;  %v1065_v45 = vld [vmem:[#allocation2 + $0x18] sm:$0xf] }
  0x49   : > { %3953 = vrot.lane.b32.xlu0 %v6460_v40, %s9115_s29  ;;  %v1144_v63 = vshll.u32 %v1063_v47, 16  ;;  %v2197_v2 = vor.u32 %v2196_v58, %v2192_v57  ;;  %v1148_v3 = vshrl.u32 %v1063_v47, 16  ;;  %v1154_v4 = vshll.u32 %v1064_v52, 16  ;;  %v1066_v50 = vld [vmem:[#allocation2 + $0x1c] sm:$0xf] }
  0x4a   : > { %v3225_v6 = vshrl.u32 %v3155_v53, 16  ;;  %v2193_v7 = vsel %vm7254_vm10, %v2188_v60, %v2192_v57  ;;  %v1140_v8 = vrot.slane %v1138_v62, 5  ;;  %v3228_v54 = vshll.u32 %v3155_v53, 16  ;;  %v1067_v57 = vld [vmem:[#allocation2 + $0x20] sm:$0x1] }
  0x4b   : > { %v1146_v9 = vrot.slane %v1144_v63, 5  ;;  %v2198_v11 = vrot.slane %v2197_v2, 4  ;;  %v1150_v12 = vrot.slane %v1148_v3, 4  ;;  %v1156_v13 = vrot.slane %v1154_v4, 5  ;;  %v3152_v58 = vld [vmem:[#allocation2 + $0x18] sm:$0xf] }
  0x4c   : > { %2911 = vrot.lane.b32.xlu1 %v6397_v48, %s7004_s25  ;;  %v3227_v42 = vrot.slane %v3225_v6, 4  ;;  %v1141_v14 = vor.u32 %v1140_v8, %v1137_v59  ;;  %v3230_v15 = vrot.slane %v3228_v54, 5  ;;  %v3234_v16 = vshll.u32 %v3156_v1, 16  ;;  %v3153_v8 = vld [vmem:[#allocation2 + $0x1c] sm:$0xf] }
  0x4d   : > { %3955 = vrot.lane.b32.xlu0 %v6461_v56, %s9115_s29  ;;  %v3238_v17 = vshrl.u32 %v3156_v1, 16  ;;  %v2203_v18 = vsel %vm7254_vm10, %v2198_v11, %v2202_v61  ;;  %v1151_v20 = vor.u32 %v1150_v12, %v1146_v9  ;;  %v3244_v21 = vshll.u32 %v3157_v5, 16 }
  0x4e   : > { %v2157_v25 = vshrl.u32 %v2108_v10, 16  ;;  %v6365_v26 = vcombine.low %v2193_v7, %v2203_v18  ;;  %v1142_v27 = vrot.slane %v1141_v14, 4  ;;  %v3231_v28 = vor.u32 %v3230_v15, %v3227_v42 }
  0x4f   : > { %v3236_v30 = vrot.slane %v3234_v16, 5  ;;  %v1152_v32 = vrot.slane %v1151_v20, 4  ;;  %v3240_v33 = vrot.slane %v3238_v17, 4  ;;  %v3246_v34 = vrot.slane %v3244_v21, 5  ;;  %v3154_v17 = vld [vmem:[#allocation2 + $0x20] sm:$0x1] }
  0x50   : > { %v2159_v35 = vrot.slane %v2157_v25, 4  ;;  %2590 = vrot.lane.b32.xlu1 %v6365_v26, %s9109_s30  ;;  %v1147_v36 = vsel %vm7254_vm10, %v1142_v27, %v1146_v9  ;;  %v3232_v39 = vrot.slane %v3231_v28, 4  ;;  %v2160_v40 = vshll.u32 %v2108_v10, 16  ;;  %v1068_v21 = vld [vmem:[#allocation2 + $0x24] sm:$0xf] }
  0x51   : > { %v2166_v44 = vshll.u32 %v2109_v22, 16  ;;  %v1157_v46 = vsel %vm7254_vm10, %v1152_v32, %v1156_v13  ;;  %v3241_v47 = vor.u32 %v3240_v33, %v3236_v30  ;;  %v2170_v48 = vshrl.u32 %v2109_v22, 16  ;;  %v1069_v28 = vld [vmem:[#allocation2 + $0x28] sm:$0xf] }
  0x52   : > { %v2176_v49 = vshll.u32 %v2110_v31, 16  ;;  %v6301_v51 = vcombine.low %v1147_v36, %v1157_v46  ;;  %v3237_v52 = vsel %vm7254_vm10, %v3232_v39, %v3236_v30  ;;  %v2162_v53 = vrot.slane %v2160_v40, 5 }
  0x53   : > { %v2168_v56 = vrot.slane %v2166_v44, 5  ;;  %v3242_v59 = vrot.slane %v3241_v47, 4  ;;  %v2172_v60 = vrot.slane %v2170_v48, 4  ;;  %v1159_v62 = vshrl.u32 %v1065_v45, 16  ;;  %v1613_v48 = vld [vmem:[#allocation2 + $0x18] sm:$0xe] }
  0x54   : > { %v2178_v61 = vrot.slane %v2176_v49, 5  ;;  %1544 = vrot.lane.b32.xlu0 %v6301_v51, %s9100_s16  ;;  %v2163_v63 = vor.u32 %v2162_v53, %v2159_v35  ;;  %v1162_v1 = vshll.u32 %v1065_v45, 16  ;;  %v1168_v2 = vshll.u32 %v1066_v50, 16  ;;  %v1070_v45 = vld [vmem:[#allocation2 + $0x2c] sm:$0x1] }
  0x55   : > { %v1172_v3 = vshrl.u32 %v1066_v50, 16  ;;  %v3247_v4 = vsel %vm7254_vm10, %v3242_v59, %v3246_v34  ;;  %v2173_v5 = vor.u32 %v2172_v60, %v2168_v56  ;;  %v1161_v6 = vrot.slane %v1159_v62, 4  ;;  %v1614_v53 = vld [vmem:[#allocation2 + $0x1c] sm:$0xf] }
  0x56   : > { %v1178_v7 = vshll.u32 %v1067_v57, 16  ;;  %v6429_v9 = vcombine.low %v3237_v52, %v3247_v4  ;;  %v2164_v54 = vrot.slane %v2163_v63, 4  ;;  %v1164_v10 = vrot.slane %v1162_v1, 5 }
  0x57   : > { %v1170_v11 = vrot.slane %v1168_v2, 5  ;;  %v2174_v12 = vrot.slane %v2173_v5, 4  ;;  %v1174_v13 = vrot.slane %v1172_v3, 4  ;;  %v3201_v14 = vshrl.u32 %v3152_v58, 16 }
  0x58   : > { %v1180_v42 = vrot.slane %v1178_v7, 5  ;;  %3634 = vrot.lane.b32.xlu1 %v6429_v9, %s7007_s12  ;;  %v2169_v15 = vsel %vm7254_vm10, %v2164_v54, %v2168_v56  ;;  %v1165_v16 = vor.u32 %v1164_v10, %v1161_v6  ;;  %v3204_v18 = vshll.u32 %v3152_v58, 16  ;;  %v1615_v56 = vld [vmem:[#allocation2 + $0x20] sm:$0x1]  ;;  %v1617_v7 = vld [vmem:[#allocation2 + $0x28] sm:$0xf] }
  0x59   : > { %v3210_v20 = vshll.u32 %v3153_v8, 16  ;;  %v2179_v22 = vsel %vm7254_vm10, %v2174_v12, %v2178_v61  ;;  %v1175_v25 = vor.u32 %v1174_v13, %v1170_v11  ;;  %v3203_v26 = vrot.slane %v3201_v14, 4  ;;  %v1616_v61 = vld [vmem:[#allocation2 + $0x24] sm:$0xe] }
  0x5a   : > { %v3214_v27 = vshrl.u32 %v3153_v8, 16  ;;  %v6364_v30 = vcombine.low %v2169_v15, %v2179_v22  ;;  %v1166_v31 = vrot.slane %v1165_v16, 4  ;;  %v3206_v32 = vrot.slane %v3204_v18, 5  ;;  %v1618_v8 = vld [vmem:[#allocation2 + $0x2c] sm:$0x1] }
  0x5b   : > { %v3212_v33 = vrot.slane %v3210_v20, 5  ;;  %v1176_v34 = vrot.slane %v1175_v25, 4  ;;  %v3220_v36 = vshll.u32 %v3154_v17, 16  ;;  %v1183_v39 = vshrl.u32 %v1068_v21, 16  ;;  %v2114_v12 = vld [vmem:[#allocation2 + $0x24] sm:$0xf] }
  0x5c   : > { %v3216_v35 = vrot.slane %v3214_v27, 4  ;;  %2588 = vrot.lane.b32.xlu0 %v6364_v30, %s9109_s30  ;;  %v1171_v40 = vsel %vm7254_vm10, %v1166_v31, %v1170_v11  ;;  %v3207_v44 = vor.u32 %v3206_v32, %v3203_v26  ;;  %v1186_v46 = vshll.u32 %v1068_v21, 16  ;;  %v2115_v21 = vld [vmem:[#allocation2 + $0x28] sm:$0xf] }
  0x5d   : > { %v1192_v47 = vshll.u32 %v1069_v28, 16  ;;  %v1181_v49 = vsel %vm7254_vm10, %v1176_v34, %v1180_v42  ;;  %v3222_v51 = vrot.slane %v3220_v36, 5  ;;  %v1185_v52 = vrot.slane %v1183_v39, 4  ;;  %v2117_v34 = vld [vmem:[#allocation2 + $0x30] sm:$0xf] }
  0x5e   : > { %v3217_v50 = vor.u32 %v3216_v35, %v3212_v33  ;;  %v6302_v57 = vcombine.low %v1171_v40, %v1181_v49  ;;  %v3208_v58 = vrot.slane %v3207_v44, 4  ;;  %v1188_v59 = vrot.slane %v1186_v46, 5  ;;  %v2659_v44 = vld [vmem:[#allocation2 + $0x24] sm:$0xe]  ;;  %v2661_v49 = vld [vmem:[#allocation2 + $0x2c] sm:$0x1] }
  0x5f   : > { %v1194_v60 = vrot.slane %v1192_v47, 5  ;;  %v1196_v63 = vshrl.u32 %v1069_v28, 16  ;;  %v1202_v1 = vshll.u32 %v1070_v45, 16  ;;  %v6318_v2 = vrot.slane %v1613_v48, 9  ;;  %v827_v28 = vld [vmem:[#allocation2 + $0x38] sm:$0x1] }
  0x60   : > { %v3218_v62 = vrot.slane %v3217_v50, 4  ;;  %1546 = vrot.lane.b32.xlu1 %v6302_v57, %s9100_s16  ;;  %v3213_v3 = vsel %vm7254_vm10, %v3208_v58, %v3212_v33  ;;  %v1189_v4 = vor.u32 %v1188_v59, %v1185_v52  ;;  %v1722_v5 = vrot.slane %v1614_v53, 5  ;;  %v2116_v33 = vld [vmem:[#allocation2 + $0x2c] sm:$0x1]  ;;  %v2660_v48 = vld [vmem:[#allocation2 + $0x28] sm:$0xf] }
  0x61   : > { %v1725_v6 = vrot.slane %v1615_v56, 5  ;;  %v1198_v54 = vrot.slane %v1196_v63, 4  ;;  %v1204_v10 = vrot.slane %v1202_v1, 5  ;;  %v6319_v11 = vrot.slane %v1616_v61, 9  ;;  %v2662_v53 = vld [vmem:[#allocation2 + $0x30] sm:$0xe] }
  0x62   : > { %v3223_v9 = vsel %vm7254_vm10, %v3218_v62, %v3222_v51  ;;  %v1190_v42 = vrot.slane %v1189_v4, 4  ;;  %v1723_v14 = vsel %vm7247_vm9, %v6318_v2, %v1722_v5  ;;  %v1724_v15 = vrot.slane %v1722_v5, 4  ;;  %v449_v56 = vld [vmem:[%s7241_s14 + $0x20] sm:$0xf]  ;;  %v7409_v61 = vld [vmem:[%s7241_s14 + $0x24] sm:$0xf] }
  0x63   : > { %v6428_v13 = vcombine.low %v3213_v3, %v3223_v9  ;;  %v1199_v16 = vor.u32 %v1198_v54, %v1194_v60  ;;  %v1729_v17 = vrot.slane %v1617_v7, 5  ;;  %v1732_v18 = vrot.slane %v1618_v8, 5 }
  0x64   : > { %v534_v20 = vrot.slane %v7302_v24, 4  ;;  %v1195_v22 = vsel %vm7254_vm10, %v1190_v42, %v1194_v60  ;;  %v1726_v25 = vsel %vm7247_vm9, %v1724_v15, %v1725_v6  ;;  %v538_v26 = vrot.slane %v536_v38, 7 }
  0x65   : > { %3632 = vrot.lane.b32.xlu0 %v6428_v13, %s7007_s12  ;;  %v2205_v27 = vshrl.u32 %v2114_v12, 16  ;;  %v1200_v30 = vrot.slane %v1199_v16, 4  ;;  %v6334_v31 = vcombine.low %v1723_v14, %v1726_v25  ;;  %v1730_v32 = vsel %vm7247_vm9, %v6319_v11, %v1729_v17 }
  0x66   : > { %v1731_v24 = vrot.slane %v1729_v17, 4  ;;  %v541_v35 = vor.u32 %v539_v43, %v538_v26  ;;  %v543_v36 = vrot.slane %v538_v26, 4  ;;  %v2208_v40 = vshll.u32 %v2114_v12, 16  ;;  %v6866_v43 = vld [vmem:[#allocation2 + $0x24] sm:$0xff]  }
  0x67   : > { %v2207_v39 = vrot.slane %v2205_v27, 4  ;;  %v1205_v38 = vsel %vm7254_vm10, %v1200_v30, %v1204_v10  ;;  %v2214_v46 = vshll.u32 %v2115_v21, 16  ;;  %v2218_v47 = vshrl.u32 %v2115_v21, 16  ;;  %v3158_v30 = vld [vmem:[#allocation2 + $0x30] sm:$0xf] }
  0x68   : > { %v1733_v45 = vsel %vm7247_vm9, %v1731_v24, %v1732_v18  ;;  %v6303_v50 = vcombine.low %v1195_v22, %v1205_v38  ;;  %v542_v51 = vsel %vm7270_vm12, %v534_v20, %v541_v35  ;;  %v2210_v52 = vrot.slane %v2208_v40, 5 }
  0x69   : > { %1870 = vrot.lane.b32.xlu0 %v6334_v31, %s9108_s15  ;;  %v6335_v23 = vcombine.low %v1730_v32, %v1733_v45  ;;  %826 = vst.msk [vmem:[#allocation2 + $0x34] sm:$0xf] %vm385_vm0, %v542_v51  ;;  %v2216_v57 = vrot.slane %v2214_v46, 5  ;;  %v2220_v58 = vrot.slane %v2218_v47, 4  ;;  %v2224_v59 = vshll.u32 %v2116_v33, 16 }
  0x6a   : > { %v828_v60 = vsel %vm7285_vm13, %v543_v36, %v827_v28  ;;  %1548 = vrot.lane.b32.xlu1 %v6303_v50, %s9100_s16  ;;  %v2211_v62 = vor.u32 %v2210_v52, %v2207_v39  ;;  %v2229_v63 = vshrl.u32 %v2117_v34, 16  ;;  %v2232_v1 = vshll.u32 %v2117_v34, 16  ;;  %v830_v28 = vld [vmem:[#allocation2 + $0x3c] sm:$0xf] }
  0x6b   : > { %829 = vst [vmem:[#allocation2 + $0x38] sm:$0x1] %v828_v60  ;;  %v6382_v2 = vrot.slane %v2659_v44, 9  ;;  %v2221_v3 = vor.u32 %v2220_v58, %v2216_v57  ;;  %v2226_v4 = vrot.slane %v2224_v59, 5  ;;  %v2765_v5 = vrot.slane %v2660_v48, 5 }
  0x6c   : > { %v2768_v6 = vrot.slane %v2661_v49, 5  ;;  %v2212_v7 = vrot.slane %v2211_v62, 4  ;;  %v2231_v8 = vrot.slane %v2229_v63, 4  ;;  %v2234_v9 = vrot.slane %v2232_v1, 5  ;;  %v3703_v58 = vld [vmem:[#allocation2 + $0x30] sm:$0xe] }
  0x6d   : > { %2047 = vrot.lane.b32.xlu0 %v6866_v43, %s7002_s22  ;;  %v6383_v54 = vrot.slane %v2662_v53, 9  ;;  %v2222_v10 = vrot.slane %v2221_v3, 4  ;;  %v2766_v11 = vsel %vm7247_vm9, %v6382_v2, %v2765_v5  ;;  %v2767_v12 = vrot.slane %v2765_v5, 4  ;;  %v834_v43 = vld [vmem:[#allocation2 + $0x44] sm:$0x1] }
  0x6e   : > { %v545_v13 = vshrl.u32 %v449_v56, 16  ;;  %1872 = vrot.lane.b32.xlu1 %v6335_v23, %s9108_s15  ;;  %v2217_v42 = vsel %vm7254_vm10, %v2212_v7, %v2216_v57  ;;  %v2235_v14 = vor.u32 %v2234_v9, %v2231_v8  ;;  %v548_v15 = vshll.u32 %v449_v56, 16  ;;  %v1071_v1 = vld [vmem:[#allocation2 + $0x30] sm:$0xf] }
  0x6f   : > { %v553_v16 = vshrl.u32 %v7409_v61, 16  ;;  %v2227_v17 = vsel %vm7254_vm10, %v2222_v10, %v2226_v4  ;;  %v2769_v18 = vsel %vm7247_vm9, %v2767_v12, %v2768_v6  ;;  %v556_v21 = vshll.u32 %v7409_v61, 16 }
  0x70   : > { %v547_v20 = vrot.slane %v545_v13, 7  ;;  %v6867_v22 = vld [vmem:[#allocation2 + $0x30] sm:$0xff]   ;;  %v6366_v25 = vcombine.low %v2217_v42, %v2227_v17  ;;  %v2236_v27 = vrot.slane %v2235_v14, 4  ;;  %v6398_v36 = vcombine.low %v2766_v11, %v2769_v18 }
  0x71   : > { %v2118_v26 = vld [vmem:[#allocation2 + $0x34] sm:$0xf]  ;;  %v555_v50 = vrot.slane %v553_v16, 7  ;;  %v3249_v57 = vshrl.u32 %v3158_v30, 16  ;;  %v3252_v63 = vshll.u32 %v3158_v30, 16  ;;  %v6446_v42 = vrot.slane %v3703_v58, 9 }
  0x72   : > { %v2119_v31 = vld [vmem:[#allocation2 + $0x38] sm:$0x1]  ;;  %v2238_v32 = vshll.u32 %v2118_v26, 16  ;;  %v2242_v24 = vshrl.u32 %v2118_v26, 16  ;;  %v2663_v33 = vld [vmem:[#allocation2 + $0x34] sm:$0xf]  ;;  %v550_v34 = vor.u32 %v548_v15, %v547_v20  ;;  %2049 = vrot.lane.b32.xlu1 %v6867_v22, %s7002_s22  ;;  %2592 = vrot.lane.b32.xlu0 %v6366_v25, %s9109_s30 }
  0x73   : > { %v2248_v35 = vshll.u32 %v2119_v31, 16  ;;  %v2664_v39 = vld [vmem:[#allocation2 + $0x38] sm:$0x1]  ;;  %v2772_v40 = vrot.slane %v2663_v33, 5  ;;  %v551_v46 = vrot.slane %v547_v20, 4  ;;  %v6868_v60 = vld [vmem:[#allocation2 + $0x30] sm:$0xff]   ;;  %v558_v61 = vor.u32 %v556_v21, %v555_v50 }
  0x74   : > { %v2240_v44 = vrot.slane %v2238_v32, 5  ;;  %v2244_v38 = vrot.slane %v2242_v24, 4  ;;  %v2775_v45 = vrot.slane %v2664_v39, 5  ;;  %v3159_v23 = vld [vmem:[#allocation2 + $0x34] sm:$0xf]  ;;  %v831_v53 = vsel %vm7262_vm11, %v550_v34, %v830_v28 }
  0x75   : > { %v2250_v47 = vrot.slane %v2248_v35, 5  ;;  %v7428_v48 = vsel %vm7247_vm9, %v6383_v54, %v2772_v40  ;;  %v2774_v49 = vrot.slane %v2772_v40, 4  ;;  %v3160_v56 = vld [vmem:[#allocation2 + $0x38] sm:$0x1]  ;;  %v560_v62 = vrot.slane %v555_v50, 4 }
  0x76   : > { %v2241_v51 = vsel %vm7254_vm10, %v2236_v27, %v2240_v44  ;;  %v2245_v52 = vor.u32 %v2244_v38, %v2240_v44  ;;  %2913 = vrot.lane.b32.xlu0 %v6398_v36, %s7004_s25  ;;  %832 = vst [vmem:[#allocation2 + $0x3c] sm:$0xf] %v831_v53  ;;  %v3251_v4 = vrot.slane %v3249_v57, 4  ;;  %v3258_v5 = vshll.u32 %v3159_v23, 16  ;;  %v3704_v6 = vld [vmem:[#allocation2 + $0x34] sm:$0xf] }
  0x77   : > { %v2776_v59 = vsel %vm7247_vm9, %v2774_v49, %v2775_v45  ;;  %v559_v7 = vsel %vm7270_vm12, %v551_v46, %v558_v61  ;;  %v3254_v8 = vrot.slane %v3252_v63, 5  ;;  %v3262_v9 = vshrl.u32 %v3159_v23, 16  ;;  %v3705_v10 = vld [vmem:[#allocation2 + $0x38] sm:$0x1]  ;;  %v1072_v14 = vld [vmem:[#allocation2 + $0x34] sm:$0xf] }
  0x78   : > { %v2246_v2 = vrot.slane %v2245_v52, 4  ;;  %v6399_v3 = vcombine.low %v7428_v48, %v2776_v59  ;;  %v3268_v54 = vshll.u32 %v3160_v56, 16  ;;  %833 = vst.msk [vmem:[#allocation2 + $0x40] sm:$0xf] %vm385_vm0, %v559_v7  ;;  %v3260_v12 = vrot.slane %v3258_v5, 5 }
  0x79   : > { %v835_v13 = vsel %vm7285_vm13, %v560_v62, %v834_v43  ;;  %v3255_v16 = vor.u32 %v3254_v8, %v3251_v4  ;;  %v3264_v17 = vrot.slane %v3262_v9, 4  ;;  %v3809_v20 = vrot.slane %v3704_v6, 5  ;;  %v1073_v40 = vld [vmem:[#allocation2 + $0x38] sm:$0x1] }
  0x7a   : > { %v2251_v11 = vsel %vm7254_vm10, %v2246_v2, %v2250_v47  ;;  %3091 = vrot.lane.b32.xlu0 %v6868_v60, %s9097_s24  ;;  %v3270_v18 = vrot.slane %v3268_v54, 5  ;;  %836 = vst [vmem:[#allocation2 + $0x44] sm:$0x1] %v835_v13  ;;  %v3812_v21 = vrot.slane %v3705_v10, 5  ;;  %v1207_v22 = vshrl.u32 %v1071_v1, 16 }
  0x7b   : > { %v6367_v15 = vcombine.low %v2241_v51, %v2251_v11  ;;  %v1210_v25 = vshll.u32 %v1071_v1, 16  ;;  %v3256_v26 = vrot.slane %v3255_v16, 4  ;;  %v3265_v27 = vor.u32 %v3264_v17, %v3260_v12  ;;  %v1619_v54 = vld [vmem:[#allocation2 + $0x30] sm:$0xe] }
  0x7c   : > { %v1216_v28 = vshll.u32 %v1072_v14, 16  ;;  %v1220_v30 = vshrl.u32 %v1072_v14, 16  ;;  %v3810_v32 = vsel %vm7247_vm9, %v6446_v42, %v3809_v20  ;;  %v3811_v24 = vrot.slane %v3809_v20, 4  ;;  %v1620_v20 = vld [vmem:[#allocation2 + $0x34] sm:$0xf] }
  0x7d   : > { %2594 = vrot.lane.b32.xlu1 %v6367_v15, %s9109_s30  ;;  %v3161_v31 = vld [vmem:[#allocation2 + $0x3c] sm:$0xf]  ;;  %v1209_v33 = vrot.slane %v1207_v22, 4  ;;  %v3261_v34 = vsel %vm7254_vm10, %v3256_v26, %v3260_v12  ;;  %v3266_v35 = vrot.slane %v3265_v27, 4  ;;  %v1212_v38 = vrot.slane %v1210_v25, 5 }
  0x7e   : > { %v3273_v36 = vshrl.u32 %v3161_v31, 16  ;;  %v3276_v39 = vshll.u32 %v3161_v31, 16  ;;  %v3813_v44 = vsel %vm7247_vm9, %v3811_v24, %v3812_v21  ;;  %v1218_v45 = vrot.slane %v1216_v28, 5  ;;  %v3706_v47 = vld [vmem:[#allocation2 + $0x3c] sm:$0xe]  ;;  %v6883_v28 = vld [vmem:[%s9086_s1] sm:$0xff]  }
  0x7f   : > { %v1222_v46 = vrot.slane %v1220_v30, 4  ;;  %v6869_v48 = vld [vmem:[#allocation2 + $0x3c] sm:$0xff]   ;;  %v3271_v49 = vsel %vm7254_vm10, %v3266_v35, %v3270_v18  ;;  %v6462_v43 = vcombine.low %v3810_v32, %v3813_v44  ;;  %v1213_v59 = vor.u32 %v1212_v38, %v1209_v33  ;;  %v1621_v27 = vld [vmem:[#allocation2 + $0x38] sm:$0x1]  ;;  %6665 = vmatprep.subr.bf16.mxu0 %v6883_v28 }
  0x80   : > { %v3162_v50 = vld [vmem:[#allocation2 + $0x40] sm:$0xf]  ;;  %v3275_v23 = vrot.slane %v3273_v36, 4  ;;  %v6430_v51 = vcombine.low %v3261_v34, %v3271_v49  ;;  %v3278_v53 = vrot.slane %v3276_v39, 5  ;;  %v1226_v61 = vshll.u32 %v1073_v40, 16  ;;  %6666 = vmatpush3.bf16.msra.mxu0 %v6883_v28 }
  0x81   : > { %2915 = vrot.lane.b32.xlu1 %v6399_v3, %s7004_s25  ;;  %v3163_v52 = vld [vmem:[#allocation2 + $0x44] sm:$0x1]  ;;  %v3282_v56 = vshll.u32 %v3162_v50, 16  ;;  %v3286_v57 = vshrl.u32 %v3162_v50, 16  ;;  %v1223_v60 = vor.u32 %v1222_v46, %v1218_v45  ;;  %v3707_v62 = vld [vmem:[#allocation2 + $0x40] sm:$0xf] }
  0x82   : > { %v3292_v58 = vshll.u32 %v3163_v52, 16  ;;  %v3708_v63 = vld [vmem:[#allocation2 + $0x44] sm:$0x1]  ;;  %3636 = vrot.lane.b32.xlu0 %v6430_v51, %s7007_s12  ;;  %v3279_v1 = vor.u32 %v3278_v53, %v3275_v23  ;;  %v6447_v4 = vrot.slane %v3706_v47, 9  ;;  %v1074_v5 = vld [vmem:[#allocation2 + $0x3c] sm:$0xf] }
  0x83   : > { %v3284_v2 = vrot.slane %v3282_v56, 5  ;;  %v3288_v3 = vrot.slane %v3286_v57, 4  ;;  %v1214_v7 = vrot.slane %v1213_v59, 4  ;;  %v1224_v8 = vrot.slane %v1223_v60, 4  ;;  %v1075_v42 = vld [vmem:[#allocation2 + $0x40] sm:$0xf] }
  0x84   : > { %v3294_v6 = vrot.slane %v3292_v58, 5  ;;  %v1228_v9 = vrot.slane %v1226_v61, 5  ;;  %v3280_v10 = vrot.slane %v3279_v1, 4  ;;  %v3816_v12 = vrot.slane %v3707_v62, 5  ;;  %v1076_v16 = vld [vmem:[#allocation2 + $0x44] sm:$0x1] }
  0x85   : > { %3093 = vrot.lane.b32.xlu1 %v6869_v48, %s9097_s24  ;;  %v3289_v11 = vor.u32 %v3288_v3, %v3284_v2  ;;  %v3819_v13 = vrot.slane %v3708_v63, 5  ;;  %v1219_v14 = vsel %vm7254_vm10, %v1214_v7, %v1218_v45  ;;  %v1231_v17 = vshrl.u32 %v1074_v5, 16  ;;  %v1622_v33 = vld [vmem:[#allocation2 + $0x3c] sm:$0xe]  ;;  %v1623_v40 = vld [vmem:[#allocation2 + $0x40] sm:$0xf] }
  0x86   : > { %v1229_v15 = vsel %vm7254_vm10, %v1224_v8, %v1228_v9  ;;  %v1234_v18 = vshll.u32 %v1074_v5, 16  ;;  %v3285_v21 = vsel %vm7254_vm10, %v3280_v10, %v3284_v2  ;;  %3957 = vrot.lane.b32.xlu0 %v6462_v43, %s9115_s29  ;;  %v3817_v26 = vsel %vm7247_vm9, %v6447_v4, %v3816_v12  ;;  %v1624_v47 = vld [vmem:[#allocation2 + $0x44] sm:$0x1]  ;;  %v6886_v48 = vld [vmem:[%s9086_s1 + $0x8] sm:$0xff]   ;;  %v2120_v4 = vld [vmem:[#allocation2 + $0x3c] sm:$0xf] }
  0x87   : > { %v3290_v22 = vrot.slane %v3289_v11, 4  ;;  %v6304_v25 = vcombine.low %v1219_v14, %v1229_v15  ;;  %v3818_v30 = vrot.slane %v3816_v12, 4  ;;  %v1233_v31 = vrot.slane %v1231_v17, 4  ;;  %v451_v51 = vld [vmem:[%s7241_s14 + $0x28] sm:$0xf]  ;;  %6667 = vmatprep.subr.bf16.mxu0 %v6886_v48  ;;  %v6870_v12 = vld [vmem:[#allocation2 + $0x3c] sm:$0xff]  }
  0x88   : > { %v1236_v32 = vrot.slane %v1234_v18, 5  ;;  %v1240_v24 = vshll.u32 %v1075_v42, 16  ;;  %v1244_v35 = vshrl.u32 %v1075_v42, 16  ;;  %v1250_v36 = vshll.u32 %v1076_v16, 16  ;;  %v452_v58 = vld [vmem:[%s7241_s14 + $0x2c] sm:$0xf]  ;;  %6668 = vmatpush3.bf16.msra.mxu0 %v6886_v48 }
  0x89   : > { %v3295_v34 = vsel %vm7254_vm10, %v3290_v22, %v3294_v6  ;;  %v6320_v39 = vrot.slane %v1619_v54, 9  ;;  %v3820_v38 = vsel %vm7247_vm9, %v3818_v30, %v3819_v13  ;;  %v1736_v43 = vrot.slane %v1620_v20, 5  ;;  %v837_v9 = vld [vmem:[#allocation2 + $0x48] sm:$0xf]  ;;  %v2121_v54 = vld [vmem:[#allocation2 + $0x40] sm:$0xf] }
  0x8a   : > { %v6431_v44 = vcombine.low %v3285_v21, %v3295_v34  ;;  %v1237_v45 = vor.u32 %v1236_v32, %v1233_v31  ;;  %v1242_v46 = vrot.slane %v1240_v24, 5  ;;  %v6463_v49 = vcombine.low %v3817_v26, %v3820_v38  ;;  %v2122_v14 = vld [vmem:[#allocation2 + $0x44] sm:$0x1]  ;;  %v841_v15 = vld [vmem:[#allocation2 + $0x50] sm:$0x1]  ;;  %s9135_s24 = smov 24  }
  0x8b   : > { %v1246_v50 = vrot.slane %v1244_v35, 4  ;;  %v1252_v23 = vrot.slane %v1250_v36, 5  ;;  %v1739_v53 = vrot.slane %v1621_v27, 5  ;;  %v6321_v56 = vrot.slane %v1622_v33, 9  ;;  %v2665_v21 = vld [vmem:[#allocation2 + $0x3c] sm:$0xe] }
  0x8c   : > { %3638 = vrot.lane.b32.xlu1 %v6431_v44, %s7007_s12  ;;  %v1238_v52 = vrot.slane %v1237_v45, 4  ;;  %v1743_v57 = vrot.slane %v1623_v40, 5  ;;  %3959 = vrot.lane.b32.xlu0 %v6463_v49, %s9115_s29  ;;  %v1737_v60 = vsel %vm7247_vm9, %v6320_v39, %v1736_v43  ;;  %v1738_v61 = vrot.slane %v1736_v43, 4  ;;  %v2666_v22 = vld [vmem:[#allocation2 + $0x40] sm:$0xf] }
  0x8d   : > { %v1247_v59 = vor.u32 %v1246_v50, %v1242_v46  ;;  %v1746_v62 = vrot.slane %v1624_v47, 5  ;;  %v562_v3 = vshrl.u32 %v451_v51, 16  ;;  %v565_v7 = vshll.u32 %v451_v51, 16  ;;  %v453_v30 = vld [vmem:[%s7241_s14 + $0x30] sm:$0xf] }
  0x8e   : > { %v1243_v63 = vsel %vm7254_vm10, %v1238_v52, %v1242_v46  ;;  %v1744_v1 = vsel %vm7247_vm9, %v6321_v56, %v1743_v57  ;;  %v1745_v2 = vrot.slane %v1743_v57, 4  ;;  %v1740_v6 = vsel %vm7247_vm9, %v1738_v61, %v1739_v53  ;;  %v454_v31 = vld [vmem:[%s7241_s14 + $0x34] sm:$0xf]  ;;  %v2667_v46 = vld [vmem:[#allocation2 + $0x44] sm:$0x1] }
  0x8f   : > { %v1248_v5 = vrot.slane %v1247_v59, 4  ;;  %v570_v8 = vshrl.u32 %v452_v58, 16  ;;  %v6336_v10 = vcombine.low %v1737_v60, %v1740_v6  ;;  %v564_v13 = vrot.slane %v562_v3, 7 }
  0x90   : > { %1550 = vrot.lane.b32.xlu1 %v6304_v25, %s9100_s16  ;;  %v1747_v11 = vsel %vm7247_vm9, %v1745_v2, %v1746_v62  ;;  %v573_v42 = vshll.u32 %v452_v58, 16  ;;  %v2253_v20 = vshrl.u32 %v2120_v4, 16  ;;  %v2256_v28 = vshll.u32 %v2120_v4, 16 }
  0x91   : > { %v1253_v16 = vsel %vm7254_vm10, %v1248_v5, %v1252_v23  ;;  %v6337_v17 = vcombine.low %v1744_v1, %v1747_v11  ;;  %v572_v18 = vrot.slane %v570_v8, 7  ;;  %1874 = vrot.lane.b32.xlu0 %v6336_v10, %s9108_s15  ;;  %v567_v26 = vor.u32 %v565_v7, %v564_v13  ;;  %v844_v1 = vld [vmem:[#allocation2 + $0x54] sm:$0xf] }
  0x92   : > { %v6305_v25 = vcombine.low %v1243_v63, %v1253_v16  ;;  %v568_v27 = vrot.slane %v564_v13, 4  ;;  %v2255_v33 = vrot.slane %v2253_v20, 4  ;;  %v2262_v34 = vshll.u32 %v2121_v54, 16 }
  0x93   : > { %v575_v32 = vor.u32 %v573_v42, %v572_v18  ;;  %v577_v24 = vrot.slane %v572_v18, 4  ;;  %v838_v35 = vsel %vm7262_vm11, %v567_v26, %v837_v9  ;;  %v2258_v36 = vrot.slane %v2256_v28, 5 }
  0x94   : > { %1552 = vrot.lane.b32.xlu1 %v6305_v25, %s9100_s16  ;;  %v2266_v39 = vshrl.u32 %v2121_v54, 16  ;;  %v2272_v40 = vshll.u32 %v2122_v14, 16  ;;  %839 = vst [vmem:[#allocation2 + $0x48] sm:$0xf] %v838_v35  ;;  %v2264_v38 = vrot.slane %v2262_v34, 5  ;;  %v6384_v49 = vrot.slane %v2665_v21, 9 }
  0x95   : > { %v576_v44 = vsel %vm7270_vm12, %v568_v27, %v575_v32  ;;  %v842_v45 = vsel %vm7285_vm13, %v577_v24, %v841_v15  ;;  %2051 = vrot.lane.b32.xlu0 %v6870_v12, %s7002_s22  ;;  %v2259_v47 = vor.u32 %v2258_v36, %v2255_v33  ;;  %v2779_v50 = vrot.slane %v2666_v22, 5  ;;  %v7519_v54 = vld [vmem:[%s7241_s14 + $0x38] sm:$0xf]  ;;  %v848_v24 = vld [vmem:[#allocation2 + $0x5c] sm:$0x1] }
  0x96   : > { %840 = vst.msk [vmem:[#allocation2 + $0x4c] sm:$0xf] %vm385_vm0, %v576_v44  ;;  %v2268_v48 = vrot.slane %v2266_v39, 4  ;;  %843 = vst [vmem:[#allocation2 + $0x50] sm:$0x1] %v842_v45  ;;  %v2274_v23 = vrot.slane %v2272_v40, 5 }
  0x97   : > { %v579_v43 = vshrl.u32 %v453_v30, 16  ;;  %v582_v51 = vshll.u32 %v453_v30, 16  ;;  %v587_v52 = vshrl.u32 %v454_v31, 16  ;;  %v2260_v53 = vrot.slane %v2259_v47, 4 }
  0x98   : > { %1876 = vrot.lane.b32.xlu1 %v6337_v17, %s9108_s15  ;;  %v2269_v56 = vor.u32 %v2268_v48, %v2264_v38  ;;  %v2781_v57 = vrot.slane %v2779_v50, 4  ;;  %v2782_v58 = vrot.slane %v2667_v46, 5  ;;  %v590_v61 = vshll.u32 %v454_v31, 16 }
  0x99   : > { %v581_v59 = vrot.slane %v579_v43, 7  ;;  %v7507_v60 = vrot.slane %v587_v52, 7  ;;  %v2265_v62 = vsel %vm7254_vm10, %v2260_v53, %v2264_v38  ;;  %v2780_v7 = vsel %vm7247_vm9, %v6384_v49, %v2779_v50 }
  0x9a   : > { %v2270_v63 = vrot.slane %v2269_v56, 4  ;;  %v2783_v8 = vsel %vm7247_vm9, %v2781_v57, %v2782_v58  ;;  %v596_v36 = vshrl.u32 %v7519_v54, 16  ;;  %vm1914_vm1 = vcmask 97344  }
  0x9b   : > { %v584_v2 = vor.u32 %v582_v51, %v581_v59  ;;  %v585_v3 = vrot.slane %v581_v59, 4  ;;  %v592_v4 = vor.u32 %v590_v61, %v7507_v60  ;;  %v2123_v6 = vld [vmem:[#allocation2 + $0x48] sm:$0xf]  ;;  %v6400_v25 = vcombine.low %v2780_v7, %v2783_v8 }
  0x9c   : > { %v2275_v5 = vsel %vm7254_vm10, %v2270_v63, %v2274_v23  ;;  %v2668_v9 = vld [vmem:[#allocation2 + $0x48] sm:$0xe]  ;;  %v2277_v13 = vshrl.u32 %v2123_v6, 16  ;;  %v2280_v16 = vshll.u32 %v2123_v6, 16  ;;  %v594_v35 = vrot.slane %v7507_v60, 4 }
  0x9d   : > { %v6871_v10 = vld [vmem:[#allocation2 + $0x48] sm:$0xff]   ;;  %v6368_v11 = vcombine.low %v2265_v62, %v2275_v5  ;;  %v593_v42 = vsel %vm7270_vm12, %v585_v3, %v592_v4  ;;  %v845_v14 = vsel %vm7262_vm11, %v584_v2, %v844_v1  ;;  %v2125_v15 = vld [vmem:[#allocation2 + $0x50] sm:$0x1]  ;;  %v6385_v20 = vrot.slane %v2668_v9, 9 }
  0x9e   : > { %v2124_v12 = vld [vmem:[#allocation2 + $0x4c] sm:$0xf]  ;;  %846 = vst [vmem:[#allocation2 + $0x54] sm:$0xf] %v845_v14  ;;  %847 = vst.msk [vmem:[#allocation2 + $0x58] sm:$0xf] %vm385_vm0, %v593_v42  ;;  %2053 = vrot.lane.b32.xlu1 %v6871_v10, %s7002_s22  ;;  %v849_v60 = vsel %vm7285_vm13, %v594_v35, %v848_v24 }
  0x9f   : > { %v2286_v17 = vshll.u32 %v2124_v12, 16  ;;  %v2290_v18 = vshrl.u32 %v2124_v12, 16  ;;  %2596 = vrot.lane.b32.xlu0 %v6368_v11, %s9109_s30  ;;  %v2279_v21 = vrot.slane %v2277_v13, 4  ;;  %v2296_v22 = vshll.u32 %v2125_v15, 16  ;;  %v2669_v26 = vld [vmem:[#allocation2 + $0x4c] sm:$0xf] }
  0xa0   : > { %v2670_v27 = vld [vmem:[#allocation2 + $0x50] sm:$0x1]  ;;  %v2282_v28 = vrot.slane %v2280_v16, 5  ;;  %v2786_v32 = vrot.slane %v2669_v26, 5  ;;  %v6872_v45 = vld [vmem:[#allocation2 + $0x48] sm:$0xff]   ;;  %v599_v61 = vshll.u32 %v7519_v54, 16 }
  0xa1   : > { %v2288_v30 = vrot.slane %v2286_v17, 5  ;;  %v2292_v31 = vrot.slane %v2290_v18, 4  ;;  %v2298_v33 = vrot.slane %v2296_v22, 5  ;;  %v2789_v34 = vrot.slane %v2670_v27, 5  ;;  %v3164_v46 = vld [vmem:[#allocation2 + $0x48] sm:$0xf]  ;;  %v7551_v24 = vpop.permute.xlu1 %1866 }
  0xa2   : > { %v2283_v39 = vor.u32 %v2282_v28, %v2279_v21  ;;  %v7532_v44 = vsel %vm7247_vm9, %v6385_v20, %v2786_v32  ;;  %v2788_v38 = vrot.slane %v2786_v32, 4  ;;  %v3165_v47 = vld [vmem:[#allocation2 + $0x4c] sm:$0xf]  ;;  %v3166_v48 = vld [vmem:[#allocation2 + $0x50] sm:$0x1]  ;;  %v3297_v49 = vshrl.u32 %v3164_v46, 16  ;;  %v7545_v5 = vpop.permute.xlu0 %1542 }
  0xa3   : > { %v2293_v40 = vor.u32 %v2292_v31, %v2288_v30  ;;  %2917 = vrot.lane.b32.xlu0 %v6400_v25, %s7004_s25  ;;  %v3300_v50 = vshll.u32 %v3164_v46, 16  ;;  %v3306_v23 = vshll.u32 %v3165_v47, 16  ;;  %v3310_v43 = vshrl.u32 %v3165_v47, 16  ;;  %v3709_v57 = vld [vmem:[#allocation2 + $0x48] sm:$0xe]  ;;  %v6891_v54 = vld [vmem:[#allocation2 + $0x30] sm:$0xff]  }
  0xa4   : > { %v2284_v51 = vrot.slane %v2283_v39, 4  ;;  %v2790_v53 = vsel %vm7247_vm9, %v2788_v38, %v2789_v34  ;;  %v3316_v56 = vshll.u32 %v3166_v48, 16  ;;  %v3299_v59 = vrot.slane %v3297_v49, 4  ;;  %850 = vst [vmem:[#allocation2 + $0x5c] sm:$0x1] %v849_v60  ;;  %1047 = vst.msk [vmem:[#allocation3 + $0x20] sm:$0xff] %vm1042_vm14, %v6891_v54 }
  0xa5   : > { %v2294_v52 = vrot.slane %v2293_v40, 4  ;;  %v6401_v58 = vcombine.low %v7532_v44, %v2790_v53  ;;  %v3302_v1 = vrot.slane %v3300_v50, 5  ;;  %v3308_v2 = vrot.slane %v3306_v23, 5  ;;  %v3167_v3 = vld [vmem:[#allocation2 + $0x54] sm:$0xf] }
  0xa6   : > { %v2289_v62 = vsel %vm7254_vm10, %v2284_v51, %v2288_v30  ;;  %v3168_v4 = vld [vmem:[#allocation2 + $0x58] sm:$0xf]  ;;  %v3312_v7 = vrot.slane %v3310_v43, 4  ;;  %v3318_v8 = vrot.slane %v3316_v56, 5  ;;  %v3321_v9 = vshrl.u32 %v3167_v3, 16 }
  0xa7   : > { %v2299_v63 = vsel %vm7254_vm10, %v2294_v52, %v2298_v33  ;;  %3095 = vrot.lane.b32.xlu0 %v6872_v45, %s9135_s24  ;;  %v3710_v10 = vld [vmem:[#allocation2 + $0x4c] sm:$0xf]  ;;  %v3303_v11 = vor.u32 %v3302_v1, %v3299_v59  ;;  %v3324_v12 = vshll.u32 %v3167_v3, 16  ;;  %v3330_v13 = vshll.u32 %v3168_v4, 16  ;;  %v3711_v14 = vld [vmem:[#allocation2 + $0x50] sm:$0x1] }
  0xa8   : > { %v6369_v6 = vcombine.low %v2289_v62, %v2299_v63  ;;  %v3334_v42 = vshrl.u32 %v3168_v4, 16  ;;  %v3313_v15 = vor.u32 %v3312_v7, %v3308_v2  ;;  %v3323_v16 = vrot.slane %v3321_v9, 4  ;;  %v1077_v20 = vld [vmem:[#allocation2 + $0x48] sm:$0xf]  ;;  %v1078_v27 = vld [vmem:[#allocation2 + $0x4c] sm:$0xf] }
  0xa9   : > { %v6448_v17 = vrot.slane %v3709_v57, 9  ;;  %v3823_v18 = vrot.slane %v3710_v10, 5  ;;  %v3304_v21 = vrot.slane %v3303_v11, 4  ;;  %v3326_v22 = vrot.slane %v3324_v12, 5  ;;  %v6873_v33 = vld [vmem:[#allocation2 + $0x54] sm:$0xff]  }
  0xaa   : > { %2598 = vrot.lane.b32.xlu1 %v6369_v6, %s9109_s30  ;;  %v3332_v25 = vrot.slane %v3330_v13, 5  ;;  %v3336_v26 = vrot.slane %v3334_v42, 4  ;;  %v3314_v28 = vrot.slane %v3313_v15, 4  ;;  %v3826_v32 = vrot.slane %v3711_v14, 5  ;;  %v1079_v40 = vld [vmem:[#allocation2 + $0x50] sm:$0x1] }
  0xab   : > { %v3824_v30 = vsel %vm7247_vm9, %v6448_v17, %v3823_v18  ;;  %v3825_v31 = vrot.slane %v3823_v18, 4  ;;  %v3309_v34 = vsel %vm7254_vm10, %v3304_v21, %v3308_v2  ;;  %v3327_v35 = vor.u32 %v3326_v22, %v3323_v16  ;;  %v3712_v38 = vld [vmem:[#allocation2 + $0x54] sm:$0xe]  ;;  %v7555_v45 = vpop.permute.xlu0 %2043  ;;  %v3169_v47 = vld [vmem:[#allocation2 + $0x5c] sm:$0x1] }
  0xac   : > { %v3337_v39 = vor.u32 %v3336_v26, %v3332_v25  ;;  %v1255_v44 = vshrl.u32 %v1077_v20, 16  ;;  %v3319_v46 = vsel %vm7254_vm10, %v3314_v28, %v3318_v8  ;;  %v1258_v49 = vshll.u32 %v1077_v20, 16  ;;  %v3713_v23 = vld [vmem:[#allocation2 + $0x58] sm:$0xf]  ;;  %v3714_v56 = vld [vmem:[#allocation2 + $0x5c] sm:$0x1] }
  0xad   : > { %v3827_v48 = vsel %vm7247_vm9, %v3825_v31, %v3826_v32  ;;  %v1264_v50 = vshll.u32 %v1078_v27, 16  ;;  %v6432_v43 = vcombine.low %v3309_v34, %v3319_v46  ;;  %v3328_v51 = vrot.slane %v3327_v35, 4  ;;  %v1081_v4 = vld [vmem:[#allocation2 + $0x58] sm:$0xf]  ;;  %v1082_v10 = vld [vmem:[#allocation2 + $0x5c] sm:$0x1] }
  0xae   : > { %2919 = vrot.lane.b32.xlu1 %v6401_v58, %s7004_s25  ;;  %v3338_v52 = vrot.slane %v3337_v39, 4  ;;  %v3340_v53 = vshll.u32 %v3169_v47, 16  ;;  %v6464_v57 = vcombine.low %v3824_v30, %v3827_v48  ;;  %v1257_v59 = vrot.slane %v1255_v44, 4  ;;  %v1080_v58 = vld [vmem:[#allocation2 + $0x54] sm:$0xf] }
  0xaf   : > { %v1260_v60 = vrot.slane %v1258_v49, 5  ;;  %v1266_v62 = vrot.slane %v1264_v50, 5  ;;  %3640 = vrot.lane.b32.xlu0 %v6432_v43, %s7007_s12  ;;  %v3333_v63 = vsel %vm7254_vm10, %v3328_v51, %v3332_v25  ;;  %v1268_v2 = vshrl.u32 %v1078_v27, 16  ;;  %v1625_v15 = vld [vmem:[#allocation2 + $0x48] sm:$0xe] }
  0xb0   : > { %v3342_v1 = vrot.slane %v3340_v53, 5  ;;  %v1274_v3 = vshll.u32 %v1079_v40, 16  ;;  %v6449_v7 = vrot.slane %v3712_v38, 9  ;;  %v3830_v8 = vrot.slane %v3713_v23, 5  ;;  %v1626_v22 = vld [vmem:[#allocation2 + $0x4c] sm:$0xf] }
  0xb1   : > { %v1261_v6 = vor.u32 %v1260_v60, %v1257_v59  ;;  %v3833_v9 = vrot.slane %v3714_v56, 5  ;;  %v1270_v13 = vrot.slane %v1268_v2, 4  ;;  %v1279_v14 = vshrl.u32 %v1080_v58, 16  ;;  %v1627_v25 = vld [vmem:[#allocation2 + $0x50] sm:$0x1] }
  0xb2   : > { %3097 = vrot.lane.b32.xlu1 %v6873_v33, %s9135_s24  ;;  %v7566_v11 = vpop.permute.xlu1 %2045  ;;  %v3343_v12 = vsel %vm7254_vm10, %v3338_v52, %v3342_v1  ;;  %v1276_v42 = vrot.slane %v1274_v3, 5  ;;  %v3831_v20 = vsel %vm7247_vm9, %v6449_v7, %v3830_v8  ;;  %v3832_v21 = vrot.slane %v3830_v8, 4  ;;  %v1628_v31 = vld [vmem:[#allocation2 + $0x54] sm:$0xe]  ;;  %v1629_v39 = vld [vmem:[#allocation2 + $0x58] sm:$0xf] }
  0xb3   : > { %v7570_v16 = vpop.permute.xlu0 %3087  ;;  %v6433_v17 = vcombine.low %v3333_v63, %v3343_v12  ;;  %v1262_v18 = vrot.slane %v1261_v6, 4  ;;  %3961 = vrot.lane.b32.xlu0 %v6464_v57, %s9115_s29  ;;  %v1271_v26 = vor.u32 %v1270_v13, %v1266_v62  ;;  %v1281_v27 = vrot.slane %v1279_v14, 4  ;;  %v1630_v51 = vld [vmem:[#allocation2 + $0x5c] sm:$0x1]  ;;  %v2126_v13 = vld [vmem:[#allocation2 + $0x54] sm:$0xf] }
  0xb4   : > { %v1282_v28 = vshll.u32 %v1080_v58, 16  ;;  %v1288_v30 = vshll.u32 %v1081_v4, 16  ;;  %v3834_v33 = vsel %vm7247_vm9, %v3832_v21, %v3833_v9  ;;  %v1292_v34 = vshrl.u32 %v1081_v4, 16  ;;  %v456_v59 = vld [vmem:[%s7241_s14 + $0x3c] sm:$0xf] }
  0xb5   : > { %v1267_v32 = vsel %vm7254_vm10, %v1262_v18, %v1266_v62  ;;  %v1298_v35 = vshll.u32 %v1082_v10, 16  ;;  %v1272_v44 = vrot.slane %v1271_v26, 4  ;;  %v6465_v38 = vcombine.low %v3831_v20, %v3834_v33  ;;  %v851_v18 = vld [vmem:[#allocation2 + $0x60] sm:$0xf]  ;;  %v855_v20 = vld [vmem:[#allocation2 + $0x68] sm:$0x1] }
  0xb6   : > { %3642 = vrot.lane.b32.xlu1 %v6433_v17, %s7007_s12  ;;  %v7580_v40 = vpop.permute.xlu1 %3089  ;;  %v1284_v46 = vrot.slane %v1282_v28, 5  ;;  %v1290_v47 = vrot.slane %v1288_v30, 5  ;;  %v1294_v49 = vrot.slane %v1292_v34, 4  ;;  %v6322_v23 = vrot.slane %v1625_v15, 9  ;;  %v6874_v17 = vld [vmem:[#allocation2 + $0x54] sm:$0xff]  }
  0xb7   : > { %v7582_v48 = vpop.permute.xlu0 %2909  ;;  %v1300_v50 = vrot.slane %v1298_v35, 5  ;;  %v1750_v43 = vrot.slane %v1626_v22, 5  ;;  %v1277_v52 = vsel %vm7254_vm10, %v1272_v44, %v1276_v42  ;;  %3963 = vrot.lane.b32.xlu0 %v6465_v38, %s9115_s29  ;;  %v1753_v56 = vrot.slane %v1627_v25, 5  ;;  %v2128_v28 = vld [vmem:[#allocation2 + $0x5c] sm:$0x1]  ;;  %v6881_v44 = vld [vmem:[#allocation2 + $0xc] sm:$0xff]  }
  0xb8   : > { %v1285_v53 = vor.u32 %v1284_v46, %v1281_v27  ;;  %v6323_v57 = vrot.slane %v1628_v31, 9  ;;  %v6306_v60 = vcombine.low %v1267_v32, %v1277_v52  ;;  %v1295_v62 = vor.u32 %v1294_v49, %v1290_v47  ;;  %v2127_v27 = vld [vmem:[#allocation2 + $0x58] sm:$0xf]  ;;  %v2671_v34 = vld [vmem:[#allocation2 + $0x54] sm:$0xe]  ;;  %v6884_v46 = vld [vmem:[#allocation2 + $0x24] sm:$0xff]  }
  0xb9   : > { %v1751_v58 = vsel %vm7247_vm9, %v6322_v23, %v1750_v43  ;;  %v1752_v63 = vrot.slane %v1750_v43, 4  ;;  %v1757_v2 = vrot.slane %v1629_v39, 5  ;;  %v1760_v3 = vrot.slane %v1630_v51, 5  ;;  %v2672_v35 = vld [vmem:[#allocation2 + $0x58] sm:$0xf]  ;;  %v6876_v39 = vld [vmem:[#allocation2] sm:$0xff]  }
  0xba   : > { %v1286_v1 = vrot.slane %v1285_v53, 4  ;;  %v598_v4 = vrot.slane %v596_v36, 7  ;;  %v7592_v6 = vpop.permute.xlu1 %1868  ;;  %1554 = vrot.lane.b32.xlu1 %v6306_v60, %s9100_s16  ;;  %v1296_v8 = vrot.slane %v1295_v62, 4  ;;  %v604_v10 = vshrl.u32 %v456_v59, 16  ;;  %v6882_v38 = vld [vmem:[#allocation2 + $0x18] sm:$0xff]   ;;  %1043 = vst.msk [vmem:[#allocation3] sm:$0xff] %vm1042_vm14, %v6876_v39 }
  0xbb   : > { %v7594_v7 = vpop.permute.xlu0 %3953  ;;  %v1754_v9 = vsel %vm7247_vm9, %v1752_v63, %v1753_v56  ;;  %v607_v12 = vshll.u32 %v456_v59, 16  ;;  %v1758_v36 = vsel %vm7247_vm9, %v6323_v57, %v1757_v2  ;;  %v1759_v15 = vrot.slane %v1757_v2, 4  ;;  %v2673_v23 = vld [vmem:[#allocation2 + $0x5c] sm:$0x1]  ;;  %1044 = vst.msk [vmem:[#allocation3 + $0x8] sm:$0xff] %vm1042_vm14, %v6881_v44  ;;  %1045 = vst.msk [vmem:[#allocation3 + $0x10] sm:$0xff] %vm1042_vm14, %v6882_v38 }
  0xbc   : > { %v1291_v42 = vsel %vm7254_vm10, %v1286_v1, %v1290_v47  ;;  %v6338_v14 = vcombine.low %v1751_v58, %v1754_v9  ;;  %v1301_v21 = vsel %vm7254_vm10, %v1296_v8, %v1300_v50  ;;  %v601_v22 = vor.u32 %v599_v61, %v598_v4  ;;  %v6892_v43 = vld [vmem:[#allocation2 + $0x3c] sm:$0xff]   ;;  %1046 = vst.msk [vmem:[#allocation3 + $0x18] sm:$0xff] %vm1042_vm14, %v6884_v46 }
  0xbd   : > { %v602_v25 = vrot.slane %v598_v4, 4  ;;  %v606_v26 = vrot.slane %v604_v10, 7  ;;  %v6307_v30 = vcombine.low %v1291_v42, %v1301_v21  ;;  %v1761_v31 = vsel %vm7247_vm9, %v1759_v15, %v1760_v3  ;;  %v457_v4 = vld [vmem:[%s7241_s14 + $0x40] sm:$0xf]  ;;  %v7625_v10 = vld [vmem:[%s7241_s14 + $0x44] sm:$0xf] }
  0xbe   : > { %1878 = vrot.lane.b32.xlu0 %v6338_v14, %s9108_s15  ;;  %v2301_v32 = vshrl.u32 %v2126_v13, 16  ;;  %v2304_v33 = vshll.u32 %v2126_v13, 16  ;;  %v6339_v61 = vcombine.low %v1758_v36, %v1761_v31  ;;  %v852_v50 = vsel %vm7262_vm11, %v601_v22, %v851_v18  ;;  %v7613_v57 = vpop.permute.xlu1 %2911  ;;  %1048 = vst.msk [vmem:[#allocation3 + $0x28] sm:$0xff] %vm1042_vm14, %v6892_v43 }
  0xbf   : > { %v609_v47 = vor.u32 %v607_v12, %v606_v26  ;;  %v611_v49 = vrot.slane %v606_v26, 4  ;;  %1556 = vrot.lane.b32.xlu1 %v6307_v30, %s9100_s16  ;;  %853 = vst [vmem:[#allocation2 + $0x60] sm:$0xf] %v852_v50  ;;  %v2310_v53 = vshll.u32 %v2127_v27, 16  ;;  %v2314_v56 = vshrl.u32 %v2127_v27, 16  ;;  %v7615_v59 = vpop.permute.xlu0 %3955  ;;  %1591 = vst.msk [vmem:[#allocation3] sm:$0xff] %vm1590_vm15, %v7545_v5 }
  0xc0   : > { %v2303_v51 = vrot.slane %v2301_v32, 4  ;;  %v2306_v52 = vrot.slane %v2304_v33, 5  ;;  %v2320_v62 = vshll.u32 %v2128_v28, 16  ;;  %v2793_v3 = vrot.slane %v2672_v35, 5  ;;  %1915 = vst.msk [vmem:[#allocation3] sm:$0xff] %vm1914_vm1, %v7551_v24 }
  0xc1   : > { %v610_v60 = vsel %vm7270_vm12, %v602_v25, %v609_v47  ;;  %v856_v58 = vsel %vm7285_vm13, %v611_v49, %v855_v20  ;;  %v2312_v1 = vrot.slane %v2310_v53, 5  ;;  %v2316_v2 = vrot.slane %v2314_v56, 4 }
  0xc2   : > { %2055 = vrot.lane.b32.xlu0 %v6874_v17, %s7002_s22  ;;  %854 = vst.msk [vmem:[#allocation2 + $0x64] sm:$0xf] %vm385_vm0, %v610_v60  ;;  %v2307_v63 = vor.u32 %v2306_v52, %v2303_v51  ;;  %857 = vst [vmem:[#allocation2 + $0x68] sm:$0x1] %v856_v58  ;;  %v6386_v8 = vrot.slane %v2671_v34, 9  ;;  %v2796_v9 = vrot.slane %v2673_v23, 5  ;;  %v7641_v21 = vpop.permute.xlu1 %2590 }
  0xc3   : > { %1880 = vrot.lane.b32.xlu1 %v6339_v61, %s9108_s15  ;;  %v2317_v13 = vor.u32 %v2316_v2, %v2312_v1  ;;  %v2322_v42 = vrot.slane %v2320_v62, 5  ;;  %v2795_v14 = vrot.slane %v2793_v3, 4  ;;  %v613_v36 = vshrl.u32 %v457_v4, 16  ;;  %v858_v61 = vld [vmem:[#allocation2 + $0x6c] sm:$0xf] }
  0xc4   : > { %v2308_v12 = vrot.slane %v2307_v63, 4  ;;  %v616_v18 = vshll.u32 %v457_v4, 16  ;;  %v621_v20 = vshrl.u32 %v7625_v10, 16  ;;  %v2794_v26 = vsel %vm7247_vm9, %v6386_v8, %v2793_v3 }
  0xc5   : > { %v2318_v17 = vrot.slane %v2317_v13, 4  ;;  %v2797_v5 = vsel %vm7247_vm9, %v2795_v14, %v2796_v9  ;;  %v615_v35 = vrot.slane %v613_v36, 7  ;;  %vm2091_vm2 = vcmask 130144  }
  0xc6   : > { %v2313_v15 = vsel %vm7254_vm10, %v2308_v12, %v2312_v1  ;;  %v1545_v22 = vpop.permute.xlu0 %1544  ;;  %v2129_v25 = vld [vmem:[#allocation2 + $0x60] sm:$0xf]  ;;  %v6402_v49 = vcombine.low %v2794_v26, %v2797_v5  ;;  %v623_v1 = vrot.slane %v621_v20, 7  ;;  %2092 = vst.msk [vmem:[#allocation3] sm:$0xff] %vm2091_vm2, %v7555_v45  ;;  %vm2636_vm3 = vcmask 162944  }
  0xc7   : > { %v2674_v27 = vld [vmem:[#allocation2 + $0x60] sm:$0xe]  ;;  %1592 = vst.msk [vmem:[#allocation3 + $0x8] sm:$0xff] %vm1590_vm15, %v1545_v22  ;;  %v2323_v28 = vsel %vm7254_vm10, %v2318_v17, %v2322_v42  ;;  %v2325_v24 = vshrl.u32 %v2129_v25, 16  ;;  %v2328_v30 = vshll.u32 %v2129_v25, 16  ;;  %v618_v43 = vor.u32 %v616_v18, %v615_v35 }
  0xc8   : > { %v6387_v31 = vrot.slane %v2674_v27, 9  ;;  %1916 = vst.msk [vmem:[#allocation3 + $0x8] sm:$0xff] %vm1914_vm1, %v7592_v6  ;;  %v6370_v33 = vcombine.low %v2313_v15, %v2323_v28  ;;  %v624_v6 = vshll.u32 %v7625_v10, 16  ;;  %v619_v63 = vrot.slane %v615_v35, 4  ;;  %v3170_v2 = vld [vmem:[#allocation2 + $0x60] sm:$0xf] }
  0xc9   : > { %v6875_v32 = vld [vmem:[#allocation2 + $0x60] sm:$0xff]   ;;  %v2131_v39 = vld [vmem:[#allocation2 + $0x68] sm:$0x1]  ;;  %v2327_v44 = vrot.slane %v2325_v24, 4  ;;  %v2330_v38 = vrot.slane %v2328_v30, 5  ;;  %v628_v42 = vrot.slane %v623_v1, 4  ;;  %v859_v14 = vsel %vm7262_vm11, %v618_v43, %v858_v61 }
  0xca   : > { %v2130_v34 = vld [vmem:[#allocation2 + $0x64] sm:$0xf]  ;;  %2057 = vrot.lane.b32.xlu1 %v6875_v32, %s7002_s22  ;;  %2600 = vrot.lane.b32.xlu0 %v6370_v33, %s9109_s30  ;;  %v2344_v47 = vshll.u32 %v2131_v39, 16  ;;  %v2676_v23 = vld [vmem:[#allocation2 + $0x68] sm:$0x1]  ;;  %v7655_v60 = vpop.permute.xlu1 %3634  ;;  %v626_v13 = vor.u32 %v624_v6, %v623_v1  ;;  %v3345_v20 = vshrl.u32 %v3170_v2, 16 }
  0xcb   : > { %v2334_v46 = vshll.u32 %v2130_v34, 16  ;;  %v2338_v54 = vshrl.u32 %v2130_v34, 16  ;;  %v2675_v50 = vld [vmem:[#allocation2 + $0x64] sm:$0xf]  ;;  %v2331_v51 = vor.u32 %v2330_v38, %v2327_v44  ;;  %v2803_v58 = vrot.slane %v2676_v23, 5  ;;  %2093 = vst.msk [vmem:[#allocation3 + $0x8] sm:$0xff] %vm2091_vm2, %v7566_v11 }
  0xcc   : > { %v2800_v56 = vrot.slane %v2675_v50, 5  ;;  %v2346_v62 = vrot.slane %v2344_v47, 5  ;;  %v3171_v12 = vld [vmem:[#allocation2 + $0x64] sm:$0xf]  ;;  %v3172_v36 = vld [vmem:[#allocation2 + $0x68] sm:$0x1]  ;;  %v627_v27 = vsel %vm7270_vm12, %v619_v63, %v626_v13 }
  0xcd   : > { %v2336_v52 = vrot.slane %v2334_v46, 5  ;;  %v2340_v53 = vrot.slane %v2338_v54, 4  ;;  %v2332_v3 = vrot.slane %v2331_v51, 4  ;;  %v6877_v10 = vld [vmem:[#allocation2 + $0x60] sm:$0xff]   ;;  %860 = vst [vmem:[#allocation2 + $0x6c] sm:$0xf] %v859_v14 }
  0xce   : > { %v7659_v8 = vsel %vm7247_vm9, %v6387_v31, %v2800_v56  ;;  %v2802_v9 = vrot.slane %v2800_v56, 4  ;;  %2921 = vrot.lane.b32.xlu0 %v6402_v49, %s7004_s25  ;;  %v862_v22 = vld [vmem:[#allocation2 + $0x74] sm:$0x1]  ;;  %v3715_v25 = vld [vmem:[#allocation2 + $0x60] sm:$0xe]  ;;  %v7672_v26 = vpop.permute.xlu0 %2588  ;;  %v3348_v28 = vshll.u32 %v3170_v2, 16 }
  0xcf   : > { %v2341_v4 = vor.u32 %v2340_v53, %v2336_v52  ;;  %v2337_v15 = vsel %vm7254_vm10, %v2332_v3, %v2336_v52  ;;  %v3354_v24 = vshll.u32 %v3171_v12, 16  ;;  %v3716_v30 = vld [vmem:[#allocation2 + $0x64] sm:$0xf]  ;;  %v3717_v31 = vld [vmem:[#allocation2 + $0x68] sm:$0x1]  ;;  %v3347_v32 = vrot.slane %v3345_v20, 4 }
  0xd0   : > { %v2804_v18 = vsel %vm7247_vm9, %v2802_v9, %v2803_v58  ;;  %861 = vst.msk [vmem:[#allocation2 + $0x70] sm:$0xf] %vm385_vm0, %v627_v27  ;;  %v3358_v33 = vshrl.u32 %v3171_v12, 16  ;;  %v3364_v34 = vshll.u32 %v3172_v36, 16  ;;  %v1083_v11 = vld [vmem:[#allocation2 + $0x60] sm:$0xf]  ;;  %v863_v46 = vsel %vm7285_vm13, %v628_v42, %v862_v22 }
  0xd1   : > { %v2342_v17 = vrot.slane %v2341_v4, 4  ;;  %v6403_v5 = vcombine.low %v7659_v8, %v2804_v18  ;;  %v3350_v44 = vrot.slane %v3348_v28, 5  ;;  %v3356_v38 = vrot.slane %v3354_v24, 5  ;;  %v1084_v54 = vld [vmem:[#allocation2 + $0x64] sm:$0xf]  ;;  %2638 = vst.msk [vmem:[#allocation3 + $0x8] sm:$0xff] %vm2636_vm3, %v7641_v21 }
  0xd2   : > { %v1547_v35 = vpop.permute.xlu1 %1546  ;;  %3099 = vrot.lane.b32.xlu0 %v6877_v10, %s9135_s24  ;;  %v3360_v61 = vrot.slane %v3358_v33, 4  ;;  %v3366_v47 = vrot.slane %v3364_v34, 5  ;;  %864 = vst [vmem:[#allocation2 + $0x74] sm:$0x1] %v863_v46  ;;  %v6450_v49 = vrot.slane %v3715_v25, 9  ;;  %v3837_v50 = vrot.slane %v3716_v30, 5 }
  0xd3   : > { %v2347_v45 = vsel %vm7254_vm10, %v2342_v17, %v2346_v62  ;;  %1593 = vst.msk [vmem:[#allocation3 + $0x10] sm:$0xff] %vm1590_vm15, %v1547_v35  ;;  %v3351_v23 = vor.u32 %v3350_v44, %v3347_v32  ;;  %v3840_v43 = vrot.slane %v3717_v31, 5  ;;  %v1303_v6 = vshrl.u32 %v1083_v11, 16  ;;  %v1085_v12 = vld [vmem:[#allocation2 + $0x68] sm:$0x1] }
  0xd4   : > { %v6371_v39 = vcombine.low %v2337_v15, %v2347_v45  ;;  %v1306_v51 = vshll.u32 %v1083_v11, 16  ;;  %v3361_v52 = vor.u32 %v3360_v61, %v3356_v38  ;;  %v7687_v53 = vsel %vm7247_vm9, %v6450_v49, %v3837_v50  ;;  %v3173_v1 = vld [vmem:[#allocation2 + $0x6c] sm:$0xf]  ;;  %2637 = vst.msk [vmem:[#allocation3] sm:$0xff] %vm2636_vm3, %v7672_v26 }
  0xd5   : > { %v3839_v56 = vrot.slane %v3837_v50, 4  ;;  %v1312_v62 = vshll.u32 %v1084_v54, 16  ;;  %v3352_v63 = vrot.slane %v3351_v23, 4  ;;  %v1305_v2 = vrot.slane %v1303_v6, 4  ;;  %v3718_v22 = vld [vmem:[#allocation2 + $0x6c] sm:$0xe] }
  0xd6   : > { %2602 = vrot.lane.b32.xlu1 %v6371_v39, %s9109_s30  ;;  %v3362_v3 = vrot.slane %v3361_v52, 4  ;;  %v3369_v4 = vshrl.u32 %v3173_v1, 16  ;;  %v3372_v8 = vshll.u32 %v3173_v1, 16  ;;  %v1308_v36 = vrot.slane %v1306_v51, 5  ;;  %v1086_v61 = vld [vmem:[#allocation2 + $0x6c] sm:$0xf] }
  0xd7   : > { %v7689_v58 = vpop.permute.xlu0 %3632  ;;  %v3841_v9 = vsel %vm7247_vm9, %v3839_v56, %v3840_v43  ;;  %v6878_v10 = vld [vmem:[#allocation2 + $0x6c] sm:$0xff]   ;;  %v3357_v13 = vsel %vm7254_vm10, %v3352_v63, %v3356_v38  ;;  %v7699_v30 = vrot.slane %v1312_v62, 5  ;;  %v1316_v34 = vshrl.u32 %v1084_v54, 16 }
  0xd8   : > { %v3174_v42 = vld [vmem:[#allocation2 + $0x70] sm:$0xf]  ;;  %v6466_v14 = vcombine.low %v7687_v53, %v3841_v9  ;;  %v3367_v15 = vsel %vm7254_vm10, %v3362_v3, %v3366_v47  ;;  %v3371_v17 = vrot.slane %v3369_v4, 4  ;;  %v3374_v18 = vrot.slane %v3372_v8, 5  ;;  %v1631_v3 = vld [vmem:[#allocation2 + $0x60] sm:$0xe] }
  0xd9   : > { %v3378_v20 = vshll.u32 %v3174_v42, 16  ;;  %v6434_v27 = vcombine.low %v3357_v13, %v3367_v15  ;;  %v3175_v28 = vld [vmem:[#allocation2 + $0x74] sm:$0x1]  ;;  %v3382_v24 = vshrl.u32 %v3174_v42, 16  ;;  %v3719_v31 = vld [vmem:[#allocation2 + $0x70] sm:$0xf] }
  0xda   : > { %2923 = vrot.lane.b32.xlu1 %v6403_v5, %s7004_s25  ;;  %v1309_v5 = vor.u32 %v1308_v36, %v1305_v2  ;;  %v3375_v45 = vor.u32 %v3374_v18, %v3371_v17  ;;  %v3388_v33 = vshll.u32 %v3175_v28, 16  ;;  %v3720_v11 = vld [vmem:[#allocation2 + $0x74] sm:$0x1]  ;;  %v1322_v38 = vshll.u32 %v1085_v12, 16  ;;  %v1087_v43 = vld [vmem:[#allocation2 + $0x70] sm:$0xf] }
  0xdb   : > { %v1871_v25 = vpop.permute.xlu0 %1870  ;;  %v3380_v32 = vrot.slane %v3378_v20, 5  ;;  %3644 = vrot.lane.b32.xlu0 %v6434_v27, %s7007_s12  ;;  %v3384_v39 = vrot.slane %v3382_v24, 4  ;;  %v6451_v46 = vrot.slane %v3718_v22, 9  ;;  %v1318_v50 = vrot.slane %v1316_v34, 4  ;;  %v1088_v56 = vld [vmem:[#allocation2 + $0x74] sm:$0x1] }
  0xdc   : > { %1917 = vst.msk [vmem:[#allocation3 + $0x10] sm:$0xff] %vm1914_vm1, %v1871_v25  ;;  %v1549_v35 = vpop.permute.xlu1 %1548  ;;  %v1310_v44 = vrot.slane %v1309_v5, 4  ;;  %v3376_v47 = vrot.slane %v3375_v45, 4  ;;  %v3390_v49 = vrot.slane %v3388_v33, 5  ;;  %v3844_v23 = vrot.slane %v3719_v31, 5  ;;  %v6897_v8 = vld [vmem:[#allocation2 + $0x48] sm:$0xff]  }
  0xdd   : > { %1594 = vst.msk [vmem:[#allocation3 + $0x18] sm:$0xff] %vm1590_vm15, %v1549_v35  ;;  %v3385_v54 = vor.u32 %v3384_v39, %v3380_v32  ;;  %v1324_v52 = vrot.slane %v1322_v38, 5  ;;  %v3847_v53 = vrot.slane %v3720_v11, 5  ;;  %v1319_v63 = vor.u32 %v1318_v50, %v7699_v30  ;;  %v1632_v18 = vld [vmem:[#allocation2 + $0x64] sm:$0xf]  ;;  %v6898_v22 = vld [vmem:[#allocation2 + $0x54] sm:$0xff]  }
  0xde   : > { %3101 = vrot.lane.b32.xlu1 %v6878_v10, %s9135_s24  ;;  %v1315_v51 = vsel %vm7254_vm10, %v1310_v44, %v7699_v30  ;;  %v3381_v62 = vsel %vm7254_vm10, %v3376_v47, %v3380_v32  ;;  %v3845_v1 = vsel %vm7247_vm9, %v6451_v46, %v3844_v23  ;;  %v3846_v2 = vrot.slane %v3844_v23, 4  ;;  %v459_v20 = vld [vmem:[%s7241_s14 + $0x48] sm:$0xf]  ;;  %1049 = vst.msk [vmem:[#allocation3 + $0x30] sm:$0xff] %vm1042_vm14, %v6897_v8  ;;  %v1634_v5 = vld [vmem:[#allocation2 + $0x6c] sm:$0xe] }
  0xdf   : > { %v2048_v6 = vpop.permute.xlu0 %2047  ;;  %v3386_v9 = vrot.slane %v3385_v54, 4  ;;  %3965 = vrot.lane.b32.xlu0 %v6466_v14, %s9115_s29  ;;  %v1327_v12 = vshrl.u32 %v1086_v61, 16  ;;  %v1330_v10 = vshll.u32 %v1086_v61, 16  ;;  %v1336_v13 = vshll.u32 %v1087_v43, 16  ;;  %v1633_v24 = vld [vmem:[#allocation2 + $0x68] sm:$0x1] }
  0xe0   : > { %2094 = vst.msk [vmem:[#allocation3 + $0x10] sm:$0xff] %vm2091_vm2, %v2048_v6  ;;  %v1873_v4 = vpop.permute.xlu1 %1872  ;;  %v1320_v42 = vrot.slane %v1319_v63, 4  ;;  %v3848_v36 = vsel %vm7247_vm9, %v3846_v2, %v3847_v53  ;;  %v1340_v15 = vshrl.u32 %v1087_v43, 16  ;;  %v1346_v17 = vshll.u32 %v1088_v56, 16  ;;  %v1635_v33 = vld [vmem:[#allocation2 + $0x70] sm:$0xf] }
  0xe1   : > { %1918 = vst.msk [vmem:[#allocation3 + $0x18] sm:$0xff] %vm1914_vm1, %v1873_v4  ;;  %v3391_v25 = vsel %vm7254_vm10, %v3386_v9, %v3390_v49  ;;  %v6467_v14 = vcombine.low %v3845_v1, %v3848_v36  ;;  %v1329_v27 = vrot.slane %v1327_v12, 4  ;;  %v1332_v28 = vrot.slane %v1330_v10, 5  ;;  %v1636_v34 = vld [vmem:[#allocation2 + $0x74] sm:$0x1] }
  0xe2   : > { %v6435_v30 = vcombine.low %v3381_v62, %v3391_v25  ;;  %v1325_v31 = vsel %vm7254_vm10, %v1320_v42, %v1324_v52  ;;  %v1338_v45 = vrot.slane %v1336_v13, 5  ;;  %v1342_v32 = vrot.slane %v1340_v15, 4  ;;  %1050 = vst.msk [vmem:[#allocation3 + $0x38] sm:$0xff] %vm1042_vm14, %v6898_v22  ;;  %v460_v54 = vld [vmem:[%s7241_s14 + $0x4c] sm:$0xf] }
  0xe3   : > { %v6308_v39 = vcombine.low %v1315_v51, %v1325_v31  ;;  %3967 = vrot.lane.b32.xlu0 %v6467_v14, %s9115_s29  ;;  %v1333_v44 = vor.u32 %v1332_v28, %v1329_v27  ;;  %v1348_v38 = vrot.slane %v1346_v17, 5  ;;  %v6324_v46 = vrot.slane %v1631_v3, 9  ;;  %v865_v63 = vld [vmem:[#allocation2 + $0x78] sm:$0xf]  ;;  %v869_v22 = vld [vmem:[#allocation2 + $0x80] sm:$0x1] }
  0xe4   : > { %v2050_v11 = vpop.permute.xlu1 %2049  ;;  %v2593_v35 = vpop.permute.xlu0 %2592  ;;  %3646 = vrot.lane.b32.xlu1 %v6435_v30, %s7007_s12  ;;  %v1343_v61 = vor.u32 %v1342_v32, %v1338_v45  ;;  %v1764_v47 = vrot.slane %v1632_v18, 5  ;;  %v1767_v49 = vrot.slane %v1633_v24, 5  ;;  %v6325_v50 = vrot.slane %v1634_v5, 9  ;;  %v2132_v18 = vld [vmem:[#allocation2 + $0x6c] sm:$0xf] }
  0xe5   : > { %2095 = vst.msk [vmem:[#allocation3 + $0x18] sm:$0xff] %vm2091_vm2, %v2050_v11  ;;  %v1334_v23 = vrot.slane %v1333_v44, 4  ;;  %v1771_v43 = vrot.slane %v1635_v33, 5  ;;  %v1774_v6 = vrot.slane %v1636_v34, 5  ;;  %v630_v52 = vshrl.u32 %v459_v20, 16  ;;  %v6879_v5 = vld [vmem:[#allocation2 + $0x6c] sm:$0xff]  }
  0xe6   : > { %v1344_v53 = vrot.slane %v1343_v61, 4  ;;  %v1765_v51 = vsel %vm7247_vm9, %v6324_v46, %v1764_v47  ;;  %v1766_v56 = vrot.slane %v1764_v47, 4  ;;  %v633_v62 = vshll.u32 %v459_v20, 16  ;;  %v2133_v20 = vld [vmem:[#allocation2 + $0x70] sm:$0xf]  ;;  %2639 = vst.msk [vmem:[#allocation3 + $0x10] sm:$0xff] %vm2636_vm3, %v2593_v35 }
  0xe7   : > { %v1339_v2 = vsel %vm7254_vm10, %v1334_v23, %v1338_v45  ;;  %v7735_v3 = vsel %vm7247_vm9, %v6325_v50, %v1771_v43  ;;  %v1773_v4 = vrot.slane %v1771_v43, 4  ;;  %v632_v8 = vrot.slane %v630_v52, 7  ;;  %v2134_v28 = vld [vmem:[#allocation2 + $0x74] sm:$0x1]  ;;  %v7753_v31 = vld [vmem:[%s7241_s14 + $0x50] sm:$0xf] }
  0xe8   : > { %v2914_v1 = vpop.permute.xlu0 %2913  ;;  %1558 = vrot.lane.b32.xlu1 %v6308_v39, %s9100_s16  ;;  %v1349_v9 = vsel %vm7254_vm10, %v1344_v53, %v1348_v38  ;;  %v1768_v12 = vsel %vm7247_vm9, %v1766_v56, %v1767_v49  ;;  %v638_v10 = vshrl.u32 %v460_v54, 16  ;;  %v641_v13 = vshll.u32 %v460_v54, 16  ;;  %v2677_v21 = vld [vmem:[#allocation2 + $0x6c] sm:$0xe]  ;;  %v7762_v34 = vld [vmem:[%s7241_s14 + $0x54] sm:$0xf] }
  0xe9   : > { %v6309_v42 = vcombine.low %v1339_v2, %v1349_v9  ;;  %v6340_v36 = vcombine.low %v1765_v51, %v1768_v12  ;;  %v1775_v15 = vsel %vm7247_vm9, %v1773_v4, %v1774_v6  ;;  %v635_v17 = vor.u32 %v633_v62, %v632_v8  ;;  %v2679_v46 = vld [vmem:[#allocation2 + $0x74] sm:$0x1]  ;;  %v872_v62 = vld [vmem:[#allocation2 + $0x84] sm:$0xf] }
  0xea   : > { %v6341_v25 = vcombine.low %v7735_v3, %v1775_v15  ;;  %v636_v14 = vrot.slane %v632_v8, 4  ;;  %v640_v27 = vrot.slane %v638_v10, 7  ;;  %vm2957_vm4 = vcmask 195744  }
  0xeb   : > { %1882 = vrot.lane.b32.xlu0 %v6340_v36, %s9108_s15  ;;  %v866_v30 = vsel %vm7262_vm11, %v635_v17, %v865_v63  ;;  %vm3135_vm5 = vcmask 228544   ;;  %vm3680_vm7 = vcmask 261344   ;;  %vm9103_vm6 = vcmask 294144   ;;  %2959 = vst.msk [vmem:[#allocation3 + $0x8] sm:$0xff] %vm2957_vm4, %v7613_v57  ;;  %2958 = vst.msk [vmem:[#allocation3] sm:$0xff] %vm2957_vm4, %v7582_v48 }
  0xec   : > { %v3092_v24 = vpop.permute.xlu0 %3091  ;;  %1560 = vrot.lane.b32.xlu1 %v6309_v42, %s9100_s16  ;;  %v643_v45 = vor.u32 %v641_v13, %v640_v27  ;;  %v645_v32 = vrot.slane %v640_v27, 4  ;;  %867 = vst [vmem:[#allocation2 + $0x78] sm:$0xf] %v866_v30  ;;  %v2349_v33 = vshrl.u32 %v2132_v18, 16  ;;  %2960 = vst.msk [vmem:[#allocation3 + $0x10] sm:$0xff] %vm2957_vm4, %v2914_v1  ;;  %v2352_v11 = vshll.u32 %v2132_v18, 16 }
  0xed   : > { %3137 = vst.msk [vmem:[#allocation3 + $0x8] sm:$0xff] %vm3135_vm5, %v7580_v40  ;;  %v2358_v35 = vshll.u32 %v2133_v20, 16  ;;  %v2362_v39 = vshrl.u32 %v2133_v20, 16  ;;  %v2368_v44 = vshll.u32 %v2134_v28, 16  ;;  %3136 = vst.msk [vmem:[#allocation3] sm:$0xff] %vm3135_vm5, %v7570_v16  ;;  %v6388_v49 = vrot.slane %v2677_v21, 9 }
  0xee   : > { %v2678_v57 = vld [vmem:[#allocation2 + $0x70] sm:$0xf]  ;;  %3138 = vst.msk [vmem:[#allocation3 + $0x10] sm:$0xff] %vm3135_vm5, %v3092_v24  ;;  %v644_v48 = vsel %vm7270_vm12, %v636_v14, %v643_v45  ;;  %v2351_v38 = vrot.slane %v2349_v33, 4  ;;  %v870_v40 = vsel %vm7285_vm13, %v645_v32, %v869_v22  ;;  %v647_v23 = vshrl.u32 %v7753_v31, 16  ;;  %s9136_s16 = smov 4  }
  0xef   : > { %v2595_v26 = vpop.permute.xlu1 %2594  ;;  %3682 = vst.msk [vmem:[#allocation3 + $0x8] sm:$0xff] %vm3680_vm7, %v7655_v60  ;;  %3681 = vst.msk [vmem:[#allocation3] sm:$0xff] %vm3680_vm7, %v7689_v58  ;;  %v7782_v16 = vld [vmem:[%s9086_s1 + $0x10] ss:$0 sps:$4 sm:$0x33]   ;;  %2059 = vrot.lane.b32.xlu0 %v6879_v5, %s7002_s22  ;;  %v2354_v60 = vrot.slane %v2352_v11, 5 }
  0xf0   : > { %2640 = vst.msk [vmem:[#allocation3 + $0x18] sm:$0xff] %vm2636_vm3, %v2595_v26  ;;  %v2360_v61 = vrot.slane %v2358_v35, 5  ;;  %v2364_v47 = vrot.slane %v2362_v39, 4  ;;  %871 = vst [vmem:[#allocation2 + $0x80] sm:$0x1] %v870_v40  ;;  %1884 = vrot.lane.b32.xlu1 %v6341_v25, %s9108_s15  ;;  %v2370_v58 = vrot.slane %v2368_v44, 5 }
  0xf1   : > { %868 = vst.msk [vmem:[#allocation2 + $0x7c] sm:$0xf] %vm385_vm0, %v644_v48  ;;  %v2807_v50 = vrot.slane %v2678_v57, 5  ;;  %v650_v43 = vshll.u32 %v7753_v31, 16  ;;  %v2355_v54 = vor.u32 %v2354_v60, %v2351_v38  ;;  %v655_v53 = vshrl.u32 %v7762_v34, 16 }
  0xf2   : > { %4003 = vst.msk [vmem:[#allocation3 + $0x8] sm:$0xff] %vm9103_vm6, %v7615_v59  ;;  %4002 = vst.msk [vmem:[#allocation3] sm:$0xff] %vm9103_vm6, %v7594_v7  ;;  %v2365_v52 = vor.u32 %v2364_v47, %v2360_v61  ;;  %v2810_v59 = vrot.slane %v2679_v46, 5  ;;  %v7795_v56 = vrot.slane %v647_v23, 7  ;;  %v658_v7 = vshll.u32 %v7762_v34, 16 }
  0xf3   : > { %v2916_v6 = vpop.permute.xlu1 %2915  ;;  %v2809_v51 = vrot.slane %v2807_v50, 4  ;;  %vm4110_vm8 = vcmask 1041408   ;;  %v2356_v63 = vrot.slane %v2355_v54, 4  ;;  %v2135_v2 = vld [vmem:[#allocation2 + $0x78] sm:$0xf]  ;;  %v2808_v36 = vsel %vm7247_vm9, %v6388_v49, %v2807_v50 }
  0xf4   : > { %2961 = vst.msk [vmem:[#allocation3 + $0x18] sm:$0xff] %vm2957_vm4, %v2916_v6  ;;  %v2366_v1 = vrot.slane %v2365_v52, 4  ;;  %6801 = vmatprep.subr.msk.bf16.mxu0 %vm4110_vm8, %v7782_v16  ;;  %v3637_v3 = vpop.permute.xlu0 %3636  ;;  %v2373_v4 = vshrl.u32 %v2135_v2, 16  ;;  %v2376_v8 = vshll.u32 %v2135_v2, 16  ;;  %v2680_v9 = vld [vmem:[#allocation2 + $0x78] sm:$0xe]  ;;  %v652_v12 = vor.u32 %v650_v43, %v7795_v56 }
  0xf5   : > { %3683 = vst.msk [vmem:[#allocation3 + $0x10] sm:$0xff] %vm3680_vm7, %v3637_v3  ;;  %v2361_v13 = vsel %vm7254_vm10, %v2356_v63, %v2360_v61  ;;  %v2811_v15 = vsel %vm7247_vm9, %v2809_v51, %v2810_v59  ;;  %v3176_v17 = vld [vmem:[#allocation2 + $0x78] sm:$0xf]  ;;  %v6389_v30 = vrot.slane %v2680_v9, 9  ;;  %v653_v34 = vrot.slane %v7795_v56, 4 }
  0xf6   : > { %v2371_v42 = vsel %vm7254_vm10, %v2366_v1, %v2370_v58  ;;  %v2375_v25 = vrot.slane %v2373_v4, 4  ;;  %v873_v14 = vsel %vm7262_vm11, %v652_v12, %v872_v62  ;;  %v2378_v28 = vrot.slane %v2376_v8, 5  ;;  %v876_v49 = vld [vmem:[#allocation2 + $0x8c] sm:$0x1]  ;;  %v3721_v62 = vld [vmem:[#allocation2 + $0x78] sm:$0xe] }
  0xf7   : > { %v3094_v10 = vpop.permute.xlu1 %3093  ;;  %v6372_v20 = vcombine.low %v2361_v13, %v2371_v42  ;;  %v2137_v27 = vld [vmem:[#allocation2 + $0x80] sm:$0x1]  ;;  %874 = vst [vmem:[#allocation2 + $0x84] sm:$0xf] %v873_v14  ;;  %v6404_v32 = vcombine.low %v2808_v36, %v2811_v15  ;;  %v657_v48 = vrot.slane %v655_v53, 7  ;;  %v3393_v40 = vshrl.u32 %v3176_v17, 16 }
  0xf8   : > { %3139 = vst.msk [vmem:[#allocation3 + $0x18] sm:$0xff] %vm3135_vm5, %v3094_v10  ;;  %v6880_v18 = vld [vmem:[#allocation2 + $0x78] sm:$0xff]   ;;  %v3958_v31 = vpop.permute.xlu0 %3957  ;;  %v2392_v45 = vshll.u32 %v2137_v27, 16  ;;  %v2682_v21 = vld [vmem:[#allocation2 + $0x80] sm:$0x1]  ;;  %v2379_v26 = vor.u32 %v2378_v28, %v2375_v25  ;;  %v3396_v54 = vshll.u32 %v3176_v17, 16 }
  0xf9   : > { %v2136_v22 = vld [vmem:[#allocation2 + $0x7c] sm:$0xf]  ;;  %2061 = vrot.lane.b32.xlu1 %v6880_v18, %s7002_s22  ;;  %2604 = vrot.lane.b32.xlu0 %v6372_v20, %s9109_s30  ;;  %4004 = vst.msk [vmem:[#allocation3 + $0x10] sm:$0xff] %vm9103_vm6, %v3958_v31  ;;  %v2817_v57 = vrot.slane %v2682_v21, 5  ;;  %v660_v50 = vor.u32 %v658_v7, %v657_v48  ;;  %v662_v23 = vrot.slane %v657_v48, 4  ;;  %v3395_v6 = vrot.slane %v3393_v40, 4 }
  0xfa   : > { %v2382_v24 = vshll.u32 %v2136_v22, 16  ;;  %v2386_v5 = vshrl.u32 %v2136_v22, 16  ;;  %v2681_v33 = vld [vmem:[#allocation2 + $0x7c] sm:$0xf]  ;;  %v2394_v44 = vrot.slane %v2392_v45, 5  ;;  %v2380_v46 = vrot.slane %v2379_v26, 4 }
  0xfb   : > { %v2814_v39 = vrot.slane %v2681_v33, 5  ;;  %v3177_v38 = vld [vmem:[#allocation2 + $0x7c] sm:$0xf]  ;;  %v3178_v43 = vld [vmem:[#allocation2 + $0x80] sm:$0x1]  ;;  %v661_v7 = vsel %vm7270_vm12, %v653_v34, %v660_v50  ;;  %v3398_v2 = vrot.slane %v3396_v54, 5  ;;  %v877_v10 = vsel %vm7285_vm13, %v662_v23, %v876_v49 }
  0xfc   : > { %v2384_v11 = vrot.slane %v2382_v24, 5  ;;  %v2388_v35 = vrot.slane %v2386_v5, 4  ;;  %v6885_v58 = vld [vmem:[#allocation2 + $0x78] sm:$0xff]   ;;  %v3402_v56 = vshll.u32 %v3177_v38, 16  ;;  %v3406_v3 = vshrl.u32 %v3177_v38, 16 }
  0xfd   : > { %v7819_v61 = vsel %vm7247_vm9, %v6389_v30, %v2814_v39  ;;  %v2816_v47 = vrot.slane %v2814_v39, 4  ;;  %2925 = vrot.lane.b32.xlu0 %v6404_v32, %s7004_s25  ;;  %875 = vst.msk [vmem:[#allocation2 + $0x88] sm:$0xf] %vm385_vm0, %v661_v7  ;;  %v3412_v12 = vshll.u32 %v3178_v43, 16  ;;  %v3722_v13 = vld [vmem:[#allocation2 + $0x7c] sm:$0xf]  ;;  %v3399_v36 = vor.u32 %v3398_v2, %v3395_v6 }
  0xfe   : > { %v2389_v60 = vor.u32 %v2388_v35, %v2384_v11  ;;  %v3639_v52 = vpop.permute.xlu1 %3638  ;;  %v2385_v59 = vsel %vm7254_vm10, %v2380_v46, %v2384_v11  ;;  %v3960_v63 = vpop.permute.xlu0 %3959  ;;  %v3179_v4 = vld [vmem:[#allocation2 + $0x84] sm:$0xf]  ;;  %v3404_v9 = vrot.slane %v3402_v56, 5  ;;  %v3408_v15 = vrot.slane %v3406_v3, 4  ;;  %878 = vst [vmem:[#allocation2 + $0x8c] sm:$0x1] %v877_v10 }
  0xff   : > { %v2818_v51 = vsel %vm7247_vm9, %v2816_v47, %v2817_v57  ;;  %3684 = vst.msk [vmem:[#allocation3 + $0x18] sm:$0xff] %vm3680_vm7, %v3639_v52  ;;  %v3417_v17 = vshrl.u32 %v3179_v4, 16  ;;  %v3723_v18 = vld [vmem:[#allocation2 + $0x80] sm:$0x1]  ;;  %v1089_v20 = vld [vmem:[#allocation2 + $0x78] sm:$0xf] }
 0x100   : > { %v2390_v53 = vrot.slane %v2389_v60, 4  ;;  %v6405_v1 = vcombine.low %v7819_v61, %v2818_v51  ;;  %4005 = vst.msk [vmem:[#allocation3 + $0x18] sm:$0xff] %vm9103_vm6, %v3960_v63  ;;  %v3414_v25 = vrot.slane %v3412_v12, 5  ;;  %v3420_v14 = vshll.u32 %v3179_v4, 16  ;;  %v4018_v24 = vld [vmem:[#allocation3] sm:$0xff]  ;;  %v4019_v11 = vld [vmem:[#allocation3 + $0x8] sm:$0xff] }
 0x101   : > { %3103 = vrot.lane.b32.xlu0 %v6885_v58, %s9135_s24  ;;  %v4112_v27 = vsel %vm4110_vm8, %v7782_v16, 0  ;;  %v6452_v28 = vrot.slane %v3721_v62, 9  ;;  %v3400_v5 = vrot.slane %v3399_v36, 4  ;;  %v3409_v30 = vor.u32 %v3408_v15, %v3404_v9  ;;  %v1090_v32 = vld [vmem:[#allocation2 + $0x7c] sm:$0xf]  ;;  %v4020_v16 = vld [vmem:[#allocation3 + $0x10] sm:$0xff] }
 0x102   : > { %v2395_v8 = vsel %vm7254_vm10, %v2390_v53, %v2394_v44  ;;  %v1551_v22 = vpop.permute.xlu1 %1550  ;;  %v3419_v31 = vrot.slane %v3417_v17, 4  ;;  %6670 = vmatpush3.bf16.msra.mxu0 %v4112_v27  ;;  %v3851_v45 = vrot.slane %v3722_v13, 5  ;;  %v3422_v21 = vrot.slane %v3420_v14, 5  ;;  %v1091_v48 = vld [vmem:[#allocation2 + $0x80] sm:$0x1] }
 0x103   : > { %v6373_v42 = vcombine.low %v2385_v59, %v2395_v8  ;;  %1595 = vst.msk [vmem:[#allocation3 + $0x20] sm:$0xff] %vm1590_vm15, %v1551_v22  ;;  %v1875_v33 = vpop.permute.xlu0 %1874  ;;  %v3854_v34 = vrot.slane %v3723_v18, 5  ;;  %vm4061_vm6 = vcmask 293888   ;;  %v1351_v26 = vshrl.u32 %v1089_v20, 16  ;;  %v3724_v47 = vld [vmem:[#allocation2 + $0x84] sm:$0xe] }
 0x104   : > { %1919 = vst.msk [vmem:[#allocation3 + $0x20] sm:$0xff] %vm1914_vm1, %v1875_v33  ;;  %v3405_v35 = vsel %vm7254_vm10, %v3400_v5, %v3404_v9  ;;  %v3410_v39 = vrot.slane %v3409_v30, 4  ;;  %v3852_v44 = vsel %vm7247_vm9, %v6452_v28, %v3851_v45  ;;  %v3853_v57 = vrot.slane %v3851_v45, 4  ;;  %6671 = vmatprep.mubr.msk.bf16.mxu0 %vm4061_vm6, %v4018_v24  ;;  %v6887_v49 = vld [vmem:[#allocation2 + $0x84] sm:$0xff]   ;;  %v1638_v45 = vld [vmem:[#allocation2 + $0x7c] sm:$0xf] }
 0x105   : > { %2606 = vrot.lane.b32.xlu1 %v6373_v42, %s9109_s30  ;;  %v3423_v40 = vor.u32 %v3422_v21, %v3419_v31  ;;  %v1353_v46 = vrot.slane %v1351_v26, 4  ;;  %v1354_v60 = vshll.u32 %v1089_v20, 16  ;;  %v1360_v61 = vshll.u32 %v1090_v32, 16  ;;  %6672 = vmatmul.mubr.msk.bf16.vlgmr.msra.gmra.mrb[0].mxu0 %vm4061_vm6, %v4019_v11  ;;  %v3180_v50 = vld [vmem:[#allocation2 + $0x88] sm:$0xf]  ;;  %v6903_v3 = vld [vmem:[#allocation2 + $0x60] sm:$0xff]  }
 0x106   : > { %v1553_v38 = vpop.permute.xlu1 %1552  ;;  %v3415_v58 = vsel %vm7254_vm10, %v3410_v39, %v3414_v25  ;;  %v3855_v23 = vsel %vm7247_vm9, %v3853_v57, %v3854_v34  ;;  %v1364_v43 = vshrl.u32 %v1090_v32, 16  ;;  %6675 = vmatprep.mubr.msk.bf16.mxu0 %vm4061_vm6, %v4020_v16  ;;  %v3181_v52 = vld [vmem:[#allocation2 + $0x8c] sm:$0x1]  ;;  %v3426_v53 = vshll.u32 %v3180_v50, 16  ;;  %v3725_v7 = vld [vmem:[#allocation2 + $0x88] sm:$0xf] }
 0x107   : > { %1596 = vst.msk [vmem:[#allocation3 + $0x28] sm:$0xff] %vm1590_vm15, %v1553_v38  ;;  %v2052_v6 = vpop.permute.xlu0 %2051  ;;  %v6436_v54 = vcombine.low %v3405_v35, %v3415_v58  ;;  %v3424_v59 = vrot.slane %v3423_v40, 4  ;;  %v3430_v51 = vshrl.u32 %v3180_v50, 16  ;;  %v3436_v56 = vshll.u32 %v3181_v52, 16  ;;  %v3726_v10 = vld [vmem:[#allocation2 + $0x8c] sm:$0x1] }
 0x108   : > { %2096 = vst.msk [vmem:[#allocation3 + $0x20] sm:$0xff] %vm2091_vm2, %v2052_v6  ;;  %v6468_v62 = vcombine.low %v3852_v44, %v3855_v23  ;;  %v1356_v63 = vrot.slane %v1354_v60, 5  ;;  %v3428_v4 = vrot.slane %v3426_v53, 5  ;;  %v1366_v9 = vrot.slane %v1364_v43, 4  ;;  %v1092_v17 = vld [vmem:[#allocation2 + $0x84] sm:$0xf] }
 0x109   : > { %2927 = vrot.lane.b32.xlu1 %v6405_v1, %s7004_s25  ;;  %v1362_v1 = vrot.slane %v1360_v61, 5  ;;  %3648 = vrot.lane.b32.xlu0 %v6436_v54, %s7007_s12  ;;  %v3432_v8 = vrot.slane %v3430_v51, 4  ;;  %v1370_v12 = vshll.u32 %v1091_v48, 16  ;;  %v3438_v13 = vrot.slane %v3436_v56, 5  ;;  %v4021_v18 = vld [vmem:[#allocation3 + $0x18] sm:$0xff]  ;;  %1051 = vst.msk [vmem:[#allocation3 + $0x40] sm:$0xff] %vm1042_vm14, %v6903_v3 }
 0x10a   : > { %v1877_v2 = vpop.permute.xlu1 %1876  ;;  %v1357_v42 = vor.u32 %v1356_v63, %v1353_v46  ;;  %v6453_v36 = vrot.slane %v3724_v47, 9  ;;  %v3858_v15 = vrot.slane %v3725_v7, 5  ;;  %v3429_v20 = vsel %vm7254_vm10, %v3424_v59, %v3428_v4  ;;  %v1093_v27 = vld [vmem:[#allocation2 + $0x88] sm:$0xf]  ;;  %v1637_v31 = vld [vmem:[#allocation2 + $0x78] sm:$0xe] }
 0x10b   : > { %1920 = vst.msk [vmem:[#allocation3 + $0x28] sm:$0xff] %vm1914_vm1, %v1877_v2  ;;  %v3433_v22 = vor.u32 %v3432_v8, %v3428_v4  ;;  %v1367_v25 = vor.u32 %v1366_v9, %v1362_v1  ;;  %v1372_v14 = vrot.slane %v1370_v12, 5  ;;  %v3861_v30 = vrot.slane %v3726_v10, 5  ;;  %v6904_v32 = vld [vmem:[#allocation2 + $0x6c] sm:$0xff]   ;;  %v1639_v57 = vld [vmem:[#allocation2 + $0x80] sm:$0x1] }
 0x10c   : > { %v1358_v28 = vrot.slane %v1357_v42, 4  ;;  %v3859_v24 = vsel %vm7247_vm9, %v6453_v36, %v3858_v15  ;;  %v3860_v5 = vrot.slane %v3858_v15, 4  ;;  %v1375_v34 = vshrl.u32 %v1092_v17, 16  ;;  %v1094_v35 = vld [vmem:[#allocation2 + $0x8c] sm:$0x1]  ;;  %1052 = vst.msk [vmem:[#allocation3 + $0x48] sm:$0xff] %vm1042_vm14, %v6904_v32 }
 0x10d   : > { %3105 = vrot.lane.b32.xlu1 %v6887_v49, %s9135_s24  ;;  %v3434_v33 = vrot.slane %v3433_v22, 4  ;;  %3969 = vrot.lane.b32.xlu0 %v6468_v62, %s9115_s29  ;;  %v1368_v21 = vrot.slane %v1367_v25, 4  ;;  %v1378_v26 = vshll.u32 %v1092_v17, 16  ;;  %v1384_v39 = vshll.u32 %v1093_v27, 16  ;;  %v1640_v60 = vld [vmem:[#allocation2 + $0x84] sm:$0xe] }
 0x10e   : > { %6676 = vmatmul.mubr.msk.bf16.gmra.mrb[4].mxu0 %vm4061_vm6, %v4021_v18  ;;  %v1363_v11 = vsel %vm7254_vm10, %v1358_v28, %v1362_v1  ;;  %v3862_v16 = vsel %vm7247_vm9, %v3860_v5, %v3861_v30  ;;  %v1388_v44 = vshrl.u32 %v1093_v27, 16  ;;  %v1377_v46 = vrot.slane %v1375_v34, 4  ;;  %v1641_v61 = vld [vmem:[#allocation2 + $0x88] sm:$0xf]  ;;  %v1642_v53 = vld [vmem:[#allocation2 + $0x8c] sm:$0x1] }
 0x10f   : > { %v3439_v48 = vsel %vm7254_vm10, %v3434_v33, %v3438_v13  ;;  %v1373_v38 = vsel %vm7254_vm10, %v1368_v21, %v1372_v14  ;;  %v6469_v40 = vcombine.low %v3859_v24, %v3862_v16  ;;  %v1380_v23 = vrot.slane %v1378_v26, 5  ;;  %v463_v1 = vld [vmem:[%s7241_s14 + $0x58] sm:$0xf]  ;;  %v464_v8 = vld [vmem:[%s7241_s14 + $0x5c] sm:$0xf] }
 0x110   : > { %v2054_v47 = vpop.permute.xlu1 %2053  ;;  %v6437_v58 = vcombine.low %v3429_v20, %v3439_v48  ;;  %v6310_v50 = vcombine.low %v1363_v11, %v1373_v38  ;;  %v1386_v43 = vrot.slane %v1384_v39, 5  ;;  %v1390_v6 = vrot.slane %v1388_v44, 4  ;;  %v2138_v36 = vld [vmem:[#allocation2 + $0x84] sm:$0xf]  ;;  %v2139_v22 = vld [vmem:[#allocation2 + $0x88] sm:$0xf] }
 0x111   : > { %v2597_v49 = vpop.permute.xlu0 %2596  ;;  %2097 = vst.msk [vmem:[#allocation3 + $0x28] sm:$0xff] %vm2091_vm2, %v2054_v47  ;;  %3971 = vrot.lane.b32.xlu0 %v6469_v40, %s9115_s29  ;;  %v1394_v54 = vshll.u32 %v1094_v35, 16  ;;  %v6326_v52 = vrot.slane %v1637_v31, 9  ;;  %v1778_v59 = vrot.slane %v1638_v45, 5  ;;  %v1381_v51 = vor.u32 %v1380_v23, %v1377_v46  ;;  %v879_v24 = vld [vmem:[#allocation2 + $0x90] sm:$0xf] }
 0x112   : > { %2641 = vst.msk [vmem:[#allocation3 + $0x20] sm:$0xff] %vm2636_vm3, %v2597_v49  ;;  %3650 = vrot.lane.b32.xlu1 %v6437_v58, %s7007_s12  ;;  %v1781_v56 = vrot.slane %v1639_v57, 5  ;;  %v6327_v62 = vrot.slane %v1640_v60, 9  ;;  %v1785_v63 = vrot.slane %v1641_v61, 5  ;;  %v1391_v7 = vor.u32 %v1390_v6, %v1386_v43  ;;  %v2140_v5 = vld [vmem:[#allocation2 + $0x8c] sm:$0x1] }
 0x113   : > { %v1396_v2 = vrot.slane %v1394_v54, 5  ;;  %v1779_v3 = vsel %vm7247_vm9, %v6326_v52, %v1778_v59  ;;  %v1780_v4 = vrot.slane %v1778_v59, 4  ;;  %v1382_v12 = vrot.slane %v1381_v51, 4  ;;  %v883_v33 = vld [vmem:[#allocation2 + $0x98] sm:$0x1]  ;;  %v6889_v11 = vld [vmem:[#allocation2 + $0x84] sm:$0xff]  }
 0x114   : > { %v7885_v10 = vsel %vm7247_vm9, %v6327_v62, %v1785_v63  ;;  %v1787_v13 = vrot.slane %v1785_v63, 4  ;;  %v1788_v42 = vrot.slane %v1642_v53, 5  ;;  %v1392_v15 = vrot.slane %v1391_v7, 4  ;;  %v2683_v21 = vld [vmem:[#allocation2 + $0x84] sm:$0xe]  ;;  %v6907_v44 = vld [vmem:[#allocation2 + $0x78] sm:$0xff]  }
 0x115   : > { %v2918_v9 = vpop.permute.xlu0 %2917  ;;  %v1782_v17 = vsel %vm7247_vm9, %v1780_v4, %v1781_v56  ;;  %v664_v18 = vshrl.u32 %v463_v1, 16  ;;  %v667_v20 = vshll.u32 %v463_v1, 16  ;;  %v1387_v25 = vsel %vm7254_vm10, %v1382_v12, %v1386_v43  ;;  %v6908_v57 = vld [vmem:[#allocation2 + $0x84] sm:$0xff]   ;;  %v465_v61 = vld [vmem:[%s7241_s14 + $0x60] sm:$0xf]  ;;  %1053 = vst.msk [vmem:[#allocation3 + $0x50] sm:$0xff] %vm1042_vm14, %v6907_v44 }
 0x116   : > { %2962 = vst.msk [vmem:[#allocation3 + $0x20] sm:$0xff] %vm2957_vm4, %v2918_v9  ;;  %1562 = vrot.lane.b32.xlu1 %v6310_v50, %s9136_s16  ;;  %v6342_v14 = vcombine.low %v1779_v3, %v1782_v17  ;;  %v1789_v27 = vsel %vm7247_vm9, %v1787_v13, %v1788_v42  ;;  %v672_v28 = vshrl.u32 %v464_v8, 16  ;;  %v1397_v30 = vsel %vm7254_vm10, %v1392_v15, %v1396_v2  ;;  %v2684_v60 = vld [vmem:[#allocation2 + $0x88] sm:$0xf]  ;;  %v2685_v43 = vld [vmem:[#allocation2 + $0x8c] sm:$0x1] }
 0x117   : > { %v6343_v31 = vcombine.low %v7885_v10, %v1789_v27  ;;  %v666_v45 = vrot.slane %v664_v18, 7  ;;  %v675_v32 = vshll.u32 %v464_v8, 16  ;;  %v6311_v26 = vcombine.low %v1387_v25, %v1397_v30  ;;  %1054 = vst.msk [vmem:[#allocation3 + $0x58] sm:$0xff] %vm1042_vm14, %v6908_v57  ;;  %v466_v53 = vld [vmem:[%s7241_s14 + $0x64] sm:$0xf] }
 0x118   : > { %1886 = vrot.lane.b32.xlu0 %v6342_v14, %s9108_s15  ;;  %v674_v16 = vrot.slane %v672_v28, 7  ;;  %v2397_v35 = vshrl.u32 %v2138_v36, 16  ;;  %v2400_v39 = vshll.u32 %v2138_v36, 16  ;;  %v2406_v40 = vshll.u32 %v2139_v22, 16  ;;  %v7917_v13 = vld [vmem:[%s7241_s14 + $0x68] sm:$0xf] }
 0x119   : > { %v3096_v34 = vpop.permute.xlu0 %3095  ;;  %v669_v48 = vor.u32 %v667_v20, %v666_v45  ;;  %v670_v38 = vrot.slane %v666_v45, 4  ;;  %v2410_v46 = vshrl.u32 %v2139_v22, 16  ;;  %v2416_v59 = vshll.u32 %v2140_v5, 16  ;;  %v7920_v17 = vld [vmem:[%s7241_s14 + $0x6c] sm:$0xf] }
 0x11a   : > { %3140 = vst.msk [vmem:[#allocation3 + $0x20] sm:$0xff] %vm3135_vm5, %v3096_v34  ;;  %1564 = vrot.lane.b32.xlu1 %v6311_v26, %s9136_s16  ;;  %v677_v49 = vor.u32 %v675_v32, %v674_v16  ;;  %v679_v58 = vrot.slane %v674_v16, 4  ;;  %v2399_v50 = vrot.slane %v2397_v35, 4  ;;  %v2402_v23 = vrot.slane %v2400_v39, 5 }
 0x11b   : > { %v880_v6 = vsel %vm7262_vm11, %v669_v48, %v879_v24  ;;  %v2408_v54 = vrot.slane %v2406_v40, 5  ;;  %v2412_v52 = vrot.slane %v2410_v46, 4  ;;  %v6390_v63 = vrot.slane %v2683_v21, 9  ;;  %v886_v24 = vld [vmem:[#allocation2 + $0x9c] sm:$0xf] }
 0x11c   : > { %v2599_v47 = vpop.permute.xlu1 %2598  ;;  %2063 = vrot.lane.b32.xlu0 %v6889_v11, %s7002_s22  ;;  %v678_v51 = vsel %vm7270_vm12, %v670_v38, %v677_v49  ;;  %881 = vst [vmem:[#allocation2 + $0x90] sm:$0xf] %v880_v6  ;;  %v2403_v56 = vor.u32 %v2402_v23, %v2399_v50  ;;  %v884_v62 = vsel %vm7285_vm13, %v679_v58, %v883_v33  ;;  %v2418_v7 = vrot.slane %v2416_v59, 5 }
 0x11d   : > { %2642 = vst.msk [vmem:[#allocation3 + $0x28] sm:$0xff] %vm2636_vm3, %v2599_v47  ;;  %v2413_v1 = vor.u32 %v2412_v52, %v2408_v54  ;;  %885 = vst [vmem:[#allocation2 + $0x98] sm:$0x1] %v884_v62  ;;  %v2821_v2 = vrot.slane %v2684_v60, 5  ;;  %v2824_v3 = vrot.slane %v2685_v43, 5  ;;  %v681_v9 = vshrl.u32 %v465_v61, 16 }
 0x11e   : > { %882 = vst.msk [vmem:[#allocation2 + $0x94] sm:$0xf] %vm385_vm0, %v678_v51  ;;  %1888 = vrot.lane.b32.xlu1 %v6343_v31, %s9108_s15  ;;  %v2404_v8 = vrot.slane %v2403_v56, 4  ;;  %v684_v12 = vshll.u32 %v465_v61, 16  ;;  %v689_v10 = vshrl.u32 %v466_v53, 16  ;;  %v692_v15 = vshll.u32 %v466_v53, 16 }
 0x11f   : > { %v2414_v42 = vrot.slane %v2413_v1, 4  ;;  %v2823_v36 = vrot.slane %v2821_v2, 4  ;;  %v2822_v20 = vsel %vm7247_vm9, %v6390_v63, %v2821_v2  ;;  %v683_v22 = vrot.slane %v681_v9, 7  ;;  %v890_v9 = vld [vmem:[#allocation2 + $0xa4] sm:$0x1] }
 0x120   : > { %v2920_v4 = vpop.permute.xlu1 %2919  ;;  %v2409_v18 = vsel %vm7254_vm10, %v2404_v8, %v2408_v54  ;;  %v7926_v25 = vrot.slane %v689_v10, 7  ;;  %v698_v30 = vshrl.u32 %v7917_v13, 16  ;;  %v701_v31 = vshll.u32 %v7917_v13, 16 }
 0x121   : > { %2963 = vst.msk [vmem:[#allocation3 + $0x28] sm:$0xff] %vm2957_vm4, %v2920_v4  ;;  %v3641_v14 = vpop.permute.xlu0 %3640  ;;  %v2419_v27 = vsel %vm7254_vm10, %v2414_v42, %v2418_v7  ;;  %v2825_v28 = vsel %vm7247_vm9, %v2823_v36, %v2824_v3  ;;  %v686_v32 = vor.u32 %v684_v12, %v683_v22  ;;  %v687_v33 = vrot.slane %v683_v22, 4 }
 0x122   : > { %3685 = vst.msk [vmem:[#allocation3 + $0x20] sm:$0xff] %vm3680_vm7, %v3641_v14  ;;  %v6374_v45 = vcombine.low %v2409_v18, %v2419_v27  ;;  %v706_v21 = vshrl.u32 %v7920_v17, 16  ;;  %v694_v11 = vor.u32 %v692_v15, %v7926_v25  ;;  %v6406_v44 = vcombine.low %v2822_v20, %v2825_v28 }
 0x123   : > { %v2141_v34 = vld [vmem:[#allocation2 + $0x90] sm:$0xf]  ;;  %v887_v57 = vsel %vm7262_vm11, %v686_v32, %v886_v24  ;;  %vm9137_vm8 = vcmask 294144   ;;  %v696_v62 = vrot.slane %v7926_v25, 4 }
 0x124   : > { %v3098_v5 = vpop.permute.xlu1 %3097  ;;  %v2686_v26 = vld [vmem:[#allocation2 + $0x90] sm:$0xe]  ;;  %2608 = vrot.lane.b32.xlu0 %v6374_v45, %s9109_s30  ;;  %v2421_v39 = vshrl.u32 %v2141_v34, 16  ;;  %v2143_v38 = vld [vmem:[#allocation2 + $0x98] sm:$0x1]  ;;  %v2424_v40 = vshll.u32 %v2141_v34, 16  ;;  %v695_v43 = vsel %vm7270_vm12, %v687_v33, %v694_v11 }
 0x125   : > { %3141 = vst.msk [vmem:[#allocation3 + $0x28] sm:$0xff] %vm3135_vm5, %v3098_v5  ;;  %v6890_v16 = vld [vmem:[#allocation2 + $0x90] sm:$0xff]   ;;  %v3962_v48 = vpop.permute.xlu0 %3961  ;;  %v6391_v61 = vrot.slane %v2686_v26, 9  ;;  %888 = vst [vmem:[#allocation2 + $0x9c] sm:$0xf] %v887_v57  ;;  %v2440_v58 = vshll.u32 %v2143_v38, 16  ;;  %v891_v57 = vsel %vm7285_vm13, %v696_v62, %v890_v9 }
 0x126   : > { %v2142_v35 = vld [vmem:[#allocation2 + $0x94] sm:$0xf]  ;;  %4006 = vst.msk [vmem:[#allocation3 + $0x20] sm:$0xff] %vm9137_vm8, %v3962_v48  ;;  %2065 = vrot.lane.b32.xlu1 %v6890_v16, %s7002_s22  ;;  %v2423_v49 = vrot.slane %v2421_v39, 4  ;;  %v2688_v23 = vld [vmem:[#allocation2 + $0x98] sm:$0x1] }
 0x127   : > { %v2430_v46 = vshll.u32 %v2142_v35, 16  ;;  %v2434_v60 = vshrl.u32 %v2142_v35, 16  ;;  %v2687_v50 = vld [vmem:[#allocation2 + $0x94] sm:$0xf]  ;;  %v2426_v6 = vrot.slane %v2424_v40, 5  ;;  %v2442_v53 = vrot.slane %v2440_v58, 5 }
 0x128   : > { %v3643_v47 = vpop.permute.xlu1 %3642  ;;  %v2828_v59 = vrot.slane %v2687_v50, 5  ;;  %889 = vst.msk [vmem:[#allocation2 + $0xa0] sm:$0xf] %vm385_vm0, %v695_v43  ;;  %2929 = vrot.lane.b32.xlu0 %v6406_v44, %s7004_s25  ;;  %v2831_v51 = vrot.slane %v2688_v23, 5  ;;  %v6893_v56 = vld [vmem:[#allocation2 + $0x90] sm:$0xff]  }
 0x129   : > { %3686 = vst.msk [vmem:[#allocation3 + $0x28] sm:$0xff] %vm3680_vm7, %v3643_v47  ;;  %v2432_v54 = vrot.slane %v2430_v46, 5  ;;  %v2436_v52 = vrot.slane %v2434_v60, 4  ;;  %v3964_v63 = vpop.permute.xlu0 %3963  ;;  %v2427_v1 = vor.u32 %v2426_v6, %v2423_v49  ;;  %v3182_v4 = vld [vmem:[#allocation2 + $0x90] sm:$0xf] }
 0x12a   : > { %v7951_v2 = vsel %vm7247_vm9, %v6391_v61, %v2828_v59  ;;  %v2830_v3 = vrot.slane %v2828_v59, 4  ;;  %v3183_v8 = vld [vmem:[#allocation2 + $0x94] sm:$0xf]  ;;  %4007 = vst.msk [vmem:[#allocation3 + $0x28] sm:$0xff] %vm9137_vm8, %v3964_v63  ;;  %v3184_v12 = vld [vmem:[#allocation2 + $0x98] sm:$0x1] }
 0x12b   : > { %v2437_v7 = vor.u32 %v2436_v52, %v2432_v54  ;;  %v3441_v10 = vshrl.u32 %v3182_v4, 16  ;;  %v3444_v42 = vshll.u32 %v3182_v4, 16  ;;  %v3450_v36 = vshll.u32 %v3183_v8, 16  ;;  %v3727_v14 = vld [vmem:[#allocation2 + $0x90] sm:$0xe] }
 0x12c   : > { %v3454_v15 = vshrl.u32 %v3183_v8, 16  ;;  %v2428_v18 = vrot.slane %v2427_v1, 4  ;;  %v2832_v22 = vsel %vm7247_vm9, %v2830_v3, %v2831_v51  ;;  %v3460_v25 = vshll.u32 %v3184_v12, 16  ;;  %v1555_v27 = vpop.permute.xlu1 %1554  ;;  %3107 = vrot.lane.b32.xlu0 %v6893_v56, %s9135_s24  ;;  %v3185_v16 = vld [vmem:[#allocation2 + $0x9c] sm:$0xf] }
 0x12d   : > { %v2438_v20 = vrot.slane %v2437_v7, 4  ;;  %v6407_v28 = vcombine.low %v7951_v2, %v2832_v22  ;;  %v3443_v24 = vrot.slane %v3441_v10, 4  ;;  %v3446_v5 = vrot.slane %v3444_v42, 5  ;;  %1597 = vst.msk [vmem:[#allocation3 + $0x30] sm:$0xff] %vm1590_vm15, %v1555_v27  ;;  %v4022_v32 = vld [vmem:[#allocation3 + $0x20] sm:$0xff] }
 0x12e   : > { %v3452_v45 = vrot.slane %v3450_v36, 5  ;;  %v2433_v33 = vsel %vm7254_vm10, %v2428_v18, %v2432_v54  ;;  %v3456_v26 = vrot.slane %v3454_v15, 4  ;;  %v3462_v11 = vrot.slane %v3460_v25, 5  ;;  %v3728_v35 = vld [vmem:[#allocation2 + $0x94] sm:$0xf]  ;;  %6679 = vmatprep.mubr.msk.bf16.mxu0 %vm4061_vm6, %v4022_v32 }
 0x12f   : > { %v2443_v34 = vsel %vm7254_vm10, %v2438_v20, %v2442_v53  ;;  %v3447_v44 = vor.u32 %v3446_v5, %v3443_v24  ;;  %v3186_v48 = vld [vmem:[#allocation2 + $0xa0] sm:$0xf]  ;;  %v3465_v38 = vshrl.u32 %v3185_v16, 16  ;;  %892 = vst [vmem:[#allocation2 + $0xa4] sm:$0x1] %v891_v57  ;;  %v3468_v60 = vshll.u32 %v3185_v16, 16 }
 0x130   : > { %v6375_v39 = vcombine.low %v2433_v33, %v2443_v34  ;;  %v1879_v40 = vpop.permute.xlu0 %1878  ;;  %v3457_v46 = vor.u32 %v3456_v26, %v3452_v45  ;;  %v3474_v61 = vshll.u32 %v3186_v48, 16  ;;  %v3478_v47 = vshrl.u32 %v3186_v48, 16  ;;  %v3729_v49 = vld [vmem:[#allocation2 + $0x98] sm:$0x1]  ;;  %v1095_v6 = vld [vmem:[#allocation2 + $0x90] sm:$0xf] }
 0x131   : > { %1921 = vst.msk [vmem:[#allocation3 + $0x30] sm:$0xff] %vm1914_vm1, %v1879_v40  ;;  %v3448_v58 = vrot.slane %v3447_v44, 4  ;;  %v3467_v50 = vrot.slane %v3465_v38, 4  ;;  %v6454_v23 = vrot.slane %v3727_v14, 9  ;;  %v3865_v43 = vrot.slane %v3728_v35, 5  ;;  %v1557_v54 = vpop.permute.xlu1 %1556  ;;  %v6894_v62 = vld [vmem:[#allocation2 + $0x9c] sm:$0xff]  }
 0x132   : > { %2610 = vrot.lane.b32.xlu1 %v6375_v39, %s9109_s30  ;;  %v3458_v52 = vrot.slane %v3457_v46, 4  ;;  %v3470_v59 = vrot.slane %v3468_v60, 5  ;;  %v7968_v53 = vrot.slane %v3474_v61, 5  ;;  %v3480_v51 = vrot.slane %v3478_v47, 4  ;;  %v1096_v56 = vld [vmem:[#allocation2 + $0x94] sm:$0xf] }
 0x133   : > { %1598 = vst.msk [vmem:[#allocation3 + $0x38] sm:$0xff] %vm1590_vm15, %v1557_v54  ;;  %v3453_v63 = vsel %vm7254_vm10, %v3448_v58, %v3452_v45  ;;  %v3866_v1 = vsel %vm7247_vm9, %v6454_v23, %v3865_v43  ;;  %v3867_v7 = vrot.slane %v3865_v43, 4  ;;  %v3868_v2 = vrot.slane %v3729_v49, 5  ;;  %v1097_v12 = vld [vmem:[#allocation2 + $0x98] sm:$0x1]  ;;  %v4023_v36 = vld [vmem:[#allocation3 + $0x28] sm:$0xff] }
 0x134   : > { %v2056_v3 = vpop.permute.xlu0 %2055  ;;  %v3463_v4 = vsel %vm7254_vm10, %v3458_v52, %v3462_v11  ;;  %v3471_v8 = vor.u32 %v3470_v59, %v3467_v50  ;;  %v3481_v9 = vor.u32 %v3480_v51, %v7968_v53  ;;  %v1399_v10 = vshrl.u32 %v1095_v6, 16  ;;  %v3730_v42 = vld [vmem:[#allocation2 + $0x9c] sm:$0xe]  ;;  %v3731_v25 = vld [vmem:[#allocation2 + $0xa0] sm:$0xf]  ;;  %6680 = vmatmul.mubr.msk.bf16.gmra.mrb[8].mxu0 %vm4061_vm6, %v4023_v36  ;;  %v6909_v34 = vld [vmem:[#allocation2 + $0x90] sm:$0xff]  }
 0x135   : > { %2098 = vst.msk [vmem:[#allocation3 + $0x30] sm:$0xff] %vm2091_vm2, %v2056_v3  ;;  %v6438_v15 = vcombine.low %v3453_v63, %v3463_v4  ;;  %v3869_v18 = vsel %vm7247_vm9, %v3867_v7, %v3868_v2  ;;  %v1402_v20 = vshll.u32 %v1095_v6, 16  ;;  %v1408_v22 = vshll.u32 %v1096_v56, 16  ;;  %v1098_v14 = vld [vmem:[#allocation2 + $0x9c] sm:$0xf]  ;;  %v1881_v27 = vpop.permute.xlu1 %1880 }
 0x136   : > { %2931 = vrot.lane.b32.xlu1 %v6407_v28, %s7004_s25  ;;  %v3472_v24 = vrot.slane %v3471_v8, 4  ;;  %v3482_v5 = vrot.slane %v3481_v9, 4  ;;  %v6470_v45 = vcombine.low %v3866_v1, %v3869_v18  ;;  %v1401_v32 = vrot.slane %v1399_v10, 4  ;;  %v1099_v33 = vld [vmem:[#allocation2 + $0xa0] sm:$0xf]  ;;  %1922 = vst.msk [vmem:[#allocation3 + $0x38] sm:$0xff] %vm1914_vm1, %v1881_v27 }
 0x137   : > { %3652 = vrot.lane.b32.xlu0 %v6438_v15, %s7007_s12  ;;  %v3187_v28 = vld [vmem:[#allocation2 + $0xa4] sm:$0x1]  ;;  %v1404_v26 = vrot.slane %v1402_v20, 5  ;;  %v1410_v11 = vrot.slane %v1408_v22, 5  ;;  %v1412_v16 = vshrl.u32 %v1096_v56, 16  ;;  %v1418_v35 = vshll.u32 %v1097_v12, 16 }
 0x138   : > { %v3477_v39 = vsel %vm7254_vm10, %v3472_v24, %v7968_v53  ;;  %v3484_v44 = vshll.u32 %v3187_v28, 16  ;;  %v3732_v57 = vld [vmem:[#allocation2 + $0xa4] sm:$0x1]  ;;  %v6455_v48 = vrot.slane %v3730_v42, 9  ;;  %v3872_v38 = vrot.slane %v3731_v25, 5  ;;  %1055 = vst.msk [vmem:[#allocation3 + $0x60] sm:$0xff] %vm1042_vm14, %v6909_v34 }
 0x139   : > { %v6910_v40 = vld [vmem:[#allocation2 + $0x9c] sm:$0xff]   ;;  %v1405_v46 = vor.u32 %v1404_v26, %v1401_v32  ;;  %v1414_v60 = vrot.slane %v1412_v16, 4  ;;  %v1420_v61 = vrot.slane %v1418_v35, 5  ;;  %v3875_v47 = vrot.slane %v3732_v57, 5  ;;  %v1643_v43 = vld [vmem:[#allocation2 + $0x90] sm:$0xe] }
 0x13a   : > { %3109 = vrot.lane.b32.xlu1 %v6894_v62, %s9135_s24  ;;  %v3486_v49 = vrot.slane %v3484_v44, 5  ;;  %v3873_v58 = vsel %vm7247_vm9, %v6455_v48, %v3872_v38  ;;  %v3874_v50 = vrot.slane %v3872_v38, 4  ;;  %v1423_v23 = vshrl.u32 %v1098_v14, 16  ;;  %v1644_v6 = vld [vmem:[#allocation2 + $0x94] sm:$0xf]  ;;  %1056 = vst.msk [vmem:[#allocation3 + $0x68] sm:$0xff] %vm1042_vm14, %v6910_v40 }
 0x13b   : > { %3973 = vrot.lane.b32.xlu0 %v6470_v45, %s9115_s29  ;;  %v1406_v54 = vrot.slane %v1405_v46, 4  ;;  %v1415_v52 = vor.u32 %v1414_v60, %v1410_v11  ;;  %v1100_v59 = vld [vmem:[#allocation2 + $0xa4] sm:$0x1]  ;;  %v1426_v53 = vshll.u32 %v1098_v14, 16  ;;  %v1432_v51 = vshll.u32 %v1099_v33, 16 }
 0x13c   : > { %v3487_v56 = vsel %vm7254_vm10, %v3482_v5, %v3486_v49  ;;  %v3876_v62 = vsel %vm7247_vm9, %v3874_v50, %v3875_v47  ;;  %v1425_v63 = vrot.slane %v1423_v23, 4  ;;  %v1436_v1 = vshrl.u32 %v1099_v33, 16  ;;  %v1645_v7 = vld [vmem:[#allocation2 + $0x98] sm:$0x1]  ;;  %v1646_v2 = vld [vmem:[#allocation2 + $0x9c] sm:$0xe]  ;;  %v2058_v3 = vpop.permute.xlu1 %2057  ;;  %v2601_v4 = vpop.permute.xlu0 %2600 }
 0x13d   : > { %v6439_v8 = vcombine.low %v3477_v39, %v3487_v56  ;;  %v1411_v9 = vsel %vm7254_vm10, %v1406_v54, %v1410_v11  ;;  %v1416_v12 = vrot.slane %v1415_v52, 4  ;;  %v6471_v10 = vcombine.low %v3873_v58, %v3876_v62  ;;  %2099 = vst.msk [vmem:[#allocation3 + $0x38] sm:$0xff] %vm2091_vm2, %v2058_v3  ;;  %v1647_v20 = vld [vmem:[#allocation2 + $0xa0] sm:$0xf]  ;;  %v1648_v24 = vld [vmem:[#allocation2 + $0xa4] sm:$0x1] }
 0x13e   : > { %2643 = vst.msk [vmem:[#allocation3 + $0x30] sm:$0xff] %vm2636_vm3, %v2601_v4  ;;  %v1428_v42 = vrot.slane %v1426_v53, 5  ;;  %v1434_v36 = vrot.slane %v1432_v51, 5  ;;  %v1438_v15 = vrot.slane %v1436_v1, 4  ;;  %v1442_v18 = vshll.u32 %v1100_v59, 16  ;;  %v6895_v62 = vld [vmem:[#allocation2 + $0x9c] sm:$0xff]  }
 0x13f   : > { %3654 = vrot.lane.b32.xlu1 %v6439_v8, %s7007_s12  ;;  %v1421_v22 = vsel %vm7254_vm10, %v1416_v12, %v1420_v61  ;;  %3975 = vrot.lane.b32.xlu0 %v6471_v10, %s9115_s29  ;;  %v6328_v25 = vrot.slane %v1643_v43, 9  ;;  %v1792_v14 = vrot.slane %v1644_v6, 5  ;;  %v1795_v27 = vrot.slane %v1645_v7, 5  ;;  %v893_v35 = vld [vmem:[#allocation2 + $0xa8] sm:$0xf] }
 0x140   : > { %v6312_v5 = vcombine.low %v1411_v9, %v1421_v22  ;;  %v1429_v45 = vor.u32 %v1428_v42, %v1425_v63  ;;  %v1439_v32 = vor.u32 %v1438_v15, %v1434_v36  ;;  %v1444_v33 = vrot.slane %v1442_v18, 5  ;;  %v2922_v34 = vpop.permute.xlu0 %2921  ;;  %v2144_v38 = vld [vmem:[#allocation2 + $0x9c] sm:$0xf]  ;;  %v897_v47 = vld [vmem:[#allocation2 + $0xb0] sm:$0x1] }
 0x141   : > { %v1793_v28 = vsel %vm7247_vm9, %v6328_v25, %v1792_v14  ;;  %v1794_v26 = vrot.slane %v1792_v14, 4  ;;  %v6329_v11 = vrot.slane %v1646_v2, 9  ;;  %v1799_v16 = vrot.slane %v1647_v20, 5  ;;  %2964 = vst.msk [vmem:[#allocation3 + $0x30] sm:$0xff] %vm2957_vm4, %v2922_v34  ;;  %v2145_v23 = vld [vmem:[#allocation2 + $0xa0] sm:$0xf] }
 0x142   : > { %v1430_v39 = vrot.slane %v1429_v45, 4  ;;  %v1440_v44 = vrot.slane %v1439_v32, 4  ;;  %v1802_v57 = vrot.slane %v1648_v24, 5  ;;  %v700_v48 = vrot.slane %v698_v30, 7  ;;  %v2146_v59 = vld [vmem:[#allocation2 + $0xa4] sm:$0x1] }
 0x143   : > { %1566 = vrot.lane.b32.xlu1 %v6312_v5, %s9136_s16  ;;  %v1796_v40 = vsel %vm7247_vm9, %v1794_v26, %v1795_v27  ;;  %v1800_v46 = vsel %vm7247_vm9, %v6329_v11, %v1799_v16  ;;  %v1801_v60 = vrot.slane %v1799_v16, 4  ;;  %v708_v61 = vrot.slane %v706_v21, 7  ;;  %v2689_v53 = vld [vmem:[#allocation2 + $0x9c] sm:$0xe]  ;;  %v469_v51 = vld [vmem:[%s7241_s14 + $0x70] sm:$0xf] }
 0x144   : > { %v1435_v49 = vsel %vm7254_vm10, %v1430_v39, %v1434_v36  ;;  %v1445_v30 = vsel %vm7254_vm10, %v1440_v44, %v1444_v33  ;;  %v6344_v58 = vcombine.low %v1793_v28, %v1796_v40  ;;  %v703_v50 = vor.u32 %v701_v31, %v700_v48  ;;  %v3100_v43 = vpop.permute.xlu0 %3099  ;;  %v2690_v1 = vld [vmem:[#allocation2 + $0xa0] sm:$0xf]  ;;  %v2691_v8 = vld [vmem:[#allocation2 + $0xa4] sm:$0x1]  ;;  %v470_v36 = vld [vmem:[%s7241_s14 + $0x74] sm:$0xf] }
 0x145   : > { %v6313_v6 = vcombine.low %v1435_v49, %v1445_v30  ;;  %v1803_v54 = vsel %vm7247_vm9, %v1801_v60, %v1802_v57  ;;  %v704_v52 = vrot.slane %v700_v48, 4  ;;  %v709_v21 = vshll.u32 %v7920_v17, 16  ;;  %3142 = vst.msk [vmem:[#allocation3 + $0x30] sm:$0xff] %vm3135_vm5, %v3100_v43  ;;  %v8042_v45 = vld [vmem:[%s7241_s14 + $0x78] sm:$0xf] }
 0x146   : > { %1890 = vrot.lane.b32.xlu0 %v6344_v58, %s9108_s15  ;;  %v6345_v56 = vcombine.low %v1800_v46, %v1803_v54  ;;  %v713_v13 = vrot.slane %v708_v61, 4  ;;  %v894_v31 = vsel %vm7262_vm11, %v703_v50, %v893_v35  ;;  %v2445_v63 = vshrl.u32 %v2144_v38, 16  ;;  %v900_v57 = vld [vmem:[#allocation2 + $0xb4] sm:$0xf] }
 0x147   : > { %1568 = vrot.lane.b32.xlu1 %v6313_v6, %s9136_s16  ;;  %v711_v17 = vor.u32 %v709_v21, %v708_v61  ;;  %895 = vst [vmem:[#allocation2 + $0xa8] sm:$0xf] %v894_v31  ;;  %v2448_v2 = vshll.u32 %v2144_v38, 16  ;;  %v2454_v3 = vshll.u32 %v2145_v23, 16  ;;  %v2458_v4 = vshrl.u32 %v2145_v23, 16 }
 0x148   : > { %v2603_v7 = vpop.permute.xlu1 %2602  ;;  %v2447_v9 = vrot.slane %v2445_v63, 4  ;;  %v2464_v12 = vshll.u32 %v2146_v59, 16  ;;  %v898_v10 = vsel %vm7285_vm13, %v713_v13, %v897_v47  ;;  %v6392_v42 = vrot.slane %v2689_v53, 9 }
 0x149   : > { %2644 = vst.msk [vmem:[#allocation3 + $0x38] sm:$0xff] %vm2636_vm3, %v2603_v7  ;;  %v712_v15 = vsel %vm7270_vm12, %v704_v52, %v711_v17  ;;  %v2450_v18 = vrot.slane %v2448_v2, 5  ;;  %v2456_v20 = vrot.slane %v2454_v3, 5  ;;  %v2460_v22 = vrot.slane %v2458_v4, 4  ;;  %899 = vst [vmem:[#allocation2 + $0xb0] sm:$0x1] %v898_v10 }
 0x14a   : > { %2067 = vrot.lane.b32.xlu0 %v6895_v62, %s7002_s22  ;;  %896 = vst.msk [vmem:[#allocation2 + $0xac] sm:$0xf] %vm385_vm0, %v712_v15  ;;  %v2466_v25 = vrot.slane %v2464_v12, 5  ;;  %v2835_v14 = vrot.slane %v2690_v1, 5  ;;  %v2838_v27 = vrot.slane %v2691_v8, 5  ;;  %v715_v24 = vshrl.u32 %v469_v51, 16 }
 0x14b   : > { %1892 = vrot.lane.b32.xlu1 %v6345_v56, %s9108_s15  ;;  %v2451_v32 = vor.u32 %v2450_v18, %v2447_v9  ;;  %v2461_v33 = vor.u32 %v2460_v22, %v2456_v20  ;;  %v718_v34 = vshll.u32 %v469_v51, 16  ;;  %v723_v28 = vshrl.u32 %v470_v36, 16 }
 0x14c   : > { %v2924_v5 = vpop.permute.xlu1 %2923  ;;  %v2837_v26 = vrot.slane %v2835_v14, 4  ;;  %v717_v11 = vrot.slane %v715_v24, 7  ;;  %v726_v16 = vshll.u32 %v470_v36, 16  ;;  %v732_v48 = vshrl.u32 %v8042_v45, 16 }
 0x14d   : > { %2965 = vst.msk [vmem:[#allocation3 + $0x38] sm:$0xff] %vm2957_vm4, %v2924_v5  ;;  %v2452_v35 = vrot.slane %v2451_v32, 4  ;;  %v2462_v39 = vrot.slane %v2461_v33, 4  ;;  %v8046_v44 = vrot.slane %v723_v28, 7  ;;  %v2836_v40 = vsel %vm7247_vm9, %v6392_v42, %v2835_v14  ;;  %v3645_v49 = vpop.permute.xlu0 %3644  ;;  %v904_v28 = vld [vmem:[#allocation2 + $0xbc] sm:$0x1] }
 0x14e   : > { %v2147_v38 = vld [vmem:[#allocation2 + $0xa8] sm:$0xf]  ;;  %v2839_v46 = vsel %vm7247_vm9, %v2837_v26, %v2838_v27  ;;  %v720_v61 = vor.u32 %v718_v34, %v717_v11  ;;  %3687 = vst.msk [vmem:[#allocation3 + $0x30] sm:$0xff] %vm3680_vm7, %v3645_v49  ;;  %v721_v21 = vrot.slane %v717_v11, 4 }
 0x14f   : > { %v2692_v60 = vld [vmem:[#allocation2 + $0xa8] sm:$0xe]  ;;  %v2457_v30 = vsel %vm7254_vm10, %v2452_v35, %v2456_v20  ;;  %v2467_v58 = vsel %vm7254_vm10, %v2462_v39, %v2466_v25  ;;  %v2469_v50 = vshrl.u32 %v2147_v38, 16  ;;  %v2472_v23 = vshll.u32 %v2147_v38, 16 }
 0x150   : > { %v3102_v47 = vpop.permute.xlu1 %3101  ;;  %v6376_v43 = vcombine.low %v2457_v30, %v2467_v58  ;;  %v2149_v6 = vld [vmem:[#allocation2 + $0xb0] sm:$0x1]  ;;  %v6393_v52 = vrot.slane %v2692_v60, 9  ;;  %v3188_v59 = vld [vmem:[#allocation2 + $0xa8] sm:$0xf]  ;;  %v6408_v62 = vcombine.low %v2836_v40, %v2839_v46  ;;  %v728_v13 = vor.u32 %v726_v16, %v8046_v44 }
 0x151   : > { %3143 = vst.msk [vmem:[#allocation3 + $0x38] sm:$0xff] %vm3135_vm5, %v3102_v47  ;;  %v2694_v54 = vld [vmem:[#allocation2 + $0xb0] sm:$0x1]  ;;  %v6896_v53 = vld [vmem:[#allocation2 + $0xa8] sm:$0xff]   ;;  %v2471_v56 = vrot.slane %v2469_v50, 4  ;;  %v901_v31 = vsel %vm7262_vm11, %v720_v61, %v900_v57  ;;  %v2474_v63 = vrot.slane %v2472_v23, 5  ;;  %v3966_v3 = vpop.permute.xlu0 %3965 }
 0x152   : > { %v2148_v51 = vld [vmem:[#allocation2 + $0xac] sm:$0xf]  ;;  %2612 = vrot.lane.b32.xlu0 %v6376_v43, %s9109_s30  ;;  %v2488_v17 = vshll.u32 %v2149_v6, 16  ;;  %902 = vst [vmem:[#allocation2 + $0xb4] sm:$0xf] %v901_v31  ;;  %2069 = vrot.lane.b32.xlu1 %v6896_v53, %s7002_s22  ;;  %v2845_v8 = vrot.slane %v2694_v54, 5  ;;  %v729_v9 = vsel %vm7270_vm12, %v721_v21, %v728_v13 }
 0x153   : > { %v2478_v1 = vshll.u32 %v2148_v51, 16  ;;  %v2482_v7 = vshrl.u32 %v2148_v51, 16  ;;  %v2693_v2 = vld [vmem:[#allocation2 + $0xac] sm:$0xf]  ;;  %v730_v12 = vrot.slane %v8046_v44, 4  ;;  %4008 = vst.msk [vmem:[#allocation3 + $0x30] sm:$0xff] %vm9137_vm8, %v3966_v3  ;;  %v2475_v10 = vor.u32 %v2474_v63, %v2471_v56 }
 0x154   : > { %v2842_v4 = vrot.slane %v2693_v2, 5  ;;  %v2490_v15 = vrot.slane %v2488_v17, 5  ;;  %903 = vst.msk [vmem:[#allocation2 + $0xb8] sm:$0xf] %vm385_vm0, %v729_v9  ;;  %v3189_v18 = vld [vmem:[#allocation2 + $0xac] sm:$0xf] }
 0x155   : > { %v2480_v42 = vrot.slane %v2478_v1, 5  ;;  %v2484_v36 = vrot.slane %v2482_v7, 4  ;;  %v3190_v25 = vld [vmem:[#allocation2 + $0xb0] sm:$0x1]  ;;  %v3489_v14 = vshrl.u32 %v3188_v59, 16  ;;  %v3492_v27 = vshll.u32 %v3188_v59, 16  ;;  %v3968_v26 = vpop.permute.xlu0 %3967 }
 0x156   : > { %v8071_v20 = vsel %vm7247_vm9, %v6393_v52, %v2842_v4  ;;  %v2844_v22 = vrot.slane %v2842_v4, 4  ;;  %v2476_v24 = vrot.slane %v2475_v10, 4  ;;  %2933 = vrot.lane.b32.xlu0 %v6408_v62, %s7004_s25  ;;  %v6899_v32 = vld [vmem:[#allocation2 + $0xa8] sm:$0xff]   ;;  %v3498_v33 = vshll.u32 %v3189_v18, 16  ;;  %v3647_v57 = vpop.permute.xlu1 %3646  ;;  %v3735_v61 = vld [vmem:[#allocation2 + $0xb0] sm:$0x1] }
 0x157   : > { %v2485_v5 = vor.u32 %v2484_v36, %v2480_v42  ;;  %v3502_v34 = vshrl.u32 %v3189_v18, 16  ;;  %v3491_v16 = vrot.slane %v3489_v14, 4  ;;  %v3494_v35 = vrot.slane %v3492_v27, 5  ;;  %v3733_v44 = vld [vmem:[#allocation2 + $0xa8] sm:$0xe]  ;;  %3688 = vst.msk [vmem:[#allocation3 + $0x38] sm:$0xff] %vm3680_vm7, %v3647_v57 }
 0x158   : > { %v8076_v11 = vsel %vm7247_vm9, %v2844_v22, %v2845_v8  ;;  %v3508_v39 = vshll.u32 %v3190_v25, 16  ;;  %v2481_v38 = vsel %vm7254_vm10, %v2476_v24, %v2480_v42  ;;  %v3500_v46 = vrot.slane %v3498_v33, 5  ;;  %v3734_v60 = vld [vmem:[#allocation2 + $0xac] sm:$0xf]  ;;  %4009 = vst.msk [vmem:[#allocation3 + $0x38] sm:$0xff] %vm9137_vm8, %v3968_v26 }
 0x159   : > { %v2486_v40 = vrot.slane %v2485_v5, 4  ;;  %v6409_v47 = vcombine.low %v8071_v20, %v8076_v11  ;;  %v3495_v49 = vor.u32 %v3494_v35, %v3491_v16  ;;  %v3504_v30 = vrot.slane %v3502_v34, 4  ;;  %v3191_v50 = vld [vmem:[#allocation2 + $0xb4] sm:$0xf]  ;;  %v1101_v52 = vld [vmem:[#allocation2 + $0xa8] sm:$0xf] }
 0x15a   : > { %v905_v58 = vsel %vm7285_vm13, %v730_v12, %v904_v28  ;;  %3111 = vrot.lane.b32.xlu0 %v6899_v32, %s9135_s24  ;;  %v3510_v43 = vrot.slane %v3508_v39, 5  ;;  %v3513_v6 = vshrl.u32 %v3191_v50, 16  ;;  %v3516_v54 = vshll.u32 %v3191_v50, 16  ;;  %v4024_v21 = vld [vmem:[#allocation3 + $0x30] sm:$0xff]  ;;  %v1559_v13 = vpop.permute.xlu1 %1558  ;;  %v1103_v14 = vld [vmem:[#allocation2 + $0xb0] sm:$0x1] }
 0x15b   : > { %v2491_v23 = vsel %vm7254_vm10, %v2486_v40, %v2490_v15  ;;  %906 = vst [vmem:[#allocation2 + $0xbc] sm:$0x1] %v905_v58  ;;  %v3496_v53 = vrot.slane %v3495_v49, 4  ;;  %v3505_v51 = vor.u32 %v3504_v30, %v3500_v46  ;;  %v3192_v56 = vld [vmem:[#allocation2 + $0xb8] sm:$0xf]  ;;  %v6456_v62 = vrot.slane %v3733_v44, 9  ;;  %6683 = vmatprep.mubr.msk.bf16.mxu0 %vm4061_vm6, %v4024_v21 }
 0x15c   : > { %v6377_v59 = vcombine.low %v2481_v38, %v2491_v23  ;;  %v3515_v31 = vrot.slane %v3513_v6, 4  ;;  %v3518_v63 = vrot.slane %v3516_v54, 5  ;;  %v3522_v1 = vshll.u32 %v3192_v56, 16  ;;  %1599 = vst.msk [vmem:[#allocation3 + $0x40] sm:$0xff] %vm1590_vm15, %v1559_v13  ;;  %v1102_v10 = vld [vmem:[#allocation2 + $0xac] sm:$0xf] }
 0x15d   : > { %v3526_v7 = vshrl.u32 %v3192_v56, 16  ;;  %v3501_v17 = vsel %vm7254_vm10, %v3496_v53, %v3500_v46  ;;  %v3506_v2 = vrot.slane %v3505_v51, 4  ;;  %v3879_v3 = vrot.slane %v3734_v60, 5  ;;  %v1883_v36 = vpop.permute.xlu0 %1882  ;;  %v6911_v15 = vld [vmem:[#allocation2 + $0xa8] sm:$0xff]   ;;  %v6900_v18 = vld [vmem:[#allocation2 + $0xb4] sm:$0xff]  }
 0x15e   : > { %2614 = vrot.lane.b32.xlu1 %v6377_v59, %s9109_s30  ;;  %v3882_v4 = vrot.slane %v3735_v61, 5  ;;  %v3519_v8 = vor.u32 %v3518_v63, %v3515_v31  ;;  %v8094_v9 = vrot.slane %v3522_v1, 5  ;;  %v1447_v42 = vshrl.u32 %v1101_v52, 16  ;;  %v1561_v24 = vpop.permute.xlu1 %1560  ;;  %1923 = vst.msk [vmem:[#allocation3 + $0x40] sm:$0xff] %vm1914_vm1, %v1883_v36  ;;  %v3736_v28 = vld [vmem:[#allocation2 + $0xb4] sm:$0xe] }
 0x15f   : > { %v3528_v12 = vrot.slane %v3526_v7, 4  ;;  %v3511_v20 = vsel %vm7254_vm10, %v3506_v2, %v3510_v43  ;;  %v3880_v22 = vsel %vm7247_vm9, %v6456_v62, %v3879_v3  ;;  %v3881_v25 = vrot.slane %v3879_v3, 4  ;;  %v3737_v26 = vld [vmem:[#allocation2 + $0xb8] sm:$0xf]  ;;  %1600 = vst.msk [vmem:[#allocation3 + $0x48] sm:$0xff] %vm1590_vm15, %v1561_v24  ;;  %v4025_v57 = vld [vmem:[#allocation3 + $0x38] sm:$0xff] }
 0x160   : > { %v1450_v27 = vshll.u32 %v1101_v52, 16  ;;  %v6440_v5 = vcombine.low %v3501_v17, %v3511_v20  ;;  %v3520_v32 = vrot.slane %v3519_v8, 4  ;;  %v1449_v34 = vrot.slane %v1447_v42, 4  ;;  %1057 = vst.msk [vmem:[#allocation3 + $0x70] sm:$0xff] %vm1042_vm14, %v6911_v15  ;;  %v1104_v49 = vld [vmem:[#allocation2 + $0xb4] sm:$0xf]  ;;  %6684 = vmatmul.mubr.msk.bf16.gmra.mrb[12].mxu0 %vm4061_vm6, %v4025_v57 }
 0x161   : > { %v3529_v33 = vor.u32 %v3528_v12, %v8094_v9  ;;  %v3883_v16 = vsel %vm7247_vm9, %v3881_v25, %v3882_v4  ;;  %v1456_v39 = vshll.u32 %v1102_v10, 16  ;;  %v1460_v44 = vshrl.u32 %v1102_v10, 16  ;;  %v6912_v6 = vld [vmem:[#allocation2 + $0xb4] sm:$0xff]   ;;  %v1649_v31 = vld [vmem:[#allocation2 + $0xa8] sm:$0xe] }
 0x162   : > { %2935 = vrot.lane.b32.xlu1 %v6409_v47, %s7004_s25  ;;  %v3193_v11 = vld [vmem:[#allocation2 + $0xbc] sm:$0x1]  ;;  %v1452_v35 = vrot.slane %v1450_v27, 5  ;;  %3656 = vrot.lane.b32.xlu0 %v6440_v5, %s7007_s12  ;;  %v3525_v38 = vsel %vm7254_vm10, %v3520_v32, %v8094_v9  ;;  %v6472_v60 = vcombine.low %v3880_v22, %v3883_v16  ;;  %v2060_v47 = vpop.permute.xlu0 %2059  ;;  %v1466_v23 = vshll.u32 %v1103_v14, 16  ;;  %v1885_v43 = vpop.permute.xlu1 %1884  ;;  %v1105_v53 = vld [vmem:[#allocation2 + $0xb8] sm:$0xf] }
 0x163   : > { %v3530_v40 = vrot.slane %v3529_v33, 4  ;;  %v3532_v46 = vshll.u32 %v3193_v11, 16  ;;  %v3738_v61 = vld [vmem:[#allocation2 + $0xbc] sm:$0x1]  ;;  %v1458_v58 = vrot.slane %v1456_v39, 5  ;;  %v1462_v50 = vrot.slane %v1460_v44, 4 }
 0x164   : > { %v1453_v30 = vor.u32 %v1452_v35, %v1449_v34  ;;  %2100 = vst.msk [vmem:[#allocation3 + $0x40] sm:$0xff] %vm2091_vm2, %v2060_v47  ;;  %v6457_v52 = vrot.slane %v3736_v28, 9  ;;  %v3886_v21 = vrot.slane %v3737_v26, 5  ;;  %v3889_v59 = vrot.slane %v3738_v61, 5  ;;  %v1106_v17 = vld [vmem:[#allocation2 + $0xbc] sm:$0x1] }
 0x165   : > { %v3534_v54 = vrot.slane %v3532_v46, 5  ;;  %1924 = vst.msk [vmem:[#allocation3 + $0x48] sm:$0xff] %vm1914_vm1, %v1885_v43  ;;  %v1463_v56 = vor.u32 %v1462_v50, %v1458_v58  ;;  %v1468_v62 = vrot.slane %v1466_v23, 5  ;;  %v1471_v13 = vshrl.u32 %v1104_v49, 16  ;;  %v1650_v3 = vld [vmem:[#allocation2 + $0xac] sm:$0xf] }
 0x166   : > { %3113 = vrot.lane.b32.xlu1 %v6900_v18, %s9135_s24  ;;  %v1454_v51 = vrot.slane %v1453_v30, 4  ;;  %1058 = vst.msk [vmem:[#allocation3 + $0x78] sm:$0xff] %vm1042_vm14, %v6912_v6  ;;  %3977 = vrot.lane.b32.xlu0 %v6472_v60, %s9115_s29  ;;  %v3887_v1 = vsel %vm7247_vm9, %v6457_v52, %v3886_v21  ;;  %v3888_v7 = vrot.slane %v3886_v21, 4  ;;  %v1474_v2 = vshll.u32 %v1104_v49, 16  ;;  %v1651_v10 = vld [vmem:[#allocation2 + $0xb0] sm:$0x1] }
 0x167   : > { %v3535_v63 = vsel %vm7254_vm10, %v3530_v40, %v3534_v54  ;;  %v1464_v9 = vrot.slane %v1463_v56, 4  ;;  %v1473_v12 = vrot.slane %v1471_v13, 4  ;;  %v1480_v15 = vshll.u32 %v1105_v53, 16  ;;  %v1652_v20 = vld [vmem:[#allocation2 + $0xb4] sm:$0xe] }
 0x168   : > { %v6441_v4 = vcombine.low %v3525_v38, %v3535_v63  ;;  %v1459_v8 = vsel %vm7254_vm10, %v1454_v51, %v1458_v58  ;;  %v3890_v42 = vsel %vm7247_vm9, %v3888_v7, %v3889_v59  ;;  %v1476_v36 = vrot.slane %v1474_v2, 5  ;;  %v1653_v24 = vld [vmem:[#allocation2 + $0xb8] sm:$0xf]  ;;  %v1654_v5 = vld [vmem:[#allocation2 + $0xbc] sm:$0x1] }
 0x169   : > { %v1484_v18 = vshrl.u32 %v1105_v53, 16  ;;  %v1469_v22 = vsel %vm7254_vm10, %v1464_v9, %v1468_v62  ;;  %v6473_v25 = vcombine.low %v3887_v1, %v3890_v42  ;;  %v1490_v14 = vshll.u32 %v1106_v17, 16  ;;  %v472_v26 = vld [vmem:[%s7241_s14 + $0x7c] sm:$0xf]  ;;  %v907_v6 = vld [vmem:[#allocation2 + $0xc0] sm:$0xf] }
 0x16a   : > { %3658 = vrot.lane.b32.xlu1 %v6441_v4, %s7007_s12  ;;  %v6330_v27 = vrot.slane %v1649_v31, 9  ;;  %v6314_v32 = vcombine.low %v1459_v8, %v1469_v22  ;;  %v1477_v33 = vor.u32 %v1476_v36, %v1473_v12  ;;  %v1482_v34 = vrot.slane %v1480_v15, 5  ;;  %v2150_v53 = vld [vmem:[#allocation2 + $0xb4] sm:$0xf]  ;;  %v2151_v51 = vld [vmem:[#allocation2 + $0xb8] sm:$0xf] }
 0x16b   : > { %v1486_v28 = vrot.slane %v1484_v18, 4  ;;  %3979 = vrot.lane.b32.xlu0 %v6473_v25, %s9115_s29  ;;  %v1492_v11 = vrot.slane %v1490_v14, 5  ;;  %v1806_v16 = vrot.slane %v1650_v3, 5  ;;  %v1809_v35 = vrot.slane %v1651_v10, 5  ;;  %v2062_v44 = vpop.permute.xlu1 %2061  ;;  %v2605_v57 = vpop.permute.xlu0 %2604  ;;  %v2152_v31 = vld [vmem:[#allocation2 + $0xbc] sm:$0x1] }
 0x16c   : > { %v6331_v39 = vrot.slane %v1652_v20, 9  ;;  %v1478_v38 = vrot.slane %v1477_v33, 4  ;;  %v1813_v46 = vrot.slane %v1653_v24, 5  ;;  %v1816_v60 = vrot.slane %v1654_v5, 5  ;;  %2101 = vst.msk [vmem:[#allocation3 + $0x48] sm:$0xff] %vm2091_vm2, %v2062_v44  ;;  %v6901_v17 = vld [vmem:[#allocation2 + $0xb4] sm:$0xff]  }
 0x16d   : > { %v1487_v40 = vor.u32 %v1486_v28, %v1482_v34  ;;  %2645 = vst.msk [vmem:[#allocation3 + $0x40] sm:$0xff] %vm2636_vm3, %v2605_v57  ;;  %v1807_v61 = vsel %vm7247_vm9, %v6330_v27, %v1806_v16  ;;  %v1808_v49 = vrot.slane %v1806_v16, 4  ;;  %v734_v47 = vrot.slane %v732_v48, 7  ;;  %v2695_v63 = vld [vmem:[#allocation2 + $0xb4] sm:$0xe]  ;;  %s9151_s14 = smov 16  }
 0x16e   : > { %1570 = vrot.lane.b32.xlu1 %v6314_v32, %s9136_s16  ;;  %v735_v30 = vshll.u32 %v8042_v45, 16  ;;  %v1483_v58 = vsel %vm7254_vm10, %v1478_v38, %v1482_v34  ;;  %v1814_v23 = vsel %vm7247_vm9, %v6331_v39, %v1813_v46  ;;  %v1815_v43 = vrot.slane %v1813_v46, 4  ;;  %v911_v4 = vld [vmem:[#allocation2 + $0xc8] sm:$0x1]  ;;  %v3197_v8 = vld [vmem:[#allocation2 + $0xcc] sm:$0xf] }
 0x16f   : > { %v1488_v50 = vrot.slane %v1487_v40, 4  ;;  %v1810_v54 = vsel %vm7247_vm9, %v1808_v49, %v1809_v35  ;;  %v738_v21 = vrot.slane %v734_v47, 4  ;;  %v740_v59 = vshrl.u32 %v472_v26, 16  ;;  %v2926_v48 = vpop.permute.xlu0 %2925  ;;  %v2696_v36 = vld [vmem:[#allocation2 + $0xb8] sm:$0xf] }
 0x170   : > { %v737_v52 = vor.u32 %v735_v30, %v734_v47  ;;  %v6346_v56 = vcombine.low %v1807_v61, %v1810_v54  ;;  %v1817_v62 = vsel %vm7247_vm9, %v1815_v43, %v1816_v60  ;;  %v743_v13 = vshll.u32 %v472_v26, 16  ;;  %2966 = vst.msk [vmem:[#allocation3 + $0x40] sm:$0xff] %vm2957_vm4, %v2926_v48  ;;  %v2697_v22 = vld [vmem:[#allocation2 + $0xbc] sm:$0x1]  ;;  %v8158_v26 = vld [vmem:[#allocation2 + $0xd0] sm:$0xf] }
 0x171   : > { %v1493_v45 = vsel %vm7254_vm10, %v1488_v50, %v1492_v11  ;;  %v6347_v7 = vcombine.low %v1814_v23, %v1817_v62  ;;  %v742_v2 = vrot.slane %v740_v59, 7  ;;  %v2493_v9 = vshrl.u32 %v2150_v53, 16 }
 0x172   : > { %v6315_v1 = vcombine.low %v1483_v58, %v1493_v45  ;;  %v908_v3 = vsel %vm7262_vm11, %v737_v52, %v907_v6  ;;  %1894 = vrot.lane.b32.xlu0 %v6346_v56, %s9108_s15  ;;  %v2496_v12 = vshll.u32 %v2150_v53, 16  ;;  %v2502_v10 = vshll.u32 %v2151_v51, 16 }
 0x173   : > { %909 = vst [vmem:[#allocation2 + $0xc0] sm:$0xf] %v908_v3  ;;  %v2506_v42 = vshrl.u32 %v2151_v51, 16  ;;  %v745_v15 = vor.u32 %v743_v13, %v742_v2  ;;  %v747_v18 = vrot.slane %v742_v2, 4  ;;  %v2512_v20 = vshll.u32 %v2152_v31, 16  ;;  %v3104_v14 = vpop.permute.xlu0 %3103 }
 0x174   : > { %1572 = vrot.lane.b32.xlu1 %v6315_v1, %s9136_s16  ;;  %v6394_v25 = vrot.slane %v2695_v63, 9  ;;  %v2495_v37 = vrot.slane %v2493_v9, 4  ;;  %v2498_v27 = vrot.slane %v2496_v12, 5  ;;  %v2504_v24 = vrot.slane %v2502_v10, 5  ;;  %3144 = vst.msk [vmem:[#allocation3 + $0x40] sm:$0xff] %vm3135_vm5, %v3104_v14  ;;  %s9106_s16 = smov 56  }
 0x175   : > { %v2508_v5 = vrot.slane %v2506_v42, 4  ;;  %v746_v32 = vsel %vm7270_vm12, %v738_v21, %v745_v15  ;;  %v2514_v33 = vrot.slane %v2512_v20, 5  ;;  %v912_v34 = vsel %vm7285_vm13, %v747_v18, %v911_v4 }
 0x176   : > { %v2849_v28 = vrot.slane %v2696_v36, 5  ;;  %2071 = vrot.lane.b32.xlu0 %v6901_v17, %s7002_s22  ;;  %910 = vst.msk [vmem:[#allocation2 + $0xc4] sm:$0xf] %vm385_vm0, %v746_v32  ;;  %v2499_v16 = vor.u32 %v2498_v27, %v2495_v37  ;;  %913 = vst [vmem:[#allocation2 + $0xc8] sm:$0x1] %v912_v34  ;;  %v2852_v39 = vrot.slane %v2697_v22, 5 }
 0x177   : > { %v2607_v11 = vpop.permute.xlu1 %2606  ;;  %v2509_v35 = vor.u32 %v2508_v5, %v2504_v24  ;;  %v3561_v44 = vshrl.u32 %v3197_v8, 16  ;;  %v3564_v55 = vshll.u32 %v3197_v8, 16  ;;  %v3570_v46 = vshll.u32 %v8158_v26, 16  ;;  %vm9138_vm0 = vmmov %vm9137_vm8 }
 0x178   : > { %2646 = vst.msk [vmem:[#allocation3 + $0x48] sm:$0xff] %vm2636_vm3, %v2607_v11  ;;  %1896 = vrot.lane.b32.xlu1 %v6347_v7, %s9108_s15  ;;  %v2851_v41 = vrot.slane %v2849_v28, 4  ;;  %v2500_v57 = vrot.slane %v2499_v16, 4  ;;  %v2850_v61 = vsel %vm7247_vm9, %v6394_v25, %v2849_v28  ;;  %v3574_v59 = vshrl.u32 %v8158_v26, 16  ;;  %v3199_v28 = vld [vmem:[#allocation2 + $0xd4] sm:$0x1]  ;;  %vm9139_vm11 = vmmov %vm9138_vm0 }
 0x179   : > { %v2510_v38 = vrot.slane %v2509_v35, 4  ;;  %v8164_v40 = vrot.slane %v3561_v44, 4  ;;  %v8177_v45 = vrot.slane %v3564_v55, 5  ;;  %vm4460_vm12 = vcmask 60416   ;;  %vm9140_vm14 = vmmov %vm9138_vm0 }
 0x17a   : > { %v2153_v60 = vld [vmem:[#allocation2 + $0xc0] sm:$0xf]  ;;  %v2853_v49 = vsel %vm7247_vm9, %v2851_v41, %v2852_v39  ;;  %v2505_v58 = vsel %vm7254_vm10, %v2500_v57, %v2504_v24  ;;  %vm4462_vm13 = vcmask 57344   ;;  %4461 = vst.msk [vmem:[#allocation6] sm:$0xf] %vm4460_vm12, %v6999_v0  ;;  %vm9141_vm8 = vmmov %vm9138_vm0 }
 0x17b   : > { %v2698_v47 = vld [vmem:[#allocation2 + $0xc0] sm:$0xe]  ;;  %v2928_v30 = vpop.permute.xlu1 %2927  ;;  %v2515_v50 = vsel %vm7254_vm10, %v2510_v38, %v2514_v33  ;;  %v2517_v23 = vshrl.u32 %v2153_v60, 16  ;;  %v2520_v43 = vshll.u32 %v2153_v60, 16  ;;  %v3649_v56 = vpop.permute.xlu0 %3648  ;;  %v6410_v31 = vcombine.low %v2850_v61, %v2853_v49  ;;  %4463 = vst.msk [vmem:[#allocation6 + $0x4] sm:$0x1] %vm4462_vm13, %v6999_v0 }
 0x17c   : > { %v3194_v6 = vld [vmem:[#allocation2 + $0xc0] sm:$0xf]  ;;  %2967 = vst.msk [vmem:[#allocation3 + $0x48] sm:$0xff] %vm2957_vm4, %v2928_v30  ;;  %v6378_v54 = vcombine.low %v2505_v58, %v2515_v50  ;;  %v6395_v52 = vrot.slane %v2698_v47, 9  ;;  %v3567_v11 = vor.u32 %v8177_v45, %v8164_v40  ;;  %v3572_v61 = vrot.slane %v3570_v46, 5 }
 0x17d   : > { %v3537_v21 = vshrl.u32 %v3194_v6, 16  ;;  %v2519_v53 = vrot.slane %v2517_v23, 4  ;;  %v2522_v51 = vrot.slane %v2520_v43, 5  ;;  %v3540_v48 = vshll.u32 %v3194_v6, 16  ;;  %v6902_v62 = vld [vmem:[#allocation2 + $0xc0] sm:$0xff]   ;;  %3689 = vst.msk [vmem:[#allocation3 + $0x40] sm:$0xff] %vm3680_vm7, %v3649_v56 }
 0x17e   : > { %2616 = vrot.lane.b32.xlu0 %v6378_v54, %s9109_s30  ;;  %v2154_v13 = vld [vmem:[#allocation2 + $0xc4] sm:$0xf]  ;;  %v2155_v7 = vld [vmem:[#allocation2 + $0xc8] sm:$0x1]  ;;  %2073 = vrot.lane.b32.xlu1 %v6902_v62, %s7002_s22  ;;  %v3739_v41 = vld [vmem:[#allocation2 + $0xc0] sm:$0xe] }
 0x17f   : > { %v3539_v63 = vrot.slane %v3537_v21, 4  ;;  %v3106_v1 = vpop.permute.xlu1 %3105  ;;  %v2523_v17 = vor.u32 %v2522_v51, %v2519_v53  ;;  %v2526_v2 = vshll.u32 %v2154_v13, 16  ;;  %v2530_v3 = vshrl.u32 %v2154_v13, 16  ;;  %v2699_v4 = vld [vmem:[#allocation2 + $0xc4] sm:$0xf]  ;;  %v3970_v18 = vpop.permute.xlu0 %3969  ;;  %s9152_s22 = smov 56  }
 0x180   : > { %3145 = vst.msk [vmem:[#allocation3 + $0x48] sm:$0xff] %vm3135_vm5, %v3106_v1  ;;  %v2536_v8 = vshll.u32 %v2155_v7, 16  ;;  %v2700_v9 = vld [vmem:[#allocation2 + $0xc8] sm:$0x1]  ;;  %v2856_v12 = vrot.slane %v2699_v4, 5  ;;  %v6905_v22 = vld [vmem:[#allocation2 + $0xc0] sm:$0xff]  }
 0x181   : > { %v2524_v10 = vrot.slane %v2523_v17, 4  ;;  %v2528_v42 = vrot.slane %v2526_v2, 5  ;;  %v2532_v36 = vrot.slane %v2530_v3, 4  ;;  %v2859_v15 = vrot.slane %v2700_v9, 5  ;;  %v3195_v25 = vld [vmem:[#allocation2 + $0xc4] sm:$0xf] }
 0x182   : > { %2937 = vrot.lane.b32.xlu0 %v6410_v31, %s7004_s25  ;;  %v2858_v20 = vrot.slane %v2856_v12, 4  ;;  %v3196_v14 = vld [vmem:[#allocation2 + $0xc8] sm:$0x1]  ;;  %4010 = vst.msk [vmem:[#allocation3 + $0x40] sm:$0xff] %vm9138_vm0, %v3970_v18  ;;  %v2538_v27 = vrot.slane %v2536_v8, 5  ;;  %v3542_v24 = vrot.slane %v3540_v48, 5  ;;  %v2857_v32 = vsel %vm7247_vm9, %v6395_v52, %v2856_v12 }
 0x183   : > { %v2533_v37 = vor.u32 %v2532_v36, %v2528_v42  ;;  %v3546_v5 = vshll.u32 %v3195_v25, 16  ;;  %v3550_v33 = vshrl.u32 %v3195_v25, 16  ;;  %v3556_v34 = vshll.u32 %v3196_v14, 16  ;;  %v3740_v55 = vld [vmem:[#allocation2 + $0xc4] sm:$0xf]  ;;  %v3972_v57 = vpop.permute.xlu0 %3971  ;;  %v6906_v9 = vld [vmem:[#allocation2 + $0xcc] sm:$0xff]  }
 0x184   : > { %v2529_v16 = vsel %vm7254_vm10, %v2524_v10, %v2528_v42  ;;  %v3543_v39 = vor.u32 %v3542_v24, %v3539_v63  ;;  %v2860_v38 = vsel %vm7247_vm9, %v2858_v20, %v2859_v15  ;;  %v3576_v49 = vrot.slane %v3574_v59, 4  ;;  %v3741_v40 = vld [vmem:[#allocation2 + $0xc8] sm:$0x1]  ;;  %v3651_v47 = vpop.permute.xlu1 %3650  ;;  %v3743_v21 = vld [vmem:[#allocation2 + $0xd0] sm:$0xf] }
 0x185   : > { %v2534_v35 = vrot.slane %v2533_v37, 4  ;;  %v3548_v44 = vrot.slane %v3546_v5, 5  ;;  %v3552_v60 = vrot.slane %v3550_v33, 4  ;;  %v3558_v50 = vrot.slane %v3556_v34, 5  ;;  %3690 = vst.msk [vmem:[#allocation3 + $0x48] sm:$0xff] %vm3680_vm7, %v3651_v47 }
 0x186   : > { %3115 = vrot.lane.b32.xlu0 %v6905_v22, %s9135_s24  ;;  %v3544_v58 = vrot.slane %v3543_v39, 4  ;;  %v3580_v23 = vshll.u32 %v3199_v28, 16  ;;  %v3577_v54 = vor.u32 %v3576_v49, %v3572_v61  ;;  %v6458_v52 = vrot.slane %v3739_v41, 9  ;;  %4011 = vst.msk [vmem:[#allocation3 + $0x48] sm:$0xff] %vm9139_vm11, %v3972_v57  ;;  %v3742_v63 = vld [vmem:[#allocation2 + $0xcc] sm:$0xe] }
 0x187   : > { %v2539_v30 = vsel %vm7254_vm10, %v2534_v35, %v2538_v27  ;;  %v3553_v6 = vor.u32 %v3552_v60, %v3548_v44  ;;  %v3893_v26 = vrot.slane %v3740_v55, 5  ;;  %v3896_v46 = vrot.slane %v3741_v40, 5  ;;  %v3744_v2 = vld [vmem:[#allocation2 + $0xd4] sm:$0x1]  ;;  %4464 = vst.msk [vmem:[#allocation6 + $0x8] sm:$0xf] %vm4460_vm12, %v6999_v0 }
 0x188   : > { %v6379_v43 = vcombine.low %v2529_v16, %v2539_v30  ;;  %v6411_v53 = vcombine.low %v2857_v32, %v2860_v38  ;;  %v3549_v51 = vsel %vm7254_vm10, %v3544_v58, %v3548_v44  ;;  %v3568_v45 = vrot.slane %v3567_v11, 4  ;;  %v1563_v56 = vpop.permute.xlu1 %1562  ;;  %4465 = vst.msk [vmem:[#allocation6 + $0xc] sm:$0x1] %vm4462_vm13, %v6999_v0  ;;  %4467 = vst.msk [vmem:[#allocation6 + $0x14] sm:$0x1] %vm4462_vm13, %v6999_v0 }
 0x189   : > { %v4026_v59 = vld [vmem:[#allocation3 + $0x40] sm:$0xff]  ;;  %v3554_v48 = vrot.slane %v3553_v6, 4  ;;  %v3578_v62 = vrot.slane %v3577_v54, 4  ;;  %v3582_v13 = vrot.slane %v3580_v23, 5  ;;  %v3895_v31 = vrot.slane %v3893_v26, 4  ;;  %1601 = vst.msk [vmem:[#allocation3 + $0x50] sm:$0xff] %vm1590_vm15, %v1563_v56 }
 0x18a   : > { %2618 = vrot.lane.b32.xlu1 %v6379_v43, %s9109_s30  ;;  %6687 = vmatprep.mubr.msk.bf16.mxu0 %vm4061_vm6, %v4026_v59  ;;  %v3900_v1 = vrot.slane %v3743_v21, 5  ;;  %v3894_v17 = vsel %vm7247_vm9, %v6458_v52, %v3893_v26  ;;  %v1887_v3 = vpop.permute.xlu0 %1886  ;;  %v3573_v12 = vsel %vm7254_vm10, %v3568_v45, %v3572_v61  ;;  %v6459_v10 = vrot.slane %v3742_v63, 9  ;;  %4466 = vst.msk [vmem:[#allocation6 + $0x10] sm:$0xf] %vm4460_vm12, %v6999_v0  ;;  %v8298_v52 = vld [vmem:[%s9087_s2] ss:$0 sm:$0xff] }
 0x18b   : > { %v3559_v7 = vsel %vm7254_vm10, %v3554_v48, %v3558_v50  ;;  %v3897_v8 = vsel %vm7247_vm9, %v3895_v31, %v3896_v46  ;;  %1925 = vst.msk [vmem:[#allocation3 + $0x50] sm:$0xff] %vm1914_vm1, %v1887_v3  ;;  %v3583_v36 = vsel %vm7254_vm10, %v3578_v62, %v3582_v13  ;;  %v3903_v20 = vrot.slane %v3744_v2, 5 }
 0x18c   : > { %v6442_v4 = vcombine.low %v3549_v51, %v3559_v7  ;;  %v1565_v42 = vpop.permute.xlu1 %1564  ;;  %v6474_v15 = vcombine.low %v3894_v17, %v3897_v8  ;;  %v3902_v18 = vrot.slane %v3900_v1, 4  ;;  %v6443_v14 = vcombine.low %v3573_v12, %v3583_v36  ;;  %4468 = vst.msk [vmem:[#allocation6 + $0x18] sm:$0xf] %vm4460_vm12, %v6999_v0  ;;  %4470 = vst.msk [vmem:[#allocation6 + $0x20] sm:$0xf] %vm4460_vm12, %v6999_v0 }
 0x18d   : > { %1602 = vst.msk [vmem:[#allocation3 + $0x58] sm:$0xff] %vm1590_vm15, %v1565_v42  ;;  %v4027_v22 = vld [vmem:[#allocation3 + $0x48] sm:$0xff]  ;;  %v3901_v27 = vsel %vm7247_vm9, %v6459_v10, %v3900_v1  ;;  %vm4307_vm11 = vcmask 64512  }
 0x18e   : > { %2939 = vrot.lane.b32.xlu1 %v6411_v53, %s7004_s25  ;;  %3660 = vrot.lane.b32.xlu0 %v6442_v4, %s7007_s12  ;;  %v2064_v25 = vpop.permute.xlu0 %2063  ;;  %v3904_v24 = vsel %vm7247_vm9, %v3902_v18, %v3903_v20  ;;  %4469 = vst.msk [vmem:[#allocation6 + $0x1c] sm:$0x1] %vm4462_vm13, %v6999_v0  ;;  %4471 = vst.msk [vmem:[#allocation6 + $0x24] sm:$0x1] %vm4462_vm13, %v6999_v0  ;;  %s7008_s25 = smov 40  }
 0x18f   : > { %6688 = vmatmul.mubr.msk.bf16.gmra.mrb[16].mxu0 %vm4061_vm6, %v4027_v22  ;;  %2102 = vst.msk [vmem:[#allocation3 + $0x50] sm:$0xff] %vm2091_vm2, %v2064_v25  ;;  %v6475_v5 = vcombine.low %v3901_v27, %v3904_v24 }
 0x190   : > { %v1889_v37 = vpop.permute.xlu1 %1888  ;;  %4472 = vst.msk [vmem:[#allocation6 + $0x28] sm:$0xf] %vm4460_vm12, %v6999_v0  ;;  %4474 = vst.msk [vmem:[#allocation6 + $0x30] sm:$0xf] %vm4460_vm12, %v6999_v0 }
 0x191   : > { %1926 = vst.msk [vmem:[#allocation3 + $0x58] sm:$0xff] %vm1914_vm1, %v1889_v37 }
 0x192   : > { %3117 = vrot.lane.b32.xlu1 %v6906_v9, %s9135_s24  ;;  %3981 = vrot.lane.b32.xlu0 %v6474_v15, %s9115_s29  ;;  %4473 = vst.msk [vmem:[#allocation6 + $0x2c] sm:$0x1] %vm4462_vm13, %v6999_v0  ;;  %4475 = vst.msk [vmem:[#allocation6 + $0x34] sm:$0x1] %vm4462_vm13, %v6999_v0 }
 0x193   : > { %4476 = vst.msk [vmem:[#allocation6 + $0x38] sm:$0xf] %vm4460_vm12, %v6999_v0  ;;  %4478 = vst.msk [vmem:[#allocation6 + $0x40] sm:$0xf] %vm4460_vm12, %v6999_v0 }
 0x194   : > { %4477 = vst.msk [vmem:[#allocation6 + $0x3c] sm:$0x1] %vm4462_vm13, %v6999_v0  ;;  %4479 = vst.msk [vmem:[#allocation6 + $0x44] sm:$0x1] %vm4462_vm13, %v6999_v0 }
 0x195   : > { %4480 = vst.msk [vmem:[#allocation6 + $0x48] sm:$0xf] %vm4460_vm12, %v6999_v0 }
 0x196   : > { %3662 = vrot.lane.b32.xlu1 %v6443_v14, %s7007_s12  ;;  %4481 = vst.msk [vmem:[#allocation6 + $0x4c] sm:$0x1] %vm4462_vm13, %v6999_v0  ;;  %v2609_v32 = vpop.permute.xlu0 %2608  ;;  %s9114_s12 = smov 48  }
 0x197   : > { %2647 = vst.msk [vmem:[#allocation3 + $0x50] sm:$0xff] %vm2636_vm3, %v2609_v32 }
 0x198   : > { %v2066_v33 = vpop.permute.xlu1 %2065 }
 0x199   : > { %2103 = vst.msk [vmem:[#allocation3 + $0x58] sm:$0xff] %vm2091_vm2, %v2066_v33 }
 0x19a   : > { %3983 = vrot.lane.b32.xlu1 %v6475_v5, %s9115_s29  ;;  %v2930_v34 = vpop.permute.xlu0 %2929 }
 0x19b   : > { %2968 = vst.msk [vmem:[#allocation3 + $0x50] sm:$0xff] %vm2957_vm4, %v2930_v34 }
 0x19e   : > { %v3108_v28 = vpop.permute.xlu0 %3107 }
 0x19f   : > { %3146 = vst.msk [vmem:[#allocation3 + $0x50] sm:$0xff] %vm3135_vm5, %v3108_v28 }
 0x1a4   : > { %v2611_v11 = vpop.permute.xlu1 %2610 }
 0x1a5   : > { %2648 = vst.msk [vmem:[#allocation3 + $0x58] sm:$0xff] %vm2636_vm3, %v2611_v11 }
 0x1a8   : > { %v2932_v16 = vpop.permute.xlu1 %2931 }
 0x1a9   : > { %2969 = vst.msk [vmem:[#allocation3 + $0x58] sm:$0xff] %vm2957_vm4, %v2932_v16  ;;  %v3653_v0 = vpop.permute.xlu0 %3652 }
 0x1aa   : > { %3691 = vst.msk [vmem:[#allocation3 + $0x50] sm:$0xff] %vm3680_vm7, %v3653_v0 }
 0x1ac   : > { %v3110_v35 = vpop.permute.xlu1 %3109 }
 0x1ad   : > { %3147 = vst.msk [vmem:[#allocation3 + $0x58] sm:$0xff] %vm3135_vm5, %v3110_v35  ;;  %v3974_v39 = vpop.permute.xlu0 %3973 }
 0x1ae   : > { %4012 = vst.msk [vmem:[#allocation3 + $0x50] sm:$0xff] %vm9140_vm14, %v3974_v39  ;;  %vm9142_vm14 = vmmov %vm9138_vm0 }
 0x1b1   : > { %v3655_v44 = vpop.permute.xlu1 %3654  ;;  %v3976_v41 = vpop.permute.xlu0 %3975 }
 0x1b2   : > { %3692 = vst.msk [vmem:[#allocation3 + $0x58] sm:$0xff] %vm3680_vm7, %v3655_v44 }
 0x1b3   : > { %4013 = vst.msk [vmem:[#allocation3 + $0x58] sm:$0xff] %vm9141_vm8, %v3976_v41 }
 0x1b5   : > { %v1567_v55 = vpop.permute.xlu1 %1566  ;;  %v4028_v57 = vld [vmem:[#allocation3 + $0x50] sm:$0xff] }
 0x1b6   : > { %1603 = vst.msk [vmem:[#allocation3 + $0x60] sm:$0xff] %vm1590_vm15, %v1567_v55  ;;  %6691 = vmatprep.mubr.msk.bf16.mxu0 %vm4061_vm6, %v4028_v57 }
 0x1b8   : > { %v1891_v38 = vpop.permute.xlu0 %1890 }
 0x1b9   : > { %v1569_v60 = vpop.permute.xlu1 %1568  ;;  %1927 = vst.msk [vmem:[#allocation3 + $0x60] sm:$0xff] %vm1914_vm1, %v1891_v38 }
 0x1ba   : > { %1604 = vst.msk [vmem:[#allocation3 + $0x68] sm:$0xff] %vm1590_vm15, %v1569_v60  ;;  %v4029_v61 = vld [vmem:[#allocation3 + $0x58] sm:$0xff] }
 0x1bb   : > { %6692 = vmatmul.mubr.msk.bf16.gmra.mrb[20].mxu0 %vm4061_vm6, %v4029_v61 }
 0x1bc   : > { %v2068_v49 = vpop.permute.xlu0 %2067 }
 0x1bd   : > { %v1893_v40 = vpop.permute.xlu1 %1892  ;;  %2104 = vst.msk [vmem:[#allocation3 + $0x60] sm:$0xff] %vm2091_vm2, %v2068_v49 }
 0x1be   : > { %1928 = vst.msk [vmem:[#allocation3 + $0x68] sm:$0xff] %vm1914_vm1, %v1893_v40 }
 0x1c4   : > { %v2613_v47 = vpop.permute.xlu0 %2612  ;;  %v2070_v30 = vpop.permute.xlu1 %2069 }
 0x1c5   : > { %2649 = vst.msk [vmem:[#allocation3 + $0x60] sm:$0xff] %vm2636_vm3, %v2613_v47 }
 0x1c6   : > { %2105 = vst.msk [vmem:[#allocation3 + $0x68] sm:$0xff] %vm2091_vm2, %v2070_v30 }
 0x1c8   : > { %v2934_v58 = vpop.permute.xlu0 %2933 }
 0x1c9   : > { %2970 = vst.msk [vmem:[#allocation3 + $0x60] sm:$0xff] %vm2957_vm4, %v2934_v58 }
 0x1cc   : > { %v3112_v50 = vpop.permute.xlu0 %3111 }
 0x1cd   : > { %3148 = vst.msk [vmem:[#allocation3 + $0x60] sm:$0xff] %vm3135_vm5, %v3112_v50 }
 0x1d0   : > { %v2615_v23 = vpop.permute.xlu1 %2614 }
 0x1d1   : > { %2650 = vst.msk [vmem:[#allocation3 + $0x68] sm:$0xff] %vm2636_vm3, %v2615_v23 }
 0x1d4   : > { %v2936_v43 = vpop.permute.xlu1 %2935  ;;  %v3657_v6 = vpop.permute.xlu0 %3656 }
 0x1d5   : > { %2971 = vst.msk [vmem:[#allocation3 + $0x68] sm:$0xff] %vm2957_vm4, %v2936_v43 }
 0x1d6   : > { %3693 = vst.msk [vmem:[#allocation3 + $0x60] sm:$0xff] %vm3680_vm7, %v3657_v6 }
 0x1d8   : > { %v3114_v54 = vpop.permute.xlu1 %3113  ;;  %v3978_v21 = vpop.permute.xlu0 %3977 }
 0x1d9   : > { %3149 = vst.msk [vmem:[#allocation3 + $0x68] sm:$0xff] %vm3135_vm5, %v3114_v54  ;;  %v6673_v26 = vpop.f32.mrb[0].mxu0  ;;  %v4597_v54 = vld [vmem:[#allocation6 + $0x8] sm:$0xf] }
 0x1da   : > { %4014 = vst.msk [vmem:[#allocation3 + $0x60] sm:$0xff] %vm9138_vm0, %v3978_v21  ;;  %v4157_v46 = vadd.f32 %v6673_v26, %v8298_v52  ;;  %v4148_v59 = vpop.f32.mrb[1].mxu0  ;;  %v4602_v21 = vld [vmem:[#allocation6 + $0xc] sm:$0x1] }
 0x1db   : > { %v4149_v51 = vadd.f32 %v8298_v52, %v4148_v59  ;;  %v6674_v48 = vpop.f32.mrb[2].mxu0 }
 0x1dc   : > { %v3659_v53 = vpop.permute.xlu1 %3658  ;;  %v4277_v45 = vmax.f32 %v4157_v46, 0.0  ;;  %v4160_v56 = vadd.f32 %v6674_v48, %v8298_v52  ;;  %v4151_v62 = vpop.f32.mrb[3].mxu0  ;;  %v4683_v48 = vld [vmem:[#allocation6] sm:$0xf] }
 0x1dd   : > { %3694 = vst.msk [vmem:[#allocation3 + $0x68] sm:$0xff] %vm3680_vm7, %v3659_v53  ;;  %v3980_v13 = vpop.permute.xlu0 %3979  ;;  %v4275_v31 = vmax.f32 %v4149_v51, 0.0  ;;  %v4152_v63 = vadd.f32 %v8298_v52, %v4151_v62 }
 0x1de   : > { %4015 = vst.msk [vmem:[#allocation3 + $0x68] sm:$0xff] %vm9142_vm14, %v3980_v13  ;;  %v4278_v1 = vmax.f32 %v4160_v56, 0.0  ;;  %v4700_v13 = vshrl.u32 %v4683_v48, 16  ;;  %vm5584_vm14 = vcmask 1043456  }
 0x1df   : > { %4310 = vst.msk [vmem:[#allocation4 + $0x10] sm:$0xff] %vm4307_vm11, %v4277_v45  ;;  %4308 = vst.msk [vmem:[#allocation4] sm:$0xff] %vm4307_vm11, %v4275_v31  ;;  %v4276_v17 = vmax.f32 %v4152_v63, 0.0  ;;  %v4703_v31 = vshll.u32 %v4683_v48, 16 }
 0x1e0   : > { %v1571_v7 = vpop.permute.xlu1 %1570  ;;  %4311 = vst.msk [vmem:[#allocation4 + $0x18] sm:$0xff] %vm4307_vm11, %v4278_v1  ;;  %v4840_v1 = vld [vmem:[#allocation6] sm:$0xe] }
 0x1e1   : > { %1605 = vst.msk [vmem:[#allocation3 + $0x70] sm:$0xff] %vm1590_vm15, %v1571_v7  ;;  %v4030_v2 = vld [vmem:[#allocation3 + $0x60] sm:$0xff]  ;;  %v6677_v3 = vpop.f32.mrb[4].mxu0 }
 0x1e2   : > { %6695 = vmatprep.mubr.msk.bf16.mxu0 %vm4061_vm6, %v4030_v2  ;;  %4309 = vst.msk [vmem:[#allocation4 + $0x8] sm:$0xff] %vm4307_vm11, %v4276_v17  ;;  %v4173_v4 = vadd.f32 %v6677_v3, %v8298_v52  ;;  %v4164_v8 = vpop.f32.mrb[5].mxu0  ;;  %v4841_v7 = vld [vmem:[#allocation6 + $0x4] sm:$0x1] }
 0x1e3   : > { %v4165_v9 = vadd.f32 %v8298_v52, %v4164_v8  ;;  %v6678_v12 = vpop.f32.mrb[6].mxu0  ;;  %v4605_v8 = vld [vmem:[#allocation6 + $0x10] sm:$0xf] }
 0x1e4   : > { %v1895_v10 = vpop.permute.xlu0 %1894  ;;  %v4281_v42 = vmax.f32 %v4173_v4, 0.0  ;;  %v4176_v36 = vadd.f32 %v6678_v12, %v8298_v52  ;;  %v4167_v15 = vpop.f32.mrb[7].mxu0  ;;  %v6512_v12 = vrot.slane %v4840_v1, 9 }
 0x1e5   : > { %1929 = vst.msk [vmem:[#allocation3 + $0x70] sm:$0xff] %vm1914_vm1, %v1895_v10  ;;  %v4031_v20 = vld [vmem:[#allocation3 + $0x68] sm:$0xff]  ;;  %v4279_v22 = vmax.f32 %v4165_v9, 0.0  ;;  %v4168_v25 = vadd.f32 %v8298_v52, %v4167_v15  ;;  %v4684_v9 = vld [vmem:[#allocation6 + $0x4] sm:$0x1]  ;;  %v4874_v10 = vrot.slane %v4841_v7, 5 }
 0x1e6   : > { %v1573_v18 = vpop.permute.xlu1 %1572  ;;  %6696 = vmatmul.mubr.msk.bf16.gmra.mrb[24].mxu0 %vm4061_vm6, %v4031_v20  ;;  %4314 = vst.msk [vmem:[#allocation4 + $0x30] sm:$0xff] %vm4307_vm11, %v4281_v42  ;;  %v4282_v14 = vmax.f32 %v4176_v36, 0.0  ;;  %v4702_v42 = vrot.slane %v4700_v13, 4  ;;  %v4705_v36 = vrot.slane %v4703_v31, 5  ;;  %v4608_v15 = vld [vmem:[#allocation6 + $0x14] sm:$0x1] }
 0x1e7   : > { %1606 = vst.msk [vmem:[#allocation3 + $0x78] sm:$0xff] %vm1590_vm15, %v1573_v18  ;;  %v4342_v37 = vld [vmem:[#allocation4 + $0x10] ss:$2 sm:$0xff]  ;;  %v4374_v27 = vld [vmem:[#allocation4 + $0x11] ss:$2 sm:$0xff]  ;;  %v4280_v24 = vmax.f32 %v4168_v25, 0.0 }
 0x1e8   : > { %4312 = vst.msk [vmem:[#allocation4 + $0x20] sm:$0xff] %vm4307_vm11, %v4279_v22  ;;  %v2072_v5 = vpop.permute.xlu0 %2071  ;;  %v4404_v32 = vmax.f32 %v4342_v37, %v4374_v27  ;;  %4315 = vst.msk [vmem:[#allocation4 + $0x38] sm:$0xff] %vm4307_vm11, %v4282_v14  ;;  %vm9143_vm15 = vsmask.f32 7938  ;;  %v4709_v14 = vshll.u32 %v4684_v9, 16 }
 0x1e9   : > { %v4340_v33 = vld [vmem:[#allocation4] ss:$2 sm:$0xff]  ;;  %v4372_v34 = vld [vmem:[#allocation4 + $0x1] ss:$2 sm:$0xff]  ;;  %2106 = vst.msk [vmem:[#allocation3 + $0x70] sm:$0xff] %vm2091_vm2, %v2072_v5 }
 0x1ea   : > { %v1897_v28 = vpop.permute.xlu1 %1896  ;;  %v4403_v11 = vmax.f32 %v4340_v33, %v4372_v34  ;;  %4313 = vst.msk [vmem:[#allocation4 + $0x28] sm:$0xff] %vm4307_vm11, %v4280_v24  ;;  %4420 = vst.msk [vmem:[#allocation5 + $0x8] sm:$0xff] %vm4307_vm11, %v4404_v32  ;;  %v4875_v32 = vsel %vm7247_vm9, %v6512_v12, %v4874_v10 }
 0x1eb   : > { %1930 = vst.msk [vmem:[#allocation3 + $0x78] sm:$0xff] %vm1914_vm1, %v1897_v28  ;;  %vm8337_vm1 = vmand %vm4460_vm12, %vm9143_vm15  ;;  %vm5130_vm12 = vcmask 326912   ;;  %vm5426_vm15 = vcmask 523712  }
 0x1ec   : > { %4419 = vst.msk [vmem:[#allocation5] sm:$0xff] %vm4307_vm11, %v4403_v11 }
 0x1ef   : > { %v4346_v0 = vld [vmem:[#allocation4 + $0x30] ss:$2 sm:$0xff]  ;;  %v4378_v35 = vld [vmem:[#allocation4 + $0x31] ss:$2 sm:$0xff] }
 0x1f0   : > { %v2617_v16 = vpop.permute.xlu0 %2616  ;;  %v4406_v39 = vmax.f32 %v4346_v0, %v4378_v35  ;;  %v2074_v55 = vpop.permute.xlu1 %2073 }
 0x1f1   : > { %2651 = vst.msk [vmem:[#allocation3 + $0x70] sm:$0xff] %vm2636_vm3, %v2617_v16  ;;  %v4344_v44 = vld [vmem:[#allocation4 + $0x20] ss:$2 sm:$0xff]  ;;  %v4376_v41 = vld [vmem:[#allocation4 + $0x21] ss:$2 sm:$0xff]  ;;  %v4706_v16 = vor.u32 %v4705_v36, %v4702_v42 }
 0x1f2   : > { %v4405_v57 = vmax.f32 %v4344_v44, %v4376_v41  ;;  %v4444_v38 = vld [vmem:[#allocation5 + $0x8] sm:$0xff]  ;;  %2107 = vst.msk [vmem:[#allocation3 + $0x78] sm:$0xff] %vm2091_vm2, %v2074_v55  ;;  %vm9146_vm2 = vsmask.f32 256 }
 0x1f3   : > { %4422 = vst.msk [vmem:[#allocation5 + $0x18] sm:$0xff] %vm4307_vm11, %v4406_v39  ;;  %v4435_v60 = vld [vmem:[#allocation5] sm:$0xff]  ;;  %vm8343_vm8 = vmand %vm4462_vm13, %vm9146_vm2  ;;  %vm5223_vm13 = vcmask 392512   ;;  %vm5519_vm2 = vcmask 589312  }
 0x1f4   : > { %v2938_v61 = vpop.permute.xlu0 %2937  ;;  %4421 = vst.msk [vmem:[#allocation5 + $0x10] sm:$0xff] %vm4307_vm11, %v4405_v57  ;;  %v4452_v49 = vmax.f32 %v4435_v60, %v4444_v38 }
 0x1f5   : > { %2972 = vst.msk [vmem:[#allocation3 + $0x70] sm:$0xff] %vm2957_vm4, %v2938_v61 }
 0x1f6   : > { %v6580_v40 = vpack.c.bf16 %v4452_v49, %v4452_v49 }
 0x1f8   : > { %v3116_v47 = vpop.permute.xlu0 %3115  ;;  %v4515_v30 = vshrl.u32 %v6580_v40, 16  ;;  %v4518_v23 = vshll.u32 %v6580_v40, 16 }
 0x1f9   : > { %3150 = vst.msk [vmem:[#allocation3 + $0x70] sm:$0xff] %vm3135_vm5, %v3116_v47 }
 0x1fa   : > { %v4517_v50 = vrot.slane %v4515_v30, 7  ;;  %v4445_v6 = vld [vmem:[#allocation5 + $0x18] sm:$0xff]  ;;  %v4707_v30 = vrot.slane %v4706_v16, 4 }
 0x1fb   : > { %v4436_v26 = vld [vmem:[#allocation5 + $0x10] sm:$0xff] }
 0x1fc   : > { %v2619_v46 = vpop.permute.xlu1 %2618  ;;  %v4520_v59 = vor.u32 %v4518_v23, %v4517_v50  ;;  %v4521_v53 = vrot.slane %v4517_v50, 4  ;;  %v4453_v51 = vmax.f32 %v4436_v26, %v4445_v6  ;;  %v4711_v50 = vrot.slane %v4709_v14, 5 }
 0x1fd   : > { %2652 = vst.msk [vmem:[#allocation3 + $0x78] sm:$0xff] %vm2636_vm3, %v2619_v46  ;;  %vm9149_vm3 = vmmov %vm9138_vm0 }
 0x1fe   : > { %v4598_v45 = vsel %vm8337_vm1, %v4520_v59, %v4597_v54  ;;  %v4603_v56 = vsel %vm8343_vm8, %v4521_v53, %v4602_v21  ;;  %v6581_v62 = vpack.c.bf16 %v4453_v51, %v4453_v51  ;;  %v4712_v1 = vsel %vm7254_vm10, %v4707_v30, %v4711_v50 }
 0x1ff   : > { %4599 = vst [vmem:[#allocation6 + $0x8] sm:$0xf] %v4598_v45  ;;  %4604 = vst [vmem:[#allocation6 + $0xc] sm:$0x1] %v4603_v56 }
 0x200   : > { %v2940_v63 = vpop.permute.xlu1 %2939  ;;  %v4523_v17 = vshrl.u32 %v6581_v62, 16  ;;  %v3661_v2 = vpop.permute.xlu0 %3660  ;;  %v4526_v4 = vshll.u32 %v6581_v62, 16 }
 0x201   : > { %2973 = vst.msk [vmem:[#allocation3 + $0x78] sm:$0xff] %vm2957_vm4, %v2940_v63  ;;  %vm9150_vm4 = vmmov %vm9138_vm0  ;;  %vm5269_vm0 = vcmask 458112  }
 0x202   : > { %3695 = vst.msk [vmem:[#allocation3 + $0x70] sm:$0xff] %vm3680_vm7, %v3661_v2  ;;  %v4525_v3 = vrot.slane %v4523_v17, 7 }
 0x204   : > { %v3118_v18 = vpop.permute.xlu1 %3117  ;;  %v4528_v20 = vor.u32 %v4526_v4, %v4525_v3  ;;  %v4529_v22 = vrot.slane %v4525_v3, 4  ;;  %v3982_v25 = vpop.permute.xlu0 %3981 }
 0x205   : > { %3151 = vst.msk [vmem:[#allocation3 + $0x78] sm:$0xff] %vm3135_vm5, %v3118_v18  ;;  %vm4928_vm5 = vcmask 195712  }
 0x206   : > { %4016 = vst.msk [vmem:[#allocation3 + $0x70] sm:$0xff] %vm9149_vm3, %v3982_v25  ;;  %v4842_v37 = vld [vmem:[#allocation6 + $0x8] sm:$0xe]  ;;  %v4843_v27 = vld [vmem:[#allocation6 + $0xc] sm:$0x1]  ;;  %v4606_v24 = vsel %vm8337_vm1, %v4528_v20, %v4605_v8  ;;  %v4609_v5 = vsel %vm8343_vm8, %v4529_v22, %v4608_v15  ;;  %vm5571_vm3 = vcmask 588800  }
 0x207   : > { %v6513_v33 = vrot.slane %v4842_v37, 9  ;;  %v4878_v34 = vrot.slane %v4843_v27, 5  ;;  %4607 = vst [vmem:[#allocation6 + $0x10] sm:$0xf] %v4606_v24  ;;  %v4685_v28 = vld [vmem:[#allocation6 + $0x8] sm:$0xf] }
 0x208   : > { %v4686_v11 = vld [vmem:[#allocation6 + $0xc] sm:$0x1]  ;;  %4610 = vst [vmem:[#allocation6 + $0x14] sm:$0x1] %v4609_v5  ;;  %v3663_v0 = vpop.permute.xlu1 %3662  ;;  %v4714_v35 = vshrl.u32 %v4685_v28, 16  ;;  %v4717_v39 = vshll.u32 %v4685_v28, 16 }
 0x209   : > { %3696 = vst.msk [vmem:[#allocation3 + $0x78] sm:$0xff] %vm3680_vm7, %v3663_v0  ;;  %v4879_v44 = vsel %vm7247_vm9, %v6513_v33, %v4878_v34  ;;  %v6681_v41 = vpop.f32.mrb[8].mxu0  ;;  %v4723_v55 = vshll.u32 %v4686_v11, 16  ;;  %v5135_v46 = vld [vmem:[#allocation6 + $0x8] sm:$0xe]  ;;  %vm4973_vm7 = vcmask 261312  }
 0x20a   : > { %v6520_v57 = vcombine.low %v4875_v32, %v4879_v44  ;;  %v4189_v38 = vadd.f32 %v6681_v41, %v8298_v52  ;;  %v4180_v60 = vpop.f32.mrb[9].mxu0  ;;  %v4716_v61 = vrot.slane %v4714_v35, 4  ;;  %v4719_v49 = vrot.slane %v4717_v39, 5  ;;  %v6917_v59 = vld [vmem:[#allocation6] ss:$8 sps:$4 sm:$0xff]  }
 0x20b   : > { %v4181_v40 = vadd.f32 %v8298_v52, %v4180_v60  ;;  %v6682_v47 = vpop.f32.mrb[10].mxu0  ;;  %v4725_v45 = vrot.slane %v4723_v55, 5  ;;  %v5136_v56 = vld [vmem:[#allocation6 + $0xc] sm:$0x1]  ;;  %4679 = vst.msk [vmem:[#allocation7] sm:$0xff] %vm4307_vm11, %v6917_v59  ;;  %v6532_v8 = vrot.slane %v5135_v46, 9 }
 0x20c   : > { %v3984_v23 = vpop.permute.xlu1 %3983  ;;  %4916 = vrot.lane.b32.xlu0 %v6520_v57, %s9109_s30  ;;  %v4285_v6 = vmax.f32 %v4189_v38, 0.0  ;;  %v4192_v54 = vadd.f32 %v6682_v47, %v8298_v52  ;;  %v4183_v21 = vpop.f32.mrb[11].mxu0  ;;  %v4720_v26 = vor.u32 %v4719_v49, %v4716_v61  ;;  %v5169_v9 = vrot.slane %v5136_v56, 5  ;;  %v4978_v33 = vld [vmem:[#allocation6 + $0x8] sm:$0xf] }
 0x20d   : > { %4017 = vst.msk [vmem:[#allocation3 + $0x78] sm:$0xff] %vm9150_vm4, %v3984_v23  ;;  %v4032_v53 = vld [vmem:[#allocation3 + $0x70] sm:$0xff]  ;;  %v4283_v51 = vmax.f32 %v4181_v40, 0.0  ;;  %v4184_v48 = vadd.f32 %v8298_v52, %v4183_v21  ;;  %v4995_v16 = vshrl.u32 %v4978_v33, 16  ;;  %v4998_v0 = vshll.u32 %v4978_v33, 16 }
 0x20e   : > { %6699 = vmatprep.mubr.msk.bf16.mxu0 %vm4061_vm6, %v4032_v53  ;;  %4318 = vst.msk [vmem:[#allocation4 + $0x50] sm:$0xff] %vm4307_vm11, %v4285_v6  ;;  %v4286_v62 = vmax.f32 %v4192_v54, 0.0  ;;  %v6913_v13 = vld [vmem:[#allocation6 + $0x8] ss:$8 sps:$4 sm:$0xff]   ;;  %v4721_v31 = vrot.slane %v4720_v26, 4  ;;  %v5170_v36 = vsel %vm7247_vm9, %v6532_v8, %v5169_v9 }
 0x20f   : > { %4316 = vst.msk [vmem:[#allocation4 + $0x40] sm:$0xff] %vm4307_vm11, %v4283_v51  ;;  %v4284_v63 = vmax.f32 %v4184_v48, 0.0  ;;  %v5137_v7 = vld [vmem:[#allocation6 + $0x10] sm:$0xe]  ;;  %v5138_v17 = vld [vmem:[#allocation6 + $0x14] sm:$0x1] }
 0x210   : > { %4319 = vst.msk [vmem:[#allocation4 + $0x58] sm:$0xff] %vm4307_vm11, %v4286_v62  ;;  %4961 = vrot.lane.b32.xlu0 %v6913_v13, %s9135_s24  ;;  %v4726_v2 = vsel %vm7254_vm10, %v4721_v31, %v4725_v45  ;;  %v6533_v3 = vrot.slane %v5137_v7, 9  ;;  %v5173_v4 = vrot.slane %v5138_v17, 5  ;;  %v4980_v5 = vld [vmem:[#allocation6 + $0x10] sm:$0xf]  ;;  %v4997_v60 = vrot.slane %v4995_v16, 4 }
 0x211   : > { %4317 = vst.msk [vmem:[#allocation4 + $0x48] sm:$0xff] %vm4307_vm11, %v4284_v63  ;;  %v6508_v12 = vcombine.low %v4712_v1, %v4726_v2  ;;  %v5009_v28 = vshrl.u32 %v4980_v5, 16  ;;  %v5012_v11 = vshll.u32 %v4980_v5, 16  ;;  %v4611_v57 = vld [vmem:[#allocation6 + $0x18] sm:$0xf]  ;;  %v5000_v61 = vrot.slane %v4998_v0, 5 }
 0x212   : > { %v5174_v10 = vsel %vm7247_vm9, %v6533_v3, %v5173_v4  ;;  %v4614_v38 = vld [vmem:[#allocation6 + $0x1c] sm:$0x1]  ;;  %v4981_v47 = vld [vmem:[#allocation6 + $0x14] sm:$0x1]  ;;  %v4979_v23 = vld [vmem:[#allocation6 + $0xc] sm:$0x1] }
 0x213   : > { %v6540_v15 = vcombine.low %v5170_v36, %v5174_v10  ;;  %v5011_v41 = vrot.slane %v5009_v28, 4  ;;  %v5014_v55 = vrot.slane %v5012_v11, 5  ;;  %v5274_v54 = vld [vmem:[#allocation6 + $0x10] sm:$0xf]  ;;  %v5001_v21 = vor.u32 %v5000_v61, %v4997_v60  ;;  %v4845_v46 = vld [vmem:[#allocation6 + $0x14] sm:$0x1] }
 0x214   : > { %v4033_v42 = vld [vmem:[#allocation3 + $0x78] sm:$0xff]  ;;  %4823 = vrot.lane.b32.xlu0 %v6508_v12, %s9108_s15  ;;  %v4844_v26 = vld [vmem:[#allocation6 + $0x10] sm:$0xe]  ;;  %v5018_v59 = vshll.u32 %v4981_v47, 16  ;;  %v5004_v53 = vshll.u32 %v4979_v23, 16  ;;  %v5291_v51 = vshrl.u32 %v5274_v54, 16 }
 0x215   : > { %6700 = vmatmul.mubr.msk.bf16.gmra.mrb[28].mxu0 %vm4061_vm6, %v4033_v42  ;;  %v5015_v6 = vor.u32 %v5014_v55, %v5011_v41  ;;  %v5431_v45 = vld [vmem:[#allocation6 + $0x10] sm:$0xe]  ;;  %v6514_v56 = vrot.slane %v4844_v26, 9  ;;  %v4882_v62 = vrot.slane %v4845_v46, 5  ;;  %v5002_v13 = vrot.slane %v5001_v21, 4 }
 0x216   : > { %v5020_v31 = vrot.slane %v5018_v59, 5  ;;  %v5294_v63 = vshll.u32 %v5274_v54, 16  ;;  %v5006_v1 = vrot.slane %v5004_v53, 5  ;;  %v5432_v7 = vld [vmem:[#allocation6 + $0x14] sm:$0x1]  ;;  %v6552_v17 = vrot.slane %v5431_v45, 9 }
 0x217   : > { %v4350_v18 = vld [vmem:[#allocation4 + $0x50] ss:$2 sm:$0xff]  ;;  %v4382_v20 = vld [vmem:[#allocation4 + $0x51] ss:$2 sm:$0xff]  ;;  %v5016_v48 = vrot.slane %v5015_v6, 4  ;;  %v5293_v2 = vrot.slane %v5291_v51, 4  ;;  %v4883_v10 = vsel %vm7247_vm9, %v6514_v56, %v4882_v62 }
 0x218   : > { %v4408_v22 = vmax.f32 %v4350_v18, %v4382_v20  ;;  %v4348_v25 = vld [vmem:[#allocation4 + $0x40] ss:$2 sm:$0xff]  ;;  %v4380_v14 = vld [vmem:[#allocation4 + $0x41] ss:$2 sm:$0xff]  ;;  %5211 = vrot.lane.b32.xlu0 %v6540_v15, %s7008_s25  ;;  %v5007_v36 = vsel %vm7254_vm10, %v5002_v13, %v5006_v1  ;;  %vm4835_vm6 = vcmask 130112  }
 0x219   : > { %v4407_v37 = vmax.f32 %v4348_v25, %v4380_v14  ;;  %v5021_v8 = vsel %vm7254_vm10, %v5016_v48, %v5020_v31 }
 0x21a   : > { %4424 = vst.msk [vmem:[#allocation5 + $0x28] sm:$0xff] %vm4307_vm11, %v4408_v22  ;;  %v6528_v5 = vcombine.low %v5007_v36, %v5021_v8 }
 0x21b   : > { %4423 = vst.msk [vmem:[#allocation5 + $0x20] sm:$0xff] %vm4307_vm11, %v4407_v37  ;;  %v5296_v37 = vrot.slane %v5294_v63, 5 }
 0x21d   : > { %v5297_v61 = vor.u32 %v5296_v37, %v5293_v2  ;;  %v4620_v37 = vld [vmem:[#allocation6 + $0x24] sm:$0x1] }
 0x21f   : > { %v5298_v21 = vrot.slane %v5297_v61, 4 }
 0x221   : > { %v4446_v27 = vld [vmem:[#allocation5 + $0x28] sm:$0xff] }
 0x222   : > { %v4437_v24 = vld [vmem:[#allocation5 + $0x20] sm:$0xff] }
 0x223   : > { %v4454_v32 = vmax.f32 %v4437_v24, %v4446_v27 }
 0x225   : > { %v6582_v34 = vpack.c.bf16 %v4454_v32, %v4454_v32  ;;  %v5465_v32 = vrot.slane %v5432_v7, 5 }
 0x227   : > { %v4531_v35 = vshrl.u32 %v6582_v34, 16  ;;  %v4534_v44 = vshll.u32 %v6582_v34, 16 }
 0x229   : > { %v4533_v39 = vrot.slane %v4531_v35, 7 }
 0x22b   : > { %v4536_v49 = vor.u32 %v4534_v44, %v4533_v39  ;;  %v4537_v40 = vrot.slane %v4533_v39, 4 }
 0x22d   : > { %v4612_v30 = vsel %vm8337_vm1, %v4536_v49, %v4611_v57  ;;  %v4615_v50 = vsel %vm8343_vm8, %v4537_v40, %v4614_v38  ;;  %v5275_v57 = vld [vmem:[#allocation6 + $0x14] sm:$0x1] }
 0x22e   : > { %4613 = vst [vmem:[#allocation6 + $0x18] sm:$0xf] %v4612_v30  ;;  %4616 = vst [vmem:[#allocation6 + $0x1c] sm:$0x1] %v4615_v50  ;;  %v5466_v30 = vsel %vm7247_vm9, %v6552_v17, %v5465_v32  ;;  %v5300_v23 = vshll.u32 %v5275_v57, 16 }
 0x230   : > { %v5302_v59 = vrot.slane %v5300_v23, 5 }
 0x232   : > { %v5303_v48 = vsel %vm7254_vm10, %v5298_v21, %v5302_v59 }
 0x233   : > { %v6685_v9 = vpop.f32.mrb[12].mxu0 }
 0x234   : > { %v4205_v18 = vadd.f32 %v6685_v9, %v8298_v52  ;;  %v4196_v20 = vpop.f32.mrb[13].mxu0  ;;  %v4687_v9 = vld [vmem:[#allocation6 + $0x10] sm:$0xf] }
 0x235   : > { %v6914_v3 = vld [vmem:[#allocation6 + $0x10] ss:$8 sps:$4 sm:$0xff]   ;;  %v4847_v12 = vld [vmem:[#allocation6 + $0x1c] sm:$0x1]  ;;  %v4197_v27 = vadd.f32 %v8298_v52, %v4196_v20  ;;  %v6686_v24 = vpop.f32.mrb[14].mxu0  ;;  %v4728_v36 = vshrl.u32 %v4687_v9, 16 }
 0x236   : > { %v4846_v4 = vld [vmem:[#allocation6 + $0x18] sm:$0xe]  ;;  %5257 = vrot.lane.b32.xlu0 %v6914_v3, %s9114_s12  ;;  %v4886_v22 = vrot.slane %v4847_v12, 5  ;;  %v5434_v25 = vld [vmem:[#allocation6 + $0x1c] sm:$0x1]  ;;  %v4289_v28 = vmax.f32 %v4205_v18, 0.0  ;;  %v4208_v11 = vadd.f32 %v6686_v24, %v8298_v52 }
 0x237   : > { %v6515_v42 = vrot.slane %v4846_v4, 9  ;;  %v5433_v15 = vld [vmem:[#allocation6 + $0x18] sm:$0xe]  ;;  %v5469_v33 = vrot.slane %v5434_v25, 5  ;;  %v4199_v16 = vpop.f32.mrb[15].mxu0  ;;  %v4287_v39 = vmax.f32 %v4197_v27, 0.0 }
 0x238   : > { %v6553_v14 = vrot.slane %v5433_v15, 9  ;;  %v5276_v34 = vld [vmem:[#allocation6 + $0x18] sm:$0xf]  ;;  %v4200_v44 = vadd.f32 %v8298_v52, %v4199_v16  ;;  %v5277_v38 = vld [vmem:[#allocation6 + $0x1c] sm:$0x1]  ;;  %4322 = vst.msk [vmem:[#allocation4 + $0x70] sm:$0xff] %vm4307_vm11, %v4289_v28 }
 0x239   : > { %v4887_v0 = vsel %vm7247_vm9, %v6515_v42, %v4886_v22  ;;  %v5305_v35 = vshrl.u32 %v5276_v34, 16  ;;  %v4290_v60 = vmax.f32 %v4208_v11, 0.0  ;;  %v5308_v40 = vshll.u32 %v5276_v34, 16  ;;  %4320 = vst.msk [vmem:[#allocation4 + $0x60] sm:$0xff] %vm4307_vm11, %v4287_v39  ;;  %v6920_v46 = vld [vmem:[#allocation6 + $0x10] ss:$8 sps:$4 sm:$0xff]  }
 0x23a   : > { %v6521_v41 = vcombine.low %v4883_v10, %v4887_v0  ;;  %v5470_v55 = vsel %vm7247_vm9, %v6553_v14, %v5469_v33  ;;  %5118 = vrot.lane.b32.xlu0 %v6528_v5, %s9115_s29  ;;  %v4288_v47 = vmax.f32 %v4200_v44, 0.0  ;;  %v5314_v54 = vshll.u32 %v5277_v38, 16  ;;  %4680 = vst.msk [vmem:[#allocation7 + $0x8] sm:$0xff] %vm4307_vm11, %v6920_v46  ;;  %v4689_v4 = vld [vmem:[#allocation6 + $0x18] sm:$0xf] }
 0x23b   : > { %v5307_v49 = vrot.slane %v5305_v35, 4  ;;  %4323 = vst.msk [vmem:[#allocation4 + $0x78] sm:$0xff] %vm4307_vm11, %v4290_v60  ;;  %v6560_v50 = vcombine.low %v5466_v30, %v5470_v55  ;;  %v5310_v6 = vrot.slane %v5308_v40, 5  ;;  %v4742_v12 = vshrl.u32 %v4689_v4, 16  ;;  %v4617_v22 = vld [vmem:[#allocation6 + $0x20] sm:$0xf] }
 0x23c   : > { %4918 = vrot.lane.b32.xlu1 %v6521_v41, %s9109_s30  ;;  %4321 = vst.msk [vmem:[#allocation4 + $0x68] sm:$0xff] %vm4307_vm11, %v4288_v47  ;;  %v5316_v51 = vrot.slane %v5314_v54, 5  ;;  %v4745_v10 = vshll.u32 %v4689_v4, 16  ;;  %v4731_v15 = vshll.u32 %v4687_v9, 16  ;;  %v4688_v5 = vld [vmem:[#allocation6 + $0x14] sm:$0x1] }
 0x23d   : > { %v5311_v26 = vor.u32 %v5310_v6, %v5307_v49  ;;  %v4744_v25 = vrot.slane %v4742_v12, 4  ;;  %v4730_v32 = vrot.slane %v4728_v36, 4  ;;  %v4690_v28 = vld [vmem:[#allocation6 + $0x1c] sm:$0x1]  ;;  %v4737_v0 = vshll.u32 %v4688_v5, 16 }
 0x23e   : > { %5507 = vrot.lane.b32.xlu0 %v6560_v50, %s9104_s13  ;;  %v4747_v14 = vrot.slane %v4745_v10, 5  ;;  %v4733_v33 = vrot.slane %v4731_v15, 5  ;;  %v4751_v39 = vshll.u32 %v4690_v28, 16  ;;  %v5139_v38 = vld [vmem:[#allocation6 + $0x18] sm:$0xe] }
 0x23f   : > { %v5312_v53 = vrot.slane %v5311_v26, 4  ;;  %v4739_v41 = vrot.slane %v4737_v0, 5  ;;  %v5140_v60 = vld [vmem:[#allocation6 + $0x1c] sm:$0x1]  ;;  %v6534_v59 = vrot.slane %v5139_v38, 9 }
 0x240   : > { %v4748_v16 = vor.u32 %v4747_v14, %v4744_v25  ;;  %v4734_v35 = vor.u32 %v4733_v33, %v4730_v32  ;;  %v4753_v57 = vrot.slane %v4751_v39, 5 }
 0x241   : > { %v5317_v45 = vsel %vm7254_vm10, %v5312_v53, %v5316_v51  ;;  %v5177_v53 = vrot.slane %v5140_v60, 5 }
 0x242   : > { %v4354_v56 = vld [vmem:[#allocation4 + $0x70] ss:$2 sm:$0xff]  ;;  %v4386_v62 = vld [vmem:[#allocation4 + $0x71] ss:$2 sm:$0xff]  ;;  %v6548_v13 = vcombine.low %v5303_v48, %v5317_v45  ;;  %v4749_v44 = vrot.slane %v4748_v16, 4  ;;  %v4735_v55 = vrot.slane %v4734_v35, 4 }
 0x243   : > { %v4410_v31 = vmax.f32 %v4354_v56, %v4386_v62  ;;  %v4352_v63 = vld [vmem:[#allocation4 + $0x60] ss:$2 sm:$0xff]  ;;  %v4384_v1 = vld [vmem:[#allocation4 + $0x61] ss:$2 sm:$0xff] }
 0x244   : > { %v4409_v7 = vmax.f32 %v4352_v63, %v4384_v1  ;;  %5414 = vrot.lane.b32.xlu0 %v6548_v13, %s9106_s16  ;;  %v4754_v47 = vsel %vm7254_vm10, %v4749_v44, %v4753_v57  ;;  %v4740_v46 = vsel %vm7254_vm10, %v4735_v55, %v4739_v41  ;;  %v4626_v16 = vld [vmem:[#allocation6 + $0x2c] sm:$0x1] }
 0x245   : > { %4426 = vst.msk [vmem:[#allocation5 + $0x38] sm:$0xff] %vm4307_vm11, %v4410_v31  ;;  %v6509_v56 = vcombine.low %v4740_v46, %v4754_v47 }
 0x246   : > { %4425 = vst.msk [vmem:[#allocation5 + $0x30] sm:$0xff] %vm4307_vm11, %v4409_v7  ;;  %v5178_v7 = vsel %vm7247_vm9, %v6534_v59, %v5177_v53 }
 0x24c   : > { %v4447_v17 = vld [vmem:[#allocation5 + $0x38] sm:$0xff] }
 0x24d   : > { %v4438_v2 = vld [vmem:[#allocation5 + $0x30] sm:$0xff] }
 0x24e   : > { %v4455_v3 = vmax.f32 %v4438_v2, %v4447_v17 }
 0x250   : > { %v6583_v8 = vpack.c.bf16 %v4455_v3, %v4455_v3 }
 0x252   : > { %v4539_v42 = vshrl.u32 %v6583_v8, 16  ;;  %v4542_v20 = vshll.u32 %v6583_v8, 16 }
 0x254   : > { %v4541_v18 = vrot.slane %v4539_v42, 7 }
 0x256   : > { %v4544_v27 = vor.u32 %v4542_v20, %v4541_v18  ;;  %v4545_v24 = vrot.slane %v4541_v18, 4  ;;  %v4982_v18 = vld [vmem:[#allocation6 + $0x18] sm:$0xf] }
 0x258   : > { %v4618_v34 = vsel %vm8337_vm1, %v4544_v27, %v4617_v22  ;;  %v4621_v11 = vsel %vm8343_vm8, %v4545_v24, %v4620_v37  ;;  %v5023_v37 = vshrl.u32 %v4982_v18, 16  ;;  %v5026_v27 = vshll.u32 %v4982_v18, 16 }
 0x259   : > { %4619 = vst [vmem:[#allocation6 + $0x20] sm:$0xf] %v4618_v34  ;;  %4622 = vst [vmem:[#allocation6 + $0x24] sm:$0x1] %v4621_v11  ;;  %v4623_v34 = vld [vmem:[#allocation6 + $0x28] sm:$0xf] }
 0x25a   : > { %v5025_v0 = vrot.slane %v5023_v37, 4  ;;  %v5028_v35 = vrot.slane %v5026_v27, 5 }
 0x25c   : > { %v5029_v47 = vor.u32 %v5028_v35, %v5025_v0 }
 0x260   : > { %v6915_v61 = vld [vmem:[#allocation6 + $0x18] ss:$8 sps:$4 sm:$0xff]   ;;  %v5142_v30 = vld [vmem:[#allocation6 + $0x24] sm:$0x1] }
 0x261   : > { %v5141_v49 = vld [vmem:[#allocation6 + $0x20] sm:$0xe]  ;;  %4963 = vrot.lane.b32.xlu1 %v6915_v61, %s9135_s24  ;;  %v5181_v54 = vrot.slane %v5142_v30, 5  ;;  %v4985_v41 = vld [vmem:[#allocation6 + $0x24] sm:$0x1] }
 0x262   : > { %v6689_v40 = vpop.f32.mrb[16].mxu0  ;;  %v6535_v50 = vrot.slane %v5141_v49, 9  ;;  %v4984_v36 = vld [vmem:[#allocation6 + $0x20] sm:$0xf]  ;;  %v4983_v61 = vld [vmem:[#allocation6 + $0x1c] sm:$0x1] }
 0x263   : > { %v4221_v23 = vadd.f32 %v6689_v40, %v8298_v52  ;;  %v4212_v6 = vpop.f32.mrb[17].mxu0  ;;  %v5037_v25 = vshrl.u32 %v4984_v36, 16  ;;  %v5040_v14 = vshll.u32 %v4984_v36, 16  ;;  %v5278_v55 = vld [vmem:[#allocation6 + $0x20] sm:$0xf] }
 0x264   : > { %v4213_v21 = vadd.f32 %v8298_v52, %v4212_v6  ;;  %v6690_v26 = vpop.f32.mrb[18].mxu0  ;;  %v5182_v31 = vsel %vm7247_vm9, %v6535_v50, %v5181_v54  ;;  %v5435_v40 = vld [vmem:[#allocation6 + $0x20] sm:$0xe]  ;;  %v5436_v50 = vld [vmem:[#allocation6 + $0x24] sm:$0x1]  ;;  %v5319_v6 = vshrl.u32 %v5278_v55, 16 }
 0x265   : > { %v4293_v51 = vmax.f32 %v4221_v23, 0.0  ;;  %v4224_v48 = vadd.f32 %v6690_v26, %v8298_v52  ;;  %v4215_v45 = vpop.f32.mrb[19].mxu0  ;;  %4825 = vrot.lane.b32.xlu1 %v6509_v56, %s9108_s15  ;;  %v6541_v17 = vcombine.low %v5178_v7, %v5182_v31  ;;  %v5039_v28 = vrot.slane %v5037_v25, 4  ;;  %v4691_v30 = vld [vmem:[#allocation6 + $0x20] sm:$0xf] }
 0x266   : > { %v4291_v62 = vmax.f32 %v4213_v21, 0.0  ;;  %v4216_v13 = vadd.f32 %v8298_v52, %v4215_v45  ;;  %v5042_v11 = vrot.slane %v5040_v14, 5  ;;  %v5046_v23 = vshll.u32 %v4985_v41, 16  ;;  %v8459_v46 = vld [vmem:[#allocation6 + $0x20] sm:$0xe] }
 0x267   : > { %4326 = vst.msk [vmem:[#allocation4 + $0x90] sm:$0xff] %vm4307_vm11, %v4293_v51  ;;  %v4294_v63 = vmax.f32 %v4224_v48, 0.0  ;;  %v5322_v54 = vshll.u32 %v5278_v55, 16  ;;  %v5032_v21 = vshll.u32 %v4983_v61, 16  ;;  %v8461_v59 = vld [vmem:[#allocation6 + $0x24] sm:$0x1] }
 0x268   : > { %4324 = vst.msk [vmem:[#allocation4 + $0x80] sm:$0xff] %vm4307_vm11, %v4291_v62  ;;  %v4292_v1 = vmax.f32 %v4216_v13, 0.0  ;;  %v5043_v49 = vor.u32 %v5042_v11, %v5039_v28  ;;  %v4756_v53 = vshrl.u32 %v4691_v30, 16  ;;  %v6554_v51 = vrot.slane %v5435_v40, 9 }
 0x269   : > { %4327 = vst.msk [vmem:[#allocation4 + $0x98] sm:$0xff] %vm4307_vm11, %v4294_v63  ;;  %5213 = vrot.lane.b32.xlu1 %v6541_v17, %s7008_s25  ;;  %v5473_v48 = vrot.slane %v5436_v50, 5  ;;  %v5030_v45 = vrot.slane %v5029_v47, 4  ;;  %v4759_v56 = vshll.u32 %v4691_v30, 16  ;;  %v5048_v62 = vrot.slane %v5046_v23, 5 }
 0x26a   : > { %4325 = vst.msk [vmem:[#allocation4 + $0x88] sm:$0xff] %vm4307_vm11, %v4292_v1  ;;  %v5044_v26 = vrot.slane %v5043_v49, 4  ;;  %v5321_v13 = vrot.slane %v5319_v6, 4  ;;  %v5324_v31 = vrot.slane %v5322_v54, 5  ;;  %v5034_v63 = vrot.slane %v5032_v21, 5 }
 0x26b   : > { %v6516_v1 = vrot.slane %v8459_v46, 9  ;;  %v4890_v7 = vrot.slane %v8461_v59, 5  ;;  %v4761_v18 = vrot.slane %v4759_v56, 5 }
 0x26c   : > { %v5035_v36 = vsel %vm7254_vm10, %v5030_v45, %v5034_v63  ;;  %v5325_v27 = vor.u32 %v5324_v31, %v5321_v13 }
 0x26d   : > { %v4891_v54 = vsel %vm7247_vm9, %v6516_v1, %v4890_v7 }
 0x26e   : > { %v5326_v21 = vrot.slane %v5325_v27, 4 }
 0x270   : > { %v4358_v2 = vld [vmem:[#allocation4 + $0x90] ss:$2 sm:$0xff]  ;;  %v4390_v3 = vld [vmem:[#allocation4 + $0x91] ss:$2 sm:$0xff] }
 0x271   : > { %v4412_v4 = vmax.f32 %v4358_v2, %v4390_v3  ;;  %v4356_v8 = vld [vmem:[#allocation4 + $0x80] ss:$2 sm:$0xff]  ;;  %v4388_v9 = vld [vmem:[#allocation4 + $0x81] ss:$2 sm:$0xff]  ;;  %v5049_v3 = vsel %vm7254_vm10, %v5044_v26, %v5048_v62 }
 0x272   : > { %v4411_v12 = vmax.f32 %v4356_v8, %v4388_v9  ;;  %v4692_v26 = vld [vmem:[#allocation6 + $0x24] sm:$0x1] }
 0x273   : > { %4428 = vst.msk [vmem:[#allocation5 + $0x48] sm:$0xff] %vm4307_vm11, %v4412_v4  ;;  %v8467_v4 = vrot.slane %v4756_v53, 4  ;;  %v4765_v31 = vshll.u32 %v4692_v26, 16 }
 0x274   : > { %4427 = vst.msk [vmem:[#allocation5 + $0x40] sm:$0xff] %vm4307_vm11, %v4411_v12 }
 0x275   : > { %v4762_v46 = vor.u32 %v4761_v18, %v8467_v4 }
 0x27a   : > { %v4448_v10 = vld [vmem:[#allocation5 + $0x48] sm:$0xff] }
 0x27b   : > { %v4439_v42 = vld [vmem:[#allocation5 + $0x40] sm:$0xff] }
 0x27c   : > { %v4456_v15 = vmax.f32 %v4439_v42, %v4448_v10  ;;  %v5474_v42 = vsel %vm7247_vm9, %v6554_v51, %v5473_v48 }
 0x27e   : > { %v4917_v20 = vpop.permute.xlu0 %4916  ;;  %v6584_v22 = vpack.c.bf16 %v4456_v15, %v4456_v15  ;;  %v5279_v15 = vld [vmem:[#allocation6 + $0x24] sm:$0x1] }
 0x27f   : > { %v5328_v49 = vshll.u32 %v5279_v15, 16 }
 0x280   : > { %v4547_v24 = vshrl.u32 %v6584_v22, 16  ;;  %v4550_v33 = vshll.u32 %v6584_v22, 16 }
 0x281   : > { %v5330_v56 = vrot.slane %v5328_v49, 5 }
 0x282   : > { %v4962_v5 = vpop.permute.xlu0 %4961  ;;  %v4549_v32 = vrot.slane %v4547_v24, 7 }
 0x283   : > { %v5331_v1 = vsel %vm7254_vm10, %v5326_v21, %v5330_v56 }
 0x284   : > { %v4552_v39 = vor.u32 %v4550_v33, %v4549_v32  ;;  %v4553_v44 = vrot.slane %v4549_v32, 4  ;;  %v6529_v33 = vcombine.low %v5035_v36, %v5049_v3  ;;  %v4767_v36 = vrot.slane %v4765_v31, 5 }
 0x286   : > { %v4824_v57 = vpop.permute.xlu0 %4823  ;;  %v4624_v38 = vsel %vm8337_vm1, %v4552_v39, %v4623_v34  ;;  %v4627_v60 = vsel %vm8343_vm8, %v4553_v44, %v4626_v16 }
 0x287   : > { %4836 = vst.msk [vmem:[#allocation7] sm:$0xff] %vm4835_vm6, %v4824_v57  ;;  %4625 = vst [vmem:[#allocation6 + $0x28] sm:$0xf] %v4624_v38 }
 0x288   : > { %4628 = vst [vmem:[#allocation6 + $0x2c] sm:$0x1] %v4627_v60  ;;  %4929 = vst.msk [vmem:[#allocation7] sm:$0xff] %vm4928_vm5, %v4917_v20 }
 0x289   : > { %4974 = vst.msk [vmem:[#allocation7] sm:$0xff] %vm4973_vm7, %v4962_v5 }
 0x28e   : > { %v6693_v17 = vpop.f32.mrb[20].mxu0  ;;  %v6916_v2 = vld [vmem:[#allocation6 + $0x20] ss:$8 sps:$4 sm:$0xff]  }
 0x28f   : > { %v4237_v8 = vadd.f32 %v6693_v17, %v8298_v52  ;;  %v4228_v9 = vpop.f32.mrb[21].mxu0  ;;  %v5437_v12 = vld [vmem:[#allocation6 + $0x28] sm:$0xe]  ;;  %v5438_v10 = vld [vmem:[#allocation6 + $0x2c] sm:$0x1]  ;;  %5259 = vrot.lane.b32.xlu1 %v6916_v2, %s9114_s12  ;;  %v4763_v17 = vrot.slane %v4762_v46, 4 }
 0x290   : > { %v4229_v20 = vadd.f32 %v8298_v52, %v4228_v9  ;;  %v6694_v22 = vpop.f32.mrb[22].mxu0  ;;  %v6555_v25 = vrot.slane %v5437_v12, 9  ;;  %v5477_v14 = vrot.slane %v5438_v10, 5  ;;  %v4850_v37 = vld [vmem:[#allocation6 + $0x28] sm:$0xe] }
 0x291   : > { %v4297_v24 = vmax.f32 %v4237_v8, 0.0  ;;  %v4240_v5 = vadd.f32 %v6694_v22, %v8298_v52  ;;  %v4231_v32 = vpop.f32.mrb[23].mxu0  ;;  %v4851_v34 = vld [vmem:[#allocation6 + $0x2c] sm:$0x1]  ;;  %v6517_v28 = vrot.slane %v4850_v37, 9  ;;  %v4768_v22 = vsel %vm7254_vm10, %v4763_v17, %v4767_v36 }
 0x292   : > { %v4295_v11 = vmax.f32 %v4229_v20, 0.0  ;;  %v4232_v16 = vadd.f32 %v8298_v52, %v4231_v32  ;;  %v5478_v0 = vsel %vm7247_vm9, %v6555_v25, %v5477_v14  ;;  %v4894_v35 = vrot.slane %v4851_v34, 5  ;;  %v5280_v39 = vld [vmem:[#allocation6 + $0x28] sm:$0xf]  ;;  %v5281_v44 = vld [vmem:[#allocation6 + $0x2c] sm:$0x1]  ;;  %v5212_v14 = vpop.permute.xlu0 %5211 }
 0x293   : > { %4330 = vst.msk [vmem:[#allocation4 + $0xb0] sm:$0xff] %vm4307_vm11, %v4297_v24  ;;  %v4298_v41 = vmax.f32 %v4240_v5, 0.0  ;;  %v6561_v55 = vcombine.low %v5474_v42, %v5478_v0  ;;  %v5333_v57 = vshrl.u32 %v5280_v39, 16  ;;  %v5336_v38 = vshll.u32 %v5280_v39, 16  ;;  %v4693_v60 = vld [vmem:[#allocation6 + $0x28] sm:$0xf]  ;;  %5120 = vrot.lane.b32.xlu1 %v6529_v33, %s9115_s29 }
 0x294   : > { %4328 = vst.msk [vmem:[#allocation4 + $0xa0] sm:$0xff] %vm4307_vm11, %v4295_v11  ;;  %v4296_v61 = vmax.f32 %v4232_v16, 0.0  ;;  %v4895_v52 = vsel %vm7247_vm9, %v6517_v28, %v4894_v35  ;;  %v4694_v40 = vld [vmem:[#allocation6 + $0x2c] sm:$0x1]  ;;  %v4770_v47 = vshrl.u32 %v4693_v60, 16  ;;  %v5342_v23 = vshll.u32 %v5281_v44, 16 }
 0x295   : > { %4331 = vst.msk [vmem:[#allocation4 + $0xb8] sm:$0xff] %vm4307_vm11, %v4298_v41  ;;  %5509 = vrot.lane.b32.xlu0 %v6561_v55, %s9104_s13  ;;  %v5335_v30 = vrot.slane %v5333_v57, 4  ;;  %v5338_v50 = vrot.slane %v5336_v38, 5  ;;  %v4773_v6 = vshll.u32 %v4693_v60, 16  ;;  %v6522_v53 = vcombine.low %v4891_v54, %v4895_v52  ;;  %v6927_v20 = vld [vmem:[#allocation6 + $0x20] ss:$8 sps:$4 sm:$0xff]  }
 0x296   : > { %4329 = vst.msk [vmem:[#allocation4 + $0xa8] sm:$0xff] %vm4307_vm11, %v4296_v61  ;;  %v4772_v59 = vrot.slane %v4770_v47, 4  ;;  %v4779_v45 = vshll.u32 %v4694_v40, 16  ;;  %v5344_v13 = vrot.slane %v5342_v23, 5  ;;  %4681 = vst.msk [vmem:[#allocation7 + $0x10] sm:$0xff] %vm4307_vm11, %v6927_v20  ;;  %v6923_v37 = vld [vmem:[%s9088_s3] sm:$0xff]  }
 0x297   : > { %v5339_v51 = vor.u32 %v5338_v50, %v5335_v30  ;;  %v4775_v48 = vrot.slane %v4773_v6, 5  ;;  %6703 = vmatprep.subr.bf16.mxu1 %v6923_v37  ;;  %v6924_v33 = vld [vmem:[%s9088_s3 + $0x8] sm:$0xff]   ;;  %v6925_v16 = vld [vmem:[%s9088_s3 + $0x10] sm:$0xff]   ;;  %v6926_v0 = vld [vmem:[%s9088_s3 + $0x18] sm:$0xff]   ;;  %s9153_s13 = smov 64  }
 0x298   : > { %v4781_v3 = vrot.slane %v4779_v45, 5  ;;  %6704 = vmatpush3.bf16.msra.mxu1 %v6923_v37  ;;  %v4629_v44 = vld [vmem:[#allocation6 + $0x30] sm:$0xf]  ;;  %v4632_v41 = vld [vmem:[#allocation6 + $0x34] sm:$0x1] }
 0x299   : > { %4920 = vrot.lane.b32.xlu0 %v6522_v53, %s9109_s30  ;;  %v5340_v62 = vrot.slane %v5339_v51, 4  ;;  %v4776_v63 = vor.u32 %v4775_v48, %v4772_v59  ;;  %6705 = vmatprep.subr.bf16.mxu1 %v6924_v33  ;;  %v6928_v60 = vld [vmem:[%s9088_s3 + $0x20] ss:$0 sps:$4 sm:$0xff]   ;;  %v5143_v40 = vld [vmem:[#allocation6 + $0x28] sm:$0xe]  ;;  %s9116_s30 = smov 96  }
 0x29a   : > { %v5586_v49 = vsel %vm5584_vm14, %v6928_v60, 0  ;;  %v5144_v47 = vld [vmem:[#allocation6 + $0x2c] sm:$0x1]  ;;  %v6536_v23 = vrot.slane %v5143_v40, 9  ;;  %v8532_v6 = vld [vmem:[%s9087_s2] ss:$0 sm:$0xff] }
 0x29b   : > { %v5345_v7 = vsel %vm7254_vm10, %v5340_v62, %v5344_v13  ;;  %v4777_v2 = vrot.slane %v4776_v63, 4  ;;  %v5185_v46 = vrot.slane %v5144_v47, 5  ;;  %v4986_v37 = vld [vmem:[#allocation6 + $0x28] sm:$0xf]  ;;  %v4987_v47 = vld [vmem:[#allocation6 + $0x2c] sm:$0x1] }
 0x29c   : > { %v4362_v4 = vld [vmem:[#allocation4 + $0xb0] ss:$2 sm:$0xff]  ;;  %v4394_v8 = vld [vmem:[#allocation4 + $0xb1] ss:$2 sm:$0xff]  ;;  %v6549_v9 = vcombine.low %v5331_v1, %v5345_v7  ;;  %6706 = vmatpush3.bf16.msra.mxu1 %v6924_v33  ;;  %v5051_v33 = vshrl.u32 %v4986_v37, 16 }
 0x29d   : > { %v4414_v12 = vmax.f32 %v4362_v4, %v4394_v8  ;;  %v4360_v10 = vld [vmem:[#allocation4 + $0xa0] ss:$2 sm:$0xff]  ;;  %v4392_v42 = vld [vmem:[#allocation4 + $0xa1] ss:$2 sm:$0xff]  ;;  %v4782_v15 = vsel %vm7254_vm10, %v4777_v2, %v4781_v3  ;;  %6707 = vmatprep.subr.bf16.mxu1 %v6925_v16  ;;  %v5186_v7 = vsel %vm7247_vm9, %v6536_v23, %v5185_v46 }
 0x29e   : > { %v4413_v18 = vmax.f32 %v4360_v10, %v4392_v42  ;;  %5416 = vrot.lane.b32.xlu1 %v6549_v9, %s9106_s16  ;;  %v6510_v25 = vcombine.low %v4768_v22, %v4782_v15  ;;  %s377_s16 = sand.u32 1, %s6989_s18  }
 0x29f   : > { %4430 = vst.msk [vmem:[#allocation5 + $0x58] sm:$0xff] %vm4307_vm11, %v4414_v12 }
 0x2a0   : > { %4429 = vst.msk [vmem:[#allocation5 + $0x50] sm:$0xff] %vm4307_vm11, %v4413_v18  ;;  %6708 = vmatpush3.bf16.msra.mxu1 %v6925_v16 }
 0x2a1   : > { %6709 = vmatprep.subr.bf16.mxu1 %v6926_v0 }
 0x2a2   : > { %4827 = vrot.lane.b32.xlu1 %v6510_v25, %s9108_s15  ;;  %s9117_s15 = smov 80  }
 0x2a4   : > { %6710 = vmatpush3.bf16.msra.mxu1 %v6926_v0 }
 0x2a5   : > { %6802 = vmatprep.subr.msk.bf16.mxu1 %vm5584_vm14, %v6928_v60 }
 0x2a6   : > { %v4449_v27 = vld [vmem:[#allocation5 + $0x58] sm:$0xff] }
 0x2a7   : > { %v4440_v24 = vld [vmem:[#allocation5 + $0x50] sm:$0xff] }
 0x2a8   : > { %v4457_v5 = vmax.f32 %v4440_v24, %v4449_v27  ;;  %v5258_v32 = vpop.permute.xlu0 %5257  ;;  %6712 = vmatpush3.bf16.msra.mxu1 %v5586_v49 }
 0x2aa   : > { %v6585_v34 = vpack.c.bf16 %v4457_v5, %v4457_v5 }
 0x2ac   : > { %v4555_v28 = vshrl.u32 %v6585_v34, 16  ;;  %v5119_v11 = vpop.permute.xlu0 %5118  ;;  %v4558_v39 = vshll.u32 %v6585_v34, 16  ;;  %v5054_v34 = vshll.u32 %v4986_v37, 16 }
 0x2ad   : > { %5131 = vst.msk [vmem:[#allocation7] sm:$0xff] %vm5130_vm12, %v5119_v11 }
 0x2ae   : > { %v4557_v35 = vrot.slane %v4555_v28, 7  ;;  %5224 = vst.msk [vmem:[#allocation7] sm:$0xff] %vm5223_vm13, %v5212_v14  ;;  %v4919_v18 = vpop.permute.xlu1 %4918 }
 0x2af   : > { %5270 = vst.msk [vmem:[#allocation7] sm:$0xff] %vm5269_vm0, %v5258_v32 }
 0x2b0   : > { %v4560_v55 = vor.u32 %v4558_v39, %v4557_v35  ;;  %v4561_v57 = vrot.slane %v4557_v35, 4  ;;  %v5508_v38 = vpop.permute.xlu0 %5507 }
 0x2b2   : > { %v4630_v61 = vsel %vm8337_vm1, %v4560_v55, %v4629_v44  ;;  %v4633_v52 = vsel %vm8343_vm8, %v4561_v57, %v4632_v41  ;;  %v4635_v44 = vld [vmem:[#allocation6 + $0x38] sm:$0xf]  ;;  %v4638_v41 = vld [vmem:[#allocation6 + $0x3c] sm:$0x1]  ;;  %v5053_v55 = vrot.slane %v5051_v33, 4  ;;  %v5056_v57 = vrot.slane %v5054_v34, 5 }
 0x2b3   : > { %4631 = vst [vmem:[#allocation6 + $0x30] sm:$0xf] %v4630_v61  ;;  %4634 = vst [vmem:[#allocation6 + $0x34] sm:$0x1] %v4633_v52 }
 0x2b4   : > { %v5057_v23 = vor.u32 %v5056_v57, %v5053_v55 }
 0x2b6   : > { %v5415_v30 = vpop.permute.xlu0 %5414 }
 0x2b7   : > { %5427 = vst.msk [vmem:[#allocation7] sm:$0xff] %vm5426_vm15, %v5415_v30 }
 0x2b8   : > { %5520 = vst.msk [vmem:[#allocation7] sm:$0xff] %vm5519_vm2, %v5508_v38 }
 0x2b9   : > { %v6697_v50 = vpop.f32.mrb[24].mxu0 }
 0x2ba   : > { %v4253_v54 = vadd.f32 %v8532_v6, %v6697_v50  ;;  %v4244_v21 = vpop.f32.mrb[25].mxu0  ;;  %v6918_v26 = vld [vmem:[#allocation6 + $0x28] ss:$8 sps:$4 sm:$0xff]   ;;  %v5146_v48 = vld [vmem:[#allocation6 + $0x34] sm:$0x1] }
 0x2bb   : > { %v4245_v59 = vadd.f32 %v8532_v6, %v4244_v21  ;;  %v6698_v53 = vpop.f32.mrb[26].mxu0  ;;  %v5145_v51 = vld [vmem:[#allocation6 + $0x30] sm:$0xe]  ;;  %4965 = vrot.lane.b32.xlu0 %v6918_v26, %s9135_s24  ;;  %v5189_v31 = vrot.slane %v5146_v48, 5  ;;  %v4989_v61 = vld [vmem:[#allocation6 + $0x34] sm:$0x1] }
 0x2bc   : > { %v4301_v45 = vmax.f32 %v4253_v54, 0.0  ;;  %v4256_v56 = vadd.f32 %v8532_v6, %v6698_v53  ;;  %v4247_v62 = vpop.f32.mrb[27].mxu0  ;;  %v6537_v13 = vrot.slane %v5145_v51, 9  ;;  %v4988_v25 = vld [vmem:[#allocation6 + $0x30] sm:$0xf]  ;;  %v5074_v21 = vshll.u32 %v4989_v61, 16 }
 0x2bd   : > { %v4299_v63 = vmax.f32 %v4245_v59, 0.0  ;;  %v4248_v17 = vadd.f32 %v8532_v6, %v4247_v62  ;;  %v5065_v24 = vshrl.u32 %v4988_v25, 16  ;;  %v5068_v5 = vshll.u32 %v4988_v25, 16  ;;  %v5282_v52 = vld [vmem:[#allocation6 + $0x30] sm:$0xf] }
 0x2be   : > { %4334 = vst.msk [vmem:[#allocation4 + $0xd0] sm:$0xff] %vm4307_vm11, %v4301_v45  ;;  %v4302_v1 = vmax.f32 %v4256_v56, 0.0  ;;  %v5190_v2 = vsel %vm7247_vm9, %v6537_v13, %v5189_v31  ;;  %v4852_v50 = vld [vmem:[#allocation6 + $0x30] sm:$0xe]  ;;  %v4853_v54 = vld [vmem:[#allocation6 + $0x34] sm:$0x1] }
 0x2bf   : > { %4332 = vst.msk [vmem:[#allocation4 + $0xc0] sm:$0xff] %vm4307_vm11, %v4299_v63  ;;  %v4300_v3 = vmax.f32 %v4248_v17, 0.0  ;;  %v6542_v4 = vcombine.low %v5186_v7, %v5190_v2  ;;  %v5524_v8 = vld [vmem:[#allocation7] sm:$0xff]  ;;  %v5067_v0 = vrot.slane %v5065_v24, 4  ;;  %v5070_v35 = vrot.slane %v5068_v5, 5 }
 0x2c0   : > { %4335 = vst.msk [vmem:[#allocation4 + $0xd8] sm:$0xff] %vm4307_vm11, %v4302_v1  ;;  %6713 = vmatprep.mubr.msk.bf16.mxu1 %vm5571_vm3, %v5524_v8  ;;  %v5347_v26 = vshrl.u32 %v5282_v52, 16  ;;  %v5350_v46 = vshll.u32 %v5282_v52, 16  ;;  %v5060_v59 = vshll.u32 %v4987_v47, 16  ;;  %v6518_v51 = vrot.slane %v4852_v50, 9 }
 0x2c1   : > { %4333 = vst.msk [vmem:[#allocation4 + $0xc8] sm:$0xff] %vm4307_vm11, %v4300_v3  ;;  %5215 = vrot.lane.b32.xlu0 %v6542_v4, %s7008_s25  ;;  %v5071_v30 = vor.u32 %v5070_v35, %v5067_v0  ;;  %v4898_v48 = vrot.slane %v4853_v54, 5  ;;  %v5058_v45 = vrot.slane %v5057_v23, 4  ;;  %v5076_v56 = vrot.slane %v5074_v21, 5  ;;  %v5283_v63 = vld [vmem:[#allocation6 + $0x34] sm:$0x1] }
 0x2c2   : > { %v5349_v62 = vrot.slane %v5347_v26, 4  ;;  %v5352_v13 = vrot.slane %v5350_v46, 5  ;;  %v5062_v31 = vrot.slane %v5060_v59, 5  ;;  %v5439_v57 = vld [vmem:[#allocation6 + $0x30] sm:$0xe] }
 0x2c3   : > { %v5072_v53 = vrot.slane %v5071_v30, 4  ;;  %v4899_v3 = vsel %vm7247_vm9, %v6518_v51, %v4898_v48  ;;  %v5440_v52 = vld [vmem:[#allocation6 + $0x34] sm:$0x1]  ;;  %v6556_v23 = vrot.slane %v5439_v57, 9 }
 0x2c4   : > { %v5063_v8 = vsel %vm7254_vm10, %v5058_v45, %v5062_v31  ;;  %v5481_v54 = vrot.slane %v5440_v52, 5 }
 0x2c5   : > { %v5077_v7 = vsel %vm7254_vm10, %v5072_v53, %v5076_v56 }
 0x2c6   : > { %v6530_v25 = vcombine.low %v5063_v8, %v5077_v7  ;;  %v5482_v59 = vsel %vm7247_vm9, %v6556_v23, %v5481_v54  ;;  %v4695_v8 = vld [vmem:[#allocation6 + $0x30] sm:$0xf] }
 0x2c7   : > { %v4366_v9 = vld [vmem:[#allocation4 + $0xd0] ss:$2 sm:$0xff]  ;;  %v4398_v12 = vld [vmem:[#allocation4 + $0xd1] ss:$2 sm:$0xff] }
 0x2c8   : > { %v4416_v10 = vmax.f32 %v4366_v9, %v4398_v12  ;;  %v4364_v42 = vld [vmem:[#allocation4 + $0xc0] ss:$2 sm:$0xff]  ;;  %v4396_v36 = vld [vmem:[#allocation4 + $0xc1] ss:$2 sm:$0xff] }
 0x2c9   : > { %v4415_v15 = vmax.f32 %v4364_v42, %v4396_v36  ;;  %v5353_v36 = vor.u32 %v5352_v13, %v5349_v62 }
 0x2ca   : > { %4432 = vst.msk [vmem:[#allocation5 + $0x68] sm:$0xff] %vm4307_vm11, %v4416_v10 }
 0x2cb   : > { %4431 = vst.msk [vmem:[#allocation5 + $0x60] sm:$0xff] %vm4307_vm11, %v4415_v15 }
 0x2d1   : > { %v4450_v20 = vld [vmem:[#allocation5 + $0x68] sm:$0xff] }
 0x2d2   : > { %v4441_v22 = vld [vmem:[#allocation5 + $0x60] sm:$0xff] }
 0x2d3   : > { %v4458_v14 = vmax.f32 %v4441_v22, %v4450_v20  ;;  %v4964_v32 = vpop.permute.xlu1 %4963 }
 0x2d5   : > { %v6586_v27 = vpack.c.bf16 %v4458_v14, %v4458_v14  ;;  %v5356_v14 = vshll.u32 %v5283_v63, 16 }
 0x2d7   : > { %v4563_v28 = vshrl.u32 %v6586_v27, 16  ;;  %v4566_v16 = vshll.u32 %v6586_v27, 16  ;;  %v4826_v39 = vpop.permute.xlu1 %4825 }
 0x2d8   : > { %4837 = vst.msk [vmem:[#allocation7 + $0x8] sm:$0xff] %vm4835_vm6, %v4826_v39 }
 0x2d9   : > { %v4565_v11 = vrot.slane %v4563_v28, 7  ;;  %4930 = vst.msk [vmem:[#allocation7 + $0x8] sm:$0xff] %vm4928_vm5, %v4919_v18 }
 0x2da   : > { %4975 = vst.msk [vmem:[#allocation7 + $0x8] sm:$0xff] %vm4973_vm7, %v4964_v32 }
 0x2db   : > { %v4568_v38 = vor.u32 %v4566_v16, %v4565_v11  ;;  %v4569_v60 = vrot.slane %v4565_v11, 4  ;;  %v5214_v31 = vpop.permute.xlu1 %5213 }
 0x2dd   : > { %v4636_v49 = vsel %vm8337_vm1, %v4568_v38, %v4635_v44  ;;  %v4639_v40 = vsel %vm8343_vm8, %v4569_v60, %v4638_v41  ;;  %v5354_v41 = vrot.slane %v5353_v36, 4  ;;  %v5358_v60 = vrot.slane %v5356_v14, 5 }
 0x2de   : > { %4637 = vst [vmem:[#allocation6 + $0x38] sm:$0xf] %v4636_v49  ;;  %4640 = vst [vmem:[#allocation6 + $0x3c] sm:$0x1] %v4639_v40 }
 0x2e5   : > { %v6919_v17 = vld [vmem:[#allocation6 + $0x30] ss:$8 sps:$4 sm:$0xff]   ;;  %v4855_v2 = vld [vmem:[#allocation6 + $0x3c] sm:$0x1] }
 0x2e6   : > { %v4854_v1 = vld [vmem:[#allocation6 + $0x38] sm:$0xe]  ;;  %5261 = vrot.lane.b32.xlu0 %v6919_v17, %s9114_s12  ;;  %v4902_v10 = vrot.slane %v4855_v2, 5  ;;  %v5285_v42 = vld [vmem:[#allocation6 + $0x3c] sm:$0x1] }
 0x2e7   : > { %v6519_v4 = vrot.slane %v4854_v1, 9  ;;  %v5284_v9 = vld [vmem:[#allocation6 + $0x38] sm:$0xf]  ;;  %v5370_v37 = vshll.u32 %v5285_v42, 16  ;;  %v5442_v35 = vld [vmem:[#allocation6 + $0x3c] sm:$0x1] }
 0x2e8   : > { %v6701_v12 = vpop.f32.mrb[28].mxu0  ;;  %v5361_v15 = vshrl.u32 %v5284_v9, 16  ;;  %v5364_v18 = vshll.u32 %v5284_v9, 16  ;;  %v5441_v0 = vld [vmem:[#allocation6 + $0x38] sm:$0xe]  ;;  %v5485_v30 = vrot.slane %v5442_v35, 5 }
 0x2e9   : > { %v4269_v20 = vadd.f32 %v8532_v6, %v6701_v12  ;;  %v4260_v22 = vpop.f32.mrb[29].mxu0  ;;  %v4903_v5 = vsel %vm7247_vm9, %v6519_v4, %v4902_v10  ;;  %v5372_v61 = vrot.slane %v5370_v37, 5  ;;  %v6557_v47 = vrot.slane %v5441_v0, 9  ;;  %v6929_v21 = vld [vmem:[#allocation6 + $0x30] ss:$8 sps:$4 sm:$0xff]  }
 0x2ea   : > { %v4261_v27 = vadd.f32 %v8532_v6, %v4260_v22  ;;  %v6702_v24 = vpop.f32.mrb[30].mxu0  ;;  %v5363_v32 = vrot.slane %v5361_v15, 4  ;;  %v5366_v33 = vrot.slane %v5364_v18, 5  ;;  %v6523_v16 = vcombine.low %v4899_v3, %v4903_v5  ;;  %5122 = vrot.lane.b32.xlu0 %v6530_v25, %s9115_s29  ;;  %4682 = vst.msk [vmem:[#allocation7 + $0x18] sm:$0xff] %vm4307_vm11, %v6929_v21  ;;  %v4697_v3 = vld [vmem:[#allocation6 + $0x38] sm:$0xf] }
 0x2eb   : > { %v4305_v34 = vmax.f32 %v4269_v20, 0.0  ;;  %v4272_v28 = vadd.f32 %v8532_v6, %v6702_v24  ;;  %v4263_v11 = vpop.f32.mrb[31].mxu0  ;;  %v5486_v46 = vsel %vm7247_vm9, %v6557_v47, %v5485_v30  ;;  %v4798_v9 = vshrl.u32 %v4697_v3, 16  ;;  %v4641_v15 = vld [vmem:[#allocation6 + $0x40] sm:$0xf] }
 0x2ec   : > { %v4303_v39 = vmax.f32 %v4261_v27, 0.0  ;;  %v4264_v44 = vadd.f32 %v8532_v6, %v4263_v11  ;;  %v5367_v55 = vor.u32 %v5366_v33, %v5363_v32  ;;  %4922 = vrot.lane.b32.xlu1 %v6523_v16, %s9151_s14  ;;  %v5359_v6 = vsel %vm7254_vm10, %v5354_v41, %v5358_v60  ;;  %v4644_v22 = vld [vmem:[#allocation6 + $0x44] sm:$0x1]  ;;  %v5288_v32 = vld [vmem:[#allocation6 + $0x48] sm:$0xf] }
 0x2ed   : > { %4338 = vst.msk [vmem:[#allocation4 + $0xf0] sm:$0xff] %vm4307_vm11, %v4305_v34  ;;  %v4306_v38 = vmax.f32 %v4272_v28, 0.0  ;;  %v6562_v53 = vcombine.low %v5482_v59, %v5486_v46  ;;  %v4801_v12 = vshll.u32 %v4697_v3, 16  ;;  %v4784_v18 = vshrl.u32 %v4695_v8, 16  ;;  %v4696_v28 = vld [vmem:[#allocation6 + $0x34] sm:$0x1] }
 0x2ee   : > { %4336 = vst.msk [vmem:[#allocation4 + $0xe0] sm:$0xff] %vm4307_vm11, %v4303_v39  ;;  %v4304_v49 = vmax.f32 %v4264_v44, 0.0  ;;  %v5368_v40 = vrot.slane %v5367_v55, 4  ;;  %v4787_v20 = vshll.u32 %v4695_v8, 16  ;;  %v4800_v37 = vrot.slane %v4798_v9, 4 }
 0x2ef   : > { %4339 = vst.msk [vmem:[#allocation4 + $0xf8] sm:$0xff] %vm4307_vm11, %v4306_v38  ;;  %v4803_v27 = vrot.slane %v4801_v12, 5  ;;  %v4786_v33 = vrot.slane %v4784_v18, 4  ;;  %v4698_v11 = vld [vmem:[#allocation6 + $0x3c] sm:$0x1]  ;;  %v5389_v0 = vshrl.u32 %v5288_v32, 16 }
 0x2f0   : > { %4337 = vst.msk [vmem:[#allocation4 + $0xe8] sm:$0xff] %vm4307_vm11, %v4304_v49  ;;  %v5373_v50 = vsel %vm7254_vm10, %v5368_v40, %v5372_v61  ;;  %v4789_v34 = vrot.slane %v4787_v20, 5  ;;  %v4990_v35 = vld [vmem:[#allocation6 + $0x38] sm:$0xf]  ;;  %v4793_v41 = vshll.u32 %v4696_v28, 16  ;;  %v4807_v55 = vshll.u32 %v4698_v11, 16 }
 0x2f1   : > { %v6550_v26 = vcombine.low %v5359_v6, %v5373_v50  ;;  %v4804_v16 = vor.u32 %v4803_v27, %v4800_v37  ;;  %v5392_v57 = vshll.u32 %v5288_v32, 16  ;;  %v5079_v38 = vshrl.u32 %v4990_v35, 16  ;;  %v5147_v30 = vld [vmem:[#allocation6 + $0x38] sm:$0xe]  ;;  %v5148_v23 = vld [vmem:[#allocation6 + $0x3c] sm:$0x1] }
 0x2f2   : > { %v4790_v44 = vor.u32 %v4789_v34, %v4786_v33  ;;  %v5082_v60 = vshll.u32 %v4990_v35, 16  ;;  %v8598_v61 = vrot.slane %v5389_v0, 4  ;;  %v4795_v40 = vrot.slane %v4793_v41, 5  ;;  %v5289_v3 = vld [vmem:[#allocation6 + $0x4c] sm:$0x1] }
 0x2f3   : > { %5418 = vrot.lane.b32.xlu0 %v6550_v26, %s9152_s22  ;;  %v4805_v43 = vrot.slane %v4804_v16, 4  ;;  %v4809_v47 = vrot.slane %v4807_v55, 5  ;;  %v5394_v6 = vrot.slane %v5392_v57, 5  ;;  %v5081_v59 = vrot.slane %v5079_v38, 4  ;;  %v4991_v9 = vld [vmem:[#allocation6 + $0x3c] sm:$0x1] }
 0x2f4   : > { %v4791_v49 = vrot.slane %v4790_v44, 4  ;;  %v6538_v8 = vrot.slane %v5147_v30, 9  ;;  %v5398_v37 = vshll.u32 %v5289_v3, 16  ;;  %v5445_v35 = vld [vmem:[#allocation6 + $0x48] sm:$0xe] }
 0x2f5   : > { %v5446_v57 = vld [vmem:[#allocation6 + $0x4c] sm:$0x1] }
 0x2f6   : > { %v4370_v51 = vld [vmem:[#allocation4 + $0xf0] ss:$2 sm:$0xff]  ;;  %v4402_v48 = vld [vmem:[#allocation4 + $0xf1] ss:$2 sm:$0xff]  ;;  %v5400_v0 = vrot.slane %v5398_v37, 5 }
 0x2f7   : > { %v4418_v45 = vmax.f32 %v4370_v51, %v4402_v48  ;;  %v4368_v56 = vld [vmem:[#allocation4 + $0xe0] ss:$2 sm:$0xff]  ;;  %v4400_v62 = vld [vmem:[#allocation4 + $0xe1] ss:$2 sm:$0xff]  ;;  %5511 = vrot.lane.b32.xlu0 %v6562_v53, %s9153_s13  ;;  %v5084_v53 = vrot.slane %v5082_v60, 5 }
 0x2f8   : > { %v4417_v13 = vmax.f32 %v4368_v56, %v4400_v62  ;;  %v4810_v62 = vsel %vm7254_vm10, %v4805_v43, %v4809_v47 }
 0x2f9   : > { %4434 = vst.msk [vmem:[#allocation5 + $0x78] sm:$0xff] %vm4307_vm11, %v4418_v45 }
 0x2fa   : > { %4433 = vst.msk [vmem:[#allocation5 + $0x70] sm:$0xff] %vm4307_vm11, %v4417_v13 }
 0x300   : > { %v4451_v63 = vld [vmem:[#allocation5 + $0x78] sm:$0xff] }
 0x301   : > { %v4442_v17 = vld [vmem:[#allocation5 + $0x70] sm:$0xff]  ;;  %v5260_v7 = vpop.permute.xlu1 %5259 }
 0x302   : > { %v4459_v1 = vmax.f32 %v4442_v17, %v4451_v63 }
 0x304   : > { %v6587_v2 = vpack.c.bf16 %v4459_v1, %v4459_v1 }
 0x305   : > { %v5121_v10 = vpop.permute.xlu1 %5120 }
 0x306   : > { %v4571_v4 = vshrl.u32 %v6587_v2, 16  ;;  %v4574_v36 = vshll.u32 %v6587_v2, 16  ;;  %5132 = vst.msk [vmem:[#allocation7 + $0x8] sm:$0xff] %vm5130_vm12, %v5121_v10 }
 0x307   : > { %5225 = vst.msk [vmem:[#allocation7 + $0x8] sm:$0xff] %vm5223_vm13, %v5214_v31  ;;  %v5510_v39 = vpop.permute.xlu0 %5509 }
 0x308   : > { %v4573_v42 = vrot.slane %v4571_v4, 7  ;;  %5271 = vst.msk [vmem:[#allocation7 + $0x8] sm:$0xff] %vm5269_vm0, %v5260_v7  ;;  %v4796_v4 = vsel %vm7254_vm10, %v4791_v49, %v4795_v40  ;;  %v5493_v49 = vrot.slane %v5446_v57, 5 }
 0x30a   : > { %v4576_v25 = vor.u32 %v4574_v36, %v4573_v42  ;;  %v4577_v14 = vrot.slane %v4573_v42, 4  ;;  %v5193_v36 = vrot.slane %v5148_v23, 5 }
 0x30b   : > { %v4921_v46 = vpop.permute.xlu0 %4920 }
 0x30c   : > { %v4642_v24 = vsel %vm8337_vm1, %v4576_v25, %v4641_v15  ;;  %v4645_v5 = vsel %vm8343_vm8, %v4577_v14, %v4644_v22  ;;  %v5085_v15 = vor.u32 %v5084_v53, %v5081_v59  ;;  %v6511_v22 = vcombine.low %v4796_v4, %v4810_v62 }
 0x30d   : > { %4643 = vst [vmem:[#allocation6 + $0x40] sm:$0xf] %v4642_v24  ;;  %4646 = vst [vmem:[#allocation6 + $0x44] sm:$0x1] %v4645_v5  ;;  %v5395_v14 = vor.u32 %v5394_v6, %v8598_v61  ;;  %v5088_v24 = vshll.u32 %v4991_v9, 16  ;;  %v5194_v33 = vsel %vm7247_vm9, %v6538_v8, %v5193_v36 }
 0x30e   : > { %v5086_v34 = vrot.slane %v5085_v15, 4 }
 0x30f   : > { %v5396_v55 = vrot.slane %v5395_v14, 4 }
 0x310   : > { %v5417_v58 = vpop.permute.xlu1 %5416 }
 0x311   : > { %5428 = vst.msk [vmem:[#allocation7 + $0x8] sm:$0xff] %vm5426_vm15, %v5417_v58  ;;  %v5401_v47 = vsel %vm7254_vm10, %v5396_v55, %v5400_v0 }
 0x312   : > { %5521 = vst.msk [vmem:[#allocation7 + $0x8] sm:$0xff] %vm5519_vm2, %v5510_v39  ;;  %v5090_v39 = vrot.slane %v5088_v24, 5 }
 0x314   : > { %v6921_v52 = vld [vmem:[#allocation6 + $0x38] ss:$8 sps:$4 sm:$0xff]   ;;  %v4828_v50 = vpop.permute.xlu1 %4827  ;;  %v5150_v21 = vld [vmem:[#allocation6 + $0x44] sm:$0x1]  ;;  %v5091_v38 = vsel %vm7254_vm10, %v5086_v34, %v5090_v39 }
 0x315   : > { %4967 = vrot.lane.b32.xlu1 %v6921_v52, %s9135_s24  ;;  %v5149_v54 = vld [vmem:[#allocation6 + $0x40] sm:$0xe]  ;;  %4838 = vst.msk [vmem:[#allocation7 + $0x10] sm:$0xff] %vm4835_vm6, %v4828_v50  ;;  %v4993_v13 = vld [vmem:[#allocation6 + $0x44] sm:$0x1]  ;;  %v5197_v1 = vrot.slane %v5150_v21, 5 }
 0x316   : > { %v4992_v26 = vld [vmem:[#allocation6 + $0x40] sm:$0xf]  ;;  %4931 = vst.msk [vmem:[#allocation7 + $0x10] sm:$0xff] %vm4928_vm5, %v4921_v46  ;;  %v6539_v17 = vrot.slane %v5149_v54, 9  ;;  %v5102_v20 = vshll.u32 %v4993_v13, 16  ;;  %s9154_s24 = smov 8  }
 0x317   : > { %v5093_v51 = vshrl.u32 %v4992_v26, 16  ;;  %v5096_v48 = vshll.u32 %v4992_v26, 16  ;;  %v5286_v45 = vld [vmem:[#allocation6 + $0x40] sm:$0xf]  ;;  %v5287_v25 = vld [vmem:[#allocation6 + $0x44] sm:$0x1] }
 0x318   : > { %v6922_v56 = vld [vmem:[#allocation6 + $0x40] ss:$8 sps:$4 sm:$0xff]   ;;  %v5375_v31 = vshrl.u32 %v5286_v45, 16  ;;  %v5378_v63 = vshll.u32 %v5286_v45, 16  ;;  %v5198_v27 = vsel %vm7247_vm9, %v6539_v17, %v5197_v1  ;;  %v5104_v28 = vrot.slane %v5102_v20, 5 }
 0x319   : > { %v5095_v7 = vrot.slane %v5093_v51, 4  ;;  %v5098_v2 = vrot.slane %v5096_v48, 5  ;;  %5263 = vrot.lane.b32.xlu1 %v6922_v56, %s9114_s12  ;;  %v5525_v42 = vld [vmem:[#allocation7 + $0x8] sm:$0xff]  ;;  %v5384_v11 = vshll.u32 %v5287_v25, 16  ;;  %v6543_v16 = vcombine.low %v5194_v33, %v5198_v27  ;;  %v5443_v58 = vld [vmem:[#allocation6 + $0x40] sm:$0xe] }
 0x31a   : > { %v5377_v12 = vrot.slane %v5375_v31, 4  ;;  %v5380_v10 = vrot.slane %v5378_v63, 5  ;;  %6714 = vmatmul.mubr.msk.bf16.vlgmr.msra.gmra.mrb[0].mxu1 %vm5571_vm3, %v5525_v42  ;;  %v5444_v43 = vld [vmem:[#allocation6 + $0x44] sm:$0x1]  ;;  %v6559_v52 = vrot.slane %v5445_v35, 9  ;;  %v6558_v30 = vrot.slane %v5443_v58, 9 }
 0x31b   : > { %v5099_v18 = vor.u32 %v5098_v2, %v5095_v7  ;;  %v5386_v60 = vrot.slane %v5384_v11, 5  ;;  %v5489_v6 = vrot.slane %v5444_v43, 5  ;;  %v8651_v7 = vld [vmem:[%s9089_s4] ss:$0 sm:$0xff]  ;;  %v5731_v11 = vlaneseq }
 0x31c   : > { %v5381_v32 = vor.u32 %v5380_v10, %v5377_v12  ;;  %v5494_v54 = vsel %vm7247_vm9, %v6559_v52, %v5493_v49 }
 0x31d   : > { %v5100_v5 = vrot.slane %v5099_v18, 4  ;;  %4829 = vrot.lane.b32.xlu1 %v6511_v22, %s9154_s24  ;;  %v5490_v23 = vsel %vm7247_vm9, %v6558_v30, %v5489_v6  ;;  %vm5661_vm9 = vcmask 130048   ;;  %vm8672_vm11 = vcmp.lt.s32.totalorder %v5731_v11, 16  ;;  %s9190_s24 = smov 80  }
 0x31e   : > { %v5382_v41 = vrot.slane %v5381_v32, 4  ;;  %v6563_v21 = vcombine.low %v5490_v23, %v5494_v54  ;;  %vm8704_vm1 = vcmp.ge.s32.totalorder %v5731_v11, 16  ;;  %vm8709_vm8 = vcmp.lt.s32.totalorder %v5731_v11, 32 }
 0x31f   : > { %v5105_v44 = vsel %vm7254_vm10, %v5100_v5, %v5104_v28  ;;  %vm8716_vm4 = vcmp.ge.s32.totalorder %v5731_v11, 32  ;;  %vm8792_vm14 = vcmp.lt.s32.totalorder %v5731_v11, 112 }
 0x320   : > { %v6531_v61 = vcombine.low %v5091_v38, %v5105_v44  ;;  %v5387_v40 = vsel %vm7254_vm10, %v5382_v41, %v5386_v60  ;;  %vm5709_vm10 = vcmask 125952   ;;  %v8666_v44 = vshrl.u32 %v5731_v11, 7  ;;  %v5920_v60 = vld [vmem:[%s9090_s5 + $0x28] sm:$0xff] }
 0x321   : > { %5217 = vrot.lane.b32.xlu1 %v6543_v16, %s7008_s25  ;;  %v6551_v50 = vcombine.low %v5387_v40, %v5401_v47  ;;  %v7012_v16 = vmov 1966171168  }
 0x322   : > { %v5738_v0 = vunpack.c.l.s4 %v7012_v16  ;;  %v5931_v16 = vld [vmem:[%s9090_s5 + $0x80] sm:$0xff] }
 0x324   : > { %v5739_v39 = vunpack.c.0.s8 %v5738_v0  ;;  %v5932_v0 = vld [vmem:[%s9090_s5 + $0x88] sm:$0xff] }
 0x325   : > { %5124 = vrot.lane.b32.xlu1 %v6531_v61, %s9115_s29 }
 0x326   : > { %v8669_v41 = vsub.s32 %v5739_v39, %v8666_v44 }
 0x329   : > { %5420 = vrot.lane.b32.xlu1 %v6551_v50, %s9152_s22  ;;  %s9111_s22 = smov 112  }
 0x32d   : > { %5513 = vrot.lane.b32.xlu1 %v6563_v21, %s9153_s13  ;;  %v4966_v26 = vpop.permute.xlu0 %4965 }
 0x32e   : > { %4976 = vst.msk [vmem:[#allocation7 + $0x10] sm:$0xff] %vm4973_vm7, %v4966_v26 }
 0x333   : > { %v5216_v29 = vpop.permute.xlu0 %5215 }
 0x358   : > { %v5262_v46 = vpop.permute.xlu0 %5261 }
 0x35c   : > { %v5123_v59 = vpop.permute.xlu0 %5122 }
 0x35d   : > { %5133 = vst.msk [vmem:[#allocation7 + $0x10] sm:$0xff] %vm5130_vm12, %v5123_v59 }
 0x35e   : > { %5226 = vst.msk [vmem:[#allocation7 + $0x10] sm:$0xff] %vm5223_vm13, %v5216_v29  ;;  %v4923_v48 = vpop.permute.xlu1 %4922 }
 0x35f   : > { %5272 = vst.msk [vmem:[#allocation7 + $0x10] sm:$0xff] %vm5269_vm0, %v5262_v46 }
 0x365   : > { %v5419_v53 = vpop.permute.xlu0 %5418 }
 0x366   : > { %5429 = vst.msk [vmem:[#allocation7 + $0x10] sm:$0xff] %vm5426_vm15, %v5419_v53 }
 0x369   : > { %v5512_v19 = vpop.permute.xlu0 %5511 }
 0x36a   : > { %5522 = vst.msk [vmem:[#allocation7 + $0x10] sm:$0xff] %vm5519_vm2, %v5512_v19 }
 0x371   : > { %v5526_v51 = vld [vmem:[#allocation7 + $0x10] sm:$0xff] }
 0x372   : > { %6717 = vmatprep.mubr.msk.bf16.mxu1 %vm5571_vm3, %v5526_v51 }
 0x387   : > { %v4968_v45 = vpop.permute.xlu1 %4967 }
 0x38b   : > { %v5264_v56 = vpop.permute.xlu1 %5263 }
 0x38f   : > { %v4830_v62 = vpop.permute.xlu1 %4829 }
 0x390   : > { %4839 = vst.msk [vmem:[#allocation7 + $0x18] sm:$0xff] %vm4835_vm6, %v4830_v62  ;;  %vm8721_vm6 = vcmp.lt.s32.totalorder %v5731_v11, 48 }
 0x391   : > { %4932 = vst.msk [vmem:[#allocation7 + $0x18] sm:$0xff] %vm4928_vm5, %v4923_v48  ;;  %vm8726_vm5 = vcmp.ge.s32.totalorder %v5731_v11, 48 }
 0x392   : > { %4977 = vst.msk [vmem:[#allocation7 + $0x18] sm:$0xff] %vm4973_vm7, %v4968_v45  ;;  %vm8731_vm7 = vcmp.lt.s32.totalorder %v5731_v11, 64 }
 0x393   : > { %v5218_v13 = vpop.permute.xlu1 %5217 }
 0x397   : > { %v5125_v31 = vpop.permute.xlu1 %5124 }
 0x398   : > { %5134 = vst.msk [vmem:[#allocation7 + $0x18] sm:$0xff] %vm5130_vm12, %v5125_v31  ;;  %vm9112_vm12 = vmand %vm8704_vm1, %vm8709_vm8 }
 0x399   : > { %5227 = vst.msk [vmem:[#allocation7 + $0x18] sm:$0xff] %vm5223_vm13, %v5218_v13  ;;  %vm8747_vm13 = vcmp.ge.s32.totalorder %v5731_v11, 64 }
 0x39a   : > { %5273 = vst.msk [vmem:[#allocation7 + $0x18] sm:$0xff] %vm5269_vm0, %v5264_v56  ;;  %vm8752_vm0 = vcmp.lt.s32.totalorder %v5731_v11, 80 }
 0x39b   : > { %v5421_v63 = vpop.permute.xlu1 %5420 }
 0x39c   : > { %5430 = vst.msk [vmem:[#allocation7 + $0x18] sm:$0xff] %vm5426_vm15, %v5421_v63  ;;  %vm8762_vm15 = vcmp.ge.s32.totalorder %v5731_v11, 80 }
 0x39f   : > { %v5514_v17 = vpop.permute.xlu1 %5513 }
 0x3a0   : > { %5523 = vst.msk [vmem:[#allocation7 + $0x18] sm:$0xff] %vm5519_vm2, %v5514_v17  ;;  %vm8767_vm2 = vcmp.lt.s32.totalorder %v5731_v11, 96 }
 0x3a7   : > { %v5527_v1 = vld [vmem:[#allocation7 + $0x18] sm:$0xff] }
 0x3a8   : > { %6718 = vmatmul.mubr.msk.bf16.gmra.mrb[4].mxu1 %vm5571_vm3, %v5527_v1  ;;  %vm8806_vm3 = vcmp.ge.s32.totalorder %v5731_v11, 112 }
 0x3ed   : > { %v6715_v2 = vpop.f32.mrb[0].mxu1 }
 0x3ee   : > { %v5631_v3 = vadd.f32 %v6715_v2, %v8651_v7  ;;  %v5622_v4 = vpop.f32.mrb[1].mxu1 }
 0x3ef   : > { %v5623_v8 = vadd.f32 %v8651_v7, %v5622_v4  ;;  %v6716_v9 = vpop.f32.mrb[2].mxu1  ;;  %v5955_v4 = vsub.s32 1, %v8666_v44 }
 0x3f0   : > { %v5655_v12 = vmax.f32 %v5631_v3, 0.0  ;;  %v5634_v10 = vadd.f32 %v6716_v9, %v8651_v7  ;;  %v5625_v42 = vpop.f32.mrb[3].mxu1 }
 0x3f1   : > { %v5653_v36 = vmax.f32 %v5623_v8, 0.0  ;;  %v5626_v15 = vadd.f32 %v8651_v7, %v5625_v42  ;;  %v9163_v8 = vmov 0 }
 0x3f2   : > { %5664 = vst.msk [vmem:[#allocation8 + $0x10] sm:$0xff] %vm5661_vm9, %v5655_v12  ;;  %v5656_v18 = vmax.f32 %v5634_v10, 0.0  ;;  %v9164_v8 = vsel %vm8721_vm6, 4294967295, %v9163_v8 }
 0x3f3   : > { %5662 = vst.msk [vmem:[#allocation8] sm:$0xff] %vm5661_vm9, %v5653_v36  ;;  %v5654_v20 = vmax.f32 %v5626_v15, 0.0 }
 0x3f4   : > { %5665 = vst.msk [vmem:[#allocation8 + $0x18] sm:$0xff] %vm5661_vm9, %v5656_v18 }
 0x3f5   : > { %5663 = vst.msk [vmem:[#allocation8 + $0x8] sm:$0xff] %vm5661_vm9, %v5654_v20 }
 0x3f9   : > { %v5674_v22 = vld [vmem:[#allocation8 + $0x10] ss:$2 sm:$0xf]  ;;  %v5690_v25 = vld [vmem:[#allocation8 + $0x11] ss:$2 sm:$0xf] }
 0x3fa   : > { %v5703_v14 = vmax.f32 %v5674_v22, %v5690_v25  ;;  %v5670_v37 = vld [vmem:[#allocation8] ss:$2 sm:$0xf]  ;;  %v5686_v27 = vld [vmem:[#allocation8 + $0x1] ss:$2 sm:$0xf] }
 0x3fb   : > { %v5701_v24 = vmax.f32 %v5670_v37, %v5686_v27  ;;  %v5676_v5 = vld [vmem:[#allocation8 + $0x18] ss:$2 sm:$0xf]  ;;  %v5692_v32 = vld [vmem:[#allocation8 + $0x19] ss:$2 sm:$0xf] }
 0x3fc   : > { %5712 = vst.msk [vmem:[#allocation9 + $0x8] sm:$0xf] %vm5709_vm10, %v5703_v14  ;;  %v5704_v33 = vmax.f32 %v5676_v5, %v5692_v32  ;;  %v5672_v34 = vld [vmem:[#allocation8 + $0x8] ss:$2 sm:$0xf]  ;;  %v7016_v32 = vmov 0.0|0.0  }
 0x3fd   : > { %v5688_v28 = vld [vmem:[#allocation8 + $0x9] ss:$2 sm:$0xf]  ;;  %5710 = vst.msk [vmem:[#allocation9] sm:$0xf] %vm5709_vm10, %v5701_v24  ;;  %6795 = vmatprep.subr.bf16.mxu0 %v7016_v32 }
 0x3fe   : > { %v5702_v35 = vmax.f32 %v5672_v34, %v5688_v28  ;;  %5713 = vst.msk [vmem:[#allocation9 + $0xc] sm:$0xf] %vm5709_vm10, %v5704_v33  ;;  %v5947_v34 = vld [vmem:[%s9091_s6] sm:$0x1] }
 0x400   : > { %5711 = vst.msk [vmem:[#allocation9 + $0x4] sm:$0xf] %vm5709_vm10, %v5702_v35  ;;  %v6751_v35 = vpack.c.bf16 %v5932_v0, %v5931_v16  ;;  %v5941_v16 = vld [vmem:[%s9090_s5 + $0xd0] sm:$0xff]  ;;  %v5942_v0 = vld [vmem:[%s9090_s5 + $0xd8] sm:$0xff] }
 0x402   : > { %6752 = vmatprep.subr.bf16.mxu1 %v6751_v35  ;;  %v6771_v35 = vpack.c.bf16 %v5942_v0, %v5941_v16  ;;  %v6046_v0 = vld [vmem:[%s9093_s8] sm:$0x1] }
 0x403   : > { %v5719_v55 = vld [vmem:[#allocation9 + $0x8] sm:$0xf] }
 0x404   : > { %v5718_v43 = vld [vmem:[#allocation9] sm:$0xf] }
 0x405   : > { %v5724_v57 = vld [vmem:[#allocation9 + $0xc] sm:$0xf] }
 0x406   : > { %v5728_v58 = vmax.f32 %v5719_v55, %v5724_v57 }
 0x407   : > { %v5723_v38 = vld [vmem:[#allocation9 + $0x4] sm:$0xf] }
 0x408   : > { %v5727_v61 = vmax.f32 %v5718_v43, %v5723_v38  ;;  %v5789_v52 = vrot.slane %v5728_v58, %v8669_v41  ;;  %v9184_v43 = vmov 0  ;;  %v5915_v38 = vld [vmem:[%s9090_s5] sm:$0xff] }
 0x40a   : > { %5735 = vst.msk [vmem:[#allocation10] sm:$0x1] %vm8672_vm11, %v5727_v61  ;;  %v5796_v49 = vrot.slane %v5789_v52, %v8669_v41  ;;  %v5804_v40 = vcombine.high %v5789_v52, %v5789_v52  ;;  %v5743_v30 = vrot.slane %v5727_v61, %v8669_v41  ;;  %v5916_v61 = vld [vmem:[%s9090_s5 + $0x8] sm:$0xff]  ;;  %v5933_v52 = vld [vmem:[%s9090_s5 + $0x90] sm:$0xff] }
 0x40c   : > { %5797 = vrot.lane.b32.xlu0 %v5796_v49, %s9153_s13  ;;  %v5811_v47 = vrot.slane %v5804_v40, %v8669_v41  ;;  %v5819_v6 = vcombine.high %v5796_v49, %v5796_v49  ;;  %v5744_v50 = vcombine.high %v5743_v30, %v5743_v30  ;;  %v5751_v54 = vrot.slane %v5743_v30, %v8669_v41  ;;  %v5934_v49 = vld [vmem:[%s9090_s5 + $0x98] sm:$0xff] }
 0x40e   : > { %v5758_v23 = vrot.slane %v5744_v50, %v8669_v41  ;;  %v5766_v21 = vcombine.high %v5751_v54, %v5751_v54  ;;  %v5827_v29 = vcombine.high %v5811_v47, %v5811_v47 }
 0x410   : > { %5812 = vrot.lane.b32.xlu0 %v5811_v47, %s9117_s15  ;;  %v5774_v26 = vcombine.high %v5758_v23, %v5758_v23  ;;  %v6755_v47 = vpack.c.bf16 %v5934_v49, %v5933_v52  ;;  %v5944_v52 = vld [vmem:[%s9090_s5 + $0xe8] sm:$0xff]  ;;  %v5927_v49 = vld [vmem:[%s9090_s5 + $0x60] sm:$0xff] }
 0x414   : > { %5820 = vrot.lane.b32.xlu0 %v5819_v6, %s9116_s30 }
 0x418   : > { %5759 = vrot.lane.b32.xlu0 %v5758_v23, %s9151_s14 }
 0x41c   : > { %5767 = vrot.lane.b32.xlu0 %v5766_v21, %s9115_s29  ;;  %v5917_v21 = vld [vmem:[%s9090_s5 + $0x10] sm:$0xff]  ;;  %s9191_s29 = smov 96  }
 0x420   : > { %5775 = vrot.lane.b32.xlu0 %v5774_v26, %s9114_s12  ;;  %v5918_v26 = vld [vmem:[%s9090_s5 + $0x18] sm:$0xff]  ;;  %s9194_s12 = smov 112  }
 0x424   : > { %5828 = vrot.lane.b32.xlu0 %v5827_v29, %s9111_s22 }
 0x47b   : > { %v6719_v46 = vpop.f32.mrb[4].mxu1 }
 0x47c   : > { %v5647_v59 = vadd.f32 %v6719_v46, %v8651_v7  ;;  %v5638_v53 = vpop.f32.mrb[5].mxu1  ;;  %v6757_v46 = vpack.c.bf16 %v5918_v26, %v5917_v21  ;;  %v5930_v21 = vld [vmem:[%s9090_s5 + $0x78] sm:$0xff] }
 0x47d   : > { %v5639_v19 = vadd.f32 %v8651_v7, %v5638_v53  ;;  %v6720_v51 = vpop.f32.mrb[6].mxu1  ;;  %v5936_v53 = vld [vmem:[%s9090_s5 + $0xa8] sm:$0xff] }
 0x47e   : > { %v5659_v48 = vmax.f32 %v5647_v59, 0.0  ;;  %v5650_v45 = vadd.f32 %v6720_v51, %v8651_v7  ;;  %v5641_v56 = vpop.f32.mrb[7].mxu1  ;;  %v8694_v62 = vpop.permute.xlu0 %5797  ;;  %v5935_v59 = vld [vmem:[%s9090_s5 + $0xa0] sm:$0xff] }
 0x47f   : > { %v5657_v13 = vmax.f32 %v5639_v19, 0.0  ;;  %v5642_v31 = vadd.f32 %v8651_v7, %v5641_v56  ;;  %v9159_v7 = vmov 0 }
 0x480   : > { %5668 = vst.msk [vmem:[#allocation8 + $0x30] sm:$0xff] %vm5661_vm9, %v5659_v48  ;;  %v5660_v63 = vmax.f32 %v5650_v45, 0.0  ;;  %v9160_v7 = vsel %vm8709_vm8, 4294967295, %v9159_v7  ;;  %vm8811_vm8 = vcmp.lt.s32.totalorder %v5731_v11, 128  ;;  %v6759_v48 = vpack.c.bf16 %v5936_v53, %v5935_v59 }
 0x481   : > { %5666 = vst.msk [vmem:[#allocation8 + $0x20] sm:$0xff] %vm5661_vm9, %v5657_v13  ;;  %v5658_v17 = vmax.f32 %v5642_v31, 0.0  ;;  %v9185_v43 = vsel %vm8811_vm8, 4294967295, %v9184_v43  ;;  %v5937_v13 = vld [vmem:[%s9090_s5 + $0xb0] sm:$0xff] }
 0x482   : > { %5669 = vst.msk [vmem:[#allocation8 + $0x38] sm:$0xff] %vm5661_vm9, %v5660_v63  ;;  %v8700_v1 = vpop.permute.xlu0 %5812  ;;  %v5938_v63 = vld [vmem:[%s9090_s5 + $0xb8] sm:$0xff] }
 0x483   : > { %5667 = vst.msk [vmem:[#allocation8 + $0x28] sm:$0xff] %vm5661_vm9, %v5658_v17  ;;  %vm9119_vm9 = vmand %vm8806_vm3, %vm8811_vm8  ;;  %v6763_v17 = vpack.c.bf16 %v5938_v63, %v5937_v13  ;;  %v6040_v13 = vld [vmem:[%s9092_s7 + $0x10] sm:$0xff] }
 0x484   : > { %vm9199_vm8 = vmand %vm8726_vm5, %vm8731_vm7 }
 0x486   : > { %v8713_v3 = vpop.permute.xlu0 %5820 }
 0x487   : > { %v5682_v10 = vld [vmem:[#allocation8 + $0x30] ss:$2 sm:$0xf]  ;;  %v5698_v42 = vld [vmem:[#allocation8 + $0x31] ss:$2 sm:$0xf] }
 0x488   : > { %v5707_v36 = vmax.f32 %v5682_v10, %v5698_v42  ;;  %v5678_v15 = vld [vmem:[#allocation8 + $0x20] ss:$2 sm:$0xf]  ;;  %v5694_v18 = vld [vmem:[#allocation8 + $0x21] ss:$2 sm:$0xf] }
 0x489   : > { %v5705_v20 = vmax.f32 %v5678_v15, %v5694_v18  ;;  %v5684_v22 = vld [vmem:[#allocation8 + $0x38] ss:$2 sm:$0xf]  ;;  %v5700_v25 = vld [vmem:[#allocation8 + $0x39] ss:$2 sm:$0xf] }
 0x48a   : > { %5716 = vst.msk [vmem:[#allocation9 + $0x18] sm:$0xf] %vm5709_vm10, %v5707_v36  ;;  %v5708_v14 = vmax.f32 %v5684_v22, %v5700_v25  ;;  %v5680_v37 = vld [vmem:[#allocation8 + $0x28] ss:$2 sm:$0xf]  ;;  %v5760_v24 = vpop.permute.xlu0 %5759  ;;  %v5922_v42 = vld [vmem:[%s9090_s5 + $0x38] sm:$0xff] }
 0x48b   : > { %v5696_v27 = vld [vmem:[#allocation8 + $0x29] ss:$2 sm:$0xf]  ;;  %5714 = vst.msk [vmem:[#allocation9 + $0x10] sm:$0xf] %vm5709_vm10, %v5705_v20  ;;  %v5939_v36 = vld [vmem:[%s9090_s5 + $0xc0] sm:$0xff] }
 0x48c   : > { %v5706_v5 = vmax.f32 %v5680_v37, %v5696_v27  ;;  %5765 = vst.msk [vmem:[#allocation10] sm:$0x1] %vm9112_vm12, %v5760_v24  ;;  %vm8787_vm12 = vcmp.ge.s32.totalorder %v5731_v11, 96  ;;  %v6753_v11 = vpack.c.bf16 %v5916_v61, %v5915_v38  ;;  %v5921_v10 = vld [vmem:[%s9090_s5 + $0x30] sm:$0xff]  ;;  %v5940_v18 = vld [vmem:[%s9090_s5 + $0xc8] sm:$0xff]  ;;  %v5926_v38 = vld [vmem:[%s9090_s5 + $0x58] sm:$0xff] }
 0x48d   : > { %5717 = vst.msk [vmem:[#allocation9 + $0x1c] sm:$0xf] %vm5709_vm10, %v5708_v14  ;;  %v6765_v15 = vpack.c.bf16 %v5922_v42, %v5921_v10  ;;  %v6767_v20 = vpack.c.bf16 %v5940_v18, %v5939_v36  ;;  %v5923_v14 = vld [vmem:[%s9090_s5 + $0x40] sm:$0xff]  ;;  %v5924_v37 = vld [vmem:[%s9090_s5 + $0x48] sm:$0xff]  ;;  %v6044_v10 = vld [vmem:[%s9092_s7 + $0x30] sm:$0xff] }
 0x48e   : > { %5715 = vst.msk [vmem:[#allocation9 + $0x14] sm:$0xf] %vm5709_vm10, %v5706_v5  ;;  %v5768_v39 = vpop.permute.xlu0 %5767  ;;  %vm9181_vm10 = vmand %vm8716_vm4, %vm8721_vm6  ;;  %6754 = vmatpush3.bf16.msra.mxu1 %v6753_v11  ;;  %v6769_v5 = vpack.c.bf16 %v5924_v37, %v5923_v14  ;;  %v6045_v42 = vld [vmem:[%s9092_s7 + $0x38] sm:$0xff]  ;;  %v6122_v18 = vld [vmem:[%s9094_s9] sm:$0xff] }
 0x48f   : > { %5773 = vst.msk [vmem:[#allocation10] sm:$0x1] %vm9181_vm10, %v5768_v39  ;;  %vm9186_vm10 = vmand %vm8726_vm5, %vm8731_vm7  ;;  %6756 = vmatprep.subr.bf16.mxu1 %v6755_v47  ;;  %v5925_v39 = vld [vmem:[%s9090_s5 + $0x50] sm:$0xff]  ;;  %vm6031_vm7 = vcmask 516096   ;;  %v6793_v36 = vpack.c.bf16 %v6045_v42, %v6044_v10  ;;  %v6125_v14 = vld [vmem:[%s9094_s9 + $0x18] sm:$0xff] }
 0x490   : > { %vm9187_vm6 = vmand %vm8747_vm13, %vm8752_vm0  ;;  %v6773_v61 = vpack.c.bf16 %v5926_v38, %v5925_v39 }
 0x491   : > { %v5721_v30 = vld [vmem:[#allocation9 + $0x18] sm:$0xf] }
 0x492   : > { %v5776_v40 = vpop.permute.xlu0 %5775  ;;  %v5720_v50 = vld [vmem:[#allocation9 + $0x10] sm:$0xf]  ;;  %6758 = vmatpush3.bf16.msra.mxu1 %v6757_v46 }
 0x493   : > { %5781 = vst.msk [vmem:[#allocation10] sm:$0x1] %vm9186_vm10, %v5776_v40  ;;  %vm9188_vm10 = vmand %vm8762_vm15, %vm8767_vm2  ;;  %6760 = vmatprep.subr.bf16.mxu1 %v6759_v48  ;;  %v5928_v40 = vld [vmem:[%s9090_s5 + $0x68] sm:$0xff] }
 0x494   : > { %v5726_v6 = vld [vmem:[#allocation9 + $0x1c] sm:$0xf]  ;;  %5803 = vst.msk [vmem:[#allocation10] sm:$0x1] %vm9187_vm6, %v8694_v62  ;;  %vm9189_vm6 = vmand %vm8787_vm12, %vm8792_vm14 }
 0x495   : > { %v5730_v23 = vmax.f32 %v5721_v30, %v5726_v6  ;;  %v5725_v54 = vld [vmem:[#allocation9 + $0x14] sm:$0xf]  ;;  %5818 = vst.msk [vmem:[#allocation10] sm:$0x1] %vm9188_vm10, %v8700_v1  ;;  %v5919_v62 = vld [vmem:[%s9090_s5 + $0x20] sm:$0xff]  ;;  %v5945_v30 = vld [vmem:[%s9090_s5 + $0xf0] sm:$0xff] }
 0x496   : > { %v5729_v29 = vmax.f32 %v5720_v50, %v5725_v54  ;;  %v5829_v51 = vpop.permute.xlu0 %5828  ;;  %5826 = vst.msk [vmem:[#allocation10] sm:$0x1] %vm9189_vm6, %v8713_v3  ;;  %v6761_v31 = vpack.c.bf16 %v5920_v60, %v5919_v62  ;;  %v5946_v6 = vld [vmem:[%s9090_s5 + $0xf8] sm:$0xff]  ;;  %v6777_v50 = vpack.c.bf16 %v5928_v40, %v5927_v49  ;;  %v5929_v54 = vld [vmem:[%s9090_s5 + $0x70] sm:$0xff]  ;;  %vm9197_vm6 = vnez %v9164_v8  ;;  %v6039_v62 = vld [vmem:[%s9092_s7 + $0x8] sm:$0xff] }
 0x497   : > { %v5880_v19 = vrot.slane %v5730_v23, %v8669_v41  ;;  %5834 = vst.msk [vmem:[#allocation10] sm:$0x1] %vm9119_vm9, %v5829_v51  ;;  %v6779_v23 = vpack.c.bf16 %v5946_v6, %v5945_v30  ;;  %vm9198_vm9 = vmand %vm8716_vm4, %vm9197_vm6 }
 0x498   : > { %5835 = vst.msk [vmem:[#allocation10 + $0x1] sm:$0x1] %vm8672_vm11, %v5729_v29  ;;  %v5843_v3 = vrot.slane %v5729_v29, %v8669_v41  ;;  %6762 = vmatpush3.bf16.msra.mxu1 %v6761_v31  ;;  %v6781_v29 = vpack.c.bf16 %v5930_v21, %v5929_v54  ;;  %vm9195_vm11 = vnez %v9160_v7  ;;  %vm9202_vm4 = vmand %vm8787_vm12, %vm8792_vm14  ;;  %v5951_v7 = vsub.s32 0, %v8666_v44  ;;  %v6041_v31 = vld [vmem:[%s9092_s7 + $0x18] sm:$0xff] }
 0x499   : > { %v5887_v45 = vrot.slane %v5880_v19, %v8669_v41  ;;  %v5892_v56 = vcombine.high %v5880_v19, %v5880_v19  ;;  %6764 = vmatprep.subr.bf16.mxu1 %v6763_v17  ;;  %vm9196_vm10 = vmand %vm8704_vm1, %vm9195_vm11  ;;  %v6787_v63 = vpack.c.bf16 %v6041_v31, %v6040_v13  ;;  %v6042_v17 = vld [vmem:[%s9092_s7 + $0x20] sm:$0xff]  ;;  %vm7017_vm12 = vmmov 0  }
 0x49a   : > { %v5844_v25 = vcombine.high %v5843_v3, %v5843_v3  ;;  %v5851_v24 = vrot.slane %v5843_v3, %v8669_v41  ;;  %vm9200_vm1 = vmand %vm8747_vm13, %vm8752_vm0  ;;  %vm6047_vm13 = vcmask 523264   ;;  %vm6127_vm0 = vcmask 261120  }
 0x49b   : > { %5888 = vrot.lane.b32.xlu1 %v5887_v45, %s9153_s13  ;;  %v5899_v1 = vrot.slane %v5892_v56, %v8669_v41  ;;  %v5904_v22 = vcombine.high %v5887_v45, %v5887_v45  ;;  %s9192_s13 = smov 32   ;;  %vm9201_vm11 = vmand %vm8762_vm15, %vm8767_vm2  ;;  %v6038_v56 = vld [vmem:[%s9092_s7] sm:$0xff]  ;;  %vm6202_vm14 = vcmask 1040384  }
 0x49c   : > { %6766 = vmatpush3.bf16.msra.mxu1 %v6765_v15  ;;  %v5858_v27 = vrot.slane %v5844_v25, %v8669_v41  ;;  %v5943_v41 = vld [vmem:[%s9090_s5 + $0xe0] sm:$0xff]  ;;  %v5863_v47 = vcombine.high %v5851_v24, %v5851_v24  ;;  %v6784_v60 = vpack.c.bf16 %v6039_v62, %v6038_v56  ;;  %v7018_v15 = vmov 0.0  }
 0x49d   : > { %6768 = vmatprep.subr.bf16.mxu1 %v6767_v20  ;;  %v6775_v11 = vpack.c.bf16 %v5944_v52, %v5943_v41  ;;  %v5909_v46 = vcombine.high %v5899_v1, %v5899_v1  ;;  %v6123_v20 = vld [vmem:[%s9094_s9 + $0x8] sm:$0xff]  ;;  %6748 = vmatprep.mubr.msk.f32.mxu0 %vm7017_vm12, %v7018_v15 }
 0x49e   : > { %v5868_v26 = vcombine.high %v5858_v27, %v5858_v27  ;;  %v6796_v25 = vpack.c.bf16 %v6123_v20, %v6122_v18 }
 0x49f   : > { %5900 = vrot.lane.b32.xlu1 %v5899_v1, %s9190_s24  ;;  %v6043_v1 = vld [vmem:[%s9092_s7 + $0x28] sm:$0xff] }
 0x4a0   : > { %6770 = vmatpush3.bf16.msra.mxu1 %v6769_v5  ;;  %v6790_v3 = vpack.c.bf16 %v6043_v1, %v6042_v17  ;;  %6797 = vmatpush3.bf16.msra.mxu0 %v6796_v25 }
 0x4a1   : > { %6772 = vmatprep.subr.bf16.mxu1 %v6771_v35  ;;  %6798 = vmatprep.subr.bf16.mxu0 %v7016_v32 }
 0x4a3   : > { %5905 = vrot.lane.b32.xlu1 %v5904_v22, %s9191_s29  ;;  %s9193_s29 = smov 48   ;;  %v6124_v22 = vld [vmem:[%s9094_s9 + $0x10] sm:$0xff] }
 0x4a4   : > { %6774 = vmatpush3.bf16.msra.mxu1 %v6773_v61  ;;  %v6799_v37 = vpack.c.bf16 %v6125_v14, %v6124_v22  ;;  %v6126_v61 = vld [vmem:[%s9095_s10] sm:$0x1] }
 0x4a5   : > { %6776 = vmatprep.subr.bf16.mxu1 %v6775_v11 }
 0x4a6   : > { %6800 = vmatpush3.bf16.msra.mxu0 %v6799_v37 }
 0x4a7   : > { %5859 = vrot.lane.b32.xlu1 %v5858_v27, %s9151_s14 }
 0x4a8   : > { %6778 = vmatpush3.bf16.msra.mxu1 %v6777_v50 }
 0x4a9   : > { %6780 = vmatprep.subr.bf16.mxu1 %v6779_v23 }
 0x4ab   : > { %5864 = vrot.lane.b32.xlu1 %v5863_v47, %s9192_s13  ;;  %s6211_s13 = scalar_lea.sflag [#allocation12], %s377_s16 }
 0x4ac   : > { %6782 = vmatpush3.bf16.msra.mxu1 %v6781_v29 }
 0x4ad   : > { %6783 = vmatprep.subr.bf16.mxu1 %v7016_v32 }
 0x4af   : > { %5869 = vrot.lane.b32.xlu1 %v5868_v26, %s9193_s29  ;;  %s6576_s29 = sshll.u32 %s7101_s21, 4  ;;  %s7019_s21 = smov [#allocation11]  }
 0x4b0   : > { %s9043_s30 = scalar_lea.hbm %s9096_s11, %s6576_s29  ;;  %s6939_s24 = sshll.u32 %s7019_s21, 4  ;;  %s6940_s24 = int_to_ptr.vmem [resolvable:$false] %s6939_s24 }
 0x4b1   : > { %s6941_s25 = scalar_lea.vmem %s6940_s24, 32 }
 0x4b3   : > { %5910 = vrot.lane.b32.xlu1 %v5909_v46, %s9194_s12  ;;  %s378_s12 = scalar_lea.vmem [#allocation11], %s377_s16 }
 0x4b4   : > { %s6223_s0 = sshll.u32 %s378_s12, 4  ;;  %s9045_s0 = int_to_ptr.vmem [resolvable:$true] %s6223_s0 }
 0x4b5   : > { %s6935_s22 = scalar_lea.vmem %s9045_s0, 16  ;;  %p6942_p0 = scmp.lt.s32.totalorder %s9045_s0, %s6940_s24 }
 0x4b6   : > { %p6936_p11 = scmp.ne.s32.totalorder %s9045_s0, %s6935_s22  ;;  %p6943_p1 = scmp.lt.s32.totalorder %s6941_s25, %s6935_s22 }
 0x4b8   : > { %p6937_p12 = pnand %p6936_p11, %p7118_p5  ;;  %p6944_p2 = por %p6943_p1, %p6942_p0 }
 0x4ba   : > { %p6938_p13 = pneg %p6937_p12 }
 0x4bc   : > { %p6945_p3 = pnand %p6944_p2, %p6938_p13 }
 0x50d   : > { %v5889_v59 = vpop.permute.xlu1 %5888 }
 0x511   : > { %v5901_v53 = vpop.permute.xlu1 %5900 }
 0x515   : > { %v5906_v19 = vpop.permute.xlu1 %5905 }
 0x519   : > { %v5860_v51 = vpop.permute.xlu1 %5859 }
 0x51a   : > { %5862 = vst.msk [vmem:[#allocation10 + $0x1] sm:$0x1] %vm9196_vm10, %v5860_v51 }
 0x51d   : > { %v5865_v48 = vpop.permute.xlu1 %5864 }
 0x51e   : > { %5867 = vst.msk [vmem:[#allocation10 + $0x1] sm:$0x1] %vm9198_vm9, %v5865_v48 }
 0x521   : > { %v5870_v45 = vpop.permute.xlu1 %5869 }
 0x522   : > { %5872 = vst.msk [vmem:[#allocation10 + $0x1] sm:$0x1] %vm9199_vm8, %v5870_v45  ;;  %vm9203_vm8 = vnez %v9185_v43 }
 0x523   : > { %5891 = vst.msk [vmem:[#allocation10 + $0x1] sm:$0x1] %vm9200_vm1, %v5889_v59  ;;  %vm9204_vm5 = vmand %vm8806_vm3, %vm9203_vm8 }
 0x524   : > { %5903 = vst.msk [vmem:[#allocation10 + $0x1] sm:$0x1] %vm9201_vm11, %v5901_v53 }
 0x525   : > { %5908 = vst.msk [vmem:[#allocation10 + $0x1] sm:$0x1] %vm9202_vm4, %v5906_v19  ;;  %v5911_v2 = vpop.permute.xlu1 %5910 }
 0x526   : > { %5913 = vst.msk [vmem:[#allocation10 + $0x1] sm:$0x1] %vm9204_vm5, %v5911_v2 }
 0x52d   : > { %v5914_v8 = vld [vmem:[#allocation10] sm:$0x3] }
 0x52e   : > { %v5952_v9 = vrot.slane %v5914_v8, %v5951_v7  ;;  %v5956_v12 = vrot.slane %v5914_v8, %v5955_v4 }
 0x530   : > { %6023 = vmatprep.mubr.f32.mxu1 %v5956_v12 }
 0x531   : > { %6024 = vmatmul.mubr.f32.vlgmr.msra.gmra.mrb[8].mxu1 %v5952_v9 }
 0x532   : > { %6785 = vmatpush3.bf16.msra.mxu1 %v6784_v60  ;;  %6737 = vmatprep.mubr.msk.f32.mxu1 %vm7017_vm12, %v7018_v15 }
 0x533   : > { %6786 = vmatprep.subr.bf16.mxu1 %v7016_v32 }
 0x536   : > { %6788 = vmatpush3.bf16.msra.mxu1 %v6787_v63 }
 0x537   : > { %6789 = vmatprep.subr.bf16.mxu1 %v7016_v32 }
 0x53a   : > { %6791 = vmatpush3.bf16.msra.mxu1 %v6790_v3 }
 0x53b   : > { %6792 = vmatprep.subr.bf16.mxu1 %v7016_v32 }
 0x53e   : > { %6794 = vmatpush3.bf16.msra.mxu1 %v6793_v36 }
 0x604   : > { %v6648_v33 = vpop.f32.mrb[8].mxu1 }
 0x605   : > { %v6649_v28 = vpop.f32.mrb[9].mxu1 }
 0x606   : > { %v6650_v55 = vadd.f32 %v6649_v28, %v6648_v33 }
 0x608   : > { %v6026_v57 = vadd.f32 %v6650_v55, %v5947_v34 }
 0x60a   : > { %v6029_v58 = vmax.f32 %v6026_v57, 0.0 }
 0x60c   : > { %v6030_v43 = vmul.f32 %v6029_v58, %v6029_v58 }
 0x60e   : > { %v6032_v44 = vsel %vm6031_vm7, %v6030_v43, 0.0 }
 0x60f   : > { %6033 = vadd.xlane.f32.xlu0 %v6032_v44 }
 0x69c   : > { %v6034_v27 = vpop.xlane.xlu0 %6033 }
 0x69d   : > { %v6035_v24 = vadd.f32 1e-12, %v6034_v27 }
 0x69f   : > { %6930 = vrsqrt.f32 %v6035_v24 }
 0x6a9   : > { %v6931_v5 = vpop.eup %6930 }
 0x6aa   : > { %v6037_v16 = vmul.f32 %v6931_v5, %v6029_v58 }
 0x6ac   : > { %6738 = vmatmul.mubr.msk.f32.vlgmr.msra.gmra.mrb[10].mxu1 %vm6047_vm13, %v6037_v16 }
 0x77f   : > { %v6117_v35 = vpop.f32.mrb[10].mxu1 }
 0x780   : > { %v6118_v39 = vadd.f32 %v6117_v35, %v6046_v0  ;;  %v6739_v38 = vpop.f32.mrb[11].mxu1 }
 0x782   : > { %v6121_v41 = vmax.f32 %v6118_v39, 0.0 }
 0x784   : > { %6749 = vmatmul.mubr.msk.f32.vlgmr.msra.gmra.mrb[32].mxu0 %vm6127_vm0, %v6121_v41 }
 0x857   : > { %v6197_v52 = vpop.f32.mrb[32].mxu0 }
 0x858   : > { %v6198_v11 = vadd.f32 %v6197_v52, %v6126_v61  ;;  %v6750_v49 = vpop.f32.mrb[33].mxu0 }
 0x85a   : > { %v6201_v40 = vmul.f32 %v6198_v11, %v6198_v11 }
 0x85c   : > { %v6203_v47 = vsel %vm6202_vm14, %v6201_v40, 0.0 }
 0x85d   : > { %6204 = vadd.xlane.f32.xlu1 %v6203_v47 }
 0x8ea   : > { %v6205_v30 = vpop.xlane.xlu1 %6204 }
 0x8eb   : > { %v6206_v6 = vadd.f32 1e-12, %v6205_v30 }
 0x8ed   : > { %6932 = vrsqrt.f32 %v6206_v6 }
 0x8f7   : > { %v6933_v50 = vpop.eup %6932 }
 0x8f8   : > { %v6208_v23 = vmul.f32 %v6933_v50, %v6198_v11 }
 0x8fa   : > { %6209 = vst [vmem:[%s378_s12] sm:$0x1] %v6208_v23 }
 0x8fb   : > { %6948 = shalt.err (!%p6945_p3)
}
 0x8fc   : > { %s6949_s16 = scalar_lea.hbm %s9043_s30, 16  ;;  %s6953_s15 = scalar_lea.hbm %s9096_s11, 32 }
 0x8fd   : > { %p6950_p4 = scmp.ne.s32.totalorder %s9043_s30, %s6949_s16  ;;  %p6954_p9 = scmp.lt.u32.totalorder %s9043_s30, %s9096_s11 }
 0x8fe   : > { %p6955_p10 = scmp.lt.u32.totalorder %s6953_s15, %s6949_s16  ;;  %p6957_p12 = scmp.lt.u32.totalorder %s6949_s16, %s9043_s30 }
 0x8ff   : > { %p6951_p7 = pnand %p6950_p4, %p7118_p5 }
 0x900   : > { %p6956_p11 = por %p6955_p10, %p6954_p9 }
 0x901   : > { %p6952_p8 = pneg %p6951_p7 }
 0x902   : > { %p6958_p13 = por %p6957_p12, %p6956_p11 }
 0x904   : > { %p6959_p0 = pnand %p6958_p13, %p6952_p8 }
 0x906   : > { %6962 = shalt.err (!%p6959_p0)
}
 0x907   : > { %6803 = dma.vmem_to_hbm [thread:$0]  (%p7118_p5), %s9045_s0, 16, %s9043_s30, %s6211_s13  }
 0x908 PF: > { %p6809_p1 = scmp.ge.s32.totalorder %s6997_s20, 2  ;;  %s6235_s22 = sand.u32 1, %s6985_s17  }
 0x909   : > { %s6236_s24 = scalar_lea.sflag [#allocation12], %s6235_s22 }
 0x90a   : > { %p6806_p2 = pnand %p6809_p1, %p7122_p6 }
 0x90c   : > { %6980 = dma.done.wait (!%p6806_p2), %s6236_s24, 16  }
 0x90d   : > { %6982 = vsyncadd (!%p6806_p2), %s6236_s24, 4294967280  ;;  %p21_p3 = scmp.ge.s32.totalorder %s7105_s23, 4   ;;  %s9205_s17 = smov %s6989_s18 }
 0x90e   : > { %s9206_s18 = smov %s6993_s19  ;;  %s9207_s19 = smov %s7116_s26 }
 0x90f   : > { %s9208_s20 = smov %s7105_s23  ;;  %23 = sbr.rel (!%p21_p3) target bundleno = 5 (0x5), region = 151 }
 0x916   :  { %6240 = vsyncpa [#allocation12], 1 }
 0x917   :  { %6242 = vsyncpa [#allocation12 + $0x1], 1 }

</bundles_post_ra>
